<compile_context>
chip_gen: v7x
topology: tpu7x:2x2x1
jax: 0.10.0
libtpu: 0.0.40
codegen_flags: <defaults>
</compile_context>

<pallas_src>
import functools
import math

import jax
import jax.numpy as jnp
from jax.experimental import pallas as pl
from jax.experimental.pallas import tpu as pltpu


# ---------------------------------------------------------------------------
# helpers
# ---------------------------------------------------------------------------
def _round_up(x, m):
    return ((x + m - 1) // m) * m


def _cp(c):
    """channel-padded size (lane-dense, multiple of 128)."""
    return max(128, _round_up(c, 128))


def _pick_hw_tile(hw, bytes_per_row, budget=4 << 20):
    """Largest tile of the flattened-HW axis that divides hw, is a multiple
    of 8 (or equals hw), and keeps bytes_per_row * tile under budget."""
    if hw % 8 != 0:
        return hw
    thw = hw
    while (thw % 2 == 0 and (thw // 2) % 8 == 0
           and thw * bytes_per_row > budget):
        thw //= 2
    return thw


# ---------------------------------------------------------------------------
# K5 / generic: fused 1x1 conv  out = act(X @ W + shift [+ residual])
# ---------------------------------------------------------------------------
def _mm_kernel(x_ref, w_ref, s_ref, o_ref, acc_ref, *, relu):
    k = pl.program_id(2)

    @pl.when(k == 0)
    def _():
        acc_ref[...] = jnp.zeros_like(acc_ref)

    acc_ref[...] += jnp.dot(x_ref[...], w_ref[...],
                            preferred_element_type=jnp.float32)

    @pl.when(k == pl.num_programs(2) - 1)
    def _():
        y = acc_ref[...] + s_ref[...]
        if relu:
            y = jnp.maximum(y, 0.0)
        o_ref[...] = y.astype(o_ref.dtype)


def _mm_kernel_res(x_ref, w_ref, s_ref, r_ref, o_ref, acc_ref, *, relu):
    k = pl.program_id(2)

    @pl.when(k == 0)
    def _():
        acc_ref[...] = jnp.zeros_like(acc_ref)

    acc_ref[...] += jnp.dot(x_ref[...], w_ref[...],
                            preferred_element_type=jnp.float32)

    @pl.when(k == pl.num_programs(2) - 1)
    def _():
        y = acc_ref[...] + s_ref[...] + r_ref[...].astype(jnp.float32)
        if relu:
            y = jnp.maximum(y, 0.0)
        o_ref[...] = y.astype(o_ref.dtype)


def matmul_fused(x, w, shift, res=None, relu=False):
    """x: (M, K) bf16, w: (K, N) bf16 pre-padded, shift: (1, N) f32."""
    M, K = x.shape
    K2, N = w.shape
    assert K == K2 and K % 128 == 0 and N % 128 == 0

    tn = 256 if N % 256 == 0 else 128
    tk = 512 if K % 512 == 0 else (256 if K % 256 == 0 else 128)
    tm = min(256, _round_up(M, 8))
    Mp = _round_up(M, tm)
    if Mp != M:
        x = jnp.pad(x, ((0, Mp - M), (0, 0)))
        if res is not None:
            res = jnp.pad(res, ((0, Mp - M), (0, 0)))

    in_specs = [
        pl.BlockSpec((tm, tk), lambda i, j, k: (i, k)),
        pl.BlockSpec((tk, tn), lambda i, j, k: (k, j)),
        pl.BlockSpec((1, tn), lambda i, j, k: (0, j)),
    ]
    args = [x, w, shift]
    if res is not None:
        in_specs.append(pl.BlockSpec((tm, tn), lambda i, j, k: (i, j)))
        args.append(res)
        kernel = functools.partial(_mm_kernel_res, relu=relu)
    else:
        kernel = functools.partial(_mm_kernel, relu=relu)

    out = pl.pallas_call(
        kernel,
        out_shape=jax.ShapeDtypeStruct((Mp, N), jnp.bfloat16),
        grid_spec=pltpu.PrefetchScalarGridSpec(
            num_scalar_prefetch=0,
            grid=(Mp // tm, N // tn, K // tk),
            in_specs=in_specs,
            out_specs=pl.BlockSpec((tm, tn), lambda i, j, k: (i, j)),
            scratch_shapes=[pltpu.VMEM((tm, tn), jnp.float32)],
        ),
        compiler_params=pltpu.CompilerParams(
            dimension_semantics=("parallel", "parallel", "arbitrary")),
    )(*args)
    return out[:M] if Mp != M else out


# ---------------------------------------------------------------------------
# K1: conv1+bn1+relu fused with MAM squeeze conv1+bn1 (two outputs)
# ---------------------------------------------------------------------------
def _conv1_mam1_kernel(x_ref, w1_ref, s1_ref, w2_ref, s2_ref,
                       out_ref, bot_ref, acc_ref):
    k = pl.program_id(1)

    @pl.when(k == 0)
    def _():
        acc_ref[...] = jnp.zeros_like(acc_ref)

    acc_ref[...] += jnp.dot(x_ref[...], w1_ref[...],
                            preferred_element_type=jnp.float32)

    @pl.when(k == pl.num_programs(1) - 1)
    def _():
        y = jnp.maximum(acc_ref[...] + s1_ref[...], 0.0)
        yb = y.astype(jnp.bfloat16)
        out_ref[...] = yb
        bot = jnp.dot(yb, w2_ref[...], preferred_element_type=jnp.float32)
        bot_ref[...] = (bot + s2_ref[...]).astype(bot_ref.dtype)


def conv1_mam1_fused(x_rows, w1, s1, w2, s2):
    """x_rows: (M, K) bf16.  Returns (out (M, N1), bot (M, N2)) bf16."""
    M, K = x_rows.shape
    N1 = w1.shape[1]
    N2 = w2.shape[1]
    assert w2.shape[0] == N1
    tk = 512 if K % 512 == 0 else (256 if K % 256 == 0 else 128)
    tm = min(256, _round_up(M, 8))
    Mp = _round_up(M, tm)
    xin = jnp.pad(x_rows, ((0, Mp - M), (0, 0))) if Mp != M else x_rows

    out, bot = pl.pallas_call(
        _conv1_mam1_kernel,
        out_shape=(jax.ShapeDtypeStruct((Mp, N1), jnp.bfloat16),
                   jax.ShapeDtypeStruct((Mp, N2), jnp.bfloat16)),
        grid_spec=pltpu.PrefetchScalarGridSpec(
            num_scalar_prefetch=0,
            grid=(Mp // tm, K // tk),
            in_specs=[
                pl.BlockSpec((tm, tk), lambda i, k: (i, k)),
                pl.BlockSpec((tk, N1), lambda i, k: (k, 0)),
                pl.BlockSpec((1, N1), lambda i, k: (0, 0)),
                pl.BlockSpec((N1, N2), lambda i, k: (0, 0)),
                pl.BlockSpec((1, N2), lambda i, k: (0, 0)),
            ],
            out_specs=(pl.BlockSpec((tm, N1), lambda i, k: (i, 0)),
                       pl.BlockSpec((tm, N2), lambda i, k: (i, 0))),
            scratch_shapes=[pltpu.VMEM((tm, N1), jnp.float32)],
        ),
        compiler_params=pltpu.CompilerParams(
            dimension_semantics=("parallel", "arbitrary")),
    )(xin, w1, s1, w2, s2)
    if Mp != M:
        out, bot = out[:M], bot[:M]
    return out, bot


# ---------------------------------------------------------------------------
# K2: MAM temporal blend + 1x1 expand (+bias) + MSM temporal mean pool
#   motion[t<T-1] = (full[t] + a*full[t+1]) / (1+a) ; motion[T-1] = full[T-1]
#   (blend applied after the linear map -- mathematically identical)
# ---------------------------------------------------------------------------
def _mam_pool_kernel(bot_ref, d2_ref, w_ref, s_ref, mo_ref, pool_ref,
                     *, T, alpha):
    thw = mo_ref.shape[2]
    cpsq = bot_ref.shape[3]
    x = bot_ref[0].reshape(T * thw, cpsq)                       # bf16
    full = (jnp.dot(x, w_ref[...], preferred_element_type=jnp.float32)
            + s_ref[...]).reshape(T, thw, -1)                   # f32
    d2 = d2_ref[0].astype(jnp.float32)                          # (T, thw, cpn)
    if T > 1:
        head = (full[:T - 1] + alpha * full[1:]) * (1.0 / (1.0 + alpha))
        tail = full[T - 1:]
        mo_ref[0, :T - 1] = head.astype(mo_ref.dtype)
        mo_ref[0, T - 1:] = tail.astype(mo_ref.dtype)
        motion_sum = jnp.sum(head, axis=0) + tail[0]
    else:
        mo_ref[0] = full.astype(mo_ref.dtype)
        motion_sum = full[0]
    pooled = (motion_sum + jnp.sum(d2, axis=0)) * (1.0 / T)
    pool_ref[0] = pooled.astype(pool_ref.dtype)


def mam_motion_and_pool(bot, out5, w, shift, *, alpha):
    """bot: (B,T,hw,cpsq) bf16; out5: (B,T,hw,cpn) bf16.
    Returns motion (B,T,hw,cpn) and pooled (B,hw,cpn) bf16."""
    B, T, hw, cpsq = bot.shape
    cpn = w.shape[1]
    thw = _pick_hw_tile(hw, 4 * T * (cpsq + 2 * cpn))
    motion, pooled = pl.pallas_call(
        functools.partial(_mam_pool_kernel, T=T, alpha=alpha),
        out_shape=(jax.ShapeDtypeStruct((B, T, hw, cpn), jnp.bfloat16),
                   jax.ShapeDtypeStruct((B, hw, cpn), jnp.bfloat16)),
        grid=(B, hw // thw),
        in_specs=[
            pl.BlockSpec((1, T, thw, cpsq), lambda b, s: (b, 0, s, 0)),
            pl.BlockSpec((1, T, thw, cpn), lambda b, s: (b, 0, s, 0)),
            pl.BlockSpec((cpsq, cpn), lambda b, s: (0, 0)),
            pl.BlockSpec((1, cpn), lambda b, s: (0, 0)),
        ],
        out_specs=(pl.BlockSpec((1, T, thw, cpn), lambda b, s: (b, 0, s, 0)),
                   pl.BlockSpec((1, thw, cpn), lambda b, s: (b, s, 0))),
        compiler_params=pltpu.CompilerParams(
            dimension_semantics=("parallel", "parallel")),
    )(bot, out5, w, shift)
    return motion, pooled


# ---------------------------------------------------------------------------
# K3: 3x3 conv (pad=1) as 9 in-VMEM shifted-window matmuls
# ---------------------------------------------------------------------------
def _conv3x3_kernel(x_ref, w_ref, s_ref, o_ref, *, ho, wo, stride, relu):
    cp = x_ref.shape[3]
    xi = x_ref[0]                                      # (hp, wp, cp) bf16
    acc = jnp.zeros((ho * wo, o_ref.shape[2]), jnp.float32)
    for t in range(9):
        di, dj = divmod(t, 3)
        win = xi[di:di + 1 + stride * (ho - 1):stride,
                 dj:dj + 1 + stride * (wo - 1):stride, :]
        acc = acc + jnp.dot(win.reshape(ho * wo, cp), w_ref[t],
                            preferred_element_type=jnp.float32)
    y = acc + s_ref[...]
    if relu:
        y = jnp.maximum(y, 0.0)
    o_ref[0] = y.astype(o_ref.dtype)


def conv3x3_fused(x_nhwc, w9, shift, *, stride=1, relu=False):
    """x: (NT, H, W, Cp) bf16; w9: (9, Cp, Np) bf16; shift: (1, Np) f32."""
    nt, h, w, cp = x_nhwc.shape
    assert w9.shape[1] == cp
    n_pad = w9.shape[2]
    ho = (h + 2 - 3) // stride + 1
    wo = (w + 2 - 3) // stride + 1
    tn = 256 if n_pad % 256 == 0 else 128

    xpad = jnp.pad(x_nhwc, ((0, 0), (1, 1), (1, 1), (0, 0)))
    hp, wp = h + 2, w + 2

    out = pl.pallas_call(
        functools.partial(_conv3x3_kernel, ho=ho, wo=wo, stride=stride,
                          relu=relu),
        out_shape=jax.ShapeDtypeStruct((nt, ho * wo, n_pad), jnp.bfloat16),
        grid=(nt, n_pad // tn),
        in_specs=[
            pl.BlockSpec((1, hp, wp, cp), lambda n, j: (n, 0, 0, 0)),
            pl.BlockSpec((9, cp, tn), lambda n, j: (0, 0, j)),
            pl.BlockSpec((1, tn), lambda n, j: (0, j)),
        ],
        out_specs=pl.BlockSpec((1, ho * wo, tn), lambda n, j: (n, 0, j)),
        compiler_params=pltpu.CompilerParams(
            dimension_semantics=("parallel", "parallel")),
    )(xpad, w9, shift)
    return out.reshape(nt, ho, wo, n_pad)


# ---------------------------------------------------------------------------
# K4: MSM 2-way softmax gating + TIM depthwise temporal 3-tap shift, fused
# ---------------------------------------------------------------------------
def _msm_tim_kernel(d1_ref, d2_ref, g_ref, w_ref, o_ref, msm_sc, *, T):
    thw = o_ref.shape[2]
    cp = o_ref.shape[3]
    d1 = d1_ref[0].astype(jnp.float32)                 # (T, thw, cp) motion
    d2 = d2_ref[0].astype(jnp.float32)                 # (T, thw, cp) out
    lg = g_ref[0].astype(jnp.float32)                  # (thw, 2*cp)
    a0 = lg[:, :cp]
    a1 = lg[:, cp:]
    g0 = 1.0 / (1.0 + jnp.exp(a1 - a0))                # softmax over the pair
    zeros1 = jnp.zeros((1, thw, cp), jnp.float32)
    msm_sc[0:1] = zeros1                               # temporal zero pad
    msm_sc[T + 1:T + 2] = zeros1
    msm_sc[1:T + 1] = d2 + g0[None] * (d1 - d2)        # gated blend
    wv = w_ref[...]                                    # (3, cp) f32
    y = (wv[0][None, None] * msm_sc[0:T]               # x[t-1]
         + wv[1][None, None] * msm_sc[1:T + 1]         # x[t]
         + wv[2][None, None] * msm_sc[2:T + 2])        # x[t+1]
    o_ref[0] = y.astype(o_ref.dtype)


def msm_gate_tim(motion5, out5, logits, tim_w):
    """motion5/out5: (B,T,hw,cp) bf16; logits: (B,hw,2cp) bf16; tim_w: (3,cp)."""
    B, T, hw, cp = motion5.shape
    thw = _pick_hw_tile(hw, 8 * T * cp)
    return pl.pallas_call(
        functools.partial(_msm_tim_kernel, T=T),
        out_shape=jax.ShapeDtypeStruct((B, T, hw, cp), jnp.bfloat16),
        grid=(B, hw // thw),
        in_specs=[
            pl.BlockSpec((1, T, thw, cp), lambda b, s: (b, 0, s, 0)),
            pl.BlockSpec((1, T, thw, cp), lambda b, s: (b, 0, s, 0)),
            pl.BlockSpec((1, thw, 2 * cp), lambda b, s: (b, s, 0)),
            pl.BlockSpec((3, cp), lambda b, s: (0, 0)),
        ],
        out_specs=pl.BlockSpec((1, T, thw, cp), lambda b, s: (b, 0, s, 0)),
        scratch_shapes=[pltpu.VMEM((T + 2, thw, cp), jnp.float32)],
        compiler_params=pltpu.CompilerParams(
            dimension_semantics=("parallel", "parallel")),
    )(motion5, out5, logits, tim_w)


# ---------------------------------------------------------------------------
# parameter construction + packing (done once; weights never re-padded)
# ---------------------------------------------------------------------------
def _bn_fold(c, eps=1e-5):
    gamma = jnp.ones((c,), jnp.float32)
    beta = jnp.zeros((c,), jnp.float32)
    mean = jnp.zeros((c,), jnp.float32)
    var = jnp.ones((c,), jnp.float32)
    scale = gamma / jnp.sqrt(var + eps)
    shift = beta - mean * scale
    return scale, shift


def _conv_w(key, o, c, kh, kw):
    std = math.sqrt(2.0 / (c * kh * kw))
    return jax.random.normal(key, (o, c, kh, kw), jnp.float32) * std


def _conv_b(key, o, fan_in):
    bound = 1.0 / math.sqrt(fan_in)
    return jax.random.uniform(key, (o,), jnp.float32, -bound, bound)


def _pack_1x1(w_oc, bias, bn, cp_k, cp_n):
    O, C = w_oc.shape
    scale, bshift = bn if bn is not None else (
        jnp.ones((O,), jnp.float32), jnp.zeros((O,), jnp.float32))
    b = jnp.zeros((O,), jnp.float32) if bias is None else bias
    shift = bshift + scale * b
    wm = (w_oc * scale[:, None]).T                      # (C, O)
    wp = jnp.zeros((cp_k, cp_n), jnp.float32).at[:C, :O].set(wm)
    sp = jnp.zeros((1, cp_n), jnp.float32).at[0, :O].set(shift)
    return wp.astype(jnp.bfloat16), sp


def _pack_3x3(w, bias, bn, cp_k, cp_n):
    O, C = w.shape[:2]
    scale, bshift = bn if bn is not None else (
        jnp.ones((O,), jnp.float32), jnp.zeros((O,), jnp.float32))
    b = jnp.zeros((O,), jnp.float32) if bias is None else bias
    shift = bshift + scale * b
    ws = w * scale[:, None, None, None]
    w9 = jnp.zeros((9, cp_k, cp_n), jnp.float32)
    for t in range(9):
        di, dj = divmod(t, 3)
        w9 = w9.at[t, :C, :O].set(ws[:, :, di, dj].T)
    sp = jnp.zeros((1, cp_n), jnp.float32).at[0, :O].set(shift)
    return w9.astype(jnp.bfloat16), sp


def _pack_3x3_gate_split(w, cp_k, cp_mid, planes):
    """Pack a (2*planes, C, 3, 3) conv so the two softmax branches land at
    lane-aligned columns [0, planes) and [cp_mid, cp_mid + planes)."""
    O, C = w.shape[:2]
    assert O == 2 * planes
    w9 = jnp.zeros((9, cp_k, 2 * cp_mid), jnp.float32)
    for t in range(9):
        di, dj = divmod(t, 3)
        w9 = w9.at[t, :C, :planes].set(w[:planes, :, di, dj].T)
        w9 = w9.at[t, :C, cp_mid:cp_mid + planes].set(w[planes:, :, di, dj].T)
    sp = jnp.zeros((1, 2 * cp_mid), jnp.float32)
    return w9.astype(jnp.bfloat16), sp


def _grouped_conv_w(key, out_c, in_c, groups, k):
    """Grouped conv expanded to a block-diagonal dense (out_c, in_c, k, k)."""
    og, cg = out_c // groups, in_c // groups
    std = math.sqrt(2.0 / (cg * k * k))
    w = jnp.zeros((out_c, in_c, k, k), jnp.float32)
    for g in range(groups):
        key, sub = jax.random.split(key)
        blk = jax.random.normal(sub, (og, cg, k, k), jnp.float32) * std
        w = w.at[g * og:(g + 1) * og, g * cg:(g + 1) * cg].set(blk)
    return w, key


def _tim_weights(planes, cp):
    """TIM conv1d weights in 'shift' mode: (3, cp), tap k acts on x[t+k-1]."""
    fold = planes // 8
    wt = jnp.zeros((3, cp), jnp.float32)
    wt = wt.at[2, :fold].set(1.0)                       # take x[t+1]
    wt = wt.at[0, fold:2 * fold].set(1.0)               # take x[t-1]
    if 2 * fold < planes:
        wt = wt.at[1, 2 * fold:planes].set(1.0)         # identity
    return wt


def init_bottleneck_params(key, num_segments, inplanes, planes, stride=1,
                           with_downsample=False):
    assert planes >= 64, "MAM reduction=64 requires planes >= 64"
    assert planes % 16 == 0, "MSM grouping requires planes % 16 == 0"
    sq_mam = planes // 64
    sq_msm = planes // 4
    groups = 16 // 4                                    # MSM: 16 // reduction

    cp_in, cp_mid = _cp(inplanes), _cp(planes)
    cp_sqm, cp_sqs = _cp(sq_mam), _cp(sq_msm)
    cp_out = _cp(planes * 4)

    p = dict(num_segments=num_segments, inplanes=inplanes, planes=planes,
             stride=stride, cp_in=cp_in, cp_mid=cp_mid, cp_out=cp_out,
             cp_sqm=cp_sqm)

    # conv1 (1x1, inplanes->planes, bias) + bn1
    key, k1, k2 = jax.random.split(key, 3)
    w = _conv_w(k1, planes, inplanes, 1, 1)[:, :, 0, 0]
    b = _conv_b(k2, planes, inplanes)
    p["conv1_w"], p["conv1_s"] = _pack_1x1(w, b, _bn_fold(planes), cp_in, cp_mid)

    # MAM: conv1 (1x1, planes->sq, no bias)+bn1 ; conv3 (1x1, sq->planes, bias)
    key, k1, k2, k3 = jax.random.split(key, 4)
    w = _conv_w(k1, sq_mam, planes, 1, 1)[:, :, 0, 0]
    p["mam1_w"], p["mam1_s"] = _pack_1x1(w, None, _bn_fold(sq_mam), cp_mid, cp_sqm)
    w = _conv_w(k2, planes, sq_mam, 1, 1)[:, :, 0, 0]
    b = _conv_b(k3, planes, sq_mam)
    p["mam3_w"], p["mam3_s"] = _pack_1x1(w, b, None, cp_sqm, cp_mid)

    # MSM (Spatial): grouped 3x3 convs (block-diagonal dense), no bias
    w_fc1, key = _grouped_conv_w(key, sq_msm, planes, groups, 3)
    p["msm1_bn_w"], p["msm1_bn_s"] = _pack_3x3(w_fc1, None, _bn_fold(sq_msm),
                                               cp_mid, cp_sqs)
    p["msm1_raw_w"], p["msm1_raw_s"] = _pack_3x3(w_fc1, None, None,
                                                 cp_mid, cp_sqs)
    w_fc2, key = _grouped_conv_w(key, 2 * planes, sq_msm, groups, 3)
    p["msm2_w"], p["msm2_s"] = _pack_3x3_gate_split(w_fc2, cp_sqs, cp_mid, planes)

    # TIM ('shift' mode)
    p["tim_w"] = _tim_weights(planes, cp_mid)

    # conv2 (3x3, planes->planes, stride, bias) + bn2
    key, k1, k2 = jax.random.split(key, 3)
    w = _conv_w(k1, planes, planes, 3, 3)
    b = _conv_b(k2, planes, planes * 9)
    p["conv2_w"], p["conv2_s"] = _pack_3x3(w, b, _bn_fold(planes), cp_mid, cp_mid)

    # conv3 (1x1, planes->4*planes, bias) + bn3
    key, k1, k2 = jax.random.split(key, 3)
    w = _conv_w(k1, planes * 4, planes, 1, 1)[:, :, 0, 0]
    b = _conv_b(k2, planes * 4, planes)
    p["conv3_w"], p["conv3_s"] = _pack_1x1(w, b, _bn_fold(planes * 4),
                                           cp_mid, cp_out)

    # optional downsample (1x1 conv stride + bn)
    if with_downsample:
        key, k1, k2 = jax.random.split(key, 3)
        w = _conv_w(k1, planes * 4, inplanes, 1, 1)[:, :, 0, 0]
        b = _conv_b(k2, planes * 4, inplanes)
        p["down_w"], p["down_s"] = _pack_1x1(w, b, _bn_fold(planes * 4),
                                             cp_in, cp_out)
    else:
        p["down_w"] = None
    return p


# ---------------------------------------------------------------------------
# forward
# ---------------------------------------------------------------------------
def bottleneck_forward(p, x_nchw):
    nt, cin, h, w = x_nchw.shape
    T = p["num_segments"]
    B = nt // T
    planes = p["planes"]
    cp_in, cp_mid, cp_out = p["cp_in"], p["cp_mid"], p["cp_out"]
    cp_sqm = p["cp_sqm"]
    hw = h * w

    # NCHW -> NHWC (boundary only), bf16, lane-dense channel pad
    xh = jnp.transpose(x_nchw, (0, 2, 3, 1)).astype(jnp.bfloat16)
    if cp_in > cin:
        xh = jnp.pad(xh, ((0, 0), (0, 0), (0, 0), (0, cp_in - cin)))
    x_rows = xh.reshape(nt * hw, cp_in)

    # K1: conv1+bn1+relu and MAM squeeze (1x1+bn) fused
    out_rows, bot_rows = conv1_mam1_fused(x_rows, p["conv1_w"], p["conv1_s"],
                                          p["mam1_w"], p["mam1_s"])
    out5 = out_rows.reshape(B, T, hw, cp_mid)
    bot = bot_rows.reshape(B, T, hw, cp_sqm)

    # K2: MAM blend + expand (bias) + MSM temporal mean pool
    motion5, pooled = mam_motion_and_pool(bot, out5, p["mam3_w"], p["mam3_s"],
                                          alpha=0.5)

    # K3: MSM spatial attention (grouped 3x3 -> [bn+relu] -> grouped 3x3)
    pooled = pooled.reshape(B, h, w, cp_mid)
    if B != 1:
        s_act = conv3x3_fused(pooled, p["msm1_bn_w"], p["msm1_bn_s"], relu=True)
    else:
        s_act = conv3x3_fused(pooled, p["msm1_raw_w"], p["msm1_raw_s"],
                              relu=False)
    logits = conv3x3_fused(s_act, p["msm2_w"], p["msm2_s"], relu=False)
    logits = logits.reshape(B, hw, 2 * cp_mid)

    # K4: softmax gating + TIM temporal shift fused
    out = msm_gate_tim(motion5, out5, logits, p["tim_w"])
    out = out.reshape(nt, h, w, cp_mid)

    # conv2 + bn2 + relu (3x3, stride)
    out = conv3x3_fused(out, p["conv2_w"], p["conv2_s"],
                        stride=p["stride"], relu=True)
    _, ho, wo, _ = out.shape

    # identity / downsample branch
    if p["down_w"] is not None:
        xid = xh[:, ::p["stride"], ::p["stride"], :]
        id_rows = matmul_fused(xid.reshape(nt * ho * wo, cp_in),
                               p["down_w"], p["down_s"], relu=False)
    else:
        # requires stride == 1 and inplanes == planes * 4
        id_rows = x_rows

    # K5: conv3 + bn3 + residual + relu (1x1), fused in one kernel
    y_rows = matmul_fused(out.reshape(nt * ho * wo, cp_mid),
                          p["conv3_w"], p["conv3_s"],
                          res=id_rows, relu=True)
    y = y_rows.reshape(nt, ho, wo, cp_out)[..., :planes * 4]
    return jnp.transpose(y, (0, 3, 1, 2)).astype(jnp.float32)   # back to NCHW


# ---------------------------------------------------------------------------
if __name__ == "__main__":
    key = jax.random.PRNGKey(0)
    pkey, xkey = jax.random.split(key)

    num_segments = 4
    n_batch = 2
    nt = n_batch * num_segments          # 8 frames total
    inplanes, planes, stride = 256, 64, 1  # identity residual (no downsample)
    h = w = 8

    params = init_bottleneck_params(pkey, num_segments, inplanes, planes,
                                    stride=stride, with_downsample=False)

    x = jax.random.normal(xkey, (nt, inplanes, h, w), jnp.float32)

    fwd = jax.jit(lambda inp: bottleneck_forward(params, inp))
    out = jax.block_until_ready(fwd(x))

    assert out.shape == (nt, planes * 4, h, w), out.shape
    assert bool(jnp.all(jnp.isfinite(out))), "non-finite output"
    print("KERNEL_OK")
</pallas_src>

<mosaic_0001>
module attributes {stable_mosaic.version = 11 : i64} {
  func.func @_conv1_mam1_kernel(%arg0: i32, %arg1: i32, %arg2: memref<256x256xbf16, #tpu.memory_space<vmem>>, %arg3: memref<256x128xbf16, #tpu.memory_space<vmem>>, %arg4: memref<1x128xf32, #tpu.memory_space<vmem>>, %arg5: memref<128x128xbf16, #tpu.memory_space<vmem>>, %arg6: memref<1x128xf32, #tpu.memory_space<vmem>>, %arg7: memref<256x128xbf16, #tpu.memory_space<vmem>>, %arg8: memref<256x128xbf16, #tpu.memory_space<vmem>>, %arg9: memref<256x128xf32, #tpu.memory_space<vmem>>) attributes {dimension_semantics = [#tpu.dimension_semantics<parallel>, #tpu.dimension_semantics<arbitrary>], iteration_bounds = array<i64: 2, 1>, scalar_prefetch = 0 : i64, scratch_operands = 1 : i64, tpu.core_type = #tpu.core_type<tc>, window_params = [{transform_indices = @transform_0, window_bounds = array<i64: 256, 256>}, {transform_indices = @transform_1, window_bounds = array<i64: 256, 128>}, {pipeline_mode = #tpu.pipeline_mode<synchronous>, transform_indices = @transform_2, window_bounds = array<i64: 1, 128>}, {pipeline_mode = #tpu.pipeline_mode<synchronous>, transform_indices = @transform_3, window_bounds = array<i64: 128, 128>}, {pipeline_mode = #tpu.pipeline_mode<synchronous>, transform_indices = @transform_4, window_bounds = array<i64: 1, 128>}, {transform_indices = @transform_5, window_bounds = array<i64: 256, 128>}, {transform_indices = @transform_6, window_bounds = array<i64: 256, 128>}]} {
    %c0_i32 = arith.constant 0 : i32
    %0 = arith.cmpi eq, %arg1, %c0_i32 : i32
    %1 = arith.extui %0 : i1 to i32
    %c0_i32_0 = arith.constant 0 : i32
    %2 = arith.cmpi ne, %1, %c0_i32_0 : i32
    scf.if %2 {
      %cst_10 = arith.constant 0.000000e+00 : f32
      %12 = vector.broadcast %cst_10 : f32 to vector<256x128xf32>
      %c0_11 = arith.constant 0 : index
      %c0_12 = arith.constant 0 : index
      %13 = vector.load %arg9[%c0_11, %c0_12] : memref<256x128xf32, #tpu.memory_space<vmem>>, vector<256x128xf32>
      tpu.vector_store %arg9[%c0_11, %c0_12], %12 {strides = array<i32>} : memref<256x128xf32, #tpu.memory_space<vmem>>, vector<256x128xf32>,
    } else {
    }
    %c0 = arith.constant 0 : index
    %c0_1 = arith.constant 0 : index
    %3 = vector.load %arg9[%c0, %c0_1] : memref<256x128xf32, #tpu.memory_space<vmem>>, vector<256x128xf32>
    %c0_2 = arith.constant 0 : index
    %c0_3 = arith.constant 0 : index
    %4 = vector.load %arg2[%c0_2, %c0_3] : memref<256x256xbf16, #tpu.memory_space<vmem>>, vector<256x256xbf16>
    %c0_4 = arith.constant 0 : index
    %c0_5 = arith.constant 0 : index
    %5 = vector.load %arg3[%c0_4, %c0_5] : memref<256x128xbf16, #tpu.memory_space<vmem>>, vector<256x128xbf16>
    %cst = arith.constant dense<0.000000e+00> : vector<256x128xf32>
    %6 = tpu.matmul %4, %5, %cst {dimension_numbers = #tpu.dot_dimension_numbers<[1], [0], [0], [1], [0, 0, 1, 1], [], []>} : vector<256x256xbf16>, vector<256x128xbf16>, vector<256x128xf32> -> vector<256x128xf32>
    %7 = arith.addf %3, %6 : vector<256x128xf32>
    %c0_6 = arith.constant 0 : index
    %c0_7 = arith.constant 0 : index
    %8 = vector.load %arg9[%c0_6, %c0_7] : memref<256x128xf32, #tpu.memory_space<vmem>>, vector<256x128xf32>
    tpu.vector_store %arg9[%c0_6, %c0_7], %7 {strides = array<i32>} : memref<256x128xf32, #tpu.memory_space<vmem>>, vector<256x128xf32>,
    %c0_i32_8 = arith.constant 0 : i32
    %9 = arith.cmpi eq, %arg1, %c0_i32_8 : i32
    %10 = arith.extui %9 : i1 to i32
    %c0_i32_9 = arith.constant 0 : i32
    %11 = arith.cmpi ne, %10, %c0_i32_9 : i32
    scf.if %11 {
      %c0_10 = arith.constant 0 : index
      %c0_11 = arith.constant 0 : index
      %12 = vector.load %arg9[%c0_10, %c0_11] : memref<256x128xf32, #tpu.memory_space<vmem>>, vector<256x128xf32>
      %c0_12 = arith.constant 0 : index
      %c0_13 = arith.constant 0 : index
      %13 = vector.load %arg4[%c0_12, %c0_13] : memref<1x128xf32, #tpu.memory_space<vmem>>, vector<1x128xf32>
      %14 = vector.broadcast %13 : vector<1x128xf32> to vector<256x128xf32>
      %15 = arith.addf %12, %14 : vector<256x128xf32>
      %cst_14 = arith.constant 0.000000e+00 : f32
      %16 = vector.broadcast %cst_14 : f32 to vector<256x128xf32>
      %17 = arith.maximumf %15, %16 : vector<256x128xf32>
      %18 = arith.truncf %17 : vector<256x128xf32> to vector<256x128xbf16>
      %c0_15 = arith.constant 0 : index
      %c0_16 = arith.constant 0 : index
      %19 = vector.load %arg7[%c0_15, %c0_16] : memref<256x128xbf16, #tpu.memory_space<vmem>>, vector<256x128xbf16>
      tpu.vector_store %arg7[%c0_15, %c0_16], %18 {strides = array<i32>} : memref<256x128xbf16, #tpu.memory_space<vmem>>, vector<256x128xbf16>,
      %c0_17 = arith.constant 0 : index
      %c0_18 = arith.constant 0 : index
      %20 = vector.load %arg5[%c0_17, %c0_18] : memref<128x128xbf16, #tpu.memory_space<vmem>>, vector<128x128xbf16>
      %cst_19 = arith.constant dense<0.000000e+00> : vector<256x128xf32>
      %21 = tpu.matmul %18, %20, %cst_19 {dimension_numbers = #tpu.dot_dimension_numbers<[1], [0], [0], [1], [0, 0, 1, 1], [], []>} : vector<256x128xbf16>, vector<128x128xbf16>, vector<256x128xf32> -> vector<256x128xf32>
      %c0_20 = arith.constant 0 : index
      %c0_21 = arith.constant 0 : index
      %22 = vector.load %arg6[%c0_20, %c0_21] : memref<1x128xf32, #tpu.memory_space<vmem>>, vector<1x128xf32>
      %23 = vector.broadcast %22 : vector<1x128xf32> to vector<256x128xf32>
      %24 = arith.addf %21, %23 : vector<256x128xf32>
      %25 = arith.truncf %24 : vector<256x128xf32> to vector<256x128xbf16>
      %c0_22 = arith.constant 0 : index
      %c0_23 = arith.constant 0 : index
      %26 = vector.load %arg8[%c0_22, %c0_23] : memref<256x128xbf16, #tpu.memory_space<vmem>>, vector<256x128xbf16>
      tpu.vector_store %arg8[%c0_22, %c0_23], %25 {strides = array<i32>} : memref<256x128xbf16, #tpu.memory_space<vmem>>, vector<256x128xbf16>,
    } else {
    }
    return
  }
  func.func @transform_0(%arg0: i32, %arg1: i32) -> (i32, i32) {
    %c0_i32 = arith.constant 0 : i32
    return %arg0, %arg1 : i32, i32
  }
  func.func @transform_1(%arg0: i32, %arg1: i32) -> (i32, i32) {
    %c0_i32 = arith.constant 0 : i32
    %c0_i32_0 = arith.constant 0 : i32
    return %arg1, %c0_i32 : i32, i32
  }
  func.func @transform_2(%arg0: i32, %arg1: i32) -> (i32, i32) {
    %c0_i32 = arith.constant 0 : i32
    %c0_i32_0 = arith.constant 0 : i32
    %c0_i32_1 = arith.constant 0 : i32
    return %c0_i32, %c0_i32_0 : i32, i32
  }
  func.func @transform_3(%arg0: i32, %arg1: i32) -> (i32, i32) {
    %c0_i32 = arith.constant 0 : i32
    %c0_i32_0 = arith.constant 0 : i32
    %c0_i32_1 = arith.constant 0 : i32
    return %c0_i32, %c0_i32_0 : i32, i32
  }
  func.func @transform_4(%arg0: i32, %arg1: i32) -> (i32, i32) {
    %c0_i32 = arith.constant 0 : i32
    %c0_i32_0 = arith.constant 0 : i32
    %c0_i32_1 = arith.constant 0 : i32
    return %c0_i32, %c0_i32_0 : i32, i32
  }
  func.func @transform_5(%arg0: i32, %arg1: i32) -> (i32, i32) {
    %c0_i32 = arith.constant 0 : i32
    %c0_i32_0 = arith.constant 0 : i32
    return %arg0, %c0_i32 : i32, i32
  }
  func.func @transform_6(%arg0: i32, %arg1: i32) -> (i32, i32) {
    %c0_i32 = arith.constant 0 : i32
    %c0_i32_0 = arith.constant 0 : i32
    return %arg0, %c0_i32 : i32, i32
  }
}

module attributes {stable_mosaic.version = 11 : i64} {
  func.func @_mam_pool_kernel(%arg0: i32, %arg1: i32, %arg2: memref<1x4x64x128xbf16, #tpu.memory_space<vmem>>, %arg3: memref<1x4x64x128xbf16, #tpu.memory_space<vmem>>, %arg4: memref<128x128xbf16, #tpu.memory_space<vmem>>, %arg5: memref<1x128xf32, #tpu.memory_space<vmem>>, %arg6: memref<1x4x64x128xbf16, #tpu.memory_space<vmem>>, %arg7: memref<1x64x128xbf16, #tpu.memory_space<vmem>>) attributes {dimension_semantics = [#tpu.dimension_semantics<parallel>, #tpu.dimension_semantics<parallel>], iteration_bounds = array<i64: 2, 1>, scalar_prefetch = 0 : i64, scratch_operands = 0 : i64, tpu.core_type = #tpu.core_type<tc>, window_params = [{transform_indices = @transform_0, window_bounds = array<i64: 1, 4, 64, 128>}, {transform_indices = @transform_1, window_bounds = array<i64: 1, 4, 64, 128>}, {pipeline_mode = #tpu.pipeline_mode<synchronous>, transform_indices = @transform_2, window_bounds = array<i64: 128, 128>}, {pipeline_mode = #tpu.pipeline_mode<synchronous>, transform_indices = @transform_3, window_bounds = array<i64: 1, 128>}, {transform_indices = @transform_4, window_bounds = array<i64: 1, 4, 64, 128>}, {transform_indices = @transform_5, window_bounds = array<i64: 1, 64, 128>}]} {
    %c0 = arith.constant 0 : index
    %c0_0 = arith.constant 0 : index
    %c0_1 = arith.constant 0 : index
    %c0_2 = arith.constant 0 : index
    %0 = vector.load %arg2[%c0, %c0_0, %c0_1, %c0_2] : memref<1x4x64x128xbf16, #tpu.memory_space<vmem>>, vector<1x4x64x128xbf16>
    %1 = vector.shape_cast %0 : vector<1x4x64x128xbf16> to vector<4x64x128xbf16>
    %2 = vector.shape_cast %1 : vector<4x64x128xbf16> to vector<256x128xbf16>
    %c0_3 = arith.constant 0 : index
    %c0_4 = arith.constant 0 : index
    %3 = vector.load %arg4[%c0_3, %c0_4] : memref<128x128xbf16, #tpu.memory_space<vmem>>, vector<128x128xbf16>
    %cst = arith.constant dense<0.000000e+00> : vector<256x128xf32>
    %4 = tpu.matmul %2, %3, %cst {dimension_numbers = #tpu.dot_dimension_numbers<[1], [0], [0], [1], [0, 0, 1, 1], [], []>} : vector<256x128xbf16>, vector<128x128xbf16>, vector<256x128xf32> -> vector<256x128xf32>
    %c0_5 = arith.constant 0 : index
    %c0_6 = arith.constant 0 : index
    %5 = vector.load %arg5[%c0_5, %c0_6] : memref<1x128xf32, #tpu.memory_space<vmem>>, vector<1x128xf32>
    %6 = vector.broadcast %5 : vector<1x128xf32> to vector<256x128xf32>
    %7 = arith.addf %4, %6 : vector<256x128xf32>
    %8 = vector.shape_cast %7 : vector<256x128xf32> to vector<4x64x128xf32>
    %c0_7 = arith.constant 0 : index
    %c0_8 = arith.constant 0 : index
    %c0_9 = arith.constant 0 : index
    %c0_10 = arith.constant 0 : index
    %9 = vector.load %arg3[%c0_7, %c0_8, %c0_9, %c0_10] : memref<1x4x64x128xbf16, #tpu.memory_space<vmem>>, vector<1x4x64x128xbf16>
    %10 = vector.shape_cast %9 : vector<1x4x64x128xbf16> to vector<4x64x128xbf16>
    %11 = arith.extf %10 : vector<4x64x128xbf16> to vector<4x64x128xf32>
    %12 = vector.extract_strided_slice %8 {offsets = [0, 0, 0], sizes = [3, 64, 128], strides = [1, 1, 1]} : vector<4x64x128xf32> to vector<3x64x128xf32>
    %13 = vector.extract_strided_slice %8 {offsets = [1, 0, 0], sizes = [3, 64, 128], strides = [1, 1, 1]} : vector<4x64x128xf32> to vector<3x64x128xf32>
    %cst_11 = arith.constant 5.000000e-01 : f32
    %14 = vector.broadcast %cst_11 : f32 to vector<3x64x128xf32>
    %15 = arith.mulf %14, %13 : vector<3x64x128xf32>
    %16 = arith.addf %12, %15 : vector<3x64x128xf32>
    %cst_12 = arith.constant 0.666666686 : f32
    %17 = vector.broadcast %cst_12 : f32 to vector<3x64x128xf32>
    %18 = arith.mulf %16, %17 : vector<3x64x128xf32>
    %19 = vector.extract_strided_slice %8 {offsets = [3, 0, 0], sizes = [1, 64, 128], strides = [1, 1, 1]} : vector<4x64x128xf32> to vector<1x64x128xf32>
    %20 = arith.truncf %18 : vector<3x64x128xf32> to vector<3x64x128xbf16>
    %c0_13 = arith.constant 0 : index
    %c0_14 = arith.constant 0 : index
    %c0_15 = arith.constant 0 : index
    %c0_16 = arith.constant 0 : index
    %21 = vector.load %arg6[%c0_13, %c0_14, %c0_15, %c0_16] : memref<1x4x64x128xbf16, #tpu.memory_space<vmem>>, vector<1x3x64x128xbf16>
    %22 = vector.shape_cast %21 : vector<1x3x64x128xbf16> to vector<3x64x128xbf16>
    %23 = vector.shape_cast %20 : vector<3x64x128xbf16> to vector<1x3x64x128xbf16>
    tpu.vector_store %arg6[%c0_13, %c0_14, %c0_15, %c0_16], %23 {strides = array<i32>} : memref<1x4x64x128xbf16, #tpu.memory_space<vmem>>, vector<1x3x64x128xbf16>,
    %24 = arith.truncf %19 : vector<1x64x128xf32> to vector<1x64x128xbf16>
    %c0_17 = arith.constant 0 : index
    %c3 = arith.constant 3 : index
    %c0_18 = arith.constant 0 : index
    %c0_19 = arith.constant 0 : index
    %25 = vector.load %arg6[%c0_17, %c3, %c0_18, %c0_19] : memref<1x4x64x128xbf16, #tpu.memory_space<vmem>>, vector<1x1x64x128xbf16>
    %26 = vector.shape_cast %25 : vector<1x1x64x128xbf16> to vector<1x64x128xbf16>
    %27 = vector.shape_cast %24 : vector<1x64x128xbf16> to vector<1x1x64x128xbf16>
    tpu.vector_store %arg6[%c0_17, %c3, %c0_18, %c0_19], %27 {strides = array<i32>} : memref<1x4x64x128xbf16, #tpu.memory_space<vmem>>, vector<1x1x64x128xbf16>,
    %cst_20 = arith.constant dense<0.000000e+00> : vector<64x128xf32>
    %28 = vector.multi_reduction <add>, %18, %cst_20 [0] : vector<3x64x128xf32> to vector<64x128xf32>
    %29 = vector.shape_cast %19 : vector<1x64x128xf32> to vector<64x128xf32>
    %30 = arith.addf %28, %29 : vector<64x128xf32>
    %cst_21 = arith.constant dense<0.000000e+00> : vector<64x128xf32>
    %31 = vector.multi_reduction <add>, %11, %cst_21 [0] : vector<4x64x128xf32> to vector<64x128xf32>
    %32 = arith.addf %30, %31 : vector<64x128xf32>
    %cst_22 = arith.constant 2.500000e-01 : f32
    %33 = vector.broadcast %cst_22 : f32 to vector<64x128xf32>
    %34 = arith.mulf %32, %33 : vector<64x128xf32>
    %35 = arith.truncf %34 : vector<64x128xf32> to vector<64x128xbf16>
    %c0_23 = arith.constant 0 : index
    %c0_24 = arith.constant 0 : index
    %c0_25 = arith.constant 0 : index
    %36 = vector.load %arg7[%c0_23, %c0_24, %c0_25] : memref<1x64x128xbf16, #tpu.memory_space<vmem>>, vector<1x64x128xbf16>
    %37 = vector.shape_cast %36 : vector<1x64x128xbf16> to vector<64x128xbf16>
    %38 = vector.shape_cast %35 : vector<64x128xbf16> to vector<1x64x128xbf16>
    tpu.vector_store %arg7[%c0_23, %c0_24, %c0_25], %38 {strides = array<i32>} : memref<1x64x128xbf16, #tpu.memory_space<vmem>>, vector<1x64x128xbf16>,
    return
  }
  func.func @transform_0(%arg0: i32, %arg1: i32) -> (i32, i32, i32, i32) {
    %c0_i32 = arith.constant 0 : i32
    %c0_i32_0 = arith.constant 0 : i32
    %c0_i32_1 = arith.constant 0 : i32
    return %arg0, %c0_i32, %arg1, %c0_i32_0 : i32, i32, i32, i32
  }
  func.func @transform_1(%arg0: i32, %arg1: i32) -> (i32, i32, i32, i32) {
    %c0_i32 = arith.constant 0 : i32
    %c0_i32_0 = arith.constant 0 : i32
    %c0_i32_1 = arith.constant 0 : i32
    return %arg0, %c0_i32, %arg1, %c0_i32_0 : i32, i32, i32, i32
  }
  func.func @transform_2(%arg0: i32, %arg1: i32) -> (i32, i32) {
    %c0_i32 = arith.constant 0 : i32
    %c0_i32_0 = arith.constant 0 : i32
    %c0_i32_1 = arith.constant 0 : i32
    return %c0_i32, %c0_i32_0 : i32, i32
  }
  func.func @transform_3(%arg0: i32, %arg1: i32) -> (i32, i32) {
    %c0_i32 = arith.constant 0 : i32
    %c0_i32_0 = arith.constant 0 : i32
    %c0_i32_1 = arith.constant 0 : i32
    return %c0_i32, %c0_i32_0 : i32, i32
  }
  func.func @transform_4(%arg0: i32, %arg1: i32) -> (i32, i32, i32, i32) {
    %c0_i32 = arith.constant 0 : i32
    %c0_i32_0 = arith.constant 0 : i32
    %c0_i32_1 = arith.constant 0 : i32
    return %arg0, %c0_i32, %arg1, %c0_i32_0 : i32, i32, i32, i32
  }
  func.func @transform_5(%arg0: i32, %arg1: i32) -> (i32, i32, i32) {
    %c0_i32 = arith.constant 0 : i32
    %c0_i32_0 = arith.constant 0 : i32
    return %arg0, %arg1, %c0_i32 : i32, i32, i32
  }
}

module attributes {stable_mosaic.version = 11 : i64} {
  func.func @_conv3x3_kernel(%arg0: i32, %arg1: i32, %arg2: memref<1x10x10x128xbf16, #tpu.memory_space<vmem>>, %arg3: memref<9x128x128xbf16, #tpu.memory_space<vmem>>, %arg4: memref<1x128xf32, #tpu.memory_space<vmem>>, %arg5: memref<1x64x128xbf16, #tpu.memory_space<vmem>>) attributes {dimension_semantics = [#tpu.dimension_semantics<parallel>, #tpu.dimension_semantics<parallel>], iteration_bounds = array<i64: 2, 1>, scalar_prefetch = 0 : i64, scratch_operands = 0 : i64, tpu.core_type = #tpu.core_type<tc>, window_params = [{transform_indices = @transform_0, window_bounds = array<i64: 1, 10, 10, 128>}, {transform_indices = @transform_1, window_bounds = array<i64: 9, 128, 128>}, {transform_indices = @transform_2, window_bounds = array<i64: 1, 128>}, {transform_indices = @transform_3, window_bounds = array<i64: 1, 64, 128>}]} {
    %c0 = arith.constant 0 : index
    %c0_0 = arith.constant 0 : index
    %c0_1 = arith.constant 0 : index
    %c0_2 = arith.constant 0 : index
    %0 = vector.load %arg2[%c0, %c0_0, %c0_1, %c0_2] : memref<1x10x10x128xbf16, #tpu.memory_space<vmem>>, vector<1x10x10x128xbf16>
    %1 = vector.shape_cast %0 : vector<1x10x10x128xbf16> to vector<10x10x128xbf16>
    %cst = arith.constant 0.000000e+00 : f32
    %2 = vector.broadcast %cst : f32 to vector<64x128xf32>
    %3 = vector.extract_strided_slice %1 {offsets = [0, 0, 0], sizes = [8, 8, 128], strides = [1, 1, 1]} : vector<10x10x128xbf16> to vector<8x8x128xbf16>
    %4 = vector.shape_cast %3 : vector<8x8x128xbf16> to vector<64x128xbf16>
    %c0_3 = arith.constant 0 : index
    %c0_4 = arith.constant 0 : index
    %c0_5 = arith.constant 0 : index
    %5 = vector.load %arg3[%c0_3, %c0_4, %c0_5] : memref<9x128x128xbf16, #tpu.memory_space<vmem>>, vector<1x128x128xbf16>
    %6 = vector.shape_cast %5 : vector<1x128x128xbf16> to vector<128x128xbf16>
    %cst_6 = arith.constant dense<0.000000e+00> : vector<64x128xf32>
    %7 = tpu.matmul %4, %6, %cst_6 {dimension_numbers = #tpu.dot_dimension_numbers<[1], [0], [0], [1], [0, 0, 1, 1], [], []>} : vector<64x128xbf16>, vector<128x128xbf16>, vector<64x128xf32> -> vector<64x128xf32>
    %8 = arith.addf %2, %7 : vector<64x128xf32>
    %9 = vector.extract_strided_slice %1 {offsets = [0, 1, 0], sizes = [8, 8, 128], strides = [1, 1, 1]} : vector<10x10x128xbf16> to vector<8x8x128xbf16>
    %10 = vector.shape_cast %9 : vector<8x8x128xbf16> to vector<64x128xbf16>
    %c1 = arith.constant 1 : index
    %c0_7 = arith.constant 0 : index
    %c0_8 = arith.constant 0 : index
    %11 = vector.load %arg3[%c1, %c0_7, %c0_8] : memref<9x128x128xbf16, #tpu.memory_space<vmem>>, vector<1x128x128xbf16>
    %12 = vector.shape_cast %11 : vector<1x128x128xbf16> to vector<128x128xbf16>
    %cst_9 = arith.constant dense<0.000000e+00> : vector<64x128xf32>
    %13 = tpu.matmul %10, %12, %cst_9 {dimension_numbers = #tpu.dot_dimension_numbers<[1], [0], [0], [1], [0, 0, 1, 1], [], []>} : vector<64x128xbf16>, vector<128x128xbf16>, vector<64x128xf32> -> vector<64x128xf32>
    %14 = arith.addf %8, %13 : vector<64x128xf32>
    %15 = vector.extract_strided_slice %1 {offsets = [0, 2, 0], sizes = [8, 8, 128], strides = [1, 1, 1]} : vector<10x10x128xbf16> to vector<8x8x128xbf16>
    %16 = vector.shape_cast %15 : vector<8x8x128xbf16> to vector<64x128xbf16>
    %c2 = arith.constant 2 : index
    %c0_10 = arith.constant 0 : index
    %c0_11 = arith.constant 0 : index
    %17 = vector.load %arg3[%c2, %c0_10, %c0_11] : memref<9x128x128xbf16, #tpu.memory_space<vmem>>, vector<1x128x128xbf16>
    %18 = vector.shape_cast %17 : vector<1x128x128xbf16> to vector<128x128xbf16>
    %cst_12 = arith.constant dense<0.000000e+00> : vector<64x128xf32>
    %19 = tpu.matmul %16, %18, %cst_12 {dimension_numbers = #tpu.dot_dimension_numbers<[1], [0], [0], [1], [0, 0, 1, 1], [], []>} : vector<64x128xbf16>, vector<128x128xbf16>, vector<64x128xf32> -> vector<64x128xf32>
    %20 = arith.addf %14, %19 : vector<64x128xf32>
    %21 = vector.extract_strided_slice %1 {offsets = [1, 0, 0], sizes = [8, 8, 128], strides = [1, 1, 1]} : vector<10x10x128xbf16> to vector<8x8x128xbf16>
    %22 = vector.shape_cast %21 : vector<8x8x128xbf16> to vector<64x128xbf16>
    %c3 = arith.constant 3 : index
    %c0_13 = arith.constant 0 : index
    %c0_14 = arith.constant 0 : index
    %23 = vector.load %arg3[%c3, %c0_13, %c0_14] : memref<9x128x128xbf16, #tpu.memory_space<vmem>>, vector<1x128x128xbf16>
    %24 = vector.shape_cast %23 : vector<1x128x128xbf16> to vector<128x128xbf16>
    %cst_15 = arith.constant dense<0.000000e+00> : vector<64x128xf32>
    %25 = tpu.matmul %22, %24, %cst_15 {dimension_numbers = #tpu.dot_dimension_numbers<[1], [0], [0], [1], [0, 0, 1, 1], [], []>} : vector<64x128xbf16>, vector<128x128xbf16>, vector<64x128xf32> -> vector<64x128xf32>
    %26 = arith.addf %20, %25 : vector<64x128xf32>
    %27 = vector.extract_strided_slice %1 {offsets = [1, 1, 0], sizes = [8, 8, 128], strides = [1, 1, 1]} : vector<10x10x128xbf16> to vector<8x8x128xbf16>
    %28 = vector.shape_cast %27 : vector<8x8x128xbf16> to vector<64x128xbf16>
    %c4 = arith.constant 4 : index
    %c0_16 = arith.constant 0 : index
    %c0_17 = arith.constant 0 : index
    %29 = vector.load %arg3[%c4, %c0_16, %c0_17] : memref<9x128x128xbf16, #tpu.memory_space<vmem>>, vector<1x128x128xbf16>
    %30 = vector.shape_cast %29 : vector<1x128x128xbf16> to vector<128x128xbf16>
    %cst_18 = arith.constant dense<0.000000e+00> : vector<64x128xf32>
    %31 = tpu.matmul %28, %30, %cst_18 {dimension_numbers = #tpu.dot_dimension_numbers<[1], [0], [0], [1], [0, 0, 1, 1], [], []>} : vector<64x128xbf16>, vector<128x128xbf16>, vector<64x128xf32> -> vector<64x128xf32>
    %32 = arith.addf %26, %31 : vector<64x128xf32>
    %33 = vector.extract_strided_slice %1 {offsets = [1, 2, 0], sizes = [8, 8, 128], strides = [1, 1, 1]} : vector<10x10x128xbf16> to vector<8x8x128xbf16>
    %34 = vector.shape_cast %33 : vector<8x8x128xbf16> to vector<64x128xbf16>
    %c5 = arith.constant 5 : index
    %c0_19 = arith.constant 0 : index
    %c0_20 = arith.constant 0 : index
    %35 = vector.load %arg3[%c5, %c0_19, %c0_20] : memref<9x128x128xbf16, #tpu.memory_space<vmem>>, vector<1x128x128xbf16>
    %36 = vector.shape_cast %35 : vector<1x128x128xbf16> to vector<128x128xbf16>
    %cst_21 = arith.constant dense<0.000000e+00> : vector<64x128xf32>
    %37 = tpu.matmul %34, %36, %cst_21 {dimension_numbers = #tpu.dot_dimension_numbers<[1], [0], [0], [1], [0, 0, 1, 1], [], []>} : vector<64x128xbf16>, vector<128x128xbf16>, vector<64x128xf32> -> vector<64x128xf32>
    %38 = arith.addf %32, %37 : vector<64x128xf32>
    %39 = vector.extract_strided_slice %1 {offsets = [2, 0, 0], sizes = [8, 8, 128], strides = [1, 1, 1]} : vector<10x10x128xbf16> to vector<8x8x128xbf16>
    %40 = vector.shape_cast %39 : vector<8x8x128xbf16> to vector<64x128xbf16>
    %c6 = arith.constant 6 : index
    %c0_22 = arith.constant 0 : index
    %c0_23 = arith.constant 0 : index
    %41 = vector.load %arg3[%c6, %c0_22, %c0_23] : memref<9x128x128xbf16, #tpu.memory_space<vmem>>, vector<1x128x128xbf16>
    %42 = vector.shape_cast %41 : vector<1x128x128xbf16> to vector<128x128xbf16>
    %cst_24 = arith.constant dense<0.000000e+00> : vector<64x128xf32>
    %43 = tpu.matmul %40, %42, %cst_24 {dimension_numbers = #tpu.dot_dimension_numbers<[1], [0], [0], [1], [0, 0, 1, 1], [], []>} : vector<64x128xbf16>, vector<128x128xbf16>, vector<64x128xf32> -> vector<64x128xf32>
    %44 = arith.addf %38, %43 : vector<64x128xf32>
    %45 = vector.extract_strided_slice %1 {offsets = [2, 1, 0], sizes = [8, 8, 128], strides = [1, 1, 1]} : vector<10x10x128xbf16> to vector<8x8x128xbf16>
    %46 = vector.shape_cast %45 : vector<8x8x128xbf16> to vector<64x128xbf16>
    %c7 = arith.constant 7 : index
    %c0_25 = arith.constant 0 : index
    %c0_26 = arith.constant 0 : index
    %47 = vector.load %arg3[%c7, %c0_25, %c0_26] : memref<9x128x128xbf16, #tpu.memory_space<vmem>>, vector<1x128x128xbf16>
    %48 = vector.shape_cast %47 : vector<1x128x128xbf16> to vector<128x128xbf16>
    %cst_27 = arith.constant dense<0.000000e+00> : vector<64x128xf32>
    %49 = tpu.matmul %46, %48, %cst_27 {dimension_numbers = #tpu.dot_dimension_numbers<[1], [0], [0], [1], [0, 0, 1, 1], [], []>} : vector<64x128xbf16>, vector<128x128xbf16>, vector<64x128xf32> -> vector<64x128xf32>
    %50 = arith.addf %44, %49 : vector<64x128xf32>
    %51 = vector.extract_strided_slice %1 {offsets = [2, 2, 0], sizes = [8, 8, 128], strides = [1, 1, 1]} : vector<10x10x128xbf16> to vector<8x8x128xbf16>
    %52 = vector.shape_cast %51 : vector<8x8x128xbf16> to vector<64x128xbf16>
    %c8 = arith.constant 8 : index
    %c0_28 = arith.constant 0 : index
    %c0_29 = arith.constant 0 : index
    %53 = vector.load %arg3[%c8, %c0_28, %c0_29] : memref<9x128x128xbf16, #tpu.memory_space<vmem>>, vector<1x128x128xbf16>
    %54 = vector.shape_cast %53 : vector<1x128x128xbf16> to vector<128x128xbf16>
    %cst_30 = arith.constant dense<0.000000e+00> : vector<64x128xf32>
    %55 = tpu.matmul %52, %54, %cst_30 {dimension_numbers = #tpu.dot_dimension_numbers<[1], [0], [0], [1], [0, 0, 1, 1], [], []>} : vector<64x128xbf16>, vector<128x128xbf16>, vector<64x128xf32> -> vector<64x128xf32>
    %56 = arith.addf %50, %55 : vector<64x128xf32>
    %c0_31 = arith.constant 0 : index
    %c0_32 = arith.constant 0 : index
    %57 = vector.load %arg4[%c0_31, %c0_32] : memref<1x128xf32, #tpu.memory_space<vmem>>, vector<1x128xf32>
    %58 = vector.broadcast %57 : vector<1x128xf32> to vector<64x128xf32>
    %59 = arith.addf %56, %58 : vector<64x128xf32>
    %cst_33 = arith.constant 0.000000e+00 : f32
    %60 = vector.broadcast %cst_33 : f32 to vector<64x128xf32>
    %61 = arith.maximumf %59, %60 : vector<64x128xf32>
    %62 = arith.truncf %61 : vector<64x128xf32> to vector<64x128xbf16>
    %c0_34 = arith.constant 0 : index
    %c0_35 = arith.constant 0 : index
    %c0_36 = arith.constant 0 : index
    %63 = vector.load %arg5[%c0_34, %c0_35, %c0_36] : memref<1x64x128xbf16, #tpu.memory_space<vmem>>, vector<1x64x128xbf16>
    %64 = vector.shape_cast %63 : vector<1x64x128xbf16> to vector<64x128xbf16>
    %65 = vector.shape_cast %62 : vector<64x128xbf16> to vector<1x64x128xbf16>
    tpu.vector_store %arg5[%c0_34, %c0_35, %c0_36], %65 {strides = array<i32>} : memref<1x64x128xbf16, #tpu.memory_space<vmem>>, vector<1x64x128xbf16>,
    return
  }
  func.func @transform_0(%arg0: i32, %arg1: i32) -> (i32, i32, i32, i32) {
    %c0_i32 = arith.constant 0 : i32
    %c0_i32_0 = arith.constant 0 : i32
    %c0_i32_1 = arith.constant 0 : i32
    %c0_i32_2 = arith.constant 0 : i32
    return %arg0, %c0_i32, %c0_i32_0, %c0_i32_1 : i32, i32, i32, i32
  }
  func.func @transform_1(%arg0: i32, %arg1: i32) -> (i32, i32, i32) {
    %c0_i32 = arith.constant 0 : i32
    %c0_i32_0 = arith.constant 0 : i32
    %c0_i32_1 = arith.constant 0 : i32
    return %c0_i32, %c0_i32_0, %arg1 : i32, i32, i32
  }
  func.func @transform_2(%arg0: i32, %arg1: i32) -> (i32, i32) {
    %c0_i32 = arith.constant 0 : i32
    %c0_i32_0 = arith.constant 0 : i32
    return %c0_i32, %arg1 : i32, i32
  }
  func.func @transform_3(%arg0: i32, %arg1: i32) -> (i32, i32, i32) {
    %c0_i32 = arith.constant 0 : i32
    %c0_i32_0 = arith.constant 0 : i32
    return %arg0, %c0_i32, %arg1 : i32, i32, i32
  }
}

module attributes {stable_mosaic.version = 11 : i64} {
  func.func @_msm_tim_kernel(%arg0: i32, %arg1: i32, %arg2: memref<1x4x64x128xbf16, #tpu.memory_space<vmem>>, %arg3: memref<1x4x64x128xbf16, #tpu.memory_space<vmem>>, %arg4: memref<1x64x256xbf16, #tpu.memory_space<vmem>>, %arg5: memref<3x128xf32, #tpu.memory_space<vmem>>, %arg6: memref<1x4x64x128xbf16, #tpu.memory_space<vmem>>, %arg7: memref<6x64x128xf32, #tpu.memory_space<vmem>>) attributes {dimension_semantics = [#tpu.dimension_semantics<parallel>, #tpu.dimension_semantics<parallel>], iteration_bounds = array<i64: 2, 1>, scalar_prefetch = 0 : i64, scratch_operands = 1 : i64, tpu.core_type = #tpu.core_type<tc>, window_params = [{transform_indices = @transform_0, window_bounds = array<i64: 1, 4, 64, 128>}, {transform_indices = @transform_1, window_bounds = array<i64: 1, 4, 64, 128>}, {transform_indices = @transform_2, window_bounds = array<i64: 1, 64, 256>}, {pipeline_mode = #tpu.pipeline_mode<synchronous>, transform_indices = @transform_3, window_bounds = array<i64: 3, 128>}, {transform_indices = @transform_4, window_bounds = array<i64: 1, 4, 64, 128>}]} {
    %c0 = arith.constant 0 : index
    %c0_0 = arith.constant 0 : index
    %c0_1 = arith.constant 0 : index
    %c0_2 = arith.constant 0 : index
    %0 = vector.load %arg2[%c0, %c0_0, %c0_1, %c0_2] : memref<1x4x64x128xbf16, #tpu.memory_space<vmem>>, vector<1x4x64x128xbf16>
    %1 = vector.shape_cast %0 : vector<1x4x64x128xbf16> to vector<4x64x128xbf16>
    %2 = arith.extf %1 : vector<4x64x128xbf16> to vector<4x64x128xf32>
    %c0_3 = arith.constant 0 : index
    %c0_4 = arith.constant 0 : index
    %c0_5 = arith.constant 0 : index
    %c0_6 = arith.constant 0 : index
    %3 = vector.load %arg3[%c0_3, %c0_4, %c0_5, %c0_6] : memref<1x4x64x128xbf16, #tpu.memory_space<vmem>>, vector<1x4x64x128xbf16>
    %4 = vector.shape_cast %3 : vector<1x4x64x128xbf16> to vector<4x64x128xbf16>
    %5 = arith.extf %4 : vector<4x64x128xbf16> to vector<4x64x128xf32>
    %c0_7 = arith.constant 0 : index
    %c0_8 = arith.constant 0 : index
    %c0_9 = arith.constant 0 : index
    %6 = vector.load %arg4[%c0_7, %c0_8, %c0_9] : memref<1x64x256xbf16, #tpu.memory_space<vmem>>, vector<1x64x256xbf16>
    %7 = vector.shape_cast %6 : vector<1x64x256xbf16> to vector<64x256xbf16>
    %8 = arith.extf %7 : vector<64x256xbf16> to vector<64x256xf32>
    %9 = vector.extract_strided_slice %8 {offsets = [0, 0], sizes = [64, 128], strides = [1, 1]} : vector<64x256xf32> to vector<64x128xf32>
    %10 = vector.extract_strided_slice %8 {offsets = [0, 128], sizes = [64, 128], strides = [1, 1]} : vector<64x256xf32> to vector<64x128xf32>
    %11 = arith.subf %10, %9 : vector<64x128xf32>
    %12 = math.exp %11 : vector<64x128xf32>
    %cst = arith.constant 1.000000e+00 : f32
    %13 = vector.broadcast %cst : f32 to vector<64x128xf32>
    %14 = arith.addf %13, %12 : vector<64x128xf32>
    %cst_10 = arith.constant 1.000000e+00 : f32
    %15 = vector.broadcast %cst_10 : f32 to vector<64x128xf32>
    %16 = arith.divf %15, %14 : vector<64x128xf32>
    %cst_11 = arith.constant 0.000000e+00 : f32
    %17 = vector.broadcast %cst_11 : f32 to vector<1x64x128xf32>
    %c0_12 = arith.constant 0 : index
    %c0_13 = arith.constant 0 : index
    %c0_14 = arith.constant 0 : index
    %18 = vector.load %arg7[%c0_12, %c0_13, %c0_14] : memref<6x64x128xf32, #tpu.memory_space<vmem>>, vector<1x64x128xf32>
    tpu.vector_store %arg7[%c0_12, %c0_13, %c0_14], %17 {strides = array<i32>} : memref<6x64x128xf32, #tpu.memory_space<vmem>>, vector<1x64x128xf32>,
    %c5 = arith.constant 5 : index
    %c0_15 = arith.constant 0 : index
    %c0_16 = arith.constant 0 : index
    %19 = vector.load %arg7[%c5, %c0_15, %c0_16] : memref<6x64x128xf32, #tpu.memory_space<vmem>>, vector<1x64x128xf32>
    tpu.vector_store %arg7[%c5, %c0_15, %c0_16], %17 {strides = array<i32>} : memref<6x64x128xf32, #tpu.memory_space<vmem>>, vector<1x64x128xf32>,
    %20 = vector.shape_cast %16 : vector<64x128xf32> to vector<1x64x128xf32>
    %21 = arith.subf %2, %5 : vector<4x64x128xf32>
    %22 = vector.broadcast %20 : vector<1x64x128xf32> to vector<4x64x128xf32>
    %23 = arith.mulf %22, %21 : vector<4x64x128xf32>
    %24 = arith.addf %5, %23 : vector<4x64x128xf32>
    %c1 = arith.constant 1 : index
    %c0_17 = arith.constant 0 : index
    %c0_18 = arith.constant 0 : index
    %25 = vector.load %arg7[%c1, %c0_17, %c0_18] : memref<6x64x128xf32, #tpu.memory_space<vmem>>, vector<4x64x128xf32>
    tpu.vector_store %arg7[%c1, %c0_17, %c0_18], %24 {strides = array<i32>} : memref<6x64x128xf32, #tpu.memory_space<vmem>>, vector<4x64x128xf32>,
    %c0_19 = arith.constant 0 : index
    %c0_20 = arith.constant 0 : index
    %26 = vector.load %arg5[%c0_19, %c0_20] : memref<3x128xf32, #tpu.memory_space<vmem>>, vector<3x128xf32>
    %27 = vector.extract_strided_slice %26 {offsets = [0, 0], sizes = [1, 128], strides = [1, 1]} : vector<3x128xf32> to vector<1x128xf32>
    %28 = vector.shape_cast %27 : vector<1x128xf32> to vector<128xf32>
    %29 = vector.shape_cast %28 : vector<128xf32> to vector<1x1x128xf32>
    %c0_21 = arith.constant 0 : index
    %c0_22 = arith.constant 0 : index
    %c0_23 = arith.constant 0 : index
    %30 = vector.load %arg7[%c0_21, %c0_22, %c0_23] : memref<6x64x128xf32, #tpu.memory_space<vmem>>, vector<4x64x128xf32>
    %31 = vector.broadcast %29 : vector<1x1x128xf32> to vector<4x64x128xf32>
    %32 = arith.mulf %31, %30 : vector<4x64x128xf32>
    %33 = vector.extract_strided_slice %26 {offsets = [1, 0], sizes = [1, 128], strides = [1, 1]} : vector<3x128xf32> to vector<1x128xf32>
    %34 = vector.shape_cast %33 : vector<1x128xf32> to vector<128xf32>
    %35 = vector.shape_cast %34 : vector<128xf32> to vector<1x1x128xf32>
    %c1_24 = arith.constant 1 : index
    %c0_25 = arith.constant 0 : index
    %c0_26 = arith.constant 0 : index
    %36 = vector.load %arg7[%c1_24, %c0_25, %c0_26] : memref<6x64x128xf32, #tpu.memory_space<vmem>>, vector<4x64x128xf32>
    %37 = vector.broadcast %35 : vector<1x1x128xf32> to vector<4x64x128xf32>
    %38 = arith.mulf %37, %36 : vector<4x64x128xf32>
    %39 = arith.addf %32, %38 : vector<4x64x128xf32>
    %40 = vector.extract_strided_slice %26 {offsets = [2, 0], sizes = [1, 128], strides = [1, 1]} : vector<3x128xf32> to vector<1x128xf32>
    %41 = vector.shape_cast %40 : vector<1x128xf32> to vector<128xf32>
    %42 = vector.shape_cast %41 : vector<128xf32> to vector<1x1x128xf32>
    %c2 = arith.constant 2 : index
    %c0_27 = arith.constant 0 : index
    %c0_28 = arith.constant 0 : index
    %43 = vector.load %arg7[%c2, %c0_27, %c0_28] : memref<6x64x128xf32, #tpu.memory_space<vmem>>, vector<4x64x128xf32>
    %44 = vector.broadcast %42 : vector<1x1x128xf32> to vector<4x64x128xf32>
    %45 = arith.mulf %44, %43 : vector<4x64x128xf32>
    %46 = arith.addf %39, %45 : vector<4x64x128xf32>
    %47 = arith.truncf %46 : vector<4x64x128xf32> to vector<4x64x128xbf16>
    %c0_29 = arith.constant 0 : index
    %c0_30 = arith.constant 0 : index
    %c0_31 = arith.constant 0 : index
    %c0_32 = arith.constant 0 : index
    %48 = vector.load %arg6[%c0_29, %c0_30, %c0_31, %c0_32] : memref<1x4x64x128xbf16, #tpu.memory_space<vmem>>, vector<1x4x64x128xbf16>
    %49 = vector.shape_cast %48 : vector<1x4x64x128xbf16> to vector<4x64x128xbf16>
    %50 = vector.shape_cast %47 : vector<4x64x128xbf16> to vector<1x4x64x128xbf16>
    tpu.vector_store %arg6[%c0_29, %c0_30, %c0_31, %c0_32], %50 {strides = array<i32>} : memref<1x4x64x128xbf16, #tpu.memory_space<vmem>>, vector<1x4x64x128xbf16>,
    return
  }
  func.func @transform_0(%arg0: i32, %arg1: i32) -> (i32, i32, i32, i32) {
    %c0_i32 = arith.constant 0 : i32
    %c0_i32_0 = arith.constant 0 : i32
    %c0_i32_1 = arith.constant 0 : i32
    return %arg0, %c0_i32, %arg1, %c0_i32_0 : i32, i32, i32, i32
  }
  func.func @transform_1(%arg0: i32, %arg1: i32) -> (i32, i32, i32, i32) {
    %c0_i32 = arith.constant 0 : i32
    %c0_i32_0 = arith.constant 0 : i32
    %c0_i32_1 = arith.constant 0 : i32
    return %arg0, %c0_i32, %arg1, %c0_i32_0 : i32, i32, i32, i32
  }
  func.func @transform_2(%arg0: i32, %arg1: i32) -> (i32, i32, i32) {
    %c0_i32 = arith.constant 0 : i32
    %c0_i32_0 = arith.constant 0 : i32
    return %arg0, %arg1, %c0_i32 : i32, i32, i32
  }
  func.func @transform_3(%arg0: i32, %arg1: i32) -> (i32, i32) {
    %c0_i32 = arith.constant 0 : i32
    %c0_i32_0 = arith.constant 0 : i32
    %c0_i32_1 = arith.constant 0 : i32
    return %c0_i32, %c0_i32_0 : i32, i32
  }
  func.func @transform_4(%arg0: i32, %arg1: i32) -> (i32, i32, i32, i32) {
    %c0_i32 = arith.constant 0 : i32
    %c0_i32_0 = arith.constant 0 : i32
    %c0_i32_1 = arith.constant 0 : i32
    return %arg0, %c0_i32, %arg1, %c0_i32_0 : i32, i32, i32, i32
  }
}

module attributes {stable_mosaic.version = 11 : i64} {
  func.func @_conv3x3_kernel(%arg0: i32, %arg1: i32, %arg2: memref<1x10x10x128xbf16, #tpu.memory_space<vmem>>, %arg3: memref<9x128x256xbf16, #tpu.memory_space<vmem>>, %arg4: memref<1x256xf32, #tpu.memory_space<vmem>>, %arg5: memref<1x64x256xbf16, #tpu.memory_space<vmem>>) attributes {dimension_semantics = [#tpu.dimension_semantics<parallel>, #tpu.dimension_semantics<parallel>], iteration_bounds = array<i64: 2, 1>, scalar_prefetch = 0 : i64, scratch_operands = 0 : i64, tpu.core_type = #tpu.core_type<tc>, window_params = [{transform_indices = @transform_0, window_bounds = array<i64: 1, 10, 10, 128>}, {transform_indices = @transform_1, window_bounds = array<i64: 9, 128, 256>}, {transform_indices = @transform_2, window_bounds = array<i64: 1, 256>}, {transform_indices = @transform_3, window_bounds = array<i64: 1, 64, 256>}]} {
    %c0 = arith.constant 0 : index
    %c0_0 = arith.constant 0 : index
    %c0_1 = arith.constant 0 : index
    %c0_2 = arith.constant 0 : index
    %0 = vector.load %arg2[%c0, %c0_0, %c0_1, %c0_2] : memref<1x10x10x128xbf16, #tpu.memory_space<vmem>>, vector<1x10x10x128xbf16>
    %1 = vector.shape_cast %0 : vector<1x10x10x128xbf16> to vector<10x10x128xbf16>
    %cst = arith.constant 0.000000e+00 : f32
    %2 = vector.broadcast %cst : f32 to vector<64x256xf32>
    %3 = vector.extract_strided_slice %1 {offsets = [0, 0, 0], sizes = [8, 8, 128], strides = [1, 1, 1]} : vector<10x10x128xbf16> to vector<8x8x128xbf16>
    %4 = vector.shape_cast %3 : vector<8x8x128xbf16> to vector<64x128xbf16>
    %c0_3 = arith.constant 0 : index
    %c0_4 = arith.constant 0 : index
    %c0_5 = arith.constant 0 : index
    %5 = vector.load %arg3[%c0_3, %c0_4, %c0_5] : memref<9x128x256xbf16, #tpu.memory_space<vmem>>, vector<1x128x256xbf16>
    %6 = vector.shape_cast %5 : vector<1x128x256xbf16> to vector<128x256xbf16>
    %cst_6 = arith.constant dense<0.000000e+00> : vector<64x256xf32>
    %7 = tpu.matmul %4, %6, %cst_6 {dimension_numbers = #tpu.dot_dimension_numbers<[1], [0], [0], [1], [0, 0, 1, 1], [], []>} : vector<64x128xbf16>, vector<128x256xbf16>, vector<64x256xf32> -> vector<64x256xf32>
    %8 = arith.addf %2, %7 : vector<64x256xf32>
    %9 = vector.extract_strided_slice %1 {offsets = [0, 1, 0], sizes = [8, 8, 128], strides = [1, 1, 1]} : vector<10x10x128xbf16> to vector<8x8x128xbf16>
    %10 = vector.shape_cast %9 : vector<8x8x128xbf16> to vector<64x128xbf16>
    %c1 = arith.constant 1 : index
    %c0_7 = arith.constant 0 : index
    %c0_8 = arith.constant 0 : index
    %11 = vector.load %arg3[%c1, %c0_7, %c0_8] : memref<9x128x256xbf16, #tpu.memory_space<vmem>>, vector<1x128x256xbf16>
    %12 = vector.shape_cast %11 : vector<1x128x256xbf16> to vector<128x256xbf16>
    %cst_9 = arith.constant dense<0.000000e+00> : vector<64x256xf32>
    %13 = tpu.matmul %10, %12, %cst_9 {dimension_numbers = #tpu.dot_dimension_numbers<[1], [0], [0], [1], [0, 0, 1, 1], [], []>} : vector<64x128xbf16>, vector<128x256xbf16>, vector<64x256xf32> -> vector<64x256xf32>
    %14 = arith.addf %8, %13 : vector<64x256xf32>
    %15 = vector.extract_strided_slice %1 {offsets = [0, 2, 0], sizes = [8, 8, 128], strides = [1, 1, 1]} : vector<10x10x128xbf16> to vector<8x8x128xbf16>
    %16 = vector.shape_cast %15 : vector<8x8x128xbf16> to vector<64x128xbf16>
    %c2 = arith.constant 2 : index
    %c0_10 = arith.constant 0 : index
    %c0_11 = arith.constant 0 : index
    %17 = vector.load %arg3[%c2, %c0_10, %c0_11] : memref<9x128x256xbf16, #tpu.memory_space<vmem>>, vector<1x128x256xbf16>
    %18 = vector.shape_cast %17 : vector<1x128x256xbf16> to vector<128x256xbf16>
    %cst_12 = arith.constant dense<0.000000e+00> : vector<64x256xf32>
    %19 = tpu.matmul %16, %18, %cst_12 {dimension_numbers = #tpu.dot_dimension_numbers<[1], [0], [0], [1], [0, 0, 1, 1], [], []>} : vector<64x128xbf16>, vector<128x256xbf16>, vector<64x256xf32> -> vector<64x256xf32>
    %20 = arith.addf %14, %19 : vector<64x256xf32>
    %21 = vector.extract_strided_slice %1 {offsets = [1, 0, 0], sizes = [8, 8, 128], strides = [1, 1, 1]} : vector<10x10x128xbf16> to vector<8x8x128xbf16>
    %22 = vector.shape_cast %21 : vector<8x8x128xbf16> to vector<64x128xbf16>
    %c3 = arith.constant 3 : index
    %c0_13 = arith.constant 0 : index
    %c0_14 = arith.constant 0 : index
    %23 = vector.load %arg3[%c3, %c0_13, %c0_14] : memref<9x128x256xbf16, #tpu.memory_space<vmem>>, vector<1x128x256xbf16>
    %24 = vector.shape_cast %23 : vector<1x128x256xbf16> to vector<128x256xbf16>
    %cst_15 = arith.constant dense<0.000000e+00> : vector<64x256xf32>
    %25 = tpu.matmul %22, %24, %cst_15 {dimension_numbers = #tpu.dot_dimension_numbers<[1], [0], [0], [1], [0, 0, 1, 1], [], []>} : vector<64x128xbf16>, vector<128x256xbf16>, vector<64x256xf32> -> vector<64x256xf32>
    %26 = arith.addf %20, %25 : vector<64x256xf32>
    %27 = vector.extract_strided_slice %1 {offsets = [1, 1, 0], sizes = [8, 8, 128], strides = [1, 1, 1]} : vector<10x10x128xbf16> to vector<8x8x128xbf16>
    %28 = vector.shape_cast %27 : vector<8x8x128xbf16> to vector<64x128xbf16>
    %c4 = arith.constant 4 : index
    %c0_16 = arith.constant 0 : index
    %c0_17 = arith.constant 0 : index
    %29 = vector.load %arg3[%c4, %c0_16, %c0_17] : memref<9x128x256xbf16, #tpu.memory_space<vmem>>, vector<1x128x256xbf16>
    %30 = vector.shape_cast %29 : vector<1x128x256xbf16> to vector<128x256xbf16>
    %cst_18 = arith.constant dense<0.000000e+00> : vector<64x256xf32>
    %31 = tpu.matmul %28, %30, %cst_18 {dimension_numbers = #tpu.dot_dimension_numbers<[1], [0], [0], [1], [0, 0, 1, 1], [], []>} : vector<64x128xbf16>, vector<128x256xbf16>, vector<64x256xf32> -> vector<64x256xf32>
    %32 = arith.addf %26, %31 : vector<64x256xf32>
    %33 = vector.extract_strided_slice %1 {offsets = [1, 2, 0], sizes = [8, 8, 128], strides = [1, 1, 1]} : vector<10x10x128xbf16> to vector<8x8x128xbf16>
    %34 = vector.shape_cast %33 : vector<8x8x128xbf16> to vector<64x128xbf16>
    %c5 = arith.constant 5 : index
    %c0_19 = arith.constant 0 : index
    %c0_20 = arith.constant 0 : index
    %35 = vector.load %arg3[%c5, %c0_19, %c0_20] : memref<9x128x256xbf16, #tpu.memory_space<vmem>>, vector<1x128x256xbf16>
    %36 = vector.shape_cast %35 : vector<1x128x256xbf16> to vector<128x256xbf16>
    %cst_21 = arith.constant dense<0.000000e+00> : vector<64x256xf32>
    %37 = tpu.matmul %34, %36, %cst_21 {dimension_numbers = #tpu.dot_dimension_numbers<[1], [0], [0], [1], [0, 0, 1, 1], [], []>} : vector<64x128xbf16>, vector<128x256xbf16>, vector<64x256xf32> -> vector<64x256xf32>
    %38 = arith.addf %32, %37 : vector<64x256xf32>
    %39 = vector.extract_strided_slice %1 {offsets = [2, 0, 0], sizes = [8, 8, 128], strides = [1, 1, 1]} : vector<10x10x128xbf16> to vector<8x8x128xbf16>
    %40 = vector.shape_cast %39 : vector<8x8x128xbf16> to vector<64x128xbf16>
    %c6 = arith.constant 6 : index
    %c0_22 = arith.constant 0 : index
    %c0_23 = arith.constant 0 : index
    %41 = vector.load %arg3[%c6, %c0_22, %c0_23] : memref<9x128x256xbf16, #tpu.memory_space<vmem>>, vector<1x128x256xbf16>
    %42 = vector.shape_cast %41 : vector<1x128x256xbf16> to vector<128x256xbf16>
    %cst_24 = arith.constant dense<0.000000e+00> : vector<64x256xf32>
    %43 = tpu.matmul %40, %42, %cst_24 {dimension_numbers = #tpu.dot_dimension_numbers<[1], [0], [0], [1], [0, 0, 1, 1], [], []>} : vector<64x128xbf16>, vector<128x256xbf16>, vector<64x256xf32> -> vector<64x256xf32>
    %44 = arith.addf %38, %43 : vector<64x256xf32>
    %45 = vector.extract_strided_slice %1 {offsets = [2, 1, 0], sizes = [8, 8, 128], strides = [1, 1, 1]} : vector<10x10x128xbf16> to vector<8x8x128xbf16>
    %46 = vector.shape_cast %45 : vector<8x8x128xbf16> to vector<64x128xbf16>
    %c7 = arith.constant 7 : index
    %c0_25 = arith.constant 0 : index
    %c0_26 = arith.constant 0 : index
    %47 = vector.load %arg3[%c7, %c0_25, %c0_26] : memref<9x128x256xbf16, #tpu.memory_space<vmem>>, vector<1x128x256xbf16>
    %48 = vector.shape_cast %47 : vector<1x128x256xbf16> to vector<128x256xbf16>
    %cst_27 = arith.constant dense<0.000000e+00> : vector<64x256xf32>
    %49 = tpu.matmul %46, %48, %cst_27 {dimension_numbers = #tpu.dot_dimension_numbers<[1], [0], [0], [1], [0, 0, 1, 1], [], []>} : vector<64x128xbf16>, vector<128x256xbf16>, vector<64x256xf32> -> vector<64x256xf32>
    %50 = arith.addf %44, %49 : vector<64x256xf32>
    %51 = vector.extract_strided_slice %1 {offsets = [2, 2, 0], sizes = [8, 8, 128], strides = [1, 1, 1]} : vector<10x10x128xbf16> to vector<8x8x128xbf16>
    %52 = vector.shape_cast %51 : vector<8x8x128xbf16> to vector<64x128xbf16>
    %c8 = arith.constant 8 : index
    %c0_28 = arith.constant 0 : index
    %c0_29 = arith.constant 0 : index
    %53 = vector.load %arg3[%c8, %c0_28, %c0_29] : memref<9x128x256xbf16, #tpu.memory_space<vmem>>, vector<1x128x256xbf16>
    %54 = vector.shape_cast %53 : vector<1x128x256xbf16> to vector<128x256xbf16>
    %cst_30 = arith.constant dense<0.000000e+00> : vector<64x256xf32>
    %55 = tpu.matmul %52, %54, %cst_30 {dimension_numbers = #tpu.dot_dimension_numbers<[1], [0], [0], [1], [0, 0, 1, 1], [], []>} : vector<64x128xbf16>, vector<128x256xbf16>, vector<64x256xf32> -> vector<64x256xf32>
    %56 = arith.addf %50, %55 : vector<64x256xf32>
    %c0_31 = arith.constant 0 : index
    %c0_32 = arith.constant 0 : index
    %57 = vector.load %arg4[%c0_31, %c0_32] : memref<1x256xf32, #tpu.memory_space<vmem>>, vector<1x256xf32>
    %58 = vector.broadcast %57 : vector<1x256xf32> to vector<64x256xf32>
    %59 = arith.addf %56, %58 : vector<64x256xf32>
    %60 = arith.truncf %59 : vector<64x256xf32> to vector<64x256xbf16>
    %c0_33 = arith.constant 0 : index
    %c0_34 = arith.constant 0 : index
    %c0_35 = arith.constant 0 : index
    %61 = vector.load %arg5[%c0_33, %c0_34, %c0_35] : memref<1x64x256xbf16, #tpu.memory_space<vmem>>, vector<1x64x256xbf16>
    %62 = vector.shape_cast %61 : vector<1x64x256xbf16> to vector<64x256xbf16>
    %63 = vector.shape_cast %60 : vector<64x256xbf16> to vector<1x64x256xbf16>
    tpu.vector_store %arg5[%c0_33, %c0_34, %c0_35], %63 {strides = array<i32>} : memref<1x64x256xbf16, #tpu.memory_space<vmem>>, vector<1x64x256xbf16>,
    return
  }
  func.func @transform_0(%arg0: i32, %arg1: i32) -> (i32, i32, i32, i32) {
    %c0_i32 = arith.constant 0 : i32
    %c0_i32_0 = arith.constant 0 : i32
    %c0_i32_1 = arith.constant 0 : i32
    %c0_i32_2 = arith.constant 0 : i32
    return %arg0, %c0_i32, %c0_i32_0, %c0_i32_1 : i32, i32, i32, i32
  }
  func.func @transform_1(%arg0: i32, %arg1: i32) -> (i32, i32, i32) {
    %c0_i32 = arith.constant 0 : i32
    %c0_i32_0 = arith.constant 0 : i32
    %c0_i32_1 = arith.constant 0 : i32
    return %c0_i32, %c0_i32_0, %arg1 : i32, i32, i32
  }
  func.func @transform_2(%arg0: i32, %arg1: i32) -> (i32, i32) {
    %c0_i32 = arith.constant 0 : i32
    %c0_i32_0 = arith.constant 0 : i32
    return %c0_i32, %arg1 : i32, i32
  }
  func.func @transform_3(%arg0: i32, %arg1: i32) -> (i32, i32, i32) {
    %c0_i32 = arith.constant 0 : i32
    %c0_i32_0 = arith.constant 0 : i32
    return %arg0, %c0_i32, %arg1 : i32, i32, i32
  }
}

module attributes {stable_mosaic.version = 11 : i64} {
  func.func @_conv3x3_kernel(%arg0: i32, %arg1: i32, %arg2: memref<1x10x10x128xbf16, #tpu.memory_space<vmem>>, %arg3: memref<9x128x128xbf16, #tpu.memory_space<vmem>>, %arg4: memref<1x128xf32, #tpu.memory_space<vmem>>, %arg5: memref<1x64x128xbf16, #tpu.memory_space<vmem>>) attributes {dimension_semantics = [#tpu.dimension_semantics<parallel>, #tpu.dimension_semantics<parallel>], iteration_bounds = array<i64: 8, 1>, scalar_prefetch = 0 : i64, scratch_operands = 0 : i64, tpu.core_type = #tpu.core_type<tc>, window_params = [{transform_indices = @transform_0, window_bounds = array<i64: 1, 10, 10, 128>}, {transform_indices = @transform_1, window_bounds = array<i64: 9, 128, 128>}, {transform_indices = @transform_2, window_bounds = array<i64: 1, 128>}, {transform_indices = @transform_3, window_bounds = array<i64: 1, 64, 128>}]} {
    %c0 = arith.constant 0 : index
    %c0_0 = arith.constant 0 : index
    %c0_1 = arith.constant 0 : index
    %c0_2 = arith.constant 0 : index
    %0 = vector.load %arg2[%c0, %c0_0, %c0_1, %c0_2] : memref<1x10x10x128xbf16, #tpu.memory_space<vmem>>, vector<1x10x10x128xbf16>
    %1 = vector.shape_cast %0 : vector<1x10x10x128xbf16> to vector<10x10x128xbf16>
    %cst = arith.constant 0.000000e+00 : f32
    %2 = vector.broadcast %cst : f32 to vector<64x128xf32>
    %3 = vector.extract_strided_slice %1 {offsets = [0, 0, 0], sizes = [8, 8, 128], strides = [1, 1, 1]} : vector<10x10x128xbf16> to vector<8x8x128xbf16>
    %4 = vector.shape_cast %3 : vector<8x8x128xbf16> to vector<64x128xbf16>
    %c0_3 = arith.constant 0 : index
    %c0_4 = arith.constant 0 : index
    %c0_5 = arith.constant 0 : index
    %5 = vector.load %arg3[%c0_3, %c0_4, %c0_5] : memref<9x128x128xbf16, #tpu.memory_space<vmem>>, vector<1x128x128xbf16>
    %6 = vector.shape_cast %5 : vector<1x128x128xbf16> to vector<128x128xbf16>
    %cst_6 = arith.constant dense<0.000000e+00> : vector<64x128xf32>
    %7 = tpu.matmul %4, %6, %cst_6 {dimension_numbers = #tpu.dot_dimension_numbers<[1], [0], [0], [1], [0, 0, 1, 1], [], []>} : vector<64x128xbf16>, vector<128x128xbf16>, vector<64x128xf32> -> vector<64x128xf32>
    %8 = arith.addf %2, %7 : vector<64x128xf32>
    %9 = vector.extract_strided_slice %1 {offsets = [0, 1, 0], sizes = [8, 8, 128], strides = [1, 1, 1]} : vector<10x10x128xbf16> to vector<8x8x128xbf16>
    %10 = vector.shape_cast %9 : vector<8x8x128xbf16> to vector<64x128xbf16>
    %c1 = arith.constant 1 : index
    %c0_7 = arith.constant 0 : index
    %c0_8 = arith.constant 0 : index
    %11 = vector.load %arg3[%c1, %c0_7, %c0_8] : memref<9x128x128xbf16, #tpu.memory_space<vmem>>, vector<1x128x128xbf16>
    %12 = vector.shape_cast %11 : vector<1x128x128xbf16> to vector<128x128xbf16>
    %cst_9 = arith.constant dense<0.000000e+00> : vector<64x128xf32>
    %13 = tpu.matmul %10, %12, %cst_9 {dimension_numbers = #tpu.dot_dimension_numbers<[1], [0], [0], [1], [0, 0, 1, 1], [], []>} : vector<64x128xbf16>, vector<128x128xbf16>, vector<64x128xf32> -> vector<64x128xf32>
    %14 = arith.addf %8, %13 : vector<64x128xf32>
    %15 = vector.extract_strided_slice %1 {offsets = [0, 2, 0], sizes = [8, 8, 128], strides = [1, 1, 1]} : vector<10x10x128xbf16> to vector<8x8x128xbf16>
    %16 = vector.shape_cast %15 : vector<8x8x128xbf16> to vector<64x128xbf16>
    %c2 = arith.constant 2 : index
    %c0_10 = arith.constant 0 : index
    %c0_11 = arith.constant 0 : index
    %17 = vector.load %arg3[%c2, %c0_10, %c0_11] : memref<9x128x128xbf16, #tpu.memory_space<vmem>>, vector<1x128x128xbf16>
    %18 = vector.shape_cast %17 : vector<1x128x128xbf16> to vector<128x128xbf16>
    %cst_12 = arith.constant dense<0.000000e+00> : vector<64x128xf32>
    %19 = tpu.matmul %16, %18, %cst_12 {dimension_numbers = #tpu.dot_dimension_numbers<[1], [0], [0], [1], [0, 0, 1, 1], [], []>} : vector<64x128xbf16>, vector<128x128xbf16>, vector<64x128xf32> -> vector<64x128xf32>
    %20 = arith.addf %14, %19 : vector<64x128xf32>
    %21 = vector.extract_strided_slice %1 {offsets = [1, 0, 0], sizes = [8, 8, 128], strides = [1, 1, 1]} : vector<10x10x128xbf16> to vector<8x8x128xbf16>
    %22 = vector.shape_cast %21 : vector<8x8x128xbf16> to vector<64x128xbf16>
    %c3 = arith.constant 3 : index
    %c0_13 = arith.constant 0 : index
    %c0_14 = arith.constant 0 : index
    %23 = vector.load %arg3[%c3, %c0_13, %c0_14] : memref<9x128x128xbf16, #tpu.memory_space<vmem>>, vector<1x128x128xbf16>
    %24 = vector.shape_cast %23 : vector<1x128x128xbf16> to vector<128x128xbf16>
    %cst_15 = arith.constant dense<0.000000e+00> : vector<64x128xf32>
    %25 = tpu.matmul %22, %24, %cst_15 {dimension_numbers = #tpu.dot_dimension_numbers<[1], [0], [0], [1], [0, 0, 1, 1], [], []>} : vector<64x128xbf16>, vector<128x128xbf16>, vector<64x128xf32> -> vector<64x128xf32>
    %26 = arith.addf %20, %25 : vector<64x128xf32>
    %27 = vector.extract_strided_slice %1 {offsets = [1, 1, 0], sizes = [8, 8, 128], strides = [1, 1, 1]} : vector<10x10x128xbf16> to vector<8x8x128xbf16>
    %28 = vector.shape_cast %27 : vector<8x8x128xbf16> to vector<64x128xbf16>
    %c4 = arith.constant 4 : index
    %c0_16 = arith.constant 0 : index
    %c0_17 = arith.constant 0 : index
    %29 = vector.load %arg3[%c4, %c0_16, %c0_17] : memref<9x128x128xbf16, #tpu.memory_space<vmem>>, vector<1x128x128xbf16>
    %30 = vector.shape_cast %29 : vector<1x128x128xbf16> to vector<128x128xbf16>
    %cst_18 = arith.constant dense<0.000000e+00> : vector<64x128xf32>
    %31 = tpu.matmul %28, %30, %cst_18 {dimension_numbers = #tpu.dot_dimension_numbers<[1], [0], [0], [1], [0, 0, 1, 1], [], []>} : vector<64x128xbf16>, vector<128x128xbf16>, vector<64x128xf32> -> vector<64x128xf32>
    %32 = arith.addf %26, %31 : vector<64x128xf32>
    %33 = vector.extract_strided_slice %1 {offsets = [1, 2, 0], sizes = [8, 8, 128], strides = [1, 1, 1]} : vector<10x10x128xbf16> to vector<8x8x128xbf16>
    %34 = vector.shape_cast %33 : vector<8x8x128xbf16> to vector<64x128xbf16>
    %c5 = arith.constant 5 : index
    %c0_19 = arith.constant 0 : index
    %c0_20 = arith.constant 0 : index
    %35 = vector.load %arg3[%c5, %c0_19, %c0_20] : memref<9x128x128xbf16, #tpu.memory_space<vmem>>, vector<1x128x128xbf16>
    %36 = vector.shape_cast %35 : vector<1x128x128xbf16> to vector<128x128xbf16>
    %cst_21 = arith.constant dense<0.000000e+00> : vector<64x128xf32>
    %37 = tpu.matmul %34, %36, %cst_21 {dimension_numbers = #tpu.dot_dimension_numbers<[1], [0], [0], [1], [0, 0, 1, 1], [], []>} : vector<64x128xbf16>, vector<128x128xbf16>, vector<64x128xf32> -> vector<64x128xf32>
    %38 = arith.addf %32, %37 : vector<64x128xf32>
    %39 = vector.extract_strided_slice %1 {offsets = [2, 0, 0], sizes = [8, 8, 128], strides = [1, 1, 1]} : vector<10x10x128xbf16> to vector<8x8x128xbf16>
    %40 = vector.shape_cast %39 : vector<8x8x128xbf16> to vector<64x128xbf16>
    %c6 = arith.constant 6 : index
    %c0_22 = arith.constant 0 : index
    %c0_23 = arith.constant 0 : index
    %41 = vector.load %arg3[%c6, %c0_22, %c0_23] : memref<9x128x128xbf16, #tpu.memory_space<vmem>>, vector<1x128x128xbf16>
    %42 = vector.shape_cast %41 : vector<1x128x128xbf16> to vector<128x128xbf16>
    %cst_24 = arith.constant dense<0.000000e+00> : vector<64x128xf32>
    %43 = tpu.matmul %40, %42, %cst_24 {dimension_numbers = #tpu.dot_dimension_numbers<[1], [0], [0], [1], [0, 0, 1, 1], [], []>} : vector<64x128xbf16>, vector<128x128xbf16>, vector<64x128xf32> -> vector<64x128xf32>
    %44 = arith.addf %38, %43 : vector<64x128xf32>
    %45 = vector.extract_strided_slice %1 {offsets = [2, 1, 0], sizes = [8, 8, 128], strides = [1, 1, 1]} : vector<10x10x128xbf16> to vector<8x8x128xbf16>
    %46 = vector.shape_cast %45 : vector<8x8x128xbf16> to vector<64x128xbf16>
    %c7 = arith.constant 7 : index
    %c0_25 = arith.constant 0 : index
    %c0_26 = arith.constant 0 : index
    %47 = vector.load %arg3[%c7, %c0_25, %c0_26] : memref<9x128x128xbf16, #tpu.memory_space<vmem>>, vector<1x128x128xbf16>
    %48 = vector.shape_cast %47 : vector<1x128x128xbf16> to vector<128x128xbf16>
    %cst_27 = arith.constant dense<0.000000e+00> : vector<64x128xf32>
    %49 = tpu.matmul %46, %48, %cst_27 {dimension_numbers = #tpu.dot_dimension_numbers<[1], [0], [0], [1], [0, 0, 1, 1], [], []>} : vector<64x128xbf16>, vector<128x128xbf16>, vector<64x128xf32> -> vector<64x128xf32>
    %50 = arith.addf %44, %49 : vector<64x128xf32>
    %51 = vector.extract_strided_slice %1 {offsets = [2, 2, 0], sizes = [8, 8, 128], strides = [1, 1, 1]} : vector<10x10x128xbf16> to vector<8x8x128xbf16>
    %52 = vector.shape_cast %51 : vector<8x8x128xbf16> to vector<64x128xbf16>
    %c8 = arith.constant 8 : index
    %c0_28 = arith.constant 0 : index
    %c0_29 = arith.constant 0 : index
    %53 = vector.load %arg3[%c8, %c0_28, %c0_29] : memref<9x128x128xbf16, #tpu.memory_space<vmem>>, vector<1x128x128xbf16>
    %54 = vector.shape_cast %53 : vector<1x128x128xbf16> to vector<128x128xbf16>
    %cst_30 = arith.constant dense<0.000000e+00> : vector<64x128xf32>
    %55 = tpu.matmul %52, %54, %cst_30 {dimension_numbers = #tpu.dot_dimension_numbers<[1], [0], [0], [1], [0, 0, 1, 1], [], []>} : vector<64x128xbf16>, vector<128x128xbf16>, vector<64x128xf32> -> vector<64x128xf32>
    %56 = arith.addf %50, %55 : vector<64x128xf32>
    %c0_31 = arith.constant 0 : index
    %c0_32 = arith.constant 0 : index
    %57 = vector.load %arg4[%c0_31, %c0_32] : memref<1x128xf32, #tpu.memory_space<vmem>>, vector<1x128xf32>
    %58 = vector.broadcast %57 : vector<1x128xf32> to vector<64x128xf32>
    %59 = arith.addf %56, %58 : vector<64x128xf32>
    %cst_33 = arith.constant 0.000000e+00 : f32
    %60 = vector.broadcast %cst_33 : f32 to vector<64x128xf32>
    %61 = arith.maximumf %59, %60 : vector<64x128xf32>
    %62 = arith.truncf %61 : vector<64x128xf32> to vector<64x128xbf16>
    %c0_34 = arith.constant 0 : index
    %c0_35 = arith.constant 0 : index
    %c0_36 = arith.constant 0 : index
    %63 = vector.load %arg5[%c0_34, %c0_35, %c0_36] : memref<1x64x128xbf16, #tpu.memory_space<vmem>>, vector<1x64x128xbf16>
    %64 = vector.shape_cast %63 : vector<1x64x128xbf16> to vector<64x128xbf16>
    %65 = vector.shape_cast %62 : vector<64x128xbf16> to vector<1x64x128xbf16>
    tpu.vector_store %arg5[%c0_34, %c0_35, %c0_36], %65 {strides = array<i32>} : memref<1x64x128xbf16, #tpu.memory_space<vmem>>, vector<1x64x128xbf16>,
    return
  }
  func.func @transform_0(%arg0: i32, %arg1: i32) -> (i32, i32, i32, i32) {
    %c0_i32 = arith.constant 0 : i32
    %c0_i32_0 = arith.constant 0 : i32
    %c0_i32_1 = arith.constant 0 : i32
    %c0_i32_2 = arith.constant 0 : i32
    return %arg0, %c0_i32, %c0_i32_0, %c0_i32_1 : i32, i32, i32, i32
  }
  func.func @transform_1(%arg0: i32, %arg1: i32) -> (i32, i32, i32) {
    %c0_i32 = arith.constant 0 : i32
    %c0_i32_0 = arith.constant 0 : i32
    %c0_i32_1 = arith.constant 0 : i32
    return %c0_i32, %c0_i32_0, %arg1 : i32, i32, i32
  }
  func.func @transform_2(%arg0: i32, %arg1: i32) -> (i32, i32) {
    %c0_i32 = arith.constant 0 : i32
    %c0_i32_0 = arith.constant 0 : i32
    return %c0_i32, %arg1 : i32, i32
  }
  func.func @transform_3(%arg0: i32, %arg1: i32) -> (i32, i32, i32) {
    %c0_i32 = arith.constant 0 : i32
    %c0_i32_0 = arith.constant 0 : i32
    return %arg0, %c0_i32, %arg1 : i32, i32, i32
  }
}

module attributes {stable_mosaic.version = 11 : i64} {
  func.func @_mm_kernel_res(%arg0: i32, %arg1: i32, %arg2: i32, %arg3: memref<256x128xbf16, #tpu.memory_space<vmem>>, %arg4: memref<128x256xbf16, #tpu.memory_space<vmem>>, %arg5: memref<1x256xf32, #tpu.memory_space<vmem>>, %arg6: memref<256x256xbf16, #tpu.memory_space<vmem>>, %arg7: memref<256x256xbf16, #tpu.memory_space<vmem>>, %arg8: memref<256x256xf32, #tpu.memory_space<vmem>>) attributes {dimension_semantics = [#tpu.dimension_semantics<parallel>, #tpu.dimension_semantics<parallel>, #tpu.dimension_semantics<arbitrary>], iteration_bounds = array<i64: 2, 1, 1>, scalar_prefetch = 0 : i64, scratch_operands = 1 : i64, tpu.core_type = #tpu.core_type<tc>, window_params = [{transform_indices = @transform_0, window_bounds = array<i64: 256, 128>}, {transform_indices = @transform_1, window_bounds = array<i64: 128, 256>}, {transform_indices = @transform_2, window_bounds = array<i64: 1, 256>}, {transform_indices = @transform_3, window_bounds = array<i64: 256, 256>}, {transform_indices = @transform_4, window_bounds = array<i64: 256, 256>}]} {
    %c0_i32 = arith.constant 0 : i32
    %0 = arith.cmpi eq, %arg2, %c0_i32 : i32
    %1 = arith.extui %0 : i1 to i32
    %c0_i32_0 = arith.constant 0 : i32
    %2 = arith.cmpi ne, %1, %c0_i32_0 : i32
    scf.if %2 {
      %cst_10 = arith.constant 0.000000e+00 : f32
      %12 = vector.broadcast %cst_10 : f32 to vector<256x256xf32>
      %c0_11 = arith.constant 0 : index
      %c0_12 = arith.constant 0 : index
      %13 = vector.load %arg8[%c0_11, %c0_12] : memref<256x256xf32, #tpu.memory_space<vmem>>, vector<256x256xf32>
      tpu.vector_store %arg8[%c0_11, %c0_12], %12 {strides = array<i32>} : memref<256x256xf32, #tpu.memory_space<vmem>>, vector<256x256xf32>,
    } else {
    }
    %c0 = arith.constant 0 : index
    %c0_1 = arith.constant 0 : index
    %3 = vector.load %arg8[%c0, %c0_1] : memref<256x256xf32, #tpu.memory_space<vmem>>, vector<256x256xf32>
    %c0_2 = arith.constant 0 : index
    %c0_3 = arith.constant 0 : index
    %4 = vector.load %arg3[%c0_2, %c0_3] : memref<256x128xbf16, #tpu.memory_space<vmem>>, vector<256x128xbf16>
    %c0_4 = arith.constant 0 : index
    %c0_5 = arith.constant 0 : index
    %5 = vector.load %arg4[%c0_4, %c0_5] : memref<128x256xbf16, #tpu.memory_space<vmem>>, vector<128x256xbf16>
    %cst = arith.constant dense<0.000000e+00> : vector<256x256xf32>
    %6 = tpu.matmul %4, %5, %cst {dimension_numbers = #tpu.dot_dimension_numbers<[1], [0], [0], [1], [0, 0, 1, 1], [], []>} : vector<256x128xbf16>, vector<128x256xbf16>, vector<256x256xf32> -> vector<256x256xf32>
    %7 = arith.addf %3, %6 : vector<256x256xf32>
    %c0_6 = arith.constant 0 : index
    %c0_7 = arith.constant 0 : index
    %8 = vector.load %arg8[%c0_6, %c0_7] : memref<256x256xf32, #tpu.memory_space<vmem>>, vector<256x256xf32>
    tpu.vector_store %arg8[%c0_6, %c0_7], %7 {strides = array<i32>} : memref<256x256xf32, #tpu.memory_space<vmem>>, vector<256x256xf32>,
    %c0_i32_8 = arith.constant 0 : i32
    %9 = arith.cmpi eq, %arg2, %c0_i32_8 : i32
    %10 = arith.extui %9 : i1 to i32
    %c0_i32_9 = arith.constant 0 : i32
    %11 = arith.cmpi ne, %10, %c0_i32_9 : i32
    scf.if %11 {
      %c0_10 = arith.constant 0 : index
      %c0_11 = arith.constant 0 : index
      %12 = vector.load %arg8[%c0_10, %c0_11] : memref<256x256xf32, #tpu.memory_space<vmem>>, vector<256x256xf32>
      %c0_12 = arith.constant 0 : index
      %c0_13 = arith.constant 0 : index
      %13 = vector.load %arg5[%c0_12, %c0_13] : memref<1x256xf32, #tpu.memory_space<vmem>>, vector<1x256xf32>
      %14 = vector.broadcast %13 : vector<1x256xf32> to vector<256x256xf32>
      %15 = arith.addf %12, %14 : vector<256x256xf32>
      %c0_14 = arith.constant 0 : index
      %c0_15 = arith.constant 0 : index
      %16 = vector.load %arg6[%c0_14, %c0_15] : memref<256x256xbf16, #tpu.memory_space<vmem>>, vector<256x256xbf16>
      %17 = arith.extf %16 : vector<256x256xbf16> to vector<256x256xf32>
      %18 = arith.addf %15, %17 : vector<256x256xf32>
      %cst_16 = arith.constant 0.000000e+00 : f32
      %19 = vector.broadcast %cst_16 : f32 to vector<256x256xf32>
      %20 = arith.maximumf %18, %19 : vector<256x256xf32>
      %21 = arith.truncf %20 : vector<256x256xf32> to vector<256x256xbf16>
      %c0_17 = arith.constant 0 : index
      %c0_18 = arith.constant 0 : index
      %22 = vector.load %arg7[%c0_17, %c0_18] : memref<256x256xbf16, #tpu.memory_space<vmem>>, vector<256x256xbf16>
      tpu.vector_store %arg7[%c0_17, %c0_18], %21 {strides = array<i32>} : memref<256x256xbf16, #tpu.memory_space<vmem>>, vector<256x256xbf16>,
    } else {
    }
    return
  }
  func.func @transform_0(%arg0: i32, %arg1: i32, %arg2: i32) -> (i32, i32) {
    %c0_i32 = arith.constant 0 : i32
    return %arg0, %arg2 : i32, i32
  }
  func.func @transform_1(%arg0: i32, %arg1: i32, %arg2: i32) -> (i32, i32) {
    %c0_i32 = arith.constant 0 : i32
    return %arg2, %arg1 : i32, i32
  }
  func.func @transform_2(%arg0: i32, %arg1: i32, %arg2: i32) -> (i32, i32) {
    %c0_i32 = arith.constant 0 : i32
    %c0_i32_0 = arith.constant 0 : i32
    return %c0_i32, %arg1 : i32, i32
  }
  func.func @transform_3(%arg0: i32, %arg1: i32, %arg2: i32) -> (i32, i32) {
    %c0_i32 = arith.constant 0 : i32
    return %arg0, %arg1 : i32, i32
  }
  func.func @transform_4(%arg0: i32, %arg1: i32, %arg2: i32) -> (i32, i32) {
    %c0_i32 = arith.constant 0 : i32
    return %arg0, %arg1 : i32, i32
  }
}

</mosaic_0001>

<bundles_post_ra>
// kernel: _lambda_.8
= control target key start
LH: loop header
LB: loop body
LE: loop exit
PB: predicated region body
PF: predicated region fallthrough
CT: control target
= control target key end

     0   :  { %s1760_s18 = smov 0   ;;  %s1762_s19 = smov 0   ;;  %s2053_s0 = inlined_call_operand.vmem [shape: bf16[2,4,64,128], index: 0, kind: input, shape index: {}]   ;;  %s2054_s1 = inlined_call_operand.vmem [shape: bf16[2,4,64,128], index: 1, kind: input, shape index: {}]   ;;  %s2055_s2 = inlined_call_operand.vmem [shape: bf16[128,128], index: 2, kind: input, shape index: {}]   ;;  %s2056_s3 = inlined_call_operand.vmem [shape: f32[1,128], index: 3, kind: input, shape index: {}]   ;;  %s2057_s4 = inlined_call_operand.vmem [shape: bf16[2,4,64,128], index: 4, kind: output, shape index: {0}]   ;;  %s2058_s5 = inlined_call_operand.vmem [shape: bf16[2,64,128], index: 5, kind: output, shape index: {1}]  }
   0x1   :  { %s1764_s20 = smov 0  }
   0x2 LB: > { %s28_s21 = sadd.s32 1, %s1724_s19  ;;  %p1245_p0 = scmp.ge.s32.totalorder %s1728_s20, 1  ;;  %s1728_s20 = sphi %s1764_s20, %s16_s20   ;;  %s1724_s19 = sphi %s1762_s19, %s2060_s19   ;;  %s1720_s18 = sphi %s1760_s18, %s2059_s18  }
   0x3   : > { %p30_p1 = scmp.ge.s32.totalorder %s28_s21, 2  ;;  %p230_p2 = scmp.lt.s32.totalorder %s1728_s20, 3 }
   0x5   : > { %s2062_s21 = smov (%p30_p1, %s28_s21), 0  ;;  %p231_p3 = pnand %p1245_p0, %p230_p2 }
   0x6   : > { %v1682_v0 = vld [vmem:[%s2055_s2] sm:$0xff] (!%p231_p3)   ;;  %p285_p4 = scmp.lt.s32.totalorder (!%p231_p3), %s1720_s18, 1  ;;  %v1683_v1 = vld [vmem:[%s2055_s2 + $0x8] sm:$0xff] (!%p231_p3)   ;;  %v1684_v2 = vld [vmem:[%s2055_s2 + $0x10] sm:$0xff] (!%p231_p3)  }
   0x7   : > { %234 = sbr.rel (%p231_p3) target bundleno = 315 (0x13b), region = 36  ;;  %1594 = vmatprep.subr.bf16.mxu0 (!%p231_p3), %v1682_v0  ;;  %1642 = vmatprep.subr.bf16.mxu1 (!%p231_p3), %v1682_v0  ;;  %v1685_v3 = vld [vmem:[%s2055_s2 + $0x18] sm:$0xff] (!%p231_p3)   ;;  %v1686_v6 = vld [vmem:[%s2055_s2 + $0x20] sm:$0xff] (!%p231_p3)   ;;  %v1687_v7 = vld [vmem:[%s2055_s2 + $0x28] sm:$0xff] (!%p231_p3)  }
   0x8   : > { %1595 = vmatpush3.bf16.msra.mxu0 (!%p231_p3), %v1682_v0  ;;  %1650 = vmatpush3.bf16.msra.mxu1 (!%p231_p3), %v1682_v0  ;;  %v1688_v8 = vld [vmem:[%s2055_s2 + $0x30] sm:$0xff] (!%p231_p3)   ;;  %v1689_v9 = vld [vmem:[%s2055_s2 + $0x38] sm:$0xff] (!%p231_p3)  }
   0x9   : > { %1596 = vmatprep.subr.bf16.mxu0 (!%p231_p3), %v1683_v1  ;;  %1643 = vmatprep.subr.bf16.mxu1 (!%p231_p3), %v1683_v1 }
   0xc   : > { %1597 = vmatpush3.bf16.msra.mxu0 (!%p231_p3), %v1683_v1  ;;  %1651 = vmatpush3.bf16.msra.mxu1 (!%p231_p3), %v1683_v1 }
   0xd   : > { %1598 = vmatprep.subr.bf16.mxu0 (!%p231_p3), %v1684_v2  ;;  %1644 = vmatprep.subr.bf16.mxu1 (!%p231_p3), %v1684_v2 }
   0xe   : > { %s2064_s18 = smov (!%p285_p4, %s1720_s18), 1 }
   0xf   : > { %s1790_s28 = sshll.u32 %s2064_s18, 7 }
  0x10   : > { %s1796_s6 = scalar_lea.vmem %s2053_s0, %s1790_s28  ;;  %1599 = vmatpush3.bf16.msra.mxu0 %v1684_v2  ;;  %1652 = vmatpush3.bf16.msra.mxu1 %v1684_v2  ;;  %s1833_s23 = scalar_lea.vmem %s2054_s1, %s1790_s28 }
  0x11   : > { %v1690_v4 = vld [vmem:[%s1796_s6] sm:$0xff]   ;;  %1600 = vmatprep.subr.bf16.mxu0 %v1685_v3  ;;  %1645 = vmatprep.subr.bf16.mxu1 %v1685_v3  ;;  %v1692_v10 = vld [vmem:[%s1796_s6 + $0x8] sm:$0xff]   ;;  %v1694_v12 = vld [vmem:[%s1796_s6 + $0x10] sm:$0xff]   ;;  %s1956_s29 = scalar_lea.vmem %s2057_s4, %s1790_s28  ;;  %s1332_s28 = sshll.u32 %s2064_s18, 5 }
  0x12   : > { %v1691_v5 = vld [vmem:[%s1796_s6 + $0x40] sm:$0xff]   ;;  %1610 = vmatprep.mubr.bf16.mxu0 %v1690_v4  ;;  %v1693_v11 = vld [vmem:[%s1796_s6 + $0x48] sm:$0xff]   ;;  %v1695_v13 = vld [vmem:[%s1796_s6 + $0x50] sm:$0xff]  }
  0x13   : > { %1626 = vmatprep.mubr.bf16.mxu1 %v1691_v5  ;;  %v1696_v14 = vld [vmem:[%s1796_s6 + $0x18] sm:$0xff]   ;;  %v1698_v16 = vld [vmem:[%s1796_s6 + $0x20] sm:$0xff]   ;;  %v1700_v18 = vld [vmem:[%s1796_s6 + $0x28] sm:$0xff]  }
  0x14   : > { %1601 = vmatpush3.bf16.msra.mxu0 %v1685_v3  ;;  %1653 = vmatpush3.bf16.msra.mxu1 %v1685_v3  ;;  %v1697_v15 = vld [vmem:[%s1796_s6 + $0x58] sm:$0xff]   ;;  %v1699_v17 = vld [vmem:[%s1796_s6 + $0x60] sm:$0xff]   ;;  %v1701_v19 = vld [vmem:[%s1796_s6 + $0x68] sm:$0xff]  }
  0x15   : > { %1602 = vmatprep.subr.bf16.mxu0 %v1686_v6  ;;  %1646 = vmatprep.subr.bf16.mxu1 %v1686_v6  ;;  %v1702_v20 = vld [vmem:[%s1796_s6 + $0x30] sm:$0xff]   ;;  %v1704_v22 = vld [vmem:[%s1796_s6 + $0x38] sm:$0xff]   ;;  %v1537_v24 = vld [vmem:[%s1833_s23 + $0x8] sm:$0xff]  }
  0x16   : > { %v1703_v21 = vld [vmem:[%s1796_s6 + $0x70] sm:$0xff]   ;;  %v1705_v23 = vld [vmem:[%s1796_s6 + $0x78] sm:$0xff]   ;;  %v1541_v25 = vld [vmem:[%s1833_s23 + $0x28] sm:$0xff]   ;;  %v1379_v28 = vunpack.c.l.bf16 %v1537_v24  ;;  %v1380_v36 = vunpack.c.h.bf16 %v1537_v24  ;;  %s1998_s6 = scalar_lea.vmem %s2058_s5, %s1332_s28 }
  0x17   : > { %v1374_v26 = vld [vmem:[%s1833_s23] sm:$0xff]   ;;  %v1395_v29 = vunpack.c.l.bf16 %v1541_v25  ;;  %v1539_v32 = vld [vmem:[%s1833_s23 + $0x18] sm:$0xff]   ;;  %v1545_v34 = vld [vmem:[%s1833_s23 + $0x48] sm:$0xff]   ;;  %v1396_v37 = vunpack.c.h.bf16 %v1541_v25 }
  0x18   : > { %1603 = vmatpush3.bf16.msra.mxu0 %v1686_v6  ;;  %1654 = vmatpush3.bf16.msra.mxu1 %v1686_v6  ;;  %v1540_v27 = vld [vmem:[%s1833_s23 + $0x20] sm:$0xff]   ;;  %v1375_v30 = vunpack.c.l.bf16 %v1374_v26  ;;  %v1543_v33 = vld [vmem:[%s1833_s23 + $0x38] sm:$0xff]   ;;  %v1376_v38 = vunpack.c.h.bf16 %v1374_v26  ;;  %v1387_v42 = vunpack.c.l.bf16 %v1539_v32  ;;  %v1388_v44 = vunpack.c.h.bf16 %v1539_v32  ;;  %v1549_v55 = vld [vmem:[%s1833_s23 + $0x68] sm:$0xff]  }
  0x19   : > { %1604 = vmatprep.subr.bf16.mxu0 %v1687_v7  ;;  %1647 = vmatprep.subr.bf16.mxu1 %v1687_v7  ;;  %v1391_v31 = vunpack.c.l.bf16 %v1540_v27  ;;  %v1544_v35 = vld [vmem:[%s1833_s23 + $0x40] sm:$0xff]   ;;  %v1392_v39 = vunpack.c.h.bf16 %v1540_v27  ;;  %v1403_v43 = vunpack.c.l.bf16 %v1543_v33  ;;  %v1404_v45 = vunpack.c.h.bf16 %v1543_v33  ;;  %v1547_v52 = vld [vmem:[%s1833_s23 + $0x58] sm:$0xff]   ;;  %v1538_v1 = vld [vmem:[%s1833_s23 + $0x10] sm:$0xff]  }
  0x1a   : > { %v1411_v48 = vunpack.c.l.bf16 %v1545_v34  ;;  %v1012_v49 = vadd.f32 %v1395_v29, %v1379_v28  ;;  %v1407_v50 = vunpack.c.l.bf16 %v1544_v35  ;;  %v1548_v56 = vld [vmem:[%s1833_s23 + $0x60] sm:$0xff]   ;;  %v1412_v57 = vunpack.c.h.bf16 %v1545_v34  ;;  %v1542_v2 = vld [vmem:[%s1833_s23 + $0x30] sm:$0xff]  }
  0x1b   : > { %v1006_v51 = vadd.f32 %v1391_v31, %v1375_v30  ;;  %v1015_v58 = vadd.f32 %v1396_v37, %v1380_v36  ;;  %v1408_v59 = vunpack.c.h.bf16 %v1544_v35  ;;  %v1009_v60 = vadd.f32 %v1392_v39, %v1376_v38  ;;  %v1864_v24 = vld [vmem:[%s2056_s3] ss:$0 sm:$0xff] }
  0x1c   : > { %1605 = vmatpush3.bf16.msra.mxu0 %v1687_v7  ;;  %1655 = vmatpush3.bf16.msra.mxu1 %v1687_v7  ;;  %v1419_v63 = vunpack.c.l.bf16 %v1547_v52  ;;  %v1024_v0 = vadd.f32 %v1403_v43, %v1387_v42  ;;  %v1420_v3 = vunpack.c.h.bf16 %v1547_v52  ;;  %v1027_v4 = vadd.f32 %v1404_v45, %v1388_v44 }
  0x1d   : > { %1606 = vmatprep.subr.bf16.mxu0 %v1688_v8  ;;  %1648 = vmatprep.subr.bf16.mxu1 %v1688_v8  ;;  %v1427_v5 = vunpack.c.l.bf16 %v1549_v55  ;;  %v1013_v6 = vadd.f32 %v1411_v48, %v1012_v49  ;;  %v1423_v7 = vunpack.c.l.bf16 %v1548_v56  ;;  %v1384_v29 = vunpack.c.h.bf16 %v1538_v1 }
  0x1e   : > { %v1400_v30 = vunpack.c.h.bf16 %v1542_v2 }
  0x1f   : > { %v1866_v27 = vadd.f32 %v1427_v5, %v1013_v6 }
  0x20   : > { %1607 = vmatpush3.bf16.msra.mxu0 %v1688_v8  ;;  %1656 = vmatpush3.bf16.msra.mxu1 %v1688_v8  ;;  %v1007_v8 = vadd.f32 %v1407_v50, %v1006_v51  ;;  %v1901_v52 = vadd.f32 %v1400_v30, %v1384_v29 }
  0x21   : > { %1608 = vmatprep.subr.bf16.mxu0 %v1689_v9  ;;  %1649 = vmatprep.subr.bf16.mxu1 %v1689_v9 }
  0x22   : > { %v1868_v28 = vadd.f32 %v1423_v7, %v1007_v8 }
  0x24   : > { %1609 = vmatpush3.bf16.msra.mxu0 %v1689_v9  ;;  %1657 = vmatpush3.bf16.msra.mxu1 %v1689_v9  ;;  %v1551_v9 = vld [vmem:[%s1833_s23 + $0x78] sm:$0xff]  }
  0x27   : > { %1611 = vmatmul.mubr.bf16.vlgmr.msra.gmra.mrb[0].mxu0 %v1692_v10  ;;  %1627 = vmatmul.mubr.bf16.vlgmr.msra.gmra.mrb[0].mxu1 %v1693_v11  ;;  %v1428_v10 = vunpack.c.h.bf16 %v1549_v55  ;;  %v1016_v11 = vadd.f32 %v1412_v57, %v1015_v58 }
  0x28   : > { %1614 = vmatprep.mubr.bf16.mxu0 %v1694_v12  ;;  %1630 = vmatprep.mubr.bf16.mxu1 %v1695_v13  ;;  %v1424_v12 = vunpack.c.h.bf16 %v1548_v56  ;;  %v1010_v13 = vadd.f32 %v1408_v59, %v1009_v60 }
  0x29   : > { %v1871_v34 = vadd.f32 %v1428_v10, %v1016_v11 }
  0x2a   : > { %v1873_v35 = vadd.f32 %v1424_v12, %v1010_v13 }
  0x2f   : > { %1615 = vmatmul.mubr.bf16.gmra.mrb[4].mxu0 %v1696_v14  ;;  %1631 = vmatmul.mubr.bf16.gmra.mrb[4].mxu1 %v1697_v15  ;;  %v1383_v14 = vunpack.c.l.bf16 %v1538_v1  ;;  %v1399_v15 = vunpack.c.l.bf16 %v1542_v2 }
  0x30   : > { %1618 = vmatprep.mubr.bf16.mxu0 %v1698_v16  ;;  %1634 = vmatprep.mubr.bf16.mxu1 %v1699_v17  ;;  %v1856_v16 = vld [vmem:[%s1833_s23 + $0x50] sm:$0xff]  }
  0x31   : > { %v1415_v36 = vunpack.c.l.bf16 %v1856_v16  ;;  %v1883_v44 = vadd.f32 %v1399_v15, %v1383_v14  ;;  %v1416_v51 = vunpack.c.h.bf16 %v1856_v16 }
  0x37   : > { %1619 = vmatmul.mubr.bf16.gmra.mrb[8].mxu0 %v1700_v18  ;;  %1635 = vmatmul.mubr.bf16.gmra.mrb[8].mxu1 %v1701_v19  ;;  %v1435_v19 = vunpack.c.l.bf16 %v1551_v9 }
  0x38   : > { %1622 = vmatprep.mubr.bf16.mxu0 %v1702_v20  ;;  %1638 = vmatprep.mubr.bf16.mxu1 %v1703_v21  ;;  %v1025_v20 = vadd.f32 %v1419_v63, %v1024_v0  ;;  %v1859_v21 = vld [vmem:[%s1833_s23 + $0x70] sm:$0xff]  }
  0x39   : > { %v1431_v43 = vunpack.c.l.bf16 %v1859_v21 }
  0x3a   : > { %v1891_v48 = vadd.f32 %v1435_v19, %v1025_v20 }
  0x3f   : > { %1623 = vmatmul.mubr.bf16.gmra.mrb[12].mxu0 %v1704_v22  ;;  %1639 = vmatmul.mubr.bf16.gmra.mrb[12].mxu1 %v1705_v23  ;;  %v1436_v22 = vunpack.c.h.bf16 %v1551_v9  ;;  %v1028_v23 = vadd.f32 %v1420_v3, %v1027_v4 }
  0x41   : > { %v1893_v49 = vadd.f32 %v1436_v22, %v1028_v23 }
  0xfa   : > { %v1843_v40 = vpop.f32.mrb[0].mxu0  ;;  %v1628_v41 = vpop.f32.mrb[0].mxu1 }
  0xfb   : > { %v1845_v46 = vpop.f32.mrb[1].mxu0  ;;  %v622_v47 = vpop.f32.mrb[1].mxu1  ;;  %v631_v31 = vadd.f32 %v1628_v41, %v1864_v24 }
  0xfc   : > { %v1848_v53 = vpop.f32.mrb[2].mxu0  ;;  %v1629_v54 = vpop.f32.mrb[2].mxu1  ;;  %v623_v37 = vadd.f32 %v1864_v24, %v622_v47  ;;  %v567_v47 = vadd.f32 %v1843_v40, %v1864_v24  ;;  %v559_v55 = vadd.f32 %v1864_v24, %v1845_v46 }
  0xfd   : > { %v561_v61 = vpop.f32.mrb[3].mxu0  ;;  %v625_v62 = vpop.f32.mrb[3].mxu1  ;;  %v1878_v38 = vadd.f32 %v1629_v54, %v1864_v24  ;;  %v759_v54 = vmul.f32 0.5, %v631_v31  ;;  %v570_v40 = vadd.f32 %v1848_v53, %v1864_v24 }
  0xfe   : > { %v1886_v41 = vadd.f32 %v1864_v24, %v625_v62  ;;  %v757_v58 = vmul.f32 0.5, %v623_v37  ;;  %v1915_v60 = vadd.f32 %v1864_v24, %v561_v61 }
  0xff   : > { %v760_v59 = vmul.f32 0.5, %v1878_v38 }
 0x100   : > { %v1918_v62 = vmul.f32 0.5, %v1886_v41 }
 0x102   : > { %v1616_v17 = vpop.f32.mrb[4].mxu0  ;;  %v1632_v18 = vpop.f32.mrb[4].mxu1 }
 0x103   : > { %v574_v25 = vpop.f32.mrb[5].mxu0  ;;  %v638_v26 = vpop.f32.mrb[5].mxu1  ;;  %v1889_v45 = vadd.f32 %v1632_v18, %v1864_v24  ;;  %v1921_v46 = vadd.f32 %v1616_v17, %v1864_v24 }
 0x104   : > { %v1617_v32 = vpop.f32.mrb[6].mxu0  ;;  %v1633_v33 = vpop.f32.mrb[6].mxu1  ;;  %v1898_v50 = vadd.f32 %v1864_v24, %v638_v26  ;;  %v1927_v0 = vadd.f32 %v1864_v24, %v574_v25 }
 0x105   : > { %v1880_v39 = vpop.f32.mrb[7].mxu0  ;;  %v641_v42 = vpop.f32.mrb[7].mxu1  ;;  %v1906_v56 = vadd.f32 %v1633_v33, %v1864_v24  ;;  %v1924_v63 = vmul.f32 0.5, %v1889_v45  ;;  %v1933_v61 = vadd.f32 %v1617_v32, %v1864_v24 }
 0x106   : > { %v1909_v57 = vadd.f32 %v1864_v24, %v641_v42  ;;  %v1930_v53 = vmul.f32 0.5, %v1898_v50 }
 0x107   : > { %v1938_v7 = vmul.f32 0.5, %v1906_v56 }
 0x108   : > { %v1941_v8 = vmul.f32 0.5, %v1909_v57 }
 0x10a   : > { %v1620_v1 = vpop.f32.mrb[8].mxu0  ;;  %v1636_v2 = vpop.f32.mrb[8].mxu1 }
 0x10b   : > { %v599_v3 = vadd.f32 %v1620_v1, %v1864_v24  ;;  %v663_v4 = vadd.f32 %v1636_v2, %v1864_v24  ;;  %v590_v5 = vpop.f32.mrb[9].mxu0  ;;  %v654_v6 = vpop.f32.mrb[9].mxu1 }
 0x10c   : > { %v591_v9 = vadd.f32 %v1864_v24, %v590_v5  ;;  %v1945_v10 = vadd.f32 %v1864_v24, %v654_v6  ;;  %v1621_v11 = vpop.f32.mrb[10].mxu0  ;;  %v1637_v12 = vpop.f32.mrb[10].mxu1 }
 0x10d   : > { %v751_v13 = vmul.f32 0.5, %v599_v3  ;;  %v783_v14 = vadd.f32 %v759_v54, %v599_v3  ;;  %v767_v15 = vmul.f32 0.5, %v663_v4  ;;  %v602_v17 = vadd.f32 %v1621_v11, %v1864_v24  ;;  %v593_v18 = vpop.f32.mrb[11].mxu0  ;;  %v657_v19 = vpop.f32.mrb[11].mxu1 }
 0x10e   : > { %v749_v20 = vmul.f32 0.5, %v591_v9  ;;  %v781_v22 = vadd.f32 %v757_v58, %v591_v9  ;;  %v765_v23 = vmul.f32 0.5, %v1945_v10  ;;  %v666_v25 = vadd.f32 %v1637_v12, %v1864_v24 }
 0x10f   : > { %v775_v26 = vadd.f32 %v751_v13, %v567_v47  ;;  %v807_v29 = vmul.f32 0.6666667, %v783_v14  ;;  %v791_v30 = vadd.f32 %v767_v15, %v631_v31  ;;  %v752_v32 = vmul.f32 0.5, %v602_v17 }
 0x110   : > { %v773_v33 = vadd.f32 %v749_v20, %v559_v55  ;;  %v1950_v42 = vmul.f32 0.6666667, %v781_v22  ;;  %v789_v54 = vadd.f32 %v765_v23, %v623_v37  ;;  %v784_v1 = vadd.f32 %v760_v59, %v602_v17 }
 0x111   : > { %v799_v2 = vmul.f32 0.6666667, %v775_v26  ;;  %v815_v3 = vmul.f32 0.6666667, %v791_v30  ;;  %v776_v58 = vadd.f32 %v752_v32, %v570_v40  ;;  %v768_v5 = vmul.f32 0.5, %v666_v25 }
 0x112   : > { %v1958_v6 = vmul.f32 0.6666667, %v773_v33  ;;  %v1960_v47 = vmul.f32 0.6666667, %v789_v54  ;;  %v808_v31 = vmul.f32 0.6666667, %v784_v1  ;;  %v1505_v55 = vpack.c.bf16 %v666_v25, %v663_v4 }
 0x113   : > { %v986_v9 = vadd.f32 %v807_v29, %v799_v2  ;;  %v800_v11 = vmul.f32 0.6666667, %v776_v58  ;;  %v792_v37 = vadd.f32 %v768_v5, %v1878_v38  ;;  %v594_v59 = vadd.f32 %v1864_v24, %v593_v18  ;;  %v1624_v12 = vpop.f32.mrb[12].mxu0  ;;  %v1640_v13 = vpop.f32.mrb[12].mxu1 }
 0x114   : > { %v982_v14 = vadd.f32 %v1950_v42, %v1958_v6  ;;  %v1465_v40 = vpack.c.bf16 %v808_v31, %v807_v29  ;;  %1564 = vst [vmem:[%s1956_s29 + $0x68] sm:$0xff] %v1505_v55   ;;  %v658_v15 = vadd.f32 %v1864_v24, %v657_v19  ;;  %v615_v17 = vadd.f32 %v1624_v12, %v1864_v24  ;;  %v606_v20 = vpop.f32.mrb[13].mxu0  ;;  %v670_v22 = vpop.f32.mrb[13].mxu1 }
 0x115   : > { %v987_v23 = vadd.f32 %v986_v9, %v815_v3  ;;  %v1445_v26 = vpack.c.bf16 %v800_v11, %v799_v2  ;;  %v988_v38 = vadd.f32 %v808_v31, %v800_v11  ;;  %v816_v30 = vmul.f32 0.6666667, %v792_v37  ;;  %v1625_v18 = vpop.f32.mrb[14].mxu0  ;;  %v1641_v32 = vpop.f32.mrb[14].mxu1 }
 0x116   : > { %v983_v33 = vadd.f32 %v982_v14, %v1960_v47  ;;  %1556 = vst [vmem:[%s1956_s29 + $0x28] sm:$0xff] %v1465_v40   ;;  %v750_v54 = vmul.f32 0.5, %v594_v59  ;;  %v782_v29 = vadd.f32 %v1918_v62, %v594_v59  ;;  %v766_v19 = vmul.f32 0.5, %v658_v15  ;;  %v1972_v1 = vpop.f32.mrb[15].mxu0  ;;  %v1974_v58 = vpop.f32.mrb[15].mxu1 }
 0x117   : > { %v1000_v5 = vadd.f32 %v987_v23, %v663_v4  ;;  %1552 = vst [vmem:[%s1956_s29 + $0x8] sm:$0xff] %v1445_v26   ;;  %v1485_v2 = vpack.c.bf16 %v816_v30, %v815_v3  ;;  %v989_v31 = vadd.f32 %v988_v38, %v816_v30  ;;  %v1500_v55 = vpack.c.bf16 %v658_v15, %v1945_v10 }
 0x118   : > { %v998_v9 = vadd.f32 %v983_v33, %v1945_v10  ;;  %v774_v11 = vadd.f32 %v750_v54, %v1915_v60  ;;  %v806_v37 = vmul.f32 0.6666667, %v782_v29  ;;  %v790_v62 = vadd.f32 %v766_v19, %v1886_v41 }
 0x119   : > { %v1032_v59 = vadd.f32 %v1866_v27, %v1000_v5  ;;  %1560 = vst [vmem:[%s1956_s29 + $0x48] sm:$0xff] %v1485_v2   ;;  %v1001_v12 = vadd.f32 %v989_v31, %v666_v25  ;;  %1563 = vst [vmem:[%s1956_s29 + $0x60] sm:$0xff] %v1500_v55   ;;  %v755_v4 = vmul.f32 0.5, %v615_v17  ;;  %v787_v3 = vadd.f32 %v1924_v63, %v615_v17 }
 0x11a   : > { %v1030_v14 = vadd.f32 %v1868_v28, %v998_v9  ;;  %v798_v40 = vmul.f32 0.6666667, %v774_v11  ;;  %v1460_v23 = vpack.c.bf16 %v806_v37, %v1950_v42  ;;  %v814_v10 = vmul.f32 0.6666667, %v790_v62 }
 0x11b   : > { %v1040_v60 = vmul.f32 0.25, %v1032_v59  ;;  %v1033_v41 = vadd.f32 %v1871_v34, %v1001_v12  ;;  %v779_v27 = vadd.f32 %v755_v4, %v1921_v46  ;;  %v811_v26 = vmul.f32 0.6666667, %v787_v3 }
 0x11c   : > { %v1038_v25 = vmul.f32 0.25, %v1030_v14  ;;  %v1440_v38 = vpack.c.bf16 %v798_v40, %v1958_v6  ;;  %1555 = vst [vmem:[%s1956_s29 + $0x20] sm:$0xff] %v1460_v23   ;;  %v984_v63 = vadd.f32 %v806_v37, %v798_v40  ;;  %v1480_v28 = vpack.c.bf16 %v814_v10, %v1960_v47 }
 0x11d   : > { %v1041_v17 = vmul.f32 0.25, %v1033_v41  ;;  %v803_v30 = vmul.f32 0.6666667, %v779_v27  ;;  %v679_v42 = vadd.f32 %v1640_v13, %v1864_v24  ;;  %v607_v33 = vadd.f32 %v1864_v24, %v606_v20 }
 0x11e   : > { %1441 = vst [vmem:[%s1956_s29] sm:$0xff] %v1440_v38   ;;  %1559 = vst [vmem:[%s1956_s29 + $0x40] sm:$0xff] %v1480_v28   ;;  %v985_v34 = vadd.f32 %v984_v63, %v814_v10  ;;  %v671_v46 = vadd.f32 %v1864_v24, %v670_v22  ;;  %v618_v6 = vadd.f32 %v1625_v18, %v1864_v24 }
 0x11f   : > { %v682_v47 = vadd.f32 %v1641_v32, %v1864_v24  ;;  %v1525_v54 = vpack.c.bf16 %v1041_v17, %v1040_v60  ;;  %v994_v29 = vadd.f32 %v811_v26, %v803_v30  ;;  %v771_v13 = vmul.f32 0.5, %v679_v42 }
 0x120   : > { %v753_v19 = vmul.f32 0.5, %v607_v33  ;;  %v999_v20 = vadd.f32 %v985_v34, %v658_v15  ;;  %v785_v5 = vadd.f32 %v1930_v53, %v607_v33  ;;  %v769_v2 = vmul.f32 0.5, %v671_v46 }
 0x121   : > { %v756_v31 = vmul.f32 0.5, %v618_v6  ;;  %1567 = vst [vmem:[%s1998_s6 + $0x8] sm:$0xff] %v1525_v54   ;;  %v795_v55 = vadd.f32 %v771_v13, %v1889_v45  ;;  %v788_v22 = vadd.f32 %v1938_v7, %v618_v6  ;;  %v772_v11 = vmul.f32 0.5, %v682_v47 }
 0x122   : > { %v777_v9 = vadd.f32 %v753_v19, %v1927_v0  ;;  %v1031_v18 = vadd.f32 %v1873_v35, %v999_v20  ;;  %v809_v32 = vmul.f32 0.6666667, %v785_v5  ;;  %v793_v37 = vadd.f32 %v769_v2, %v1898_v50 }
 0x123   : > { %v780_v62 = vadd.f32 %v756_v31, %v1933_v61  ;;  %v819_v15 = vmul.f32 0.6666667, %v795_v55  ;;  %v812_v59 = vmul.f32 0.6666667, %v788_v22  ;;  %v796_v12 = vadd.f32 %v772_v11, %v1906_v56 }
 0x124   : > { %v801_v53 = vmul.f32 0.6666667, %v777_v9  ;;  %v1039_v45 = vmul.f32 0.25, %v1031_v18  ;;  %v817_v4 = vmul.f32 0.6666667, %v793_v37  ;;  %v1515_v3 = vpack.c.bf16 %v682_v47, %v679_v42 }
 0x125   : > { %v804_v0 = vmul.f32 0.6666667, %v780_v62  ;;  %v995_v7 = vadd.f32 %v994_v29, %v819_v15  ;;  %v1475_v14 = vpack.c.bf16 %v812_v59, %v811_v26  ;;  %v820_v40 = vmul.f32 0.6666667, %v796_v12 }
 0x126   : > { %v990_v35 = vadd.f32 %v809_v32, %v801_v53  ;;  %v1520_v50 = vpack.c.bf16 %v1039_v45, %v1038_v25  ;;  %1566 = vst [vmem:[%s1956_s29 + $0x78] sm:$0xff] %v1515_v3   ;;  %v610_v10 = vadd.f32 %v1864_v24, %v1972_v1  ;;  %v674_v27 = vadd.f32 %v1864_v24, %v1974_v58 }
 0x127   : > { %v1455_v23 = vpack.c.bf16 %v804_v0, %v803_v30  ;;  %v996_v61 = vadd.f32 %v812_v59, %v804_v0  ;;  %v1004_v56 = vadd.f32 %v995_v7, %v679_v42  ;;  %1558 = vst [vmem:[%s1956_s29 + $0x38] sm:$0xff] %v1475_v14   ;;  %v1495_v41 = vpack.c.bf16 %v820_v40, %v819_v15 }
 0x128   : > { %v991_v60 = vadd.f32 %v990_v35, %v817_v4  ;;  %v578_v38 = vadd.f32 %v1864_v24, %v1880_v39  ;;  %1521 = vst [vmem:[%s1998_s6] sm:$0xff] %v1520_v50   ;;  %v754_v25 = vmul.f32 0.5, %v610_v10  ;;  %v786_v63 = vadd.f32 %v1941_v8, %v610_v10 }
 0x129   : > { %1554 = vst [vmem:[%s1956_s29 + $0x18] sm:$0xff] %v1455_v23   ;;  %v997_v26 = vadd.f32 %v996_v61, %v820_v40  ;;  %v1019_v1 = vadd.f32 %v1415_v36, %v1883_v44  ;;  %1562 = vst [vmem:[%s1956_s29 + $0x58] sm:$0xff] %v1495_v41   ;;  %v770_v17 = vmul.f32 0.5, %v674_v27  ;;  %v1510_v30 = vpack.c.bf16 %v674_v27, %v671_v46 }
 0x12a   : > { %v1002_v28 = vadd.f32 %v991_v60, %v671_v46  ;;  %v1036_v58 = vadd.f32 %v1891_v48, %v1004_v56  ;;  %v778_v24 = vadd.f32 %v754_v25, %v578_v38  ;;  %v810_v39 = vmul.f32 0.6666667, %v786_v63 }
 0x12b   : > { %v1005_v42 = vadd.f32 %v997_v26, %v682_v47  ;;  %v1432_v33 = vunpack.c.h.bf16 %v1859_v21  ;;  %v794_v34 = vadd.f32 %v770_v17, %v1909_v57  ;;  %1565 = vst [vmem:[%s1956_s29 + $0x70] sm:$0xff] %v1510_v30   ;;  %v1022_v44 = vadd.f32 %v1416_v51, %v1901_v52 }
 0x12c   : > { %v802_v6 = vmul.f32 0.6666667, %v778_v24  ;;  %v1470_v36 = vpack.c.bf16 %v810_v39, %v809_v32  ;;  %v1020_v48 = vadd.f32 %v1431_v43, %v1019_v1  ;;  %v1044_v47 = vmul.f32 0.25, %v1036_v58 }
 0x12d   : > { %v1037_v8 = vadd.f32 %v1893_v49, %v1005_v42  ;;  %v818_v46 = vmul.f32 0.6666667, %v794_v34  ;;  %v1023_v20 = vadd.f32 %v1432_v33, %v1022_v44 }
 0x12e   : > { %v1450_v29 = vpack.c.bf16 %v802_v6, %v801_v53  ;;  %1557 = vst [vmem:[%s1956_s29 + $0x30] sm:$0xff] %v1470_v36   ;;  %v992_v57 = vadd.f32 %v810_v39, %v802_v6  ;;  %v1034_v5 = vadd.f32 %v1020_v48, %v1002_v28 }
 0x12f   : > { %v1045_v54 = vmul.f32 0.25, %v1037_v8  ;;  %v1490_v13 = vpack.c.bf16 %v818_v46, %v817_v4 }
 0x130   : > { %1553 = vst [vmem:[%s1956_s29 + $0x10] sm:$0xff] %v1450_v29   ;;  %v993_v19 = vadd.f32 %v992_v57, %v818_v46  ;;  %v1042_v52 = vmul.f32 0.25, %v1034_v5 }
 0x131   : > { %v1535_v49 = vpack.c.bf16 %v1045_v54, %v1044_v47  ;;  %1561 = vst [vmem:[%s1956_s29 + $0x50] sm:$0xff] %v1490_v13  }
 0x132   : > { %v1003_v16 = vadd.f32 %v993_v19, %v674_v27 }
 0x133   : > { %1569 = vst [vmem:[%s1998_s6 + $0x18] sm:$0xff] %v1535_v49  }
 0x134   : > { %v1035_v51 = vadd.f32 %v1023_v20, %v1003_v16 }
 0x136   : > { %v1043_v21 = vmul.f32 0.25, %v1035_v51 }
 0x138   : > { %v1530_v43 = vpack.c.bf16 %v1043_v21, %v1042_v52 }
 0x13a   : > { %1568 = vst [vmem:[%s1998_s6 + $0x10] sm:$0xff] %v1530_v43  }
 0x13b PF: > { %s16_s20 = sadd.s32 1, %s1728_s20   ;;  %s2059_s18 = smov %s1724_s19 }
 0x13c   : > { %p13_p5 = scmp.ge.s32.totalorder %s16_s20, 4   ;;  %s2060_s19 = smov %s2062_s21 }
 0x13e   :  { %15 = sbr.rel (!%p13_p5) target bundleno = 2 (0x2), region = 82 }

// kernel: _lambda_.7
= control target key start
LH: loop header
LB: loop body
LE: loop exit
PB: predicated region body
PF: predicated region fallthrough
CT: control target
= control target key end

     0   :  { %s2461_s21 = smov 0   ;;  %s2463_s22 = smov 0   ;;  %s2737_s0 = inlined_call_operand.vmem [shape: bf16[512,256], index: 0, kind: input, shape index: {}]   ;;  %s2738_s1 = inlined_call_operand.vmem [shape: bf16[256,128], index: 1, kind: input, shape index: {}]   ;;  %s2739_s2 = inlined_call_operand.vmem [shape: f32[1,128], index: 2, kind: input, shape index: {}]   ;;  %s2740_s3 = inlined_call_operand.vmem [shape: bf16[128,128], index: 3, kind: input, shape index: {}]   ;;  %s2741_s4 = inlined_call_operand.vmem [shape: f32[1,128], index: 4, kind: input, shape index: {}]   ;;  %s2742_s5 = inlined_call_operand.vmem [shape: bf16[512,128], index: 5, kind: output, shape index: {0}]   ;;  %s2743_s6 = inlined_call_operand.vmem [shape: bf16[512,128], index: 6, kind: output, shape index: {1}]  }
   0x1   :  { %s2465_s23 = smov 0  }
   0x2 LB: > { %s29_s24 = sadd.s32 1, %s2420_s22  ;;  %p1719_p0 = scmp.ge.s32.totalorder %s2424_s23, 1  ;;  %s2424_s23 = sphi %s2465_s23, %s17_s23   ;;  %s2420_s22 = sphi %s2463_s22, %s2745_s22   ;;  %s2416_s21 = sphi %s2461_s21, %s2744_s21  }
   0x3   : > { %p31_p1 = scmp.ge.s32.totalorder %s29_s24, 2  ;;  %p247_p2 = scmp.lt.s32.totalorder %s2424_s23, 3 }
   0x5   : > { %s2747_s24 = smov (%p31_p1, %s29_s24), 0  ;;  %p248_p3 = pnand %p1719_p0, %p247_p2 }
   0x6   : > { %v2330_v0 = vld [vmem:[%s2738_s1 + $0x40] sm:$0xff] (!%p248_p3)   ;;  %s1720_s27 = sshll.u32 (!%p248_p3), %s2416_s21, 5  ;;  %v2332_v2 = vld [vmem:[%s2738_s1 + $0x48] sm:$0xff] (!%p248_p3)   ;;  %v2334_v4 = vld [vmem:[%s2738_s1 + $0x50] sm:$0xff] (!%p248_p3)  }
   0x7   : > { %251 = sbr.rel (%p248_p3) target bundleno = 586 (0x24a), region = 40  ;;  %v2331_v1 = vld [vmem:[%s2738_s1] sm:$0xff] (!%p248_p3)   ;;  %2106 = vmatprep.subr.bf16.mxu0 (!%p248_p3), %v2330_v0  ;;  %2290 = vmatprep.subr.bf16.mxu1 (!%p248_p3), %v2330_v0  ;;  %v2333_v3 = vld [vmem:[%s2738_s1 + $0x8] sm:$0xff] (!%p248_p3)   ;;  %p294_p4 = scmp.lt.s32.totalorder (!%p248_p3), %s1720_s27, 63  ;;  %v2335_v5 = vld [vmem:[%s2738_s1 + $0x10] sm:$0xff] (!%p248_p3)  }
   0x8   : > { %2107 = vmatpush3.bf16.msra.mxu0 (!%p248_p3), %v2331_v1  ;;  %2298 = vmatpush3.bf16.msra.mxu1 (!%p248_p3), %v2331_v1  ;;  %v2336_v6 = vld [vmem:[%s2738_s1 + $0x58] sm:$0xff] (!%p248_p3)   ;;  %v2338_v8 = vld [vmem:[%s2738_s1 + $0x60] sm:$0xff] (!%p248_p3)   ;;  %v2340_v10 = vld [vmem:[%s2738_s1 + $0x68] sm:$0xff] (!%p248_p3)  }
   0x9   : > { %2108 = vmatprep.subr.bf16.mxu0 (!%p248_p3), %v2332_v2  ;;  %2291 = vmatprep.subr.bf16.mxu1 (!%p248_p3), %v2332_v2  ;;  %v2337_v7 = vld [vmem:[%s2738_s1 + $0x18] sm:$0xff] (!%p248_p3)   ;;  %v2339_v9 = vld [vmem:[%s2738_s1 + $0x20] sm:$0xff] (!%p248_p3)   ;;  %v2341_v12 = vld [vmem:[%s2738_s1 + $0x28] sm:$0xff] (!%p248_p3)  }
   0xa   : > { %v2342_v13 = vld [vmem:[%s2738_s1 + $0x70] sm:$0xff] (!%p248_p3)   ;;  %v2344_v15 = vld [vmem:[%s2738_s1 + $0x78] sm:$0xff] (!%p248_p3)   ;;  %v2394_v26 = vld [vmem:[%s2740_s3] sm:$0xff] (!%p248_p3)  }
   0xb   : > { %v2343_v14 = vld [vmem:[%s2738_s1 + $0x30] sm:$0xff] (!%p248_p3)   ;;  %v2345_v16 = vld [vmem:[%s2738_s1 + $0x38] sm:$0xff] (!%p248_p3)   ;;  %v2395_v27 = vld [vmem:[%s2740_s3 + $0x8] sm:$0xff] (!%p248_p3)  }
   0xc   : > { %2109 = vmatpush3.bf16.msra.mxu0 (!%p248_p3), %v2333_v3  ;;  %2299 = vmatpush3.bf16.msra.mxu1 (!%p248_p3), %v2333_v3  ;;  %v2396_v28 = vld [vmem:[%s2740_s3 + $0x10] sm:$0xff] (!%p248_p3)   ;;  %v2397_v50 = vld [vmem:[%s2740_s3 + $0x18] sm:$0xff] (!%p248_p3)   ;;  %v2398_v52 = vld [vmem:[%s2740_s3 + $0x20] sm:$0xff] (!%p248_p3)  }
   0xd   : > { %2110 = vmatprep.subr.bf16.mxu0 (!%p248_p3), %v2334_v4  ;;  %2292 = vmatprep.subr.bf16.mxu1 (!%p248_p3), %v2334_v4  ;;  %v2399_v53 = vld [vmem:[%s2740_s3 + $0x28] sm:$0xff] (!%p248_p3)   ;;  %v2400_v54 = vld [vmem:[%s2740_s3 + $0x30] sm:$0xff] (!%p248_p3)   ;;  %v2401_v55 = vld [vmem:[%s2740_s3 + $0x38] sm:$0xff] (!%p248_p3)  }
   0xe   : > { %s2749_s27 = smov (!%p294_p4, %s1720_s27), 63  ;;  %v2594_v58 = vld [vmem:[%s2739_s2] ss:$0 sm:$0xff] }
   0xf   : > { %s1851_s18 = sshll.u32 %s2749_s27, 3  ;;  %s1724_s16 = sshll.u32 %s2749_s27, 2 }
  0x10   : > { %2111 = vmatpush3.bf16.msra.mxu0 %v2335_v5  ;;  %2300 = vmatpush3.bf16.msra.mxu1 %v2335_v5  ;;  %s2512_s26 = scalar_lea.vmem %s2737_s0, %s1851_s18  ;;  %s2606_s19 = scalar_lea.vmem %s2742_s5, %s1724_s16 }
  0x11   : > { %2112 = vmatprep.subr.bf16.mxu0 %v2336_v6  ;;  %2293 = vmatprep.subr.bf16.mxu1 %v2336_v6  ;;  %v2348_v11 = vld [vmem:[%s2512_s26 + $0x4] ss:$8 sps:$4 sm:$0xff]   ;;  %v2346_v17 = vld [vmem:[%s2512_s26] ss:$8 sps:$4 sm:$0xff]   ;;  %v2349_v19 = vld [vmem:[%s2512_s26 + $0x14] ss:$8 sps:$4 sm:$0xff]   ;;  %s2681_s29 = scalar_lea.vmem %s2743_s6, %s1724_s16 }
  0x12   : > { %743 = vmatprep.mubr.bf16.mxu0 %v2348_v11  ;;  %v2378_v18 = vld [vmem:[%s2512_s26 + $0xc4] ss:$8 sps:$4 sm:$0xff]   ;;  %v2376_v20 = vld [vmem:[%s2512_s26 + $0xc0] ss:$8 sps:$4 sm:$0xff]   ;;  %v2382_v21 = vld [vmem:[%s2512_s26 + $0xd4] ss:$8 sps:$4 sm:$0xff]  }
  0x13   : > { %839 = vmatprep.mubr.bf16.mxu1 %v2378_v18  ;;  %v2351_v22 = vld [vmem:[%s2512_s26 + $0x10] ss:$8 sps:$4 sm:$0xff]   ;;  %v2352_v23 = vld [vmem:[%s2512_s26 + $0x24] ss:$8 sps:$4 sm:$0xff]   ;;  %v2354_v29 = vld [vmem:[%s2512_s26 + $0x20] ss:$8 sps:$4 sm:$0xff]  }
  0x14   : > { %2113 = vmatpush3.bf16.msra.mxu0 %v2337_v7  ;;  %2301 = vmatpush3.bf16.msra.mxu1 %v2337_v7  ;;  %v2384_v24 = vld [vmem:[%s2512_s26 + $0xd0] ss:$8 sps:$4 sm:$0xff]   ;;  %v2388_v25 = vld [vmem:[%s2512_s26 + $0xe4] ss:$8 sps:$4 sm:$0xff]   ;;  %v2355_v30 = vld [vmem:[%s2512_s26 + $0x34] ss:$8 sps:$4 sm:$0xff]  }
  0x15   : > { %2114 = vmatprep.subr.bf16.mxu0 %v2338_v8  ;;  %2294 = vmatprep.subr.bf16.mxu1 %v2338_v8  ;;  %v2390_v31 = vld [vmem:[%s2512_s26 + $0xe0] ss:$8 sps:$4 sm:$0xff]   ;;  %v2391_v32 = vld [vmem:[%s2512_s26 + $0xf4] ss:$8 sps:$4 sm:$0xff]   ;;  %v2357_v33 = vld [vmem:[%s2512_s26 + $0x30] ss:$8 sps:$4 sm:$0xff]  }
  0x16   : > { %v2358_v34 = vld [vmem:[%s2512_s26 + $0x44] ss:$8 sps:$4 sm:$0xff]   ;;  %v2393_v35 = vld [vmem:[%s2512_s26 + $0xf0] ss:$8 sps:$4 sm:$0xff]   ;;  %v2360_v36 = vld [vmem:[%s2512_s26 + $0x40] ss:$8 sps:$4 sm:$0xff]  }
  0x17   : > { %v2361_v37 = vld [vmem:[%s2512_s26 + $0x54] ss:$8 sps:$4 sm:$0xff]   ;;  %v2363_v38 = vld [vmem:[%s2512_s26 + $0x50] ss:$8 sps:$4 sm:$0xff]   ;;  %v2364_v39 = vld [vmem:[%s2512_s26 + $0x64] ss:$8 sps:$4 sm:$0xff]  }
  0x18   : > { %2115 = vmatpush3.bf16.msra.mxu0 %v2339_v9  ;;  %2302 = vmatpush3.bf16.msra.mxu1 %v2339_v9  ;;  %v2366_v40 = vld [vmem:[%s2512_s26 + $0x60] ss:$8 sps:$4 sm:$0xff]   ;;  %v2367_v41 = vld [vmem:[%s2512_s26 + $0x74] ss:$8 sps:$4 sm:$0xff]   ;;  %v2369_v42 = vld [vmem:[%s2512_s26 + $0x70] ss:$8 sps:$4 sm:$0xff]  }
  0x19   : > { %2116 = vmatprep.subr.bf16.mxu0 %v2340_v10  ;;  %2295 = vmatprep.subr.bf16.mxu1 %v2340_v10  ;;  %v2370_v43 = vld [vmem:[%s2512_s26 + $0x84] ss:$8 sps:$4 sm:$0xff]   ;;  %v2372_v44 = vld [vmem:[%s2512_s26 + $0x80] ss:$8 sps:$4 sm:$0xff]   ;;  %v2373_v45 = vld [vmem:[%s2512_s26 + $0x94] ss:$8 sps:$4 sm:$0xff]  }
  0x1a   : > { %v2375_v46 = vld [vmem:[%s2512_s26 + $0x90] ss:$8 sps:$4 sm:$0xff]   ;;  %v2379_v47 = vld [vmem:[%s2512_s26 + $0xa4] ss:$8 sps:$4 sm:$0xff]   ;;  %v2381_v48 = vld [vmem:[%s2512_s26 + $0xa0] ss:$8 sps:$4 sm:$0xff]  }
  0x1b   : > { %v2385_v49 = vld [vmem:[%s2512_s26 + $0xb4] ss:$8 sps:$4 sm:$0xff]   ;;  %v2387_v51 = vld [vmem:[%s2512_s26 + $0xb0] ss:$8 sps:$4 sm:$0xff]  }
  0x1c   : > { %2117 = vmatpush3.bf16.msra.mxu0 %v2341_v12  ;;  %2303 = vmatpush3.bf16.msra.mxu1 %v2341_v12 }
  0x1d   : > { %2118 = vmatprep.subr.bf16.mxu0 %v2342_v13  ;;  %2296 = vmatprep.subr.bf16.mxu1 %v2342_v13 }
  0x20   : > { %2119 = vmatpush3.bf16.msra.mxu0 %v2343_v14  ;;  %2304 = vmatpush3.bf16.msra.mxu1 %v2343_v14 }
  0x21   : > { %2120 = vmatprep.subr.bf16.mxu0 %v2344_v15  ;;  %2297 = vmatprep.subr.bf16.mxu1 %v2344_v15 }
  0x24   : > { %2121 = vmatpush3.bf16.msra.mxu0 %v2345_v16  ;;  %2305 = vmatpush3.bf16.msra.mxu1 %v2345_v16 }
  0x25   : > { %2242 = vmatprep.subr.bf16.mxu1 %v2394_v26 }
  0x27   : > { %744 = vmatmul.mubr.bf16.vlgmr.msra.gmra.mrb[0].mxu0 %v2346_v17  ;;  %840 = vmatmul.mubr.bf16.vlgmr.msra.gmra.mrb[0].mxu1 %v2376_v20 }
  0x28   : > { %751 = vmatprep.mubr.bf16.mxu0 %v2349_v19  ;;  %847 = vmatprep.mubr.bf16.mxu1 %v2382_v21 }
  0x29   : > { %2243 = vmatpush3.bf16.msra.mxu1 %v2394_v26 }
  0x2a   : > { %2244 = vmatprep.subr.bf16.mxu1 %v2395_v27 }
  0x2d   : > { %2245 = vmatpush3.bf16.msra.mxu1 %v2395_v27 }
  0x2e   : > { %2246 = vmatprep.subr.bf16.mxu1 %v2396_v28 }
  0x2f   : > { %752 = vmatmul.mubr.bf16.gmra.mrb[4].mxu0 %v2351_v22  ;;  %848 = vmatmul.mubr.bf16.gmra.mrb[4].mxu1 %v2384_v24 }
  0x30   : > { %759 = vmatprep.mubr.bf16.mxu0 %v2352_v23  ;;  %855 = vmatprep.mubr.bf16.mxu1 %v2388_v25 }
  0x31   : > { %2247 = vmatpush3.bf16.msra.mxu1 %v2396_v28 }
  0x32   : > { %2248 = vmatprep.subr.bf16.mxu1 %v2397_v50 }
  0x35   : > { %2249 = vmatpush3.bf16.msra.mxu1 %v2397_v50 }
  0x36   : > { %2250 = vmatprep.subr.bf16.mxu1 %v2398_v52 }
  0x37   : > { %760 = vmatmul.mubr.bf16.gmra.mrb[8].mxu0 %v2354_v29  ;;  %856 = vmatmul.mubr.bf16.gmra.mrb[8].mxu1 %v2390_v31 }
  0x38   : > { %767 = vmatprep.mubr.bf16.mxu0 %v2355_v30  ;;  %863 = vmatprep.mubr.bf16.mxu1 %v2391_v32 }
  0x39   : > { %2251 = vmatpush3.bf16.msra.mxu1 %v2398_v52 }
  0x3a   : > { %2252 = vmatprep.subr.bf16.mxu1 %v2399_v53 }
  0x3d   : > { %2253 = vmatpush3.bf16.msra.mxu1 %v2399_v53 }
  0x3e   : > { %2254 = vmatprep.subr.bf16.mxu1 %v2400_v54 }
  0x3f   : > { %768 = vmatmul.mubr.bf16.gmra.mrb[12].mxu0 %v2357_v33  ;;  %864 = vmatmul.mubr.bf16.gmra.mrb[12].mxu1 %v2393_v35 }
  0x40   : > { %775 = vmatprep.mubr.bf16.mxu0 %v2358_v34 }
  0x41   : > { %2255 = vmatpush3.bf16.msra.mxu1 %v2400_v54 }
  0x42   : > { %2256 = vmatprep.subr.bf16.mxu1 %v2401_v55 }
  0x45   : > { %2257 = vmatpush3.bf16.msra.mxu1 %v2401_v55 }
  0x47   : > { %776 = vmatmul.mubr.bf16.gmra.mrb[16].mxu0 %v2360_v36 }
  0x48   : > { %783 = vmatprep.mubr.bf16.mxu0 %v2361_v37 }
  0x4f   : > { %784 = vmatmul.mubr.bf16.gmra.mrb[20].mxu0 %v2363_v38 }
  0x50   : > { %791 = vmatprep.mubr.bf16.mxu0 %v2364_v39 }
  0x57   : > { %792 = vmatmul.mubr.bf16.gmra.mrb[24].mxu0 %v2366_v40 }
  0x58   : > { %799 = vmatprep.mubr.bf16.mxu0 %v2367_v41 }
  0x5f   : > { %800 = vmatmul.mubr.bf16.gmra.mrb[28].mxu0 %v2369_v42 }
  0x60   : > { %807 = vmatprep.mubr.bf16.mxu0 %v2370_v43 }
  0x67   : > { %808 = vmatmul.mubr.bf16.gmra.mrb[32].mxu0 %v2372_v44 }
  0x68   : > { %815 = vmatprep.mubr.bf16.mxu0 %v2373_v45 }
  0x6f   : > { %816 = vmatmul.mubr.bf16.gmra.mrb[36].mxu0 %v2375_v46 }
  0x70   : > { %823 = vmatprep.mubr.bf16.mxu0 %v2379_v47 }
  0x77   : > { %824 = vmatmul.mubr.bf16.gmra.mrb[40].mxu0 %v2381_v48 }
  0x78   : > { %831 = vmatprep.mubr.bf16.mxu0 %v2385_v49 }
  0x7f   : > { %832 = vmatmul.mubr.bf16.gmra.mrb[44].mxu0 %v2387_v51 }
  0xfa   : > { %v2122_v56 = vpop.f32.mrb[0].mxu0  ;;  %v2194_v59 = vpop.f32.mrb[0].mxu1 }
  0xfb   : > { %v2123_v57 = vpop.f32.mrb[1].mxu0  ;;  %v2195_v62 = vpop.f32.mrb[1].mxu1 }
  0xfc   : > { %v2124_v60 = vadd.f32 %v2123_v57, %v2122_v56  ;;  %v2125_v61 = vpop.f32.mrb[2].mxu0  ;;  %v2196_v0 = vadd.f32 %v2195_v62, %v2194_v59  ;;  %v2197_v1 = vpop.f32.mrb[2].mxu1 }
  0xfd   : > { %v2126_v63 = vpop.f32.mrb[3].mxu0  ;;  %v2198_v4 = vpop.f32.mrb[3].mxu1 }
  0xfe   : > { %v978_v2 = vadd.f32 %v2124_v60, %v2594_v58  ;;  %v2127_v3 = vadd.f32 %v2126_v63, %v2125_v61  ;;  %v1002_v5 = vadd.f32 %v2196_v0, %v2594_v58  ;;  %v2199_v6 = vadd.f32 %v2198_v4, %v2197_v1 }
 0x100   : > { %v979_v7 = vadd.f32 %v2127_v3, %v2594_v58  ;;  %v1034_v8 = vmax.f32 %v1002_v5, 0.0  ;;  %v1003_v9 = vadd.f32 %v2199_v6, %v2594_v58  ;;  %v1010_v10 = vmax.f32 %v978_v2, 0.0 }
 0x102   : > { %v1011_v11 = vmax.f32 %v979_v7, 0.0  ;;  %v2128_v12 = vpop.f32.mrb[4].mxu0  ;;  %v1035_v14 = vmax.f32 %v1003_v9, 0.0  ;;  %v2200_v15 = vpop.f32.mrb[4].mxu1 }
 0x103   : > { %v2129_v13 = vpop.f32.mrb[5].mxu0  ;;  %v2201_v19 = vpop.f32.mrb[5].mxu1 }
 0x104   : > { %v2130_v16 = vadd.f32 %v2129_v13, %v2128_v12  ;;  %v2131_v17 = vpop.f32.mrb[6].mxu0  ;;  %v1042_v18 = vpack.c.bf16 %v1011_v11, %v1010_v10  ;;  %v2202_v21 = vadd.f32 %v2201_v19, %v2200_v15  ;;  %v2203_v22 = vpop.f32.mrb[6].mxu1  ;;  %v2608_v23 = vpack.c.bf16 %v1035_v14, %v1034_v8 }
 0x105   : > { %v2132_v20 = vpop.f32.mrb[7].mxu0  ;;  %v2204_v26 = vpop.f32.mrb[7].mxu1 }
 0x106   : > { %v980_v24 = vadd.f32 %v2130_v16, %v2594_v58  ;;  %v2133_v25 = vadd.f32 %v2132_v20, %v2131_v17  ;;  %1920 = vst [vmem:[%s2606_s19] sm:$0xff] %v1042_v18   ;;  %2258 = vmatprep.mubr.bf16.mxu1 %v1042_v18  ;;  %v1004_v27 = vadd.f32 %v2202_v21, %v2594_v58  ;;  %2087 = vst [vmem:[%s2606_s19 + $0x60] sm:$0xff] %v2608_v23  }
 0x107   : > { %v2205_v28 = vadd.f32 %v2204_v26, %v2203_v22 }
 0x108   : > { %v981_v29 = vadd.f32 %v2133_v25, %v2594_v58  ;;  %v1036_v30 = vmax.f32 %v1004_v27, 0.0  ;;  %v1012_v32 = vmax.f32 %v980_v24, 0.0 }
 0x109   : > { %v1005_v31 = vadd.f32 %v2205_v28, %v2594_v58 }
 0x10a   : > { %v1013_v33 = vmax.f32 %v981_v29, 0.0  ;;  %v2134_v34 = vpop.f32.mrb[8].mxu0  ;;  %v2206_v37 = vpop.f32.mrb[8].mxu1 }
 0x10b   : > { %v2135_v35 = vpop.f32.mrb[9].mxu0  ;;  %v1037_v36 = vmax.f32 %v1005_v31, 0.0  ;;  %v2207_v41 = vpop.f32.mrb[9].mxu1 }
 0x10c   : > { %v1043_v38 = vpack.c.bf16 %v1013_v33, %v1012_v32  ;;  %v2136_v39 = vadd.f32 %v2135_v35, %v2134_v34  ;;  %v2137_v40 = vpop.f32.mrb[10].mxu0  ;;  %v2208_v43 = vadd.f32 %v2207_v41, %v2206_v37  ;;  %v2209_v44 = vpop.f32.mrb[10].mxu1 }
 0x10d   : > { %v2138_v42 = vpop.f32.mrb[11].mxu0  ;;  %v2617_v45 = vpack.c.bf16 %v1037_v36, %v1036_v30  ;;  %v2210_v48 = vpop.f32.mrb[11].mxu1 }
 0x10e   : > { %2076 = vst [vmem:[%s2606_s19 + $0x8] sm:$0xff] %v1043_v38   ;;  %v982_v46 = vadd.f32 %v2136_v39, %v2594_v58  ;;  %v2139_v47 = vadd.f32 %v2138_v42, %v2137_v40  ;;  %2259 = vmatmul.mubr.bf16.vlgmr.msra.gmra.mrb[16].mxu1 %v1043_v38  ;;  %v1006_v49 = vadd.f32 %v2208_v43, %v2594_v58 }
 0x10f   : > { %v2211_v50 = vadd.f32 %v2210_v48, %v2209_v44  ;;  %2088 = vst [vmem:[%s2606_s19 + $0x68] sm:$0xff] %v2617_v45  }
 0x110   : > { %v983_v51 = vadd.f32 %v2139_v47, %v2594_v58  ;;  %v1038_v52 = vmax.f32 %v1006_v49, 0.0  ;;  %v1014_v54 = vmax.f32 %v982_v46, 0.0 }
 0x111   : > { %v1007_v53 = vadd.f32 %v2211_v50, %v2594_v58 }
 0x112   : > { %v1015_v55 = vmax.f32 %v983_v51, 0.0  ;;  %v2140_v56 = vpop.f32.mrb[12].mxu0  ;;  %v2212_v60 = vpop.f32.mrb[12].mxu1 }
 0x113   : > { %v2141_v57 = vpop.f32.mrb[13].mxu0  ;;  %v1039_v59 = vmax.f32 %v1007_v53, 0.0  ;;  %v2213_v0 = vpop.f32.mrb[13].mxu1 }
 0x114   : > { %v2142_v61 = vadd.f32 %v2141_v57, %v2140_v56  ;;  %v2143_v62 = vpop.f32.mrb[14].mxu0  ;;  %v1044_v63 = vpack.c.bf16 %v1015_v55, %v1014_v54  ;;  %v2214_v2 = vadd.f32 %v2213_v0, %v2212_v60  ;;  %v2215_v3 = vpop.f32.mrb[14].mxu1 }
 0x115   : > { %v2144_v1 = vpop.f32.mrb[15].mxu0  ;;  %v2626_v4 = vpack.c.bf16 %v1039_v59, %v1038_v52  ;;  %v2216_v7 = vpop.f32.mrb[15].mxu1 }
 0x116   : > { %v984_v5 = vadd.f32 %v2142_v61, %v2594_v58  ;;  %v2145_v6 = vadd.f32 %v2144_v1, %v2143_v62  ;;  %2077 = vst [vmem:[%s2606_s19 + $0x10] sm:$0xff] %v1044_v63   ;;  %2262 = vmatprep.mubr.bf16.mxu1 %v1044_v63  ;;  %v1008_v8 = vadd.f32 %v2214_v2, %v2594_v58 }
 0x117   : > { %v2217_v9 = vadd.f32 %v2216_v7, %v2215_v3  ;;  %2089 = vst [vmem:[%s2606_s19 + $0x70] sm:$0xff] %v2626_v4  }
 0x118   : > { %v985_v10 = vadd.f32 %v2145_v6, %v2594_v58  ;;  %v1040_v11 = vmax.f32 %v1008_v8, 0.0  ;;  %v1016_v13 = vmax.f32 %v984_v5, 0.0 }
 0x119   : > { %v1009_v12 = vadd.f32 %v2217_v9, %v2594_v58 }
 0x11a   : > { %v1017_v14 = vmax.f32 %v985_v10, 0.0  ;;  %v2146_v15 = vpop.f32.mrb[16].mxu0 }
 0x11b   : > { %v2147_v16 = vpop.f32.mrb[17].mxu0  ;;  %v1041_v17 = vmax.f32 %v1009_v12, 0.0 }
 0x11c   : > { %v2148_v18 = vadd.f32 %v2147_v16, %v2146_v15  ;;  %v2149_v19 = vpop.f32.mrb[18].mxu0  ;;  %v1045_v20 = vpack.c.bf16 %v1017_v14, %v1016_v13 }
 0x11d   : > { %v2150_v21 = vpop.f32.mrb[19].mxu0  ;;  %v2635_v22 = vpack.c.bf16 %v1041_v17, %v1040_v11 }
 0x11e   : > { %v986_v24 = vadd.f32 %v2148_v18, %v2594_v58  ;;  %v2151_v25 = vadd.f32 %v2150_v21, %v2149_v19  ;;  %2078 = vst [vmem:[%s2606_s19 + $0x18] sm:$0xff] %v1045_v20   ;;  %2263 = vmatmul.mubr.bf16.gmra.mrb[20].mxu1 %v1045_v20 }
 0x11f   : > { %2090 = vst [vmem:[%s2606_s19 + $0x78] sm:$0xff] %v2635_v22  }
 0x120   : > { %v987_v26 = vadd.f32 %v2151_v25, %v2594_v58  ;;  %v1018_v27 = vmax.f32 %v986_v24, 0.0 }
 0x122   : > { %v1019_v28 = vmax.f32 %v987_v26, 0.0  ;;  %v2152_v29 = vpop.f32.mrb[20].mxu0 }
 0x123   : > { %v2153_v30 = vpop.f32.mrb[21].mxu0 }
 0x124   : > { %v2154_v31 = vadd.f32 %v2153_v30, %v2152_v29  ;;  %v2155_v32 = vpop.f32.mrb[22].mxu0  ;;  %v1046_v33 = vpack.c.bf16 %v1019_v28, %v1018_v27 }
 0x125   : > { %v2156_v34 = vpop.f32.mrb[23].mxu0 }
 0x126   : > { %v988_v35 = vadd.f32 %v2154_v31, %v2594_v58  ;;  %v2157_v36 = vadd.f32 %v2156_v34, %v2155_v32  ;;  %2079 = vst [vmem:[%s2606_s19 + $0x20] sm:$0xff] %v1046_v33   ;;  %2266 = vmatprep.mubr.bf16.mxu1 %v1046_v33 }
 0x128   : > { %v989_v37 = vadd.f32 %v2157_v36, %v2594_v58  ;;  %v1020_v38 = vmax.f32 %v988_v35, 0.0 }
 0x12a   : > { %v1021_v39 = vmax.f32 %v989_v37, 0.0  ;;  %v2158_v40 = vpop.f32.mrb[24].mxu0 }
 0x12b   : > { %v2159_v41 = vpop.f32.mrb[25].mxu0 }
 0x12c   : > { %v2160_v42 = vadd.f32 %v2159_v41, %v2158_v40  ;;  %v2161_v43 = vpop.f32.mrb[26].mxu0  ;;  %v1047_v44 = vpack.c.bf16 %v1021_v39, %v1020_v38 }
 0x12d   : > { %v2162_v46 = vpop.f32.mrb[27].mxu0 }
 0x12e   : > { %v990_v47 = vadd.f32 %v2160_v42, %v2594_v58  ;;  %v2163_v48 = vadd.f32 %v2162_v46, %v2161_v43  ;;  %2080 = vst [vmem:[%s2606_s19 + $0x28] sm:$0xff] %v1047_v44   ;;  %2267 = vmatmul.mubr.bf16.gmra.mrb[24].mxu1 %v1047_v44 }
 0x130   : > { %v991_v49 = vadd.f32 %v2163_v48, %v2594_v58  ;;  %v1022_v50 = vmax.f32 %v990_v47, 0.0 }
 0x132   : > { %v1023_v51 = vmax.f32 %v991_v49, 0.0  ;;  %v2164_v52 = vpop.f32.mrb[28].mxu0 }
 0x133   : > { %v2165_v53 = vpop.f32.mrb[29].mxu0 }
 0x134   : > { %v2166_v54 = vadd.f32 %v2165_v53, %v2164_v52  ;;  %v2167_v55 = vpop.f32.mrb[30].mxu0  ;;  %v1048_v56 = vpack.c.bf16 %v1023_v51, %v1022_v50  ;;  %v2671_v50 = vld [vmem:[%s2741_s4] ss:$0 sm:$0xff] }
 0x135   : > { %v2168_v57 = vpop.f32.mrb[31].mxu0 }
 0x136   : > { %v992_v59 = vadd.f32 %v2166_v54, %v2594_v58  ;;  %v2169_v60 = vadd.f32 %v2168_v57, %v2167_v55  ;;  %2081 = vst [vmem:[%s2606_s19 + $0x30] sm:$0xff] %v1048_v56   ;;  %2270 = vmatprep.mubr.bf16.mxu1 %v1048_v56 }
 0x138   : > { %v993_v61 = vadd.f32 %v2169_v60, %v2594_v58  ;;  %v1024_v62 = vmax.f32 %v992_v59, 0.0 }
 0x13a   : > { %v1025_v63 = vmax.f32 %v993_v61, 0.0  ;;  %v2170_v0 = vpop.f32.mrb[32].mxu0 }
 0x13b   : > { %v2171_v1 = vpop.f32.mrb[33].mxu0 }
 0x13c   : > { %v2172_v2 = vadd.f32 %v2171_v1, %v2170_v0  ;;  %v2173_v3 = vpop.f32.mrb[34].mxu0  ;;  %v1049_v5 = vpack.c.bf16 %v1025_v63, %v1024_v62 }
 0x13d   : > { %v2174_v6 = vpop.f32.mrb[35].mxu0 }
 0x13e   : > { %v994_v7 = vadd.f32 %v2172_v2, %v2594_v58  ;;  %v2175_v8 = vadd.f32 %v2174_v6, %v2173_v3  ;;  %2082 = vst [vmem:[%s2606_s19 + $0x38] sm:$0xff] %v1049_v5   ;;  %2271 = vmatmul.mubr.bf16.gmra.mrb[28].mxu1 %v1049_v5 }
 0x140   : > { %v995_v9 = vadd.f32 %v2175_v8, %v2594_v58  ;;  %v1026_v10 = vmax.f32 %v994_v7, 0.0 }
 0x142   : > { %v1027_v11 = vmax.f32 %v995_v9, 0.0  ;;  %v2176_v12 = vpop.f32.mrb[36].mxu0 }
 0x143   : > { %v2177_v13 = vpop.f32.mrb[37].mxu0 }
 0x144   : > { %v2178_v14 = vadd.f32 %v2177_v13, %v2176_v12  ;;  %v2179_v15 = vpop.f32.mrb[38].mxu0  ;;  %v1050_v16 = vpack.c.bf16 %v1027_v11, %v1026_v10 }
 0x145   : > { %v2180_v17 = vpop.f32.mrb[39].mxu0 }
 0x146   : > { %v996_v18 = vadd.f32 %v2178_v14, %v2594_v58  ;;  %v2181_v19 = vadd.f32 %v2180_v17, %v2179_v15  ;;  %2083 = vst [vmem:[%s2606_s19 + $0x40] sm:$0xff] %v1050_v16   ;;  %2274 = vmatprep.mubr.bf16.mxu1 %v1050_v16 }
 0x148   : > { %v997_v20 = vadd.f32 %v2181_v19, %v2594_v58  ;;  %v1028_v21 = vmax.f32 %v996_v18, 0.0 }
 0x14a   : > { %v1029_v24 = vmax.f32 %v997_v20, 0.0  ;;  %v2182_v25 = vpop.f32.mrb[40].mxu0 }
 0x14b   : > { %v2183_v26 = vpop.f32.mrb[41].mxu0 }
 0x14c   : > { %v2184_v27 = vadd.f32 %v2183_v26, %v2182_v25  ;;  %v2185_v28 = vpop.f32.mrb[42].mxu0  ;;  %v1051_v29 = vpack.c.bf16 %v1029_v24, %v1028_v21 }
 0x14d   : > { %v2186_v30 = vpop.f32.mrb[43].mxu0 }
 0x14e   : > { %v998_v31 = vadd.f32 %v2184_v27, %v2594_v58  ;;  %v2187_v32 = vadd.f32 %v2186_v30, %v2185_v28  ;;  %2084 = vst [vmem:[%s2606_s19 + $0x48] sm:$0xff] %v1051_v29   ;;  %2275 = vmatmul.mubr.bf16.gmra.mrb[32].mxu1 %v1051_v29 }
 0x150   : > { %v999_v33 = vadd.f32 %v2187_v32, %v2594_v58  ;;  %v1030_v34 = vmax.f32 %v998_v31, 0.0 }
 0x152   : > { %v1031_v35 = vmax.f32 %v999_v33, 0.0  ;;  %v2188_v36 = vpop.f32.mrb[44].mxu0 }
 0x153   : > { %v2189_v37 = vpop.f32.mrb[45].mxu0 }
 0x154   : > { %v2190_v38 = vadd.f32 %v2189_v37, %v2188_v36  ;;  %v2191_v39 = vpop.f32.mrb[46].mxu0  ;;  %v1052_v40 = vpack.c.bf16 %v1031_v35, %v1030_v34 }
 0x155   : > { %v2192_v41 = vpop.f32.mrb[47].mxu0 }
 0x156   : > { %v1000_v42 = vadd.f32 %v2190_v38, %v2594_v58  ;;  %v2193_v43 = vadd.f32 %v2192_v41, %v2191_v39  ;;  %2085 = vst [vmem:[%s2606_s19 + $0x50] sm:$0xff] %v1052_v40   ;;  %2278 = vmatprep.mubr.bf16.mxu1 %v1052_v40 }
 0x158   : > { %v1001_v44 = vadd.f32 %v2193_v43, %v2594_v58  ;;  %v1032_v46 = vmax.f32 %v1000_v42, 0.0 }
 0x15a   : > { %v1033_v47 = vmax.f32 %v1001_v44, 0.0 }
 0x15c   : > { %v1053_v48 = vpack.c.bf16 %v1033_v47, %v1032_v46 }
 0x15e   : > { %2086 = vst [vmem:[%s2606_s19 + $0x58] sm:$0xff] %v1053_v48   ;;  %2279 = vmatmul.mubr.bf16.gmra.mrb[36].mxu1 %v1053_v48 }
 0x15f   : > { %2282 = vmatprep.mubr.bf16.mxu1 %v2608_v23 }
 0x166   : > { %2283 = vmatmul.mubr.bf16.gmra.mrb[40].mxu1 %v2617_v45 }
 0x167   : > { %2286 = vmatprep.mubr.bf16.mxu1 %v2626_v4 }
 0x16e   : > { %2287 = vmatmul.mubr.bf16.gmra.mrb[44].mxu1 %v2635_v22 }
 0x1e1   : > { %v2260_v49 = vpop.f32.mrb[16].mxu1 }
 0x1e2   : > { %v1307_v58 = vpop.f32.mrb[17].mxu1  ;;  %v1316_v52 = vadd.f32 %v2260_v49, %v2671_v50 }
 0x1e3   : > { %v2261_v51 = vpop.f32.mrb[18].mxu1  ;;  %v1308_v23 = vadd.f32 %v2671_v50, %v1307_v58 }
 0x1e4   : > { %v1319_v53 = vadd.f32 %v2261_v51, %v2671_v50  ;;  %v1310_v54 = vpop.f32.mrb[19].mxu1 }
 0x1e5   : > { %v1311_v45 = vadd.f32 %v2671_v50, %v1310_v54 }
 0x1e6   : > { %v2004_v4 = vpack.c.bf16 %v1319_v53, %v1316_v52 }
 0x1e7   : > { %v1999_v22 = vpack.c.bf16 %v1311_v45, %v1308_v23 }
 0x1e8   : > { %2091 = vst [vmem:[%s2681_s29 + $0x8] sm:$0xff] %v2004_v4  }
 0x1e9   : > { %2000 = vst [vmem:[%s2681_s29] sm:$0xff] %v1999_v22  }
 0x1f1   : > { %v2264_v55 = vpop.f32.mrb[20].mxu1 }
 0x1f2   : > { %v1323_v56 = vpop.f32.mrb[21].mxu1  ;;  %v1332_v59 = vadd.f32 %v2264_v55, %v2671_v50 }
 0x1f3   : > { %v2265_v57 = vpop.f32.mrb[22].mxu1  ;;  %v1324_v62 = vadd.f32 %v2671_v50, %v1323_v56 }
 0x1f4   : > { %v1335_v60 = vadd.f32 %v2265_v57, %v2671_v50  ;;  %v1326_v61 = vpop.f32.mrb[23].mxu1 }
 0x1f5   : > { %v1327_v63 = vadd.f32 %v2671_v50, %v1326_v61 }
 0x1f6   : > { %v2014_v0 = vpack.c.bf16 %v1335_v60, %v1332_v59 }
 0x1f7   : > { %v2009_v1 = vpack.c.bf16 %v1327_v63, %v1324_v62 }
 0x1f8   : > { %2093 = vst [vmem:[%s2681_s29 + $0x18] sm:$0xff] %v2014_v0  }
 0x1f9   : > { %2092 = vst [vmem:[%s2681_s29 + $0x10] sm:$0xff] %v2009_v1  }
 0x201   : > { %v2268_v2 = vpop.f32.mrb[24].mxu1 }
 0x202   : > { %v1339_v3 = vpop.f32.mrb[25].mxu1  ;;  %v1348_v6 = vadd.f32 %v2268_v2, %v2671_v50 }
 0x203   : > { %v2269_v5 = vpop.f32.mrb[26].mxu1  ;;  %v1340_v9 = vadd.f32 %v2671_v50, %v1339_v3 }
 0x204   : > { %v1351_v7 = vadd.f32 %v2269_v5, %v2671_v50  ;;  %v1342_v8 = vpop.f32.mrb[27].mxu1 }
 0x205   : > { %v1343_v10 = vadd.f32 %v2671_v50, %v1342_v8 }
 0x206   : > { %v2024_v11 = vpack.c.bf16 %v1351_v7, %v1348_v6 }
 0x207   : > { %v2019_v12 = vpack.c.bf16 %v1343_v10, %v1340_v9 }
 0x208   : > { %2095 = vst [vmem:[%s2681_s29 + $0x28] sm:$0xff] %v2024_v11  }
 0x209   : > { %2094 = vst [vmem:[%s2681_s29 + $0x20] sm:$0xff] %v2019_v12  }
 0x211   : > { %v2272_v13 = vpop.f32.mrb[28].mxu1 }
 0x212   : > { %v1355_v14 = vpop.f32.mrb[29].mxu1  ;;  %v1364_v16 = vadd.f32 %v2272_v13, %v2671_v50 }
 0x213   : > { %v2273_v15 = vpop.f32.mrb[30].mxu1  ;;  %v1356_v19 = vadd.f32 %v2671_v50, %v1355_v14 }
 0x214   : > { %v1367_v17 = vadd.f32 %v2273_v15, %v2671_v50  ;;  %v1358_v18 = vpop.f32.mrb[31].mxu1 }
 0x215   : > { %v1359_v20 = vadd.f32 %v2671_v50, %v1358_v18 }
 0x216   : > { %v2034_v21 = vpack.c.bf16 %v1367_v17, %v1364_v16 }
 0x217   : > { %v2029_v24 = vpack.c.bf16 %v1359_v20, %v1356_v19 }
 0x218   : > { %2097 = vst [vmem:[%s2681_s29 + $0x38] sm:$0xff] %v2034_v21  }
 0x219   : > { %2096 = vst [vmem:[%s2681_s29 + $0x30] sm:$0xff] %v2029_v24  }
 0x221   : > { %v2276_v25 = vpop.f32.mrb[32].mxu1 }
 0x222   : > { %v1371_v26 = vpop.f32.mrb[33].mxu1  ;;  %v1380_v28 = vadd.f32 %v2276_v25, %v2671_v50 }
 0x223   : > { %v2277_v27 = vpop.f32.mrb[34].mxu1  ;;  %v1372_v31 = vadd.f32 %v2671_v50, %v1371_v26 }
 0x224   : > { %v1383_v29 = vadd.f32 %v2277_v27, %v2671_v50  ;;  %v1374_v30 = vpop.f32.mrb[35].mxu1 }
 0x225   : > { %v1375_v32 = vadd.f32 %v2671_v50, %v1374_v30 }
 0x226   : > { %v2044_v33 = vpack.c.bf16 %v1383_v29, %v1380_v28 }
 0x227   : > { %v2039_v34 = vpack.c.bf16 %v1375_v32, %v1372_v31 }
 0x228   : > { %2099 = vst [vmem:[%s2681_s29 + $0x48] sm:$0xff] %v2044_v33  }
 0x229   : > { %2098 = vst [vmem:[%s2681_s29 + $0x40] sm:$0xff] %v2039_v34  }
 0x231   : > { %v2280_v35 = vpop.f32.mrb[36].mxu1 }
 0x232   : > { %v1387_v36 = vpop.f32.mrb[37].mxu1  ;;  %v1396_v38 = vadd.f32 %v2280_v35, %v2671_v50 }
 0x233   : > { %v2281_v37 = vpop.f32.mrb[38].mxu1  ;;  %v1388_v41 = vadd.f32 %v2671_v50, %v1387_v36 }
 0x234   : > { %v1399_v39 = vadd.f32 %v2281_v37, %v2671_v50  ;;  %v1390_v40 = vpop.f32.mrb[39].mxu1 }
 0x235   : > { %v1391_v42 = vadd.f32 %v2671_v50, %v1390_v40 }
 0x236   : > { %v2054_v43 = vpack.c.bf16 %v1399_v39, %v1396_v38 }
 0x237   : > { %v2049_v44 = vpack.c.bf16 %v1391_v42, %v1388_v41 }
 0x238   : > { %2101 = vst [vmem:[%s2681_s29 + $0x58] sm:$0xff] %v2054_v43  }
 0x239   : > { %2100 = vst [vmem:[%s2681_s29 + $0x50] sm:$0xff] %v2049_v44   ;;  %v2284_v46 = vpop.f32.mrb[40].mxu1 }
 0x23a   : > { %v1403_v47 = vpop.f32.mrb[41].mxu1  ;;  %v1412_v49 = vadd.f32 %v2284_v46, %v2671_v50 }
 0x23b   : > { %v2285_v48 = vpop.f32.mrb[42].mxu1  ;;  %v1404_v52 = vadd.f32 %v2671_v50, %v1403_v47 }
 0x23c   : > { %v1415_v58 = vadd.f32 %v2285_v48, %v2671_v50  ;;  %v1406_v51 = vpop.f32.mrb[43].mxu1 }
 0x23d   : > { %v1407_v53 = vadd.f32 %v2671_v50, %v1406_v51 }
 0x23e   : > { %v2064_v54 = vpack.c.bf16 %v1415_v58, %v1412_v49 }
 0x23f   : > { %v2059_v23 = vpack.c.bf16 %v1407_v53, %v1404_v52 }
 0x240   : > { %2103 = vst [vmem:[%s2681_s29 + $0x68] sm:$0xff] %v2064_v54  }
 0x241   : > { %2102 = vst [vmem:[%s2681_s29 + $0x60] sm:$0xff] %v2059_v23   ;;  %v2288_v45 = vpop.f32.mrb[44].mxu1 }
 0x242   : > { %v1419_v4 = vpop.f32.mrb[45].mxu1  ;;  %v1428_v55 = vadd.f32 %v2288_v45, %v2671_v50 }
 0x243   : > { %v2289_v22 = vpop.f32.mrb[46].mxu1  ;;  %v1420_v59 = vadd.f32 %v2671_v50, %v1419_v4 }
 0x244   : > { %v1431_v56 = vadd.f32 %v2289_v22, %v2671_v50  ;;  %v1422_v57 = vpop.f32.mrb[47].mxu1 }
 0x245   : > { %v1423_v60 = vadd.f32 %v2671_v50, %v1422_v57 }
 0x246   : > { %v2074_v61 = vpack.c.bf16 %v1431_v56, %v1428_v55 }
 0x247   : > { %v2069_v62 = vpack.c.bf16 %v1423_v60, %v1420_v59 }
 0x248   : > { %2105 = vst [vmem:[%s2681_s29 + $0x78] sm:$0xff] %v2074_v61  }
 0x249   : > { %2104 = vst [vmem:[%s2681_s29 + $0x70] sm:$0xff] %v2069_v62  }
 0x24a PF: > { %s17_s23 = sadd.s32 1, %s2424_s23   ;;  %s2744_s21 = smov %s2420_s22 }
 0x24b   : > { %p14_p5 = scmp.ge.s32.totalorder %s17_s23, 4   ;;  %s2745_s22 = smov %s2747_s24 }
 0x24d   :  { %16 = sbr.rel (!%p14_p5) target bundleno = 2 (0x2), region = 93 }

// kernel: _lambda_.9
= control target key start
LH: loop header
LB: loop body
LE: loop exit
PB: predicated region body
PF: predicated region fallthrough
CT: control target
= control target key end

     0   :  { %s2770_s12 = smov 0   ;;  %s2772_s13 = smov 0   ;;  %s3299_s0 = inlined_call_operand.vmem [shape: bf16[2,10,10,128], index: 0, kind: input, shape index: {}]   ;;  %s3300_s1 = inlined_call_operand.vmem [shape: bf16[9,128,128], index: 1, kind: input, shape index: {}]   ;;  %s3301_s2 = inlined_call_operand.vmem [shape: f32[1,128], index: 2, kind: input, shape index: {}]   ;;  %s3302_s3 = inlined_call_operand.vmem [shape: bf16[2,64,128], index: 3, kind: output, shape index: {}]  }
   0x1   :  { %s2774_s14 = smov 0  }
   0x2 LB: > { %s25_s15 = sadd.s32 1, %s2744_s13  ;;  %p1932_p0 = scmp.ge.s32.totalorder %s2748_s14, 1  ;;  %s2748_s14 = sphi %s2774_s14, %s13_s14   ;;  %s2744_s13 = sphi %s2772_s13, %s3308_s13   ;;  %s2740_s12 = sphi %s2770_s12, %s3307_s12  }
   0x3   : > { %p27_p1 = scmp.ge.s32.totalorder %s25_s15, 2  ;;  %p168_p2 = scmp.lt.s32.totalorder %s2748_s14, 3 }
   0x5   : > { %s3310_s15 = smov (%p27_p1, %s25_s15), 0  ;;  %p169_p3 = pnand %p1932_p0, %p168_p2 }
   0x6   : > { %v2645_v0 = vld [vmem:[%s3300_s1 + $0x40] sm:$0xff] (!%p169_p3)   ;;  %p202_p4 = scmp.lt.s32.totalorder (!%p169_p3), %s2740_s12, 1  ;;  %v2647_v2 = vld [vmem:[%s3300_s1 + $0x48] sm:$0xff] (!%p169_p3)   ;;  %v2649_v4 = vld [vmem:[%s3300_s1 + $0x50] sm:$0xff] (!%p169_p3)   ;;  %vm259_vm0 = vsmask.f32 (!%p169_p3), 3328 }
   0x7   : > { %172 = sbr.rel (%p169_p3) target bundleno = 393 (0x189), region = 32  ;;  %v2646_v1 = vld [vmem:[%s3300_s1 + $0x100] sm:$0xff] (!%p169_p3)   ;;  %2324 = vmatprep.subr.bf16.mxu1 (!%p169_p3), %v2645_v0  ;;  %v2648_v3 = vld [vmem:[%s3300_s1 + $0x108] sm:$0xff] (!%p169_p3)   ;;  %v2650_v5 = vld [vmem:[%s3300_s1 + $0x110] sm:$0xff] (!%p169_p3)   ;;  %vm260_vm1 = vsmask.f32 (!%p169_p3), 7440 }
   0x8   : > { %2420 = vmatprep.subr.bf16.mxu0 (!%p169_p3), %v2646_v1  ;;  %2325 = vmatpush3.bf16.msra.mxu1 (!%p169_p3), %v2645_v0  ;;  %v2651_v6 = vld [vmem:[%s3300_s1 + $0x58] sm:$0xff] (!%p169_p3)   ;;  %v2653_v8 = vld [vmem:[%s3300_s1 + $0x60] sm:$0xff] (!%p169_p3)   ;;  %v2655_v10 = vld [vmem:[%s3300_s1 + $0x68] sm:$0xff] (!%p169_p3)   ;;  %vm665_vm3 = vcmask (!%p169_p3), 1042432   ;;  %vm666_vm4 = vcmask (!%p169_p3), 1046532  }
   0x9   : > { %2421 = vmatpush3.bf16.msra.mxu0 (!%p169_p3), %v2646_v1  ;;  %2326 = vmatprep.subr.bf16.mxu1 (!%p169_p3), %v2647_v2  ;;  %v2652_v7 = vld [vmem:[%s3300_s1 + $0x118] sm:$0xff] (!%p169_p3)   ;;  %v2654_v9 = vld [vmem:[%s3300_s1 + $0x120] sm:$0xff] (!%p169_p3)   ;;  %v2656_v14 = vld [vmem:[%s3300_s1 + $0x128] sm:$0xff] (!%p169_p3)  }
   0xa   : > { %2422 = vmatprep.subr.bf16.mxu0 (!%p169_p3), %v2648_v3  ;;  %v2657_v22 = vld [vmem:[%s3300_s1 + $0x70] sm:$0xff] (!%p169_p3)   ;;  %v2659_v38 = vld [vmem:[%s3300_s1 + $0x78] sm:$0xff] (!%p169_p3)   ;;  %vm2877_vm2 = vmor (!%p169_p3), %vm259_vm0, %vm260_vm1 }
   0xb   : > { %v2658_v23 = vld [vmem:[%s3300_s1 + $0x130] sm:$0xff] (!%p169_p3)   ;;  %v2660_v48 = vld [vmem:[%s3300_s1 + $0x138] sm:$0xff] (!%p169_p3)   ;;  %v2661_v62 = vld [vmem:[%s3300_s1] sm:$0xff] (!%p169_p3)  }
   0xc   : > { %2327 = vmatpush3.bf16.msra.mxu1 (!%p169_p3), %v2647_v2  ;;  %vm2990_vm5 = vmor (!%p169_p3), %vm665_vm3, %vm666_vm4  ;;  %v2689_v39 = vld [vmem:[%s3300_s1 + $0xa8] sm:$0xff] (!%p169_p3)  }
   0xd   : > { %2423 = vmatpush3.bf16.msra.mxu0 (!%p169_p3), %v2648_v3  ;;  %2328 = vmatprep.subr.bf16.mxu1 (!%p169_p3), %v2649_v4  ;;  %v2662_v3 = vld [vmem:[%s3300_s1 + $0x140] sm:$0xff] (!%p169_p3)  }
   0xe   : > { %s3312_s12 = smov (!%p202_p4, %s2740_s12), 1  ;;  %2424 = vmatprep.subr.bf16.mxu0 %v2650_v5 }
   0xf   : > { %s2620_s5 = smul.u32 80, %s3312_s12  ;;  %s2184_s29 = sshll.u32 %s3312_s12, 5 }
  0x10   : > { %2329 = vmatpush3.bf16.msra.mxu1 %v2649_v4 }
  0x11   : > { %2425 = vmatpush3.bf16.msra.mxu0 %v2650_v5  ;;  %2330 = vmatprep.subr.bf16.mxu1 %v2651_v6  ;;  %s2824_s16 = scalar_lea.vmem %s3299_s0, %s2620_s5  ;;  %s221_s5 = scalar_lea.vmem %s3302_s3, %s2184_s29 }
  0x12   : > { %2426 = vmatprep.subr.bf16.mxu0 %v2652_v7  ;;  %v2830_v11 = vld [vmem:[%s2824_s16] sm:$0xf]  ;;  %v2833_v12 = vld [vmem:[%s2824_s16 + $0x4] sm:$0x1]  ;;  %v2836_v13 = vld [vmem:[%s2824_s16 + $0x8] sm:$0xf] }
  0x13   : > { %v2842_v15 = vld [vmem:[%s2824_s16 + $0xc] sm:$0x1]  ;;  %v263_v16 = vshrl.u32 %v2830_v11, 16  ;;  %v266_v17 = vshll.u32 %v2830_v11, 16  ;;  %v272_v18 = vshll.u32 %v2833_v12, 16  ;;  %v277_v19 = vshrl.u32 %v2836_v13, 16 }
  0x14   : > { %2331 = vmatpush3.bf16.msra.mxu1 %v2651_v6  ;;  %v280_v20 = vshll.u32 %v2836_v13, 16  ;;  %v286_v21 = vshll.u32 %v2842_v15, 16  ;;  %v2857_v30 = vld [vmem:[%s2824_s16 + $0x10] sm:$0xf]  ;;  %v2860_v31 = vld [vmem:[%s2824_s16 + $0x14] sm:$0x1] }
  0x15   : > { %2427 = vmatpush3.bf16.msra.mxu0 %v2652_v7  ;;  %2332 = vmatprep.subr.bf16.mxu1 %v2653_v8  ;;  %v265_v24 = vrot.slane %v263_v16, 4  ;;  %v268_v25 = vrot.slane %v266_v17, 5  ;;  %v274_v26 = vrot.slane %v272_v18, 5  ;;  %v279_v27 = vrot.slane %v277_v19, 4  ;;  %v2863_v33 = vld [vmem:[%s2824_s16 + $0x18] sm:$0xf] }
  0x16   : > { %2428 = vmatprep.subr.bf16.mxu0 %v2654_v9  ;;  %v282_v28 = vrot.slane %v280_v20, 5  ;;  %v288_v29 = vrot.slane %v286_v21, 5  ;;  %v2866_v34 = vld [vmem:[%s2824_s16 + $0x1c] sm:$0x1]  ;;  %v291_v35 = vshrl.u32 %v2857_v30, 16  ;;  %v294_v36 = vshll.u32 %v2857_v30, 16 }
  0x17   : > { %v269_v32 = vor.u32 %v268_v25, %v265_v24  ;;  %v2028_v37 = vcombine.low %v2836_v13, %v2857_v30  ;;  %v300_v41 = vshll.u32 %v2860_v31, 16  ;;  %v305_v42 = vshrl.u32 %v2863_v33, 16  ;;  %v2889_v52 = vld [vmem:[%s2824_s16 + $0x20] sm:$0xf]  ;;  %v2894_v56 = vld [vmem:[%s2824_s16 + $0x24] sm:$0x1] }
  0x18   : > { %2333 = vmatpush3.bf16.msra.mxu1 %v2653_v8  ;;  %v283_v40 = vor.u32 %v282_v28, %v279_v27  ;;  %v308_v43 = vshll.u32 %v2863_v33, 16  ;;  %v293_v45 = vrot.slane %v291_v35, 4  ;;  %v296_v46 = vrot.slane %v294_v36, 5  ;;  %v2663_v17 = vld [vmem:[%s3300_s1 + $0x8] sm:$0xff]   ;;  %v2667_v35 = vld [vmem:[%s3300_s1 + $0x18] sm:$0xff]  }
  0x19   : > { %2429 = vmatpush3.bf16.msra.mxu0 %v2654_v9  ;;  %2334 = vmatprep.subr.bf16.mxu1 %v2655_v10  ;;  %v270_v44 = vrot.slane %v269_v32, 4  ;;  %v314_v47 = vshll.u32 %v2866_v34, 16  ;;  %v307_v50 = vrot.slane %v305_v42, 4  ;;  %v302_v55 = vrot.slane %v300_v41, 5  ;;  %v2664_v24 = vld [vmem:[%s3300_s1 + $0x148] sm:$0xff]   ;;  %v2666_v32 = vld [vmem:[%s3300_s1 + $0x150] sm:$0xff]  }
  0x1a   : > { %2430 = vmatprep.subr.bf16.mxu0 %v2656_v14  ;;  %v284_v49 = vrot.slane %v283_v40, 4  ;;  %v310_v51 = vrot.slane %v308_v43, 5  ;;  %v297_v54 = vor.u32 %v296_v46, %v293_v45  ;;  %v319_v60 = vshrl.u32 %v2889_v52, 16  ;;  %v2930_v25 = vld [vmem:[%s2824_s16 + $0x28] sm:$0xf] }
  0x1b   : > { %v275_v53 = vsel %vm2877_vm2, %v270_v44, %v274_v26  ;;  %v316_v59 = vrot.slane %v314_v47, 5  ;;  %v322_v0 = vshll.u32 %v2889_v52, 16  ;;  %v328_v1 = vshll.u32 %v2894_v56, 16  ;;  %v2934_v27 = vld [vmem:[%s2824_s16 + $0x2c] sm:$0x1] }
  0x1c   : > { %2335 = vmatpush3.bf16.msra.mxu1 %v2655_v10  ;;  %v289_v57 = vsel %vm2877_vm2, %v284_v49, %v288_v29  ;;  %v311_v58 = vor.u32 %v310_v51, %v307_v50  ;;  %v298_v63 = vrot.slane %v297_v54, 4  ;;  %v321_v4 = vrot.slane %v319_v60, 4  ;;  %v2949_v42 = vld [vmem:[%s2824_s16 + $0x34] sm:$0x1]  ;;  %v2668_v54 = vld [vmem:[%s3300_s1 + $0x158] sm:$0xff]  }
  0x1d   : > { %2431 = vmatpush3.bf16.msra.mxu0 %v2656_v14  ;;  %2336 = vmatprep.subr.bf16.mxu1 %v2657_v22  ;;  %v1952_v61 = vcombine.low %v275_v53, %v289_v57  ;;  %v324_v6 = vrot.slane %v322_v0, 5  ;;  %v2029_v7 = vcombine.low %v2863_v33, %v2889_v52  ;;  %v330_v16 = vrot.slane %v328_v1, 5  ;;  %v2958_v53 = vld [vmem:[%s2824_s16 + $0x38] sm:$0xf]  ;;  %v2973_v0 = vld [vmem:[%s2824_s16 + $0x40] sm:$0xf] }
  0x1e   : > { %2432 = vmatprep.subr.bf16.mxu0 %v2658_v23  ;;  %v312_v2 = vrot.slane %v311_v58, 4  ;;  %v303_v5 = vsel %vm2877_vm2, %v298_v63, %v302_v55  ;;  %v674_v19 = vrot.slane %v2842_v15, 5  ;;  %v678_v20 = vrot.slane %v2860_v31, 5  ;;  %v2669_v55 = vld [vmem:[%s3300_s1 + $0x20] sm:$0xff]   ;;  %v2967_v58 = vld [vmem:[%s2824_s16 + $0x3c] sm:$0x1] }
  0x1f   : > { %2340 = vmatprep.mubr.bf16.mxu1 %v1952_v61  ;;  %v2056_v9 = vcombine.low %v289_v57, %v303_v5  ;;  %v325_v14 = vor.u32 %v324_v6, %v321_v4  ;;  %v1977_v26 = vrot.slane %v2836_v13, 9  ;;  %v333_v28 = vshrl.u32 %v2930_v25, 16  ;;  %v2976_v1 = vld [vmem:[%s2824_s16 + $0x44] sm:$0x1]  ;;  %v2672_v15 = vld [vmem:[%s3300_s1 + $0x168] sm:$0xff]  }
  0x20   : > { %2337 = vmatpush3.bf16.msra.mxu1 %v2657_v22  ;;  %v317_v8 = vsel %vm2877_vm2, %v312_v2, %v316_v59  ;;  %v2665_v22 = vld [vmem:[%s3300_s1 + $0x10] sm:$0xff]   ;;  %v336_v29 = vshll.u32 %v2930_v25, 16  ;;  %v342_v36 = vshll.u32 %v2934_v27, 16  ;;  %v356_v45 = vshll.u32 %v2949_v42, 16 }
  0x21   : > { %2433 = vmatpush3.bf16.msra.mxu0 %v2658_v23  ;;  %2338 = vmatprep.subr.bf16.mxu1 %v2659_v38  ;;  %v2913_v10 = vcombine.low %v303_v5, %v317_v8  ;;  %v326_v18 = vrot.slane %v325_v14, 4  ;;  %v335_v40 = vrot.slane %v333_v28, 4  ;;  %v1978_v46 = vrot.slane %v2857_v30, 9  ;;  %v2671_v28 = vld [vmem:[%s3300_s1 + $0x28] sm:$0xff]  }
  0x22   : > { %2434 = vmatprep.subr.bf16.mxu0 %v2660_v48  ;;  %2436 = vmatprep.mubr.bf16.mxu0 %v2056_v9  ;;  %v338_v41 = vrot.slane %v336_v29, 5  ;;  %v344_v49 = vrot.slane %v342_v36, 5  ;;  %v358_v57 = vrot.slane %v356_v45, 5  ;;  %v361_v59 = vshrl.u32 %v2958_v53, 16 }
  0x23   : > { %v331_v21 = vsel %vm2877_vm2, %v326_v18, %v330_v16  ;;  %v364_v60 = vshll.u32 %v2958_v53, 16  ;;  %v370_v63 = vshll.u32 %v2967_v58, 16  ;;  %v1003_v4 = vshrl.u32 %v2973_v0, 16  ;;  %v2670_v16 = vld [vmem:[%s3300_s1 + $0x160] sm:$0xff]  }
  0x24   : > { %2339 = vmatpush3.bf16.msra.mxu1 %v2659_v38  ;;  %v2057_v23 = vcombine.low %v317_v8, %v331_v21  ;;  %v2946_v38 = vld [vmem:[%s2824_s16 + $0x30] sm:$0xf]  ;;  %v363_v2 = vrot.slane %v361_v59, 4  ;;  %v1006_v5 = vshll.u32 %v2973_v0, 16  ;;  %v1012_v14 = vshll.u32 %v2976_v1, 16  ;;  %v2678_v59 = vld [vmem:[%s3300_s1 + $0x80] sm:$0xff]  }
  0x25   : > { %2435 = vmatpush3.bf16.msra.mxu0 %v2660_v48  ;;  %2348 = vmatprep.subr.bf16.mxu1 %v2661_v62  ;;  %v347_v43 = vshrl.u32 %v2946_v38, 16  ;;  %v350_v44 = vshll.u32 %v2946_v38, 16  ;;  %v2030_v47 = vcombine.low %v2930_v25, %v2946_v38  ;;  %v339_v48 = vor.u32 %v338_v41, %v335_v40 }
  0x26   : > { %2444 = vmatprep.subr.bf16.mxu0 %v2662_v3  ;;  %v372_v9 = vrot.slane %v370_v63, 5  ;;  %v1014_v41 = vrot.slane %v1012_v14, 5  ;;  %v3012_v45 = vsel %vm2990_vm5, %v1977_v26, %v674_v19  ;;  %v670_v26 = vrot.slane %v2833_v12, 5  ;;  %v3058_v63 = vld [vmem:[%s2824_s16 + $0x48] sm:$0xf]  ;;  %v2679_v14 = vld [vmem:[%s3300_s1 + $0x180] sm:$0xff]  }
  0x27   : > { %2341 = vmatmul.mubr.bf16.vlgmr.msra.gmra.mrb[0].mxu1 %v2913_v10  ;;  %v349_v50 = vrot.slane %v347_v43, 4  ;;  %v352_v51 = vrot.slane %v350_v44, 5  ;;  %v340_v61 = vrot.slane %v339_v48, 4  ;;  %v3018_v48 = vsel %vm2990_vm5, %v1978_v46, %v678_v20 }
  0x28   : > { %2349 = vmatpush3.bf16.msra.mxu1 %v2661_v62  ;;  %2437 = vmatmul.mubr.bf16.vlgmr.msra.gmra.mrb[0].mxu0 %v2057_v23  ;;  %v1008_v23 = vrot.slane %v1006_v5, 5  ;;  %v2085_v20 = vcombine.low %v3012_v45, %v3018_v48  ;;  %v682_v46 = vrot.slane %v2866_v34, 5  ;;  %v1979_v12 = vrot.slane %v2863_v33, 9  ;;  %v242_v5 = vld [vmem:[%s2824_s16 + $0x4c] sm:$0x1] }
  0x29   : > { %2350 = vmatprep.subr.bf16.mxu1 %v2663_v17  ;;  %2445 = vmatpush3.bf16.msra.mxu0 %v2662_v3  ;;  %v353_v62 = vor.u32 %v352_v51, %v349_v50  ;;  %v366_v3 = vrot.slane %v364_v60, 5  ;;  %v345_v6 = vsel %vm2877_vm2, %v340_v61, %v344_v49  ;;  %v2673_v49 = vld [vmem:[%s3300_s1 + $0x30] sm:$0xff]   ;;  %v686_v51 = vrot.slane %v2894_v56, 5 }
  0x2a   : > { %2446 = vmatprep.subr.bf16.mxu0 %v2664_v24  ;;  %v1980_v34 = vrot.slane %v2889_v52, 9  ;;  %v1976_v56 = vrot.slane %v2830_v11, 9  ;;  %v1981_v60 = vrot.slane %v2930_v25, 9  ;;  %v690_v61 = vrot.slane %v2934_v27, 5  ;;  %v2681_v27 = vld [vmem:[%s3300_s1 + $0x88] sm:$0xff]  }
  0x2b   : > { %v354_v8 = vrot.slane %v353_v62, 4  ;;  %v367_v18 = vor.u32 %v366_v3, %v363_v2  ;;  %v1982_v62 = vrot.slane %v2946_v38, 9  ;;  %v1166_v2 = vrot.slane %v2976_v1, 5 }
  0x2c   : > { %2351 = vmatpush3.bf16.msra.mxu1 %v2663_v17  ;;  %v2986_v17 = vcombine.low %v331_v21, %v345_v6  ;;  %v2031_v21 = vcombine.low %v2958_v53, %v2973_v0  ;;  %v3064_v3 = vcombine.low %v2857_v30, %v2863_v33  ;;  %v3078_v1 = vsel %vm2990_vm5, %v1979_v12, %v682_v46  ;;  %v2706_v30 = vld [vmem:[%s3300_s1 + $0x1e0] sm:$0xff]   ;;  %v2721_v33 = vld [vmem:[%s3300_s1 + $0x218] sm:$0xff]  }
  0x2d   : > { %2352 = vmatprep.subr.bf16.mxu1 %v2665_v22  ;;  %2447 = vmatpush3.bf16.msra.mxu0 %v2664_v24  ;;  %v359_v29 = vsel %vm2877_vm2, %v354_v8, %v358_v57  ;;  %v368_v36 = vrot.slane %v367_v18, 4  ;;  %v2676_v57 = vld [vmem:[%s3300_s1 + $0x178] sm:$0xff]   ;;  %v3074_v8 = vcombine.low %v2889_v52, %v2930_v25  ;;  %v3125_v46 = vcombine.low %v2946_v38, %v2958_v53  ;;  %v2687_v24 = vld [vmem:[%s3300_s1 + $0xa0] sm:$0xff]   ;;  %v2724_v25 = vld [vmem:[%s3300_s1 + $0x230] sm:$0xff]  }
  0x2e   : > { %2448 = vmatprep.subr.bf16.mxu0 %v2666_v32  ;;  %2344 = vmatprep.mubr.bf16.mxu1 %v2986_v17  ;;  %v2722_v52 = vld [vmem:[%s3300_s1 + $0x220] sm:$0xff]   ;;  %v2725_v38 = vld [vmem:[%s3300_s1 + $0x238] sm:$0xff]  }
  0x2f   : > { %v373_v43 = vsel %vm2877_vm2, %v368_v36, %v372_v9  ;;  %v1615_v9 = vrot.slane %v242_v5, 5  ;;  %v1461_v36 = vshll.u32 %v3058_v63, 16 }
  0x30   : > { %2353 = vmatpush3.bf16.msra.mxu1 %v2665_v22  ;;  %v1005_v22 = vrot.slane %v1003_v4, 4  ;;  %v3023_v50 = vcombine.low %v359_v29, %v373_v43  ;;  %v694_v4 = vrot.slane %v2949_v42, 5  ;;  %v3082_v42 = vsel %vm2990_vm5, %v1980_v34, %v686_v51  ;;  %v2684_v34 = vld [vmem:[%s3300_s1 + $0x190] sm:$0xff]  }
  0x31   : > { %2354 = vmatprep.subr.bf16.mxu1 %v2667_v35  ;;  %2449 = vmatpush3.bf16.msra.mxu0 %v2666_v32  ;;  %v1964_v32 = vcombine.low %v2830_v11, %v2836_v13  ;;  %v2068_v11 = vrot.slane %v2973_v0, 9  ;;  %v2707_v13 = vld [vmem:[%s3300_s1 + $0xe8] sm:$0xff]  }
  0x32   : > { %2450 = vmatprep.subr.bf16.mxu0 %v2668_v54  ;;  %v1009_v40 = vor.u32 %v1008_v23, %v1005_v22  ;;  %2345 = vmatmul.mubr.bf16.gmra.mrb[4].mxu1 %v3023_v50  ;;  %v1458_v22 = vshrl.u32 %v3058_v63, 16  ;;  %v2683_v23 = vld [vmem:[%s3300_s1 + $0x90] sm:$0xff]  }
  0x33   : > { %2364 = vmatprep.mubr.bf16.mxu1 %v1964_v32 }
  0x34   : > { %2355 = vmatpush3.bf16.msra.mxu1 %v2667_v35  ;;  %v2058_v35 = vcombine.low %v345_v6, %v359_v29  ;;  %v1010_v44 = vrot.slane %v1009_v40, 4  ;;  %v2147_v6 = vrot.slane %v3058_v63, 9  ;;  %v3106_v29 = vsel %vm2990_vm5, %v1982_v62, %v694_v4  ;;  %v2695_v62 = vld [vmem:[%s3300_s1 + $0xb8] sm:$0xff]  }
  0x35   : > { %2356 = vmatprep.subr.bf16.mxu1 %v2669_v55  ;;  %2451 = vmatpush3.bf16.msra.mxu0 %v2668_v54  ;;  %v2675_v54 = vld [vmem:[%s3300_s1 + $0x38] sm:$0xff]   ;;  %v2086_v40 = vcombine.low %v3078_v1, %v3082_v42  ;;  %v1460_v32 = vrot.slane %v1458_v22, 4  ;;  %v3176_v4 = vcombine.low %v3018_v48, %v3078_v1  ;;  %v2701_v48 = vld [vmem:[%s3300_s1 + $0xd0] sm:$0xff]   ;;  %v2705_v22 = vld [vmem:[%s3300_s1 + $0xe0] sm:$0xff]  }
  0x36   : > { %2440 = vmatprep.mubr.bf16.mxu0 %v2058_v35  ;;  %2452 = vmatprep.subr.bf16.mxu0 %v2670_v16  ;;  %v3030_v31 = vsel %vm2877_vm2, %v1010_v44, %v1014_v41  ;;  %v3093_v18 = vsel %vm2990_vm5, %v2147_v6, %v1615_v9  ;;  %v1983_v41 = vrot.slane %v2958_v53, 9  ;;  %v671_v44 = vsel %vm2990_vm5, %v1976_v56, %v670_v26  ;;  %v2699_v6 = vld [vmem:[%s3300_s1 + $0xc8] sm:$0xff]  }
  0x37   : > { %v2059_v19 = vcombine.low %v373_v43, %v3030_v31  ;;  %v698_v43 = vrot.slane %v2967_v58, 5  ;;  %v2000_v58 = vcombine.low %v671_v44, %v3012_v45  ;;  %v2700_v9 = vld [vmem:[%s3300_s1 + $0x1c8] sm:$0xff]  }
  0x38   : > { %2357 = vmatpush3.bf16.msra.mxu1 %v2669_v55  ;;  %v2674_v55 = vld [vmem:[%s3300_s1 + $0x170] sm:$0xff]  }
  0x39   : > { %2358 = vmatprep.subr.bf16.mxu1 %v2671_v28  ;;  %2453 = vmatpush3.bf16.msra.mxu0 %v2670_v16  ;;  %v3089_v16 = vsel %vm2990_vm5, %v2068_v11, %v1166_v2  ;;  %v2693_v11 = vld [vmem:[%s3300_s1 + $0x1b0] sm:$0xff]   ;;  %v2697_v2 = vld [vmem:[%s3300_s1 + $0xc0] sm:$0xff]  }
  0x3a   : > { %2454 = vmatprep.subr.bf16.mxu0 %v2672_v15  ;;  %2441 = vmatmul.mubr.bf16.gmra.mrb[4].mxu0 %v2059_v19  ;;  %v2164_v35 = vcombine.low %v3089_v16, %v3093_v18 }
  0x3b   : > { %2460 = vmatprep.mubr.bf16.mxu0 %v2085_v20  ;;  %v1467_v20 = vshll.u32 %v242_v5, 16 }
  0x3c   : > { %2359 = vmatpush3.bf16.msra.mxu1 %v2671_v28  ;;  %v3102_v28 = vsel %vm2990_vm5, %v1981_v60, %v690_v61  ;;  %v2692_v60 = vld [vmem:[%s3300_s1 + $0xb0] sm:$0xff]   ;;  %v2690_v61 = vld [vmem:[%s3300_s1 + $0x1a8] sm:$0xff]  }
  0x3d   : > { %2360 = vmatprep.subr.bf16.mxu1 %v2673_v49  ;;  %2455 = vmatpush3.bf16.msra.mxu0 %v2672_v15  ;;  %v2682_v15 = vld [vmem:[%s3300_s1 + $0x188] sm:$0xff]   ;;  %v2087_v19 = vcombine.low %v3102_v28, %v3106_v29  ;;  %v1469_v26 = vrot.slane %v1467_v20, 5  ;;  %v3180_v5 = vcombine.low %v3082_v42, %v3102_v28  ;;  %v2703_v42 = vld [vmem:[%s3300_s1 + $0xd8] sm:$0xff]  }
  0x3e   : > { %2456 = vmatprep.subr.bf16.mxu0 %v2674_v55  ;;  %v2712_v28 = vld [vmem:[%s3300_s1 + $0xf8] sm:$0xff]  }
  0x40   : > { %2361 = vmatpush3.bf16.msra.mxu1 %v2673_v49  ;;  %v1463_v49 = vrot.slane %v1461_v36, 5  ;;  %v2713_v36 = vld [vmem:[%s3300_s1 + $0x1f8] sm:$0xff]  }
  0x41   : > { %2362 = vmatprep.subr.bf16.mxu1 %v2675_v54  ;;  %2457 = vmatpush3.bf16.msra.mxu0 %v2674_v55  ;;  %v699_v55 = vsel %vm2990_vm5, %v1983_v41, %v698_v43  ;;  %v2720_v41 = vld [vmem:[%s3300_s1 + $0x210] sm:$0xff]  }
  0x42   : > { %2458 = vmatprep.subr.bf16.mxu0 %v2676_v57  ;;  %v1464_v51 = vor.u32 %v1463_v49, %v1460_v32  ;;  %v2088_v56 = vcombine.low %v699_v55, %v3089_v16  ;;  %v3197_v1 = vcombine.low %v3106_v29, %v699_v55  ;;  %v2716_v29 = vld [vmem:[%s3300_s1 + $0x200] sm:$0xff]  }
  0x44   : > { %2363 = vmatpush3.bf16.msra.mxu1 %v2675_v54  ;;  %v2685_v54 = vld [vmem:[%s3300_s1 + $0x98] sm:$0xff]   ;;  %v1465_v12 = vrot.slane %v1464_v51, 4 }
  0x45   : > { %2372 = vmatprep.subr.bf16.mxu1 %v2678_v59  ;;  %2459 = vmatpush3.bf16.msra.mxu0 %v2676_v57 }
  0x46   : > { %2468 = vmatprep.subr.bf16.mxu0 %v2679_v14  ;;  %v1470_v45 = vsel %vm2877_vm2, %v1465_v12, %v1469_v26 }
  0x47   : > { %2365 = vmatmul.mubr.bf16.vlgmr.msra.gmra.mrb[0].mxu1 %v3064_v3  ;;  %v3141_v57 = vcombine.low %v3030_v31, %v1470_v45  ;;  %v2688_v31 = vld [vmem:[%s3300_s1 + $0x1a0] sm:$0xff]  }
  0x48   : > { %2373 = vmatpush3.bf16.msra.mxu1 %v2678_v59  ;;  %2368 = vmatprep.mubr.bf16.mxu1 %v3074_v8  ;;  %v2686_v59 = vld [vmem:[%s3300_s1 + $0x198] sm:$0xff]  }
  0x49   : > { %2374 = vmatprep.subr.bf16.mxu1 %v2681_v27  ;;  %2461 = vmatmul.mubr.bf16.vlgmr.msra.gmra.mrb[0].mxu0 %v2086_v40  ;;  %v2717_v40 = vld [vmem:[%s3300_s1 + $0x208] sm:$0xff]  }
  0x4a   : > { %2469 = vmatpush3.bf16.msra.mxu0 %v2679_v14  ;;  %2464 = vmatprep.mubr.bf16.mxu0 %v2087_v19  ;;  %v2702_v14 = vld [vmem:[%s3300_s1 + $0x1d0] sm:$0xff]  }
  0x4b   : > { %2470 = vmatprep.subr.bf16.mxu0 %v2682_v15 }
  0x4c   : > { %2375 = vmatpush3.bf16.msra.mxu1 %v2681_v27  ;;  %v2698_v27 = vld [vmem:[%s3300_s1 + $0x1c0] sm:$0xff]  }
  0x4d   : > { %2376 = vmatprep.subr.bf16.mxu1 %v2683_v23 }
  0x4e   : > { %2471 = vmatpush3.bf16.msra.mxu0 %v2682_v15 }
  0x4f   : > { %2369 = vmatmul.mubr.bf16.gmra.mrb[4].mxu1 %v3125_v46  ;;  %2472 = vmatprep.subr.bf16.mxu0 %v2684_v34 }
  0x50   : > { %2377 = vmatpush3.bf16.msra.mxu1 %v2683_v23  ;;  %2388 = vmatprep.mubr.bf16.mxu1 %v2000_v58  ;;  %v2704_v23 = vld [vmem:[%s3300_s1 + $0x1d8] sm:$0xff]  }
  0x51   : > { %2378 = vmatprep.subr.bf16.mxu1 %v2685_v54  ;;  %2465 = vmatmul.mubr.bf16.gmra.mrb[4].mxu0 %v2088_v56 }
  0x52   : > { %2473 = vmatpush3.bf16.msra.mxu0 %v2684_v34  ;;  %2484 = vmatprep.mubr.bf16.mxu0 %v3064_v3  ;;  %v2696_v3 = vld [vmem:[%s3300_s1 + $0x1b8] sm:$0xff]  }
  0x53   : > { %2474 = vmatprep.subr.bf16.mxu0 %v2686_v59 }
  0x54   : > { %2379 = vmatpush3.bf16.msra.mxu1 %v2685_v54 }
  0x55   : > { %2380 = vmatprep.subr.bf16.mxu1 %v2687_v24 }
  0x56   : > { %2475 = vmatpush3.bf16.msra.mxu0 %v2686_v59 }
  0x57   : > { %2476 = vmatprep.subr.bf16.mxu0 %v2688_v31 }
  0x58   : > { %2381 = vmatpush3.bf16.msra.mxu1 %v2687_v24 }
  0x59   : > { %2382 = vmatprep.subr.bf16.mxu1 %v2689_v39 }
  0x5a   : > { %2477 = vmatpush3.bf16.msra.mxu0 %v2688_v31 }
  0x5b   : > { %2478 = vmatprep.subr.bf16.mxu0 %v2690_v61 }
  0x5c   : > { %2383 = vmatpush3.bf16.msra.mxu1 %v2689_v39 }
  0x5d   : > { %2384 = vmatprep.subr.bf16.mxu1 %v2692_v60 }
  0x5e   : > { %2479 = vmatpush3.bf16.msra.mxu0 %v2690_v61 }
  0x5f   : > { %2480 = vmatprep.subr.bf16.mxu0 %v2693_v11 }
  0x60   : > { %2385 = vmatpush3.bf16.msra.mxu1 %v2692_v60 }
  0x61   : > { %2386 = vmatprep.subr.bf16.mxu1 %v2695_v62 }
  0x62   : > { %2481 = vmatpush3.bf16.msra.mxu0 %v2693_v11 }
  0x63   : > { %2482 = vmatprep.subr.bf16.mxu0 %v2696_v3 }
  0x64   : > { %2387 = vmatpush3.bf16.msra.mxu1 %v2695_v62 }
  0x65   : > { %2396 = vmatprep.subr.bf16.mxu1 %v2697_v2 }
  0x66   : > { %2483 = vmatpush3.bf16.msra.mxu0 %v2696_v3 }
  0x67   : > { %2389 = vmatmul.mubr.bf16.vlgmr.msra.gmra.mrb[0].mxu1 %v3176_v4  ;;  %2492 = vmatprep.subr.bf16.mxu0 %v2698_v27 }
  0x68   : > { %2397 = vmatpush3.bf16.msra.mxu1 %v2697_v2  ;;  %2392 = vmatprep.mubr.bf16.mxu1 %v3180_v5 }
  0x69   : > { %2398 = vmatprep.subr.bf16.mxu1 %v2699_v6  ;;  %2485 = vmatmul.mubr.bf16.vlgmr.msra.gmra.mrb[0].mxu0 %v3074_v8  ;;  %v2113_v8 = vcombine.low %v2973_v0, %v3058_v63  ;;  %v2708_v63 = vld [vmem:[%s3300_s1 + $0x1e8] sm:$0xff]  }
  0x6a   : > { %2493 = vmatpush3.bf16.msra.mxu0 %v2698_v27  ;;  %2488 = vmatprep.mubr.bf16.mxu0 %v3125_v46 }
  0x6b   : > { %2494 = vmatprep.subr.bf16.mxu0 %v2700_v9 }
  0x6c   : > { %2399 = vmatpush3.bf16.msra.mxu1 %v2699_v6 }
  0x6d   : > { %2400 = vmatprep.subr.bf16.mxu1 %v2701_v48 }
  0x6e   : > { %2495 = vmatpush3.bf16.msra.mxu0 %v2700_v9 }
  0x6f   : > { %2393 = vmatmul.mubr.bf16.gmra.mrb[4].mxu1 %v3197_v1  ;;  %2496 = vmatprep.subr.bf16.mxu0 %v2702_v14 }
  0x70   : > { %2401 = vmatpush3.bf16.msra.mxu1 %v2701_v48  ;;  %2412 = vmatprep.mubr.bf16.mxu1 %v2028_v37  ;;  %v2709_v37 = vld [vmem:[%s3300_s1 + $0xf0] sm:$0xff]  }
  0x71   : > { %2402 = vmatprep.subr.bf16.mxu1 %v2703_v42  ;;  %2489 = vmatmul.mubr.bf16.gmra.mrb[4].mxu0 %v2113_v8 }
  0x72   : > { %2497 = vmatpush3.bf16.msra.mxu0 %v2702_v14  ;;  %2508 = vmatprep.mubr.bf16.mxu0 %v2913_v10  ;;  %v2711_v10 = vld [vmem:[%s3300_s1 + $0x1f0] sm:$0xff]  }
  0x73   : > { %2498 = vmatprep.subr.bf16.mxu0 %v2704_v23 }
  0x74   : > { %2403 = vmatpush3.bf16.msra.mxu1 %v2703_v42 }
  0x75   : > { %2404 = vmatprep.subr.bf16.mxu1 %v2705_v22 }
  0x76   : > { %2499 = vmatpush3.bf16.msra.mxu0 %v2704_v23 }
  0x77   : > { %2500 = vmatprep.subr.bf16.mxu0 %v2706_v30 }
  0x78   : > { %2405 = vmatpush3.bf16.msra.mxu1 %v2705_v22 }
  0x79   : > { %2406 = vmatprep.subr.bf16.mxu1 %v2707_v13 }
  0x7a   : > { %2501 = vmatpush3.bf16.msra.mxu0 %v2706_v30 }
  0x7b   : > { %2502 = vmatprep.subr.bf16.mxu0 %v2708_v63 }
  0x7c   : > { %2407 = vmatpush3.bf16.msra.mxu1 %v2707_v13 }
  0x7d   : > { %2408 = vmatprep.subr.bf16.mxu1 %v2709_v37 }
  0x7e   : > { %2503 = vmatpush3.bf16.msra.mxu0 %v2708_v63 }
  0x7f   : > { %2504 = vmatprep.subr.bf16.mxu0 %v2711_v10 }
  0x80   : > { %2409 = vmatpush3.bf16.msra.mxu1 %v2709_v37 }
  0x81   : > { %2410 = vmatprep.subr.bf16.mxu1 %v2712_v28 }
  0x82   : > { %2505 = vmatpush3.bf16.msra.mxu0 %v2711_v10 }
  0x83   : > { %2506 = vmatprep.subr.bf16.mxu0 %v2713_v36 }
  0x84   : > { %2411 = vmatpush3.bf16.msra.mxu1 %v2712_v28 }
  0x85   : > { %2540 = vmatprep.subr.bf16.mxu1 %v2716_v29 }
  0x86   : > { %2507 = vmatpush3.bf16.msra.mxu0 %v2713_v36 }
  0x87   : > { %2413 = vmatmul.mubr.bf16.vlgmr.msra.gmra.mrb[0].mxu1 %v2029_v7  ;;  %2516 = vmatprep.subr.bf16.mxu0 %v2716_v29  ;;  %v2723_v7 = vld [vmem:[%s3300_s1 + $0x228] sm:$0xff]  }
  0x88   : > { %2548 = vmatpush3.bf16.msra.mxu1 %v2716_v29  ;;  %2416 = vmatprep.mubr.bf16.mxu1 %v2030_v47 }
  0x89   : > { %2541 = vmatprep.subr.bf16.mxu1 %v2717_v40  ;;  %2509 = vmatmul.mubr.bf16.vlgmr.msra.gmra.mrb[0].mxu0 %v2986_v17 }
  0x8a   : > { %2517 = vmatpush3.bf16.msra.mxu0 %v2716_v29  ;;  %2512 = vmatprep.mubr.bf16.mxu0 %v3023_v50 }
  0x8b   : > { %2518 = vmatprep.subr.bf16.mxu0 %v2717_v40 }
  0x8c   : > { %2549 = vmatpush3.bf16.msra.mxu1 %v2717_v40 }
  0x8d   : > { %2542 = vmatprep.subr.bf16.mxu1 %v2720_v41 }
  0x8e   : > { %2519 = vmatpush3.bf16.msra.mxu0 %v2717_v40 }
  0x8f   : > { %2417 = vmatmul.mubr.bf16.gmra.mrb[4].mxu1 %v2031_v21  ;;  %2520 = vmatprep.subr.bf16.mxu0 %v2720_v41 }
  0x90   : > { %2550 = vmatpush3.bf16.msra.mxu1 %v2720_v41  ;;  %2536 = vmatprep.mubr.bf16.mxu1 %v3197_v1 }
  0x91   : > { %2543 = vmatprep.subr.bf16.mxu1 %v2721_v33  ;;  %2513 = vmatmul.mubr.bf16.gmra.mrb[4].mxu0 %v3141_v57 }
  0x92   : > { %2521 = vmatpush3.bf16.msra.mxu0 %v2720_v41  ;;  %2532 = vmatprep.mubr.bf16.mxu0 %v3176_v4 }
  0x93   : > { %2522 = vmatprep.subr.bf16.mxu0 %v2721_v33 }
  0x94   : > { %2551 = vmatpush3.bf16.msra.mxu1 %v2721_v33 }
  0x95   : > { %2544 = vmatprep.subr.bf16.mxu1 %v2722_v52 }
  0x96   : > { %2523 = vmatpush3.bf16.msra.mxu0 %v2721_v33 }
  0x97   : > { %2524 = vmatprep.subr.bf16.mxu0 %v2722_v52 }
  0x98   : > { %2552 = vmatpush3.bf16.msra.mxu1 %v2722_v52 }
  0x99   : > { %2545 = vmatprep.subr.bf16.mxu1 %v2723_v7 }
  0x9a   : > { %2525 = vmatpush3.bf16.msra.mxu0 %v2722_v52 }
  0x9b   : > { %2526 = vmatprep.subr.bf16.mxu0 %v2723_v7 }
  0x9c   : > { %2553 = vmatpush3.bf16.msra.mxu1 %v2723_v7 }
  0x9d   : > { %2546 = vmatprep.subr.bf16.mxu1 %v2724_v25 }
  0x9e   : > { %2527 = vmatpush3.bf16.msra.mxu0 %v2723_v7 }
  0x9f   : > { %2528 = vmatprep.subr.bf16.mxu0 %v2724_v25 }
  0xa0   : > { %2554 = vmatpush3.bf16.msra.mxu1 %v2724_v25 }
  0xa1   : > { %2547 = vmatprep.subr.bf16.mxu1 %v2725_v38 }
  0xa2   : > { %2529 = vmatpush3.bf16.msra.mxu0 %v2724_v25 }
  0xa3   : > { %2530 = vmatprep.subr.bf16.mxu0 %v2725_v38 }
  0xa4   : > { %2555 = vmatpush3.bf16.msra.mxu1 %v2725_v38 }
  0xa6   : > { %2531 = vmatpush3.bf16.msra.mxu0 %v2725_v38 }
  0xa7   : > { %2537 = vmatmul.mubr.bf16.vlgmr.msra.gmra.mrb[8].mxu1 %v2164_v35  ;;  %v2173_v35 = vld [vmem:[%s3301_s2] ss:$0 sm:$0xff] }
  0xa9   : > { %2533 = vmatmul.mubr.bf16.vlgmr.msra.gmra.mrb[0].mxu0 %v3180_v5 }
 0x15a   : > { %v2414_v47 = vpop.f32.mrb[0].mxu1 }
 0x15b   : > { %v963_v53 = vpop.f32.mrb[1].mxu1 }
 0x15c   : > { %v2415_v0 = vpop.f32.mrb[2].mxu1 }
 0x15d   : > { %v966_v17 = vpop.f32.mrb[3].mxu1 }
 0x162   : > { %v2418_v21 = vpop.f32.mrb[4].mxu1 }
 0x163   : > { %v979_v50 = vpop.f32.mrb[5].mxu1 }
 0x164   : > { %v2419_v32 = vpop.f32.mrb[6].mxu1  ;;  %v2514_v44 = vpop.f32.mrb[4].mxu0 }
 0x165   : > { %v982_v43 = vpop.f32.mrb[7].mxu1  ;;  %v2560_v49 = vadd.f32 %v2514_v44, %v2418_v21  ;;  %v1589_v15 = vpop.f32.mrb[5].mxu0 }
 0x166   : > { %v2562_v19 = vadd.f32 %v1589_v15, %v979_v50  ;;  %v2515_v20 = vpop.f32.mrb[6].mxu0 }
 0x167   : > { %v2564_v46 = vadd.f32 %v2515_v20, %v2419_v32  ;;  %v1592_v16 = vpop.f32.mrb[7].mxu0 }
 0x168   : > { %v2566_v18 = vadd.f32 %v1592_v16, %v982_v43 }
 0x17a   : > { %v2538_v51 = vpop.f32.mrb[8].mxu1 }
 0x17b   : > { %v2561_v58 = vadd.f32 %v2560_v49, %v2538_v51  ;;  %v1735_v26 = vpop.f32.mrb[9].mxu1 }
 0x17c   : > { %v2563_v54 = vadd.f32 %v2562_v19, %v1735_v26  ;;  %v2539_v55 = vpop.f32.mrb[10].mxu1  ;;  %v2534_v24 = vpop.f32.mrb[0].mxu0 }
 0x17d   : > { %v1771_v12 = vadd.f32 %v2561_v58, %v2173_v35  ;;  %v2565_v34 = vadd.f32 %v2564_v46, %v2539_v55  ;;  %v1738_v45 = vpop.f32.mrb[11].mxu1  ;;  %v2556_v39 = vadd.f32 %v2534_v24, %v2414_v47  ;;  %v1719_v31 = vpop.f32.mrb[1].mxu0 }
 0x17e   : > { %v1769_v56 = vadd.f32 %v2563_v54, %v2173_v35  ;;  %v2567_v57 = vadd.f32 %v2566_v18, %v1738_v45  ;;  %v2557_v62 = vadd.f32 %v1719_v31, %v963_v53  ;;  %v2535_v11 = vpop.f32.mrb[2].mxu0 }
 0x17f   : > { %v1772_v59 = vadd.f32 %v2565_v34, %v2173_v35  ;;  %v1779_v61 = vmax.f32 %v1771_v12, 0.0  ;;  %v1767_v3 = vadd.f32 %v2556_v39, %v2173_v35  ;;  %v2558_v5 = vadd.f32 %v2535_v11, %v2415_v0  ;;  %v1722_v6 = vpop.f32.mrb[3].mxu0 }
 0x180   : > { %v1770_v60 = vadd.f32 %v2567_v57, %v2173_v35  ;;  %v1777_v4 = vmax.f32 %v1769_v56, 0.0  ;;  %v1765_v48 = vadd.f32 %v2557_v62, %v2173_v35  ;;  %v2559_v1 = vadd.f32 %v1722_v6, %v966_v17 }
 0x181   : > { %v1780_v2 = vmax.f32 %v1772_v59, 0.0  ;;  %v1768_v42 = vadd.f32 %v2558_v5, %v2173_v35  ;;  %v1775_v22 = vmax.f32 %v1767_v3, 0.0 }
 0x182   : > { %v1778_v27 = vmax.f32 %v1770_v60, 0.0  ;;  %v1766_v8 = vadd.f32 %v2559_v1, %v2173_v35  ;;  %v1773_v13 = vmax.f32 %v1765_v48, 0.0 }
 0x183   : > { %v2211_v9 = vpack.c.bf16 %v1780_v2, %v1779_v61  ;;  %v1776_v23 = vmax.f32 %v1768_v42, 0.0 }
 0x184   : > { %v2206_v14 = vpack.c.bf16 %v1778_v27, %v1777_v4  ;;  %v1774_v30 = vmax.f32 %v1766_v8, 0.0 }
 0x185   : > { %2215 = vst [vmem:[%s221_s5 + $0x18] sm:$0xff] %v2211_v9   ;;  %v2201_v37 = vpack.c.bf16 %v1776_v23, %v1775_v22 }
 0x186   : > { %2214 = vst [vmem:[%s221_s5 + $0x10] sm:$0xff] %v2206_v14   ;;  %v2196_v63 = vpack.c.bf16 %v1774_v30, %v1773_v13 }
 0x187   : > { %2213 = vst [vmem:[%s221_s5 + $0x8] sm:$0xff] %v2201_v37  }
 0x188   : > { %2197 = vst [vmem:[%s221_s5] sm:$0xff] %v2196_v63  }
 0x189 PF: > { %s13_s14 = sadd.s32 1, %s2748_s14   ;;  %s3307_s12 = smov %s2744_s13 }
 0x18a   : > { %p10_p5 = scmp.ge.s32.totalorder %s13_s14, 4   ;;  %s3308_s13 = smov %s3310_s15 }
 0x18c   :  { %12 = sbr.rel (!%p10_p5) target bundleno = 2 (0x2), region = 76 }

// kernel: _lambda_.11
= control target key start
LH: loop header
LB: loop body
LE: loop exit
PB: predicated region body
PF: predicated region fallthrough
CT: control target
= control target key end

     0   :  { %s1655_s15 = smov 0   ;;  %s1657_s16 = smov 0   ;;  %s2237_s0 = inlined_call_operand.vmem [shape: bf16[2,4,64,128], index: 0, kind: input, shape index: {}]   ;;  %s2238_s1 = inlined_call_operand.vmem [shape: bf16[2,4,64,128], index: 1, kind: input, shape index: {}]   ;;  %s2239_s2 = inlined_call_operand.vmem [shape: bf16[2,64,256], index: 2, kind: input, shape index: {}]   ;;  %s2240_s3 = inlined_call_operand.vmem [shape: f32[3,128], index: 3, kind: input, shape index: {}]   ;;  %s2241_s4 = inlined_call_operand.vmem [shape: bf16[2,4,64,128], index: 4, kind: output, shape index: {}]  }
   0x1   :  { %s1659_s17 = smov 0  }
   0x2 LB: > { %s26_s18 = sadd.s32 1, %s1624_s16  ;;  %p1218_p0 = scmp.ge.s32.totalorder %s1628_s17, 1  ;;  %s1628_s17 = sphi %s1659_s17, %s14_s17   ;;  %s1624_s16 = sphi %s1657_s16, %s2291_s16   ;;  %s1620_s15 = sphi %s1655_s15, %s2290_s15  }
   0x3   : > { %p28_p1 = scmp.ge.s32.totalorder %s26_s18, 2  ;;  %p218_p2 = scmp.lt.s32.totalorder %s1628_s17, 3 }
   0x5   : > { %s2293_s18 = smov (%p28_p1, %s26_s18), 0  ;;  %p219_p3 = pnand %p1218_p0, %p218_p2 }
   0x7   : > { %222 = sbr.rel (%p219_p3) target bundleno = 128 (0x80), region = 36 }
   0xe   : > { %p272_p4 = scmp.lt.s32.totalorder %s1620_s15, 1  ;;  %v691_v0 = vlaneseq  ;;  %v658_v2 = vld [vmem:[%s2240_s3] sm:$0x7] }
  0x10   : > { %s2295_s15 = smov (!%p272_p4, %s1620_s15), 1  ;;  %v692_v1 = vshrl.u32 %v691_v0, 7 }
  0x11   : > { %s1676_s21 = sshll.u32 %s2295_s15, 7  ;;  %s1263_s22 = sshll.u32 %s2295_s15, 6 }
  0x12   : > { %v693_v3 = vsub.s32 0, %v692_v1  ;;  %v761_v4 = vsub.s32 1, %v692_v1  ;;  %v862_v5 = vsub.s32 2, %v692_v1  ;;  %s1682_s25 = scalar_lea.vmem %s2237_s0, %s1676_s21  ;;  %s1688_s28 = scalar_lea.vmem %s2238_s1, %s1676_s21 }
  0x13   : > { %s1693_s5 = scalar_lea.vmem %s2239_s2, %s1263_s22  ;;  %v1298_v6 = vld [vmem:[%s1682_s25] sm:$0xff]   ;;  %v1505_v23 = vld [vmem:[%s1682_s25 + $0x8] sm:$0xff]   ;;  %v1506_v53 = vld [vmem:[%s1682_s25 + $0x10] sm:$0xff]   ;;  %s1972_s8 = scalar_lea.vmem %s2241_s4, %s1676_s21 }
  0x14   : > { %v1508_v7 = vld [vmem:[%s1682_s25 + $0x20] sm:$0xff]   ;;  %v1700_v9 = vrot.slane %v658_v2, %v693_v3  ;;  %v1702_v10 = vrot.slane %v658_v2, %v761_v4  ;;  %v1704_v11 = vrot.slane %v658_v2, %v862_v5  ;;  %v1299_v12 = vunpack.c.l.bf16 %v1298_v6  ;;  %v441_v18 = vld [vmem:[%s1693_s5 + $0x8] sm:$0xff]  ;;  %v442_v39 = vld [vmem:[%s1693_s5 + $0x10] sm:$0xff] }
  0x15   : > { %v1698_v8 = vld [vmem:[%s1688_s28] sm:$0xff]   ;;  %v1300_v13 = vunpack.c.h.bf16 %v1298_v6  ;;  %v1315_v14 = vunpack.c.l.bf16 %v1508_v7  ;;  %v1316_v15 = vunpack.c.h.bf16 %v1508_v7  ;;  %v450_v26 = vunpack.c.l.bf16 %v441_v18  ;;  %v1509_v28 = vld [vmem:[%s1682_s25 + $0x28] sm:$0xff]   ;;  %v443_v40 = vld [vmem:[%s1693_s5 + $0x18] sm:$0xff] }
  0x16   : > { %v1707_v16 = vld [vmem:[%s1688_s28 + $0x20] sm:$0xff]   ;;  %v1363_v19 = vunpack.c.l.bf16 %v1698_v8  ;;  %v1364_v20 = vunpack.c.h.bf16 %v1698_v8  ;;  %v451_v27 = vunpack.c.h.bf16 %v441_v18  ;;  %v1718_v29 = vld [vmem:[%s1688_s28 + $0x8] sm:$0xff]   ;;  %v1740_v37 = vmul.f32 0.0, %v1700_v9  ;;  %v1510_v54 = vld [vmem:[%s1682_s25 + $0x30] sm:$0xff]  }
  0x17   : > { %v440_v17 = vld [vmem:[%s1693_s5] sm:$0xff]  ;;  %v1379_v21 = vunpack.c.l.bf16 %v1707_v16  ;;  %v1380_v22 = vunpack.c.h.bf16 %v1707_v16  ;;  %v1737_v34 = vld [vmem:[%s1688_s28 + $0x28] sm:$0xff]   ;;  %v1303_v38 = vunpack.c.l.bf16 %v1505_v23  ;;  %v1304_v41 = vunpack.c.h.bf16 %v1505_v23  ;;  %v1759_v58 = vld [vmem:[%s1688_s28 + $0x10] sm:$0xff]  }
  0x18   : > { %v448_v24 = vunpack.c.l.bf16 %v440_v17  ;;  %v449_v25 = vunpack.c.h.bf16 %v440_v17  ;;  %v1722_v30 = vsub.f32 %v1299_v12, %v1363_v19  ;;  %v1726_v31 = vsub.f32 %v1300_v13, %v1364_v20  ;;  %v1770_v62 = vld [vmem:[%s1688_s28 + $0x30] sm:$0xff]   ;;  %v444_v63 = vld [vmem:[%s1693_s5 + $0x20] sm:$0xff]  ;;  %v445_v4 = vld [vmem:[%s1693_s5 + $0x28] sm:$0xff] }
  0x19   : > { %v1730_v32 = vsub.f32 %v1315_v14, %v1379_v21  ;;  %v1734_v33 = vsub.f32 %v1316_v15, %v1380_v22  ;;  %v465_v36 = vsub.f32 %v451_v27, %v450_v26  ;;  %v1319_v42 = vunpack.c.l.bf16 %v1509_v28  ;;  %v1507_v18 = vld [vmem:[%s1682_s25 + $0x18] sm:$0xff]  }
  0x1a   : > { %v464_v35 = vsub.f32 %v449_v25, %v448_v24  ;;  %v1320_v43 = vunpack.c.h.bf16 %v1509_v28  ;;  %v1367_v44 = vunpack.c.l.bf16 %v1718_v29  ;;  %v2253_v47 = vunpack.c.h.bf16 %v1718_v29  ;;  %v1511_v26 = vld [vmem:[%s1682_s25 + $0x38] sm:$0xff]  }
  0x1b   : > { %v474_v46 = vmul.f32 1.442695, %v465_v36  ;;  %v2256_v48 = vunpack.c.l.bf16 %v1737_v34  ;;  %v2252_v49 = vunpack.c.h.bf16 %v1737_v34  ;;  %v452_v50 = vunpack.c.l.bf16 %v442_v39  ;;  %v1781_v27 = vld [vmem:[%s1688_s28 + $0x18] sm:$0xff]  }
  0x1c   : > { %v472_v45 = vmul.f32 1.442695, %v464_v35  ;;  %v453_v51 = vunpack.c.h.bf16 %v442_v39  ;;  %v454_v52 = vunpack.c.l.bf16 %v443_v40  ;;  %v455_v55 = vunpack.c.h.bf16 %v443_v40 }
  0x1d   : > { %v1752_v56 = vsub.f32 %v1303_v38, %v1367_v44  ;;  %v1756_v57 = vsub.f32 %v1304_v41, %v2253_v47  ;;  %v1763_v60 = vsub.f32 %v1319_v42, %v2256_v48  ;;  %v1767_v61 = vsub.f32 %v1320_v43, %v2252_v49  ;;  %v1796_v38 = vld [vmem:[%s1688_s28 + $0x38] sm:$0xff]   ;;  %v446_v43 = vld [vmem:[%s1693_s5 + $0x30] sm:$0xff] }
  0x1e   : > { %1574 = vpow2.f32 %v472_v45  ;;  %v466_v59 = vsub.f32 %v453_v51, %v452_v50  ;;  %v467_v0 = vsub.f32 %v455_v55, %v454_v52  ;;  %v1307_v1 = vunpack.c.l.bf16 %v1506_v53  ;;  %v447_v45 = vld [vmem:[%s1693_s5 + $0x38] sm:$0xff] }
  0x1f   : > { %1576 = vpow2.f32 %v474_v46  ;;  %v1308_v2 = vunpack.c.h.bf16 %v1506_v53  ;;  %v1323_v3 = vunpack.c.l.bf16 %v1510_v54  ;;  %v1324_v6 = vunpack.c.h.bf16 %v1510_v54 }
  0x20   : > { %v476_v5 = vmul.f32 1.442695, %v466_v59  ;;  %v2251_v7 = vunpack.c.l.bf16 %v1759_v58  ;;  %v2248_v12 = vunpack.c.h.bf16 %v1759_v58  ;;  %v478_v13 = vmul.f32 1.442695, %v467_v0 }
  0x21   : > { %v2249_v14 = vunpack.c.l.bf16 %v1770_v62  ;;  %v2246_v15 = vunpack.c.h.bf16 %v1770_v62  ;;  %v456_v17 = vunpack.c.l.bf16 %v444_v63  ;;  %v457_v23 = vunpack.c.h.bf16 %v444_v63 }
  0x22   : > { %1578 = vpow2.f32 %v476_v5  ;;  %v458_v24 = vunpack.c.l.bf16 %v445_v4  ;;  %v459_v25 = vunpack.c.h.bf16 %v445_v4  ;;  %v1785_v28 = vsub.f32 %v1307_v1, %v2251_v7 }
  0x23   : > { %1580 = vpow2.f32 %v478_v13  ;;  %v1789_v35 = vsub.f32 %v1308_v2, %v2248_v12  ;;  %v1793_v36 = vsub.f32 %v1323_v3, %v2249_v14  ;;  %v468_v39 = vsub.f32 %v457_v23, %v456_v17  ;;  %v1512_v17 = vld [vmem:[%s1682_s25 + $0x40] sm:$0xff]  }
  0x24   : > { %v469_v40 = vsub.f32 %v459_v25, %v458_v24  ;;  %v1800_v41 = vsub.f32 %v1324_v6, %v2246_v15  ;;  %v1311_v42 = vunpack.c.l.bf16 %v1507_v18  ;;  %v1312_v46 = vunpack.c.h.bf16 %v1507_v18  ;;  %v1818_v25 = vld [vmem:[%s1688_s28 + $0x40] sm:$0xff]  }
  0x25   : > { %v1327_v50 = vunpack.c.l.bf16 %v1511_v26  ;;  %v1328_v51 = vunpack.c.h.bf16 %v1511_v26  ;;  %v2245_v52 = vunpack.c.l.bf16 %v1781_v27  ;;  %v480_v53 = vmul.f32 1.442695, %v468_v39  ;;  %v1513_v26 = vld [vmem:[%s1682_s25 + $0x48] sm:$0xff]  }
  0x26   : > { %v482_v54 = vmul.f32 1.442695, %v469_v40  ;;  %v2243_v55 = vunpack.c.h.bf16 %v1781_v27  ;;  %v2244_v59 = vunpack.c.l.bf16 %v1796_v38  ;;  %v2242_v0 = vunpack.c.h.bf16 %v1796_v38 }
  0x27   : > { %v460_v1 = vunpack.c.l.bf16 %v446_v43  ;;  %v461_v2 = vunpack.c.h.bf16 %v446_v43  ;;  %v462_v3 = vunpack.c.l.bf16 %v447_v45  ;;  %1582 = vpow2.f32 %v480_v53  ;;  %v1830_v43 = vld [vmem:[%s1688_s28 + $0x48] sm:$0xff]  }
  0x28   : > { %v1575_v63 = vpop.eup %1574  ;;  %v463_v6 = vunpack.c.h.bf16 %v447_v45  ;;  %v1810_v13 = vsub.f32 %v1311_v42, %v2245_v52  ;;  %1584 = vpow2.f32 %v482_v54  ;;  %v1815_v24 = vsub.f32 %v1312_v46, %v2243_v55  ;;  %v1843_v55 = vld [vmem:[%s1688_s28 + $0x58] sm:$0xff]  }
  0x29   : > { %v1577_v4 = vpop.eup %1576  ;;  %v488_v5 = vadd.f32 1.0, %v1575_v63  ;;  %v470_v23 = vsub.f32 %v461_v2, %v460_v1  ;;  %v1823_v40 = vsub.f32 %v1327_v50, %v2244_v59  ;;  %v1827_v42 = vsub.f32 %v1328_v51, %v2242_v0  ;;  %v1515_v0 = vld [vmem:[%s1682_s25 + $0x58] sm:$0xff]   ;;  %v1851_v59 = vld [vmem:[%s1682_s25 + $0x60] sm:$0xff]  }
  0x2a   : > { %v489_v18 = vadd.f32 1.0, %v1577_v4  ;;  %v471_v39 = vsub.f32 %v463_v6, %v462_v3  ;;  %v1331_v46 = vunpack.c.l.bf16 %v1512_v17  ;;  %v1332_v53 = vunpack.c.h.bf16 %v1512_v17  ;;  %v1514_v3 = vld [vmem:[%s1682_s25 + $0x50] sm:$0xff]  }
  0x2b   : > { %1586 = vrcp.f32 %v488_v5  ;;  %v484_v45 = vmul.f32 1.442695, %v470_v23  ;;  %v1395_v1 = vunpack.c.l.bf16 %v1818_v25  ;;  %v1396_v50 = vunpack.c.h.bf16 %v1818_v25 }
  0x2c   : > { %1588 = vrcp.f32 %v489_v18  ;;  %v1579_v54 = vpop.eup %1578  ;;  %v486_v63 = vmul.f32 1.442695, %v471_v39  ;;  %v1335_v2 = vunpack.c.l.bf16 %v1513_v26  ;;  %v1336_v5 = vunpack.c.h.bf16 %v1513_v26  ;;  %v1837_v18 = vld [vmem:[%s1688_s28 + $0x50] sm:$0xff]  }
  0x2d   : > { %v1581_v4 = vpop.eup %1580  ;;  %v490_v51 = vadd.f32 1.0, %v1579_v54  ;;  %1590 = vpow2.f32 %v484_v45  ;;  %v2247_v6 = vunpack.c.l.bf16 %v1830_v43  ;;  %v545_v23 = vsub.f32 %v1331_v46, %v1395_v1 }
  0x2e   : > { %v491_v17 = vadd.f32 1.0, %v1581_v4  ;;  %1592 = vpow2.f32 %v486_v63  ;;  %v546_v39 = vsub.f32 %v1332_v53, %v1396_v50  ;;  %v2250_v54 = vunpack.c.h.bf16 %v1830_v43  ;;  %v1856_v4 = vld [vmem:[%s1688_s28 + $0x60] sm:$0xff]  }
  0x2f   : > { %1594 = vrcp.f32 %v490_v51  ;;  %v1848_v26 = vsub.f32 %v1335_v2, %v2247_v6  ;;  %v1339_v45 = vunpack.c.l.bf16 %v1514_v3  ;;  %v1340_v63 = vunpack.c.h.bf16 %v1514_v3  ;;  %v1864_v6 = vld [vmem:[%s1682_s25 + $0x68] sm:$0xff]  }
  0x30   : > { %1596 = vrcp.f32 %v491_v17  ;;  %v2254_v46 = vunpack.c.l.bf16 %v1837_v18  ;;  %v2255_v53 = vunpack.c.h.bf16 %v1837_v18  ;;  %v1860_v51 = vsub.f32 %v1336_v5, %v2250_v54  ;;  %2264 = vst [vmem:[#allocation3_spill] sm:$0xff] %v1864_v6 }
  0x31   : > { %v1343_v52 = vunpack.c.l.bf16 %v1515_v0  ;;  %v1344_v15 = vunpack.c.h.bf16 %v1515_v0  ;;  %v2257_v2 = vunpack.c.l.bf16 %v1843_v55  ;;  %v1583_v12 = vpop.eup %1582  ;;  %v2258_v14 = vunpack.c.h.bf16 %v1843_v55 }
  0x32   : > { %v1868_v3 = vsub.f32 %v1339_v45, %v2254_v46  ;;  %v1872_v17 = vsub.f32 %v1340_v63, %v2255_v53  ;;  %v1347_v5 = vunpack.c.l.bf16 %v1851_v59  ;;  %v1585_v54 = vpop.eup %1584  ;;  %v492_v7 = vadd.f32 1.0, %v1583_v12 }
  0x33   : > { %v1878_v0 = vsub.f32 %v1343_v52, %v2257_v2  ;;  %v2259_v47 = vunpack.c.l.bf16 %v1856_v4  ;;  %v493_v46 = vadd.f32 1.0, %v1585_v54  ;;  %v1886_v63 = vsub.f32 %v1344_v15, %v2258_v14 }
  0x34   : > { %1598 = vrcp.f32 %v492_v7 }
  0x35   : > { %v1882_v45 = vpop.eup %1586  ;;  %1600 = vrcp.f32 %v493_v46  ;;  %v1912_v7 = vsub.f32 %v1347_v5, %v2259_v47 }
  0x36   : > { %v1890_v12 = vpop.eup %1588  ;;  %v561_v52 = vmul.f32 %v1882_v45, %v1722_v30  ;;  %v569_v49 = vmul.f32 %v1882_v45, %v1730_v32  ;;  %v577_v2 = vmul.f32 %v1882_v45, %v545_v23 }
  0x37   : > { %v562_v54 = vmul.f32 %v1890_v12, %v1726_v31  ;;  %v570_v15 = vmul.f32 %v1890_v12, %v1734_v33  ;;  %v578_v48 = vmul.f32 %v1890_v12, %v546_v39  ;;  %v1591_v53 = vpop.eup %1590 }
  0x38   : > { %v593_v14 = vadd.f32 %v1363_v19, %v561_v52  ;;  %v1906_v30 = vadd.f32 %v1379_v21, %v569_v49  ;;  %v1908_v32 = vadd.f32 %v1395_v1, %v577_v2  ;;  %v1593_v31 = vpop.eup %1592  ;;  %v494_v39 = vadd.f32 1.0, %v1591_v53 }
  0x39   : > { %v594_v33 = vadd.f32 %v1364_v20, %v562_v54  ;;  %v1918_v23 = vadd.f32 %v1380_v22, %v570_v15  ;;  %v1922_v19 = vadd.f32 %v1396_v50, %v578_v48  ;;  %v1924_v21 = vpop.eup %1594  ;;  %v495_v46 = vadd.f32 1.0, %v1593_v31 }
  0x3a   : > { %2265 = vst [vmem:[#allocation4_spill] sm:$0xff] %v1908_v32  ;;  %v763_v49 = vmul.f32 %v1702_v10, %v593_v14  ;;  %v864_v1 = vmul.f32 %v1704_v11, %v1906_v30  ;;  %v703_v8 = vmul.f32 %v1700_v9, %v593_v14  ;;  %v1930_v20 = vpop.eup %1596  ;;  %v563_v48 = vmul.f32 %v1924_v21, %v1752_v56 }
  0x3b   : > { %v764_v16 = vmul.f32 %v1702_v10, %v594_v33  ;;  %v865_v22 = vmul.f32 %v1704_v11, %v1918_v23  ;;  %v571_v25 = vmul.f32 %v1924_v21, %v1763_v60  ;;  %v564_v53 = vmul.f32 %v1930_v20, %v1756_v57 }
  0x3c   : > { %v795_v50 = vadd.f32 %v763_v49, %v1740_v37  ;;  %v572_v14 = vmul.f32 %v1930_v20, %v1767_v61  ;;  %1602 = vrcp.f32 %v494_v39  ;;  %v1947_v5 = vadd.f32 %v1367_v44, %v563_v48 }
  0x3d   : > { %v796_v2 = vadd.f32 %v764_v16, %v1740_v37  ;;  %v2266_v56 = vunpack.c.l.bf16 %v1737_v34  ;;  %1604 = vrcp.f32 %v495_v46  ;;  %v2267_v54 = vunpack.c.h.bf16 %v1718_v29 }
  0x3e   : > { %v896_v60 = vadd.f32 %v864_v1, %v795_v50  ;;  %v2268_v15 = vunpack.c.h.bf16 %v1737_v34  ;;  %v704_v61 = vmul.f32 %v1700_v9, %v594_v33  ;;  %v765_v44 = vmul.f32 %v1702_v10, %v1947_v5  ;;  %v1966_v1 = vpop.eup %1598 }
  0x3f   : > { %v1951_v52 = vadd.f32 %v2266_v56, %v571_v25  ;;  %v596_v57 = vadd.f32 %v2267_v54, %v564_v53  ;;  %v897_v39 = vadd.f32 %v865_v22, %v796_v2  ;;  %v771_v46 = vmul.f32 %v1702_v10, %v1906_v30  ;;  %v1981_v22 = vpop.eup %1600 }
  0x40   : > { %v1957_v31 = vadd.f32 %v2268_v15, %v572_v14  ;;  %v772_v33 = vmul.f32 %v1702_v10, %v1918_v23  ;;  %v872_v16 = vmul.f32 %v1704_v11, %v1908_v32  ;;  %v797_v25 = vadd.f32 %v765_v44, %v1740_v37 }
  0x41   : > { %v866_v49 = vmul.f32 %v1704_v11, %v1951_v52  ;;  %v766_v29 = vmul.f32 %v1702_v10, %v596_v57  ;;  %v1428_v48 = vpack.c.bf16 %v897_v39, %v896_v60  ;;  %v565_v50 = vmul.f32 %v1966_v1, %v1785_v28 }
  0x42   : > { %v867_v34 = vmul.f32 %v1704_v11, %v1957_v31  ;;  %v573_v53 = vmul.f32 %v1966_v1, %v1793_v36  ;;  %v566_v2 = vmul.f32 %v1981_v22, %v1789_v35  ;;  %v574_v56 = vmul.f32 %v1981_v22, %v1800_v41 }
  0x43   : > { %v798_v14 = vadd.f32 %v766_v29, %v1740_v37  ;;  %v803_v54 = vadd.f32 %v771_v46, %v703_v8  ;;  %1429 = vst [vmem:[%s1972_s8] sm:$0xff] %v1428_v48   ;;  %v898_v15 = vadd.f32 %v866_v49, %v797_v25  ;;  %v2269_v60 = vunpack.c.l.bf16 %v1759_v58 }
  0x44   : > { %v2270_v44 = vunpack.c.l.bf16 %v1770_v62  ;;  %v804_v47 = vadd.f32 %v772_v33, %v704_v61  ;;  %v2271_v29 = vunpack.c.h.bf16 %v1759_v58  ;;  %v2272_v35 = vunpack.c.h.bf16 %v1770_v62 }
  0x45   : > { %v597_v39 = vadd.f32 %v2269_v60, %v565_v50  ;;  %v899_v36 = vadd.f32 %v867_v34, %v798_v14  ;;  %v873_v41 = vmul.f32 %v1704_v11, %v1922_v19  ;;  %v904_v46 = vadd.f32 %v872_v16, %v803_v54 }
  0x46   : > { %v1998_v28 = vadd.f32 %v2270_v44, %v573_v53  ;;  %v598_v6 = vadd.f32 %v2271_v29, %v566_v2  ;;  %v2004_v32 = vadd.f32 %v2272_v35, %v574_v56  ;;  %v579_v61 = vmul.f32 %v1924_v21, %v1848_v26  ;;  %v2013_v34 = vpop.eup %1602 }
  0x47   : > { %v767_v8 = vmul.f32 %v1702_v10, %v597_v39  ;;  %v1433_v58 = vpack.c.bf16 %v899_v36, %v898_v15  ;;  %v905_v48 = vadd.f32 %v873_v41, %v804_v47  ;;  %v2018_v25 = vpop.eup %1604  ;;  %v567_v16 = vmul.f32 %v2013_v34, %v1810_v13 }
  0x48   : > { %v868_v49 = vmul.f32 %v1704_v11, %v1998_v28  ;;  %v768_v62 = vmul.f32 %v1702_v10, %v598_v6  ;;  %v869_v33 = vmul.f32 %v1704_v11, %v2004_v32  ;;  %v575_v26 = vmul.f32 %v2013_v34, %v1823_v40 }
  0x49   : > { %v799_v50 = vadd.f32 %v767_v8, %v1740_v37  ;;  %v580_v53 = vmul.f32 %v1930_v20, %v1860_v51  ;;  %1535 = vst [vmem:[%s1972_s8 + $0x8] sm:$0xff] %v1433_v58   ;;  %v568_v47 = vmul.f32 %v2018_v25, %v1815_v24  ;;  %v576_v2 = vmul.f32 %v2018_v25, %v1827_v42 }
  0x4a   : > { %v800_v14 = vadd.f32 %v768_v62, %v1740_v37  ;;  %v1448_v56 = vpack.c.bf16 %v905_v48, %v904_v46  ;;  %v2273_v15 = vunpack.c.l.bf16 %v1781_v27  ;;  %v2274_v60 = vunpack.c.l.bf16 %v1796_v38 }
  0x4b   : > { %v900_v54 = vadd.f32 %v868_v49, %v799_v50  ;;  %v2275_v51 = vunpack.c.l.bf16 %v1830_v43  ;;  %v2276_v29 = vunpack.c.h.bf16 %v1781_v27  ;;  %v2277_v35 = vunpack.c.h.bf16 %v1796_v38 }
  0x4c   : > { %v599_v13 = vadd.f32 %v2273_v15, %v567_v16  ;;  %v2037_v40 = vadd.f32 %v2274_v60, %v575_v26  ;;  %v901_v36 = vadd.f32 %v869_v33, %v800_v14  ;;  %1538 = vst [vmem:[%s1972_s8 + $0x20] sm:$0xff] %v1448_v56   ;;  %v2278_v41 = vunpack.c.h.bf16 %v1830_v43 }
  0x4d   : > { %v2041_v44 = vadd.f32 %v2275_v51, %v579_v61  ;;  %v600_v24 = vadd.f32 %v2276_v29, %v568_v47  ;;  %v2047_v42 = vadd.f32 %v2277_v35, %v576_v2  ;;  %v705_v61 = vmul.f32 %v1700_v9, %v1947_v5 }
  0x4e   : > { %v2052_v8 = vadd.f32 %v2278_v41, %v580_v53  ;;  %v769_v49 = vmul.f32 %v1702_v10, %v599_v13  ;;  %v870_v46 = vmul.f32 %v1704_v11, %v2037_v40  ;;  %v706_v27 = vmul.f32 %v1700_v9, %v596_v57 }
  0x4f   : > { %v1438_v58 = vpack.c.bf16 %v901_v36, %v900_v54  ;;  %v770_v38 = vmul.f32 %v1702_v10, %v600_v24  ;;  %v871_v62 = vmul.f32 %v1704_v11, %v2047_v42  ;;  %v773_v43 = vmul.f32 %v1702_v10, %v1951_v52 }
  0x50   : > { %v801_v33 = vadd.f32 %v769_v49, %v1740_v37  ;;  %v774_v48 = vmul.f32 %v1702_v10, %v1957_v31  ;;  %v874_v50 = vmul.f32 %v1704_v11, %v2041_v44  ;;  %v875_v5 = vmul.f32 %v1704_v11, %v2052_v8 }
  0x51   : > { %1536 = vst [vmem:[%s1972_s8 + $0x10] sm:$0xff] %v1438_v58   ;;  %v802_v57 = vadd.f32 %v770_v38, %v1740_v37  ;;  %v805_v16 = vadd.f32 %v773_v43, %v705_v61  ;;  %v581_v26 = vmul.f32 %v1966_v1, %v1868_v3  ;;  %v582_v53 = vmul.f32 %v1981_v22, %v1872_v17 }
  0x52   : > { %v902_v14 = vadd.f32 %v870_v46, %v801_v33  ;;  %v806_v47 = vadd.f32 %v774_v48, %v706_v27  ;;  %v707_v2 = vmul.f32 %v1700_v9, %v597_v39  ;;  %v708_v56 = vmul.f32 %v1700_v9, %v598_v6 }
  0x53   : > { %v903_v54 = vadd.f32 %v871_v62, %v802_v57  ;;  %v906_v15 = vadd.f32 %v874_v50, %v805_v16  ;;  %v2279_v60 = vunpack.c.l.bf16 %v1837_v18  ;;  %v2280_v37 = vunpack.c.h.bf16 %v1837_v18 }
  0x54   : > { %v907_v3 = vadd.f32 %v875_v5, %v806_v47  ;;  %v775_v17 = vmul.f32 %v1702_v10, %v1998_v28  ;;  %v776_v39 = vmul.f32 %v1702_v10, %v2004_v32  ;;  %v583_v6 = vmul.f32 %v2013_v34, %v1878_v0 }
  0x55   : > { %v2082_v51 = vadd.f32 %v2279_v60, %v581_v26  ;;  %v2086_v36 = vadd.f32 %v2280_v37, %v582_v53  ;;  %v1443_v29 = vpack.c.bf16 %v903_v54, %v902_v14  ;;  %v584_v41 = vmul.f32 %v2018_v25, %v1886_v63  ;;  %v1532_v53 = vld [vmem:[%s1688_s28 + $0x68] sm:$0xff]  }
  0x56   : > { %v1453_v49 = vpack.c.bf16 %v907_v3, %v906_v15  ;;  %v807_v46 = vadd.f32 %v775_v17, %v707_v2  ;;  %v808_v61 = vadd.f32 %v776_v39, %v708_v56  ;;  %v2281_v27 = vunpack.c.l.bf16 %v1843_v55  ;;  %v2286_v37 = vld [vmem:[#allocation4_spill] sm:$0xff] }
  0x57   : > { %v876_v35 = vmul.f32 %v1704_v11, %v2082_v51  ;;  %v877_v18 = vmul.f32 %v1704_v11, %v2086_v36  ;;  %1537 = vst [vmem:[%s1972_s8 + $0x18] sm:$0xff] %v1443_v29   ;;  %v2282_v0 = vunpack.c.h.bf16 %v1843_v55  ;;  %v709_v62 = vmul.f32 %v1700_v9, %v599_v13 }
  0x58   : > { %v2102_v58 = vadd.f32 %v2281_v27, %v583_v6  ;;  %v710_v43 = vmul.f32 %v1700_v9, %v600_v24  ;;  %v777_v63 = vmul.f32 %v1702_v10, %v2037_v40  ;;  %1539 = vst [vmem:[%s1972_s8 + $0x28] sm:$0xff] %v1453_v49   ;;  %v778_v50 = vmul.f32 %v1702_v10, %v2047_v42 }
  0x59   : > { %v2107_v38 = vadd.f32 %v2282_v0, %v584_v41  ;;  %v908_v33 = vadd.f32 %v876_v35, %v807_v46  ;;  %v909_v48 = vadd.f32 %v877_v18, %v808_v61  ;;  %v2283_v13 = vunpack.c.h.bf16 %v1856_v4  ;;  %v1518_v18 = vld [vmem:[%s1682_s25 + $0x70] sm:$0xff]  }
  0x5a   : > { %v878_v5 = vmul.f32 %v1704_v11, %v2102_v58  ;;  %v809_v55 = vadd.f32 %v777_v63, %v709_v62  ;;  %v2284_v24 = vunpack.c.h.bf16 %v1851_v59  ;;  %v585_v26 = vmul.f32 %v1882_v45, %v1912_v7  ;;  %v1533_v0 = vld [vmem:[%s1688_s28 + $0x70] sm:$0xff]  }
  0x5b   : > { %v879_v57 = vmul.f32 %v1704_v11, %v2107_v38  ;;  %v1458_v14 = vpack.c.bf16 %v909_v48, %v908_v33  ;;  %v810_v47 = vadd.f32 %v778_v50, %v710_v43  ;;  %v711_v2 = vmul.f32 %v1700_v9, %v1906_v30  ;;  %v2287_v30 = vld [vmem:[#allocation3_spill] sm:$0xff] }
  0x5c   : > { %v554_v16 = vsub.f32 %v2284_v24, %v2283_v13  ;;  %v712_v56 = vmul.f32 %v1700_v9, %v1918_v23  ;;  %v910_v54 = vadd.f32 %v878_v5, %v809_v55  ;;  %v2285_v60 = vunpack.c.l.bf16 %v1856_v4 }
  0x5d   : > { %v779_v45 = vmul.f32 %v1702_v10, %v2286_v37  ;;  %1540 = vst [vmem:[%s1972_s8 + $0x30] sm:$0xff] %v1458_v14   ;;  %v911_v7 = vadd.f32 %v879_v57, %v810_v47  ;;  %v780_v3 = vmul.f32 %v1702_v10, %v1922_v19  ;;  %v1352_v17 = vunpack.c.h.bf16 %v2287_v30 }
  0x5e   : > { %v586_v15 = vmul.f32 %v1890_v12, %v554_v16  ;;  %v2134_v59 = vadd.f32 %v2285_v60, %v585_v26  ;;  %v1415_v23 = vunpack.c.l.bf16 %v1532_v53  ;;  %v2288_v39 = vmov %v2283_v13  ;;  %v1534_v60 = vld [vmem:[%s1688_s28 + $0x78] sm:$0xff]  }
  0x5f   : > { %v811_v6 = vadd.f32 %v779_v45, %v711_v2  ;;  %v1416_v35 = vunpack.c.h.bf16 %v1532_v53  ;;  %v1463_v41 = vpack.c.bf16 %v911_v7, %v910_v54  ;;  %v812_v49 = vadd.f32 %v780_v3, %v712_v56  ;;  %v1519_v53 = vld [vmem:[%s1682_s25 + $0x78] sm:$0xff]  }
  0x60   : > { %v2144_v12 = vadd.f32 %v2288_v39, %v586_v15  ;;  %v880_v29 = vmul.f32 %v1704_v11, %v2134_v59  ;;  %v2289_v46 = vunpack.c.l.bf16 %v2287_v30  ;;  %v713_v27 = vmul.f32 %v1700_v9, %v1951_v52 }
  0x61   : > { %v556_v43 = vsub.f32 %v1352_v17, %v1416_v35  ;;  %v714_v63 = vmul.f32 %v1700_v9, %v1957_v31  ;;  %1541 = vst [vmem:[%s1972_s8 + $0x38] sm:$0xff] %v1463_v41   ;;  %v781_v48 = vmul.f32 %v1702_v10, %v2041_v44  ;;  %v782_v50 = vmul.f32 %v1702_v10, %v2052_v8 }
  0x62   : > { %v555_v61 = vsub.f32 %v2289_v46, %v1415_v23  ;;  %v881_v4 = vmul.f32 %v1704_v11, %v2144_v12  ;;  %v912_v62 = vadd.f32 %v880_v29, %v811_v6  ;;  %v1355_v52 = vunpack.c.l.bf16 %v1518_v18 }
  0x63   : > { %v588_v55 = vmul.f32 %v1930_v20, %v556_v43  ;;  %v1356_v57 = vunpack.c.h.bf16 %v1518_v18  ;;  %v1419_v13 = vunpack.c.l.bf16 %v1533_v0  ;;  %v813_v16 = vadd.f32 %v781_v48, %v713_v27 }
  0x64   : > { %v587_v33 = vmul.f32 %v1924_v21, %v555_v61  ;;  %v913_v5 = vadd.f32 %v881_v4, %v812_v49  ;;  %v814_v31 = vadd.f32 %v782_v50, %v714_v63  ;;  %v1420_v26 = vunpack.c.h.bf16 %v1533_v0 }
  0x65   : > { %v620_v14 = vadd.f32 %v1416_v35, %v588_v55  ;;  %v557_v47 = vsub.f32 %v1355_v52, %v1419_v13  ;;  %v715_v2 = vmul.f32 %v1700_v9, %v1998_v28  ;;  %v716_v20 = vmul.f32 %v1700_v9, %v2004_v32 }
  0x66   : > { %v619_v24 = vadd.f32 %v1415_v23, %v587_v33  ;;  %v1468_v21 = vpack.c.bf16 %v913_v5, %v912_v62  ;;  %v558_v54 = vsub.f32 %v1356_v57, %v1420_v26  ;;  %v783_v15 = vmul.f32 %v1702_v10, %v2082_v51 }
  0x67   : > { %v883_v45 = vmul.f32 %v1704_v11, %v620_v14  ;;  %v589_v7 = vmul.f32 %v1966_v1, %v557_v47  ;;  %v784_v3 = vmul.f32 %v1702_v10, %v2086_v36  ;;  %v1359_v30 = vunpack.c.l.bf16 %v1519_v53 }
  0x68   : > { %v882_v56 = vmul.f32 %v1704_v11, %v619_v24  ;;  %1542 = vst [vmem:[%s1972_s8 + $0x40] sm:$0xff] %v1468_v21   ;;  %v590_v17 = vmul.f32 %v1981_v22, %v558_v54  ;;  %v815_v23 = vadd.f32 %v783_v15, %v715_v2  ;;  %v1360_v39 = vunpack.c.h.bf16 %v1519_v53 }
  0x69   : > { %v915_v6 = vadd.f32 %v883_v45, %v814_v31  ;;  %v621_v32 = vadd.f32 %v1419_v13, %v589_v7  ;;  %v816_v29 = vadd.f32 %v784_v3, %v716_v20  ;;  %v1423_v35 = vunpack.c.l.bf16 %v1534_v60 }
  0x6a   : > { %v914_v28 = vadd.f32 %v882_v56, %v813_v16  ;;  %v622_v18 = vadd.f32 %v1420_v26, %v590_v17  ;;  %v1424_v41 = vunpack.c.h.bf16 %v1534_v60  ;;  %v717_v49 = vmul.f32 %v1700_v9, %v2037_v40 }
  0x6b   : > { %v718_v1 = vmul.f32 %v1700_v9, %v2047_v42  ;;  %v884_v61 = vmul.f32 %v1704_v11, %v621_v32  ;;  %v559_v27 = vsub.f32 %v1359_v30, %v1423_v35  ;;  %v785_v22 = vmul.f32 %v1702_v10, %v2102_v58 }
  0x6c   : > { %v1473_v46 = vpack.c.bf16 %v915_v6, %v914_v28  ;;  %v885_v0 = vmul.f32 %v1704_v11, %v622_v18  ;;  %v560_v4 = vsub.f32 %v1360_v39, %v1424_v41  ;;  %v786_v62 = vmul.f32 %v1702_v10, %v2107_v38 }
  0x6d   : > { %v719_v43 = vmul.f32 %v1700_v9, %v2286_v37  ;;  %v916_v40 = vadd.f32 %v884_v61, %v815_v23  ;;  %v591_v42 = vmul.f32 %v2013_v34, %v559_v27  ;;  %v817_v63 = vadd.f32 %v785_v22, %v717_v49 }
  0x6e   : > { %1543 = vst [vmem:[%s1972_s8 + $0x48] sm:$0xff] %v1473_v46   ;;  %v720_v33 = vmul.f32 %v1700_v9, %v1922_v19  ;;  %v917_v48 = vadd.f32 %v885_v0, %v816_v29  ;;  %v592_v50 = vmul.f32 %v2018_v25, %v560_v4  ;;  %v818_v52 = vadd.f32 %v786_v62, %v718_v1 }
  0x6f   : > { %v787_v5 = vmul.f32 %v1702_v10, %v2134_v59  ;;  %v623_v55 = vadd.f32 %v1423_v35, %v591_v42  ;;  %v788_v37 = vmul.f32 %v1702_v10, %v2144_v12  ;;  %v888_v57 = vmul.f32 0.0, %v1704_v11 }
  0x70   : > { %v721_v34 = vmul.f32 %v1700_v9, %v2041_v44  ;;  %v1478_v13 = vpack.c.bf16 %v917_v48, %v916_v40  ;;  %v624_v16 = vadd.f32 %v1424_v41, %v592_v50  ;;  %v722_v31 = vmul.f32 %v1700_v9, %v2052_v8 }
  0x71   : > { %v819_v19 = vadd.f32 %v787_v5, %v719_v43  ;;  %v886_v25 = vmul.f32 %v1704_v11, %v623_v55  ;;  %v820_v26 = vadd.f32 %v788_v37, %v720_v33  ;;  %v789_v59 = vmul.f32 %v1702_v10, %v619_v24 }
  0x72   : > { %v790_v53 = vmul.f32 %v1702_v10, %v620_v14  ;;  %1544 = vst [vmem:[%s1972_s8 + $0x50] sm:$0xff] %v1478_v13   ;;  %v887_v12 = vmul.f32 %v1704_v11, %v624_v16  ;;  %v723_v44 = vmul.f32 %v1700_v9, %v2082_v51  ;;  %v724_v47 = vmul.f32 %v1700_v9, %v2086_v36 }
  0x73   : > { %v920_v21 = vadd.f32 %v888_v57, %v819_v19  ;;  %v918_v2 = vadd.f32 %v886_v25, %v817_v63  ;;  %v921_v8 = vadd.f32 %v888_v57, %v820_v26  ;;  %v821_v56 = vadd.f32 %v789_v59, %v721_v34 }
  0x74   : > { %v822_v54 = vadd.f32 %v790_v53, %v722_v31  ;;  %v919_v20 = vadd.f32 %v887_v12, %v818_v52  ;;  %v791_v24 = vmul.f32 %v1702_v10, %v621_v32  ;;  %v792_v14 = vmul.f32 %v1702_v10, %v622_v18 }
  0x75   : > { %v725_v11 = vmul.f32 %v1700_v9, %v2102_v58  ;;  %v1488_v15 = vpack.c.bf16 %v921_v8, %v920_v21  ;;  %v922_v51 = vadd.f32 %v888_v57, %v821_v56  ;;  %v726_v36 = vmul.f32 %v1700_v9, %v2107_v38 }
  0x76   : > { %v923_v60 = vadd.f32 %v888_v57, %v822_v54  ;;  %v1483_v45 = vpack.c.bf16 %v919_v20, %v918_v2  ;;  %v823_v7 = vadd.f32 %v791_v24, %v723_v44  ;;  %v824_v3 = vadd.f32 %v792_v14, %v724_v47 }
  0x77   : > { %v793_v30 = vmul.f32 %v1702_v10, %v623_v55  ;;  %1546 = vst [vmem:[%s1972_s8 + $0x60] sm:$0xff] %v1488_v15   ;;  %v794_v17 = vmul.f32 %v1702_v10, %v624_v16 }
  0x78   : > { %v1493_v28 = vpack.c.bf16 %v923_v60, %v922_v51  ;;  %1545 = vst [vmem:[%s1972_s8 + $0x58] sm:$0xff] %v1483_v45   ;;  %v924_v58 = vadd.f32 %v888_v57, %v823_v7  ;;  %v925_v23 = vadd.f32 %v888_v57, %v824_v3 }
  0x79   : > { %v825_v39 = vadd.f32 %v793_v30, %v725_v11  ;;  %v826_v6 = vadd.f32 %v794_v17, %v726_v36 }
  0x7a   : > { %1547 = vst [vmem:[%s1972_s8 + $0x68] sm:$0xff] %v1493_v28   ;;  %v1498_v32 = vpack.c.bf16 %v925_v23, %v924_v58 }
  0x7b   : > { %v926_v29 = vadd.f32 %v888_v57, %v825_v39  ;;  %v927_v9 = vadd.f32 %v888_v57, %v826_v6 }
  0x7c   : > { %1548 = vst [vmem:[%s1972_s8 + $0x70] sm:$0xff] %v1498_v32  }
  0x7d   : > { %v1503_v38 = vpack.c.bf16 %v927_v9, %v926_v29 }
  0x7f   : > { %1549 = vst [vmem:[%s1972_s8 + $0x78] sm:$0xff] %v1503_v38  }
  0x80 PF: > { %s14_s17 = sadd.s32 1, %s1628_s17   ;;  %s2290_s15 = smov %s1624_s16 }
  0x81   : > { %p11_p5 = scmp.ge.s32.totalorder %s14_s17, 4   ;;  %s2291_s16 = smov %s2293_s18 }
  0x83   :  { %13 = sbr.rel (!%p11_p5) target bundleno = 2 (0x2), region = 75 }

// kernel: _lambda_.10
= control target key start
LH: loop header
LB: loop body
LE: loop exit
PB: predicated region body
PF: predicated region fallthrough
CT: control target
= control target key end

     0   :  { %s3157_s12 = smov 0   ;;  %s3159_s13 = smov 0   ;;  %s3956_s0 = inlined_call_operand.vmem [shape: bf16[2,10,10,128], index: 0, kind: input, shape index: {}]   ;;  %s3957_s1 = inlined_call_operand.vmem [shape: bf16[9,128,256], index: 1, kind: input, shape index: {}]   ;;  %s3958_s2 = inlined_call_operand.vmem [shape: f32[1,256], index: 2, kind: input, shape index: {}]   ;;  %s3959_s3 = inlined_call_operand.vmem [shape: bf16[2,64,256], index: 3, kind: output, shape index: {}]  }
   0x1   :  { %s3161_s14 = smov 0  }
   0x2 LB: > { %s25_s15 = sadd.s32 1, %s3130_s13  ;;  %p2385_p0 = scmp.ge.s32.totalorder %s3134_s14, 1  ;;  %s3134_s14 = sphi %s3161_s14, %s13_s14   ;;  %s3130_s13 = sphi %s3159_s13, %s3965_s13   ;;  %s3126_s12 = sphi %s3157_s12, %s3964_s12  }
   0x3   : > { %p27_p1 = scmp.ge.s32.totalorder %s25_s15, 2  ;;  %p172_p2 = scmp.lt.s32.totalorder %s3134_s14, 3 }
   0x5   : > { %s3967_s15 = smov (%p27_p1, %s25_s15), 0  ;;  %p173_p3 = pnand %p2385_p0, %p172_p2 }
   0x6   : > { %v2887_v0 = vld [vmem:[%s3957_s1 + $0x84] ss:$8 sps:$4 sm:$0xff] (!%p173_p3)   ;;  %v3136_v2 = vmov (!%p173_p3), 0   ;;  %v2891_v3 = vld [vmem:[%s3957_s1 + $0x80] ss:$8 sps:$4 sm:$0xff] (!%p173_p3)   ;;  %p209_p4 = scmp.lt.s32.totalorder (!%p173_p3), %s3126_s12, 1 }
   0x7   : > { %176 = sbr.rel (%p173_p3) target bundleno = 400 (0x190), region = 32  ;;  %v2889_v1 = vld [vmem:[%s3957_s1 + $0x204] ss:$8 sps:$4 sm:$0xff] (!%p173_p3)   ;;  %532 = vmatprep.mubr.bf16.mxu1 (!%p173_p3), %v3136_v2  ;;  %1343 = vmatprep.mubr.bf16.mxu0 (!%p173_p3), %v3136_v2  ;;  %v2892_v4 = vld [vmem:[%s3957_s1 + $0x200] ss:$8 sps:$4 sm:$0xff] (!%p173_p3)   ;;  %vm758_vm3 = vcmask (!%p173_p3), 1042432  }
   0x8   : > { %500 = vmatprep.subr.bf16.mxu1 (!%p173_p3), %v2887_v0  ;;  %1311 = vmatprep.subr.bf16.mxu0 (!%p173_p3), %v2889_v1  ;;  %v2893_v5 = vld [vmem:[%s3957_s1 + $0x94] ss:$8 sps:$4 sm:$0xff] (!%p173_p3)   ;;  %v2897_v7 = vld [vmem:[%s3957_s1 + $0x90] ss:$8 sps:$4 sm:$0xff] (!%p173_p3)   ;;  %v2899_v9 = vld [vmem:[%s3957_s1 + $0xa4] ss:$8 sps:$4 sm:$0xff] (!%p173_p3)  }
   0x9   : > { %501 = vmatpush1.bf16.msra.mxu1 (!%p173_p3), %v2891_v3  ;;  %1312 = vmatpush1.bf16.msra.mxu0 (!%p173_p3), %v2892_v4  ;;  %v2895_v6 = vld [vmem:[%s3957_s1 + $0x214] ss:$8 sps:$4 sm:$0xff] (!%p173_p3)   ;;  %v2898_v8 = vld [vmem:[%s3957_s1 + $0x210] ss:$8 sps:$4 sm:$0xff] (!%p173_p3)   ;;  %v2901_v10 = vld [vmem:[%s3957_s1 + $0x224] ss:$8 sps:$4 sm:$0xff] (!%p173_p3)  }
   0xa   : > { %502 = vmatprep.subr.bf16.mxu1 (!%p173_p3), %v2893_v5  ;;  %1313 = vmatprep.subr.bf16.mxu0 (!%p173_p3), %v2895_v6  ;;  %v2903_v11 = vld [vmem:[%s3957_s1 + $0xa0] ss:$8 sps:$4 sm:$0xff] (!%p173_p3)   ;;  %v2905_v13 = vld [vmem:[%s3957_s1 + $0xb4] ss:$8 sps:$4 sm:$0xff] (!%p173_p3)   ;;  %v2909_v15 = vld [vmem:[%s3957_s1 + $0xb0] ss:$8 sps:$4 sm:$0xff] (!%p173_p3)  }
   0xb   : > { %v2904_v12 = vld [vmem:[%s3957_s1 + $0x220] ss:$8 sps:$4 sm:$0xff] (!%p173_p3)   ;;  %v2907_v14 = vld [vmem:[%s3957_s1 + $0x234] ss:$8 sps:$4 sm:$0xff] (!%p173_p3)   ;;  %v2910_v16 = vld [vmem:[%s3957_s1 + $0x230] ss:$8 sps:$4 sm:$0xff] (!%p173_p3)  }
   0xc   : > { %v2911_v17 = vld [vmem:[%s3957_s1 + $0xc4] ss:$8 sps:$4 sm:$0xff] (!%p173_p3)   ;;  %v2915_v19 = vld [vmem:[%s3957_s1 + $0xc0] ss:$8 sps:$4 sm:$0xff] (!%p173_p3)   ;;  %v2917_v21 = vld [vmem:[%s3957_s1 + $0xd4] ss:$8 sps:$4 sm:$0xff] (!%p173_p3)  }
   0xd   : > { %503 = vmatpush1.bf16.msra.mxu1 (!%p173_p3), %v2897_v7  ;;  %1314 = vmatpush1.bf16.msra.mxu0 (!%p173_p3), %v2898_v8  ;;  %v2913_v18 = vld [vmem:[%s3957_s1 + $0x244] ss:$8 sps:$4 sm:$0xff] (!%p173_p3)   ;;  %v2916_v20 = vld [vmem:[%s3957_s1 + $0x240] ss:$8 sps:$4 sm:$0xff] (!%p173_p3)   ;;  %v2919_v22 = vld [vmem:[%s3957_s1 + $0x254] ss:$8 sps:$4 sm:$0xff] (!%p173_p3)  }
   0xe   : > { %504 = vmatprep.subr.bf16.mxu1 %v2899_v9  ;;  %1315 = vmatprep.subr.bf16.mxu0 %v2901_v10  ;;  %s3969_s12 = smov (!%p209_p4, %s3126_s12), 1  ;;  %vm272_vm0 = vsmask.f32 3328  ;;  %v2921_v23 = vld [vmem:[%s3957_s1 + $0xd0] ss:$8 sps:$4 sm:$0xff]   ;;  %vm759_vm4 = vcmask 1046532  }
   0xf   : > { %s2861_s29 = smul.u32 80, %s3969_s12  ;;  %vm273_vm1 = vsmask.f32 7440  ;;  %v2922_v24 = vld [vmem:[%s3957_s1 + $0x250] ss:$8 sps:$4 sm:$0xff]   ;;  %vm3352_vm5 = vmor %vm758_vm3, %vm759_vm4  ;;  %s2708_s21 = sshll.u32 %s3969_s12, 6 }
  0x10   : > { %v2923_v25 = vld [vmem:[%s3957_s1 + $0xe4] ss:$8 sps:$4 sm:$0xff]   ;;  %v2927_v29 = vld [vmem:[%s3957_s1 + $0xe0] ss:$8 sps:$4 sm:$0xff]   ;;  %v2929_v39 = vld [vmem:[%s3957_s1 + $0xf4] ss:$8 sps:$4 sm:$0xff]   ;;  %s3933_s24 = scalar_lea.vmem %s3959_s3, %s2708_s21 }
  0x11   : > { %505 = vmatpush1.bf16.msra.mxu1 %v2903_v11  ;;  %1316 = vmatpush1.bf16.msra.mxu0 %v2904_v12  ;;  %s3253_s17 = scalar_lea.vmem %s3956_s0, %s2861_s29  ;;  %v2925_v26 = vld [vmem:[%s3957_s1 + $0x264] ss:$8 sps:$4 sm:$0xff]   ;;  %v2928_v38 = vld [vmem:[%s3957_s1 + $0x260] ss:$8 sps:$4 sm:$0xff]   ;;  %v2931_v42 = vld [vmem:[%s3957_s1 + $0x274] ss:$8 sps:$4 sm:$0xff]  }
  0x12   : > { %506 = vmatprep.subr.bf16.mxu1 %v2905_v13  ;;  %1317 = vmatprep.subr.bf16.mxu0 %v2907_v14  ;;  %v3268_v27 = vld [vmem:[%s3253_s17] sm:$0xf]  ;;  %v3271_v28 = vld [vmem:[%s3253_s17 + $0x4] sm:$0x1]  ;;  %v3277_v30 = vld [vmem:[%s3253_s17 + $0x8] sm:$0xf] }
  0x13   : > { %v3280_v31 = vld [vmem:[%s3253_s17 + $0xc] sm:$0x1]  ;;  %v276_v32 = vshrl.u32 %v3268_v27, 16  ;;  %v279_v33 = vshll.u32 %v3268_v27, 16  ;;  %v285_v34 = vshll.u32 %v3271_v28, 16  ;;  %v290_v35 = vshrl.u32 %v3277_v30, 16  ;;  %vm3311_vm2 = vmor %vm272_vm0, %vm273_vm1 }
  0x14   : > { %v293_v36 = vshll.u32 %v3277_v30, 16  ;;  %v299_v37 = vshll.u32 %v3280_v31, 16  ;;  %v2933_v46 = vld [vmem:[%s3957_s1 + $0xf0] ss:$8 sps:$4 sm:$0xff]   ;;  %v3304_v50 = vld [vmem:[%s3253_s17 + $0x14] sm:$0x1] }
  0x15   : > { %507 = vmatpush1.bf16.msra.mxu1 %v2909_v15  ;;  %1318 = vmatpush1.bf16.msra.mxu0 %v2910_v16  ;;  %v278_v40 = vrot.slane %v276_v32, 4  ;;  %v281_v41 = vrot.slane %v279_v33, 5  ;;  %v287_v43 = vrot.slane %v285_v34, 5  ;;  %v292_v44 = vrot.slane %v290_v35, 4  ;;  %v3301_v49 = vld [vmem:[%s3253_s17 + $0x10] sm:$0xf] }
  0x16   : > { %508 = vmatprep.subr.bf16.mxu1 %v2911_v17  ;;  %1319 = vmatprep.subr.bf16.mxu0 %v2913_v18  ;;  %v295_v45 = vrot.slane %v293_v36, 5  ;;  %v301_v48 = vrot.slane %v299_v37, 5  ;;  %v2934_v51 = vld [vmem:[%s3957_s1 + $0x270] ss:$8 sps:$4 sm:$0xff]   ;;  %v304_v54 = vshrl.u32 %v3301_v49, 16  ;;  %v307_v55 = vshll.u32 %v3301_v49, 16 }
  0x17   : > { %v282_v47 = vor.u32 %v281_v41, %v278_v40  ;;  %v313_v56 = vshll.u32 %v3304_v50, 16  ;;  %v2937_v58 = vld [vmem:[%s3957_s1 + $0x4] ss:$8 sps:$4 sm:$0xff]   ;;  %v2505_v59 = vcombine.low %v3277_v30, %v3301_v49  ;;  %v763_v1 = vrot.slane %v3271_v28, 5  ;;  %v2935_v5 = vld [vmem:[%s3957_s1] ss:$8 sps:$4 sm:$0xff]  }
  0x18   : > { %v296_v53 = vor.u32 %v295_v45, %v292_v44  ;;  %v306_v61 = vrot.slane %v304_v54, 4  ;;  %v309_v62 = vrot.slane %v307_v55, 5  ;;  %v2940_v63 = vld [vmem:[%s3957_s1 + $0x284] ss:$8 sps:$4 sm:$0xff]   ;;  %v2445_v3 = vrot.slane %v3268_v27, 9 }
  0x19   : > { %509 = vmatpush1.bf16.msra.mxu1 %v2915_v19  ;;  %1320 = vmatpush1.bf16.msra.mxu0 %v2916_v20  ;;  %v283_v57 = vrot.slane %v282_v47, 4  ;;  %v315_v7 = vrot.slane %v313_v56, 5  ;;  %v3336_v8 = vld [vmem:[%s3253_s17 + $0x18] sm:$0xf]  ;;  %v3339_v10 = vld [vmem:[%s3253_s17 + $0x1c] sm:$0x1] }
  0x1a   : > { %510 = vmatprep.subr.bf16.mxu1 %v2917_v21  ;;  %1321 = vmatprep.subr.bf16.mxu0 %v2919_v22  ;;  %v297_v60 = vrot.slane %v296_v53, 4  ;;  %v310_v6 = vor.u32 %v309_v62, %v306_v61  ;;  %v318_v11 = vshrl.u32 %v3336_v8, 16  ;;  %v321_v12 = vshll.u32 %v3336_v8, 16  ;;  %v2938_v14 = vld [vmem:[%s3957_s1 + $0x280] ss:$8 sps:$4 sm:$0xff]  }
  0x1b   : > { %v288_v0 = vsel %vm3311_vm2, %v283_v57, %v287_v43  ;;  %v2943_v15 = vld [vmem:[%s3957_s1 + $0x14] ss:$8 sps:$4 sm:$0xff]   ;;  %v327_v16 = vshll.u32 %v3339_v10, 16  ;;  %v2941_v18 = vld [vmem:[%s3957_s1 + $0x10] ss:$8 sps:$4 sm:$0xff]  }
  0x1c   : > { %v302_v4 = vsel %vm3311_vm2, %v297_v60, %v301_v48  ;;  %v311_v13 = vrot.slane %v310_v6, 4  ;;  %v320_v19 = vrot.slane %v318_v11, 4  ;;  %v323_v20 = vrot.slane %v321_v12, 5  ;;  %v3360_v21 = vld [vmem:[%s3253_s17 + $0x20] sm:$0xf] }
  0x1d   : > { %511 = vmatpush1.bf16.msra.mxu1 %v2921_v23  ;;  %1322 = vmatpush1.bf16.msra.mxu0 %v2922_v24  ;;  %v2405_v9 = vcombine.low %v288_v0, %v302_v4  ;;  %v3363_v22 = vld [vmem:[%s3253_s17 + $0x24] sm:$0x1]  ;;  %v3367_v23 = vsel %vm3352_vm5, %v2445_v3, %v763_v1  ;;  %v329_v33 = vrot.slane %v327_v16, 5  ;;  %v2944_v35 = vld [vmem:[%s3957_s1 + $0x290] ss:$8 sps:$4 sm:$0xff]  }
  0x1e   : > { %512 = vmatprep.subr.bf16.mxu1 %v2923_v25  ;;  %1323 = vmatprep.subr.bf16.mxu0 %v2925_v26  ;;  %v316_v24 = vsel %vm3311_vm2, %v311_v13, %v315_v7  ;;  %v332_v25 = vshrl.u32 %v3360_v21, 16  ;;  %v335_v26 = vshll.u32 %v3360_v21, 16  ;;  %v324_v32 = vor.u32 %v323_v20, %v320_v19  ;;  %v2949_v36 = vld [vmem:[%s3957_s1 + $0x24] ss:$8 sps:$4 sm:$0xff]   ;;  %v2947_v41 = vld [vmem:[%s3957_s1 + $0x20] ss:$8 sps:$4 sm:$0xff]  }
  0x1f   : > { %v2541_v28 = vcombine.low %v302_v4, %v316_v24  ;;  %v341_v34 = vshll.u32 %v3363_v22, 16  ;;  %v3394_v45 = vld [vmem:[%s3253_s17 + $0x28] sm:$0xf]  ;;  %v2955_v57 = vld [vmem:[%s3957_s1 + $0x34] ss:$8 sps:$4 sm:$0xff]  }
  0x20   : > { %v334_v37 = vrot.slane %v332_v25, 4  ;;  %v325_v40 = vrot.slane %v324_v32, 4  ;;  %v346_v48 = vshrl.u32 %v3394_v45, 16  ;;  %v2950_v56 = vld [vmem:[%s3957_s1 + $0x2a0] ss:$8 sps:$4 sm:$0xff]  }
  0x21   : > { %513 = vmatpush1.bf16.msra.mxu1 %v2927_v29  ;;  %1324 = vmatpush1.bf16.msra.mxu0 %v2928_v38  ;;  %v2946_v29 = vld [vmem:[%s3957_s1 + $0x294] ss:$8 sps:$4 sm:$0xff]   ;;  %v337_v38 = vrot.slane %v335_v26, 5  ;;  %v343_v44 = vrot.slane %v341_v34, 5  ;;  %v3413_v61 = vld [vmem:[%s3253_s17 + $0x30] sm:$0xf] }
  0x22   : > { %514 = vmatprep.subr.bf16.mxu1 %v2929_v39  ;;  %1325 = vmatprep.subr.bf16.mxu0 %v2931_v42  ;;  %v2506_v39 = vcombine.low %v3336_v8, %v3360_v21  ;;  %v2952_v42 = vld [vmem:[%s3957_s1 + $0x2a4] ss:$8 sps:$4 sm:$0xff]   ;;  %v330_v47 = vsel %vm3311_vm2, %v325_v40, %v329_v33  ;;  %v3422_v0 = vld [vmem:[%s3253_s17 + $0x34] sm:$0x1]  ;;  %v360_v1 = vshrl.u32 %v3413_v61, 16  ;;  %v363_v3 = vshll.u32 %v3413_v61, 16 }
  0x23   : > { %v338_v43 = vor.u32 %v337_v38, %v334_v37  ;;  %v3404_v54 = vcombine.low %v316_v24, %v330_v47  ;;  %v2507_v4 = vcombine.low %v3394_v45, %v3413_v61  ;;  %v2958_v6 = vld [vmem:[%s3957_s1 + $0x2b4] ss:$8 sps:$4 sm:$0xff]   ;;  %v369_v11 = vshll.u32 %v3422_v0, 16  ;;  %v2961_v12 = vld [vmem:[%s3957_s1 + $0x44] ss:$8 sps:$4 sm:$0xff]  }
  0x24   : > { %v362_v13 = vrot.slane %v360_v1, 4  ;;  %v3444_v24 = vld [vmem:[%s3253_s17 + $0x38] sm:$0xf]  ;;  %v3447_v25 = vld [vmem:[%s3253_s17 + $0x3c] sm:$0x1] }
  0x25   : > { %515 = vmatpush1.bf16.msra.mxu1 %v2933_v46  ;;  %1326 = vmatpush1.bf16.msra.mxu0 %v2934_v51  ;;  %v3397_v46 = vld [vmem:[%s3253_s17 + $0x2c] sm:$0x1]  ;;  %v349_v51 = vshll.u32 %v3394_v45, 16  ;;  %v339_v55 = vrot.slane %v338_v43, 4  ;;  %v371_v20 = vrot.slane %v369_v11, 5  ;;  %v377_v32 = vshll.u32 %v3444_v24, 16 }
  0x26   : > { %677 = vmatprep.subr.bf16.mxu1 %v2937_v58  ;;  %1511 = vmatprep.subr.bf16.mxu0 %v2940_v63  ;;  %v355_v53 = vshll.u32 %v3397_v46, 16  ;;  %v348_v58 = vrot.slane %v346_v48, 4  ;;  %v2953_v63 = vld [vmem:[%s3957_s1 + $0x30] ss:$8 sps:$4 sm:$0xff]   ;;  %v383_v33 = vshll.u32 %v3447_v25, 16 }
  0x27   : > { %v351_v60 = vrot.slane %v349_v51, 5  ;;  %v344_v62 = vsel %vm3311_vm2, %v339_v55, %v343_v44  ;;  %v2967_v37 = vld [vmem:[%s3957_s1 + $0x54] ss:$8 sps:$4 sm:$0xff]   ;;  %v3466_v38 = vld [vmem:[%s3253_s17 + $0x40] sm:$0xf] }
  0x28   : > { %533 = vmatmul.mubr.bf16.vlgmr.msra.gmra.mrb[0].mxu1 %v2405_v9  ;;  %1344 = vmatmul.mubr.bf16.vlgmr.msra.gmra.mrb[0].mxu0 %v2541_v28  ;;  %v357_v9 = vrot.slane %v355_v53, 5  ;;  %v2964_v28 = vld [vmem:[%s3957_s1 + $0x2c4] ss:$8 sps:$4 sm:$0xff]   ;;  %v1192_v43 = vshrl.u32 %v3466_v38, 16  ;;  %v1195_v48 = vshll.u32 %v3466_v38, 16  ;;  %v2508_v53 = vcombine.low %v3444_v24, %v3466_v38 }
  0x29   : > { %678 = vmatpush1.bf16.msra.mxu1 %v2935_v5  ;;  %542 = vmatprep.mubr.bf16.mxu1 %v3136_v2  ;;  %v2542_v5 = vcombine.low %v330_v47, %v344_v62  ;;  %v352_v7 = vor.u32 %v351_v60, %v348_v58  ;;  %v2965_v47 = vld [vmem:[%s3957_s1 + $0x50] ss:$8 sps:$4 sm:$0xff]   ;;  %v385_v58 = vrot.slane %v383_v33, 5  ;;  %v2976_v11 = vld [vmem:[%s3957_s1 + $0x2e4] ss:$8 sps:$4 sm:$0xff]   ;;  %v2425_v33 = vcombine.low %v3268_v27, %v3277_v30 }
  0x2a   : > { %679 = vmatprep.subr.bf16.mxu1 %v2943_v15  ;;  %1512 = vmatpush1.bf16.msra.mxu0 %v2938_v14  ;;  %v365_v14 = vrot.slane %v363_v3, 5  ;;  %v2956_v15 = vld [vmem:[%s3957_s1 + $0x2b0] ss:$8 sps:$4 sm:$0xff]   ;;  %v1194_v60 = vrot.slane %v1192_v43, 4  ;;  %v2992_v27 = vld [vmem:[%s3957_s1 + $0x114] ss:$8 sps:$4 sm:$0xff]  }
  0x2b   : > { %1353 = vmatprep.mubr.bf16.mxu0 %v3136_v2  ;;  %1513 = vmatprep.subr.bf16.mxu0 %v2946_v29  ;;  %v353_v16 = vrot.slane %v352_v7, 4  ;;  %v374_v29 = vshrl.u32 %v3444_v24, 16  ;;  %v2968_v3 = vld [vmem:[%s3957_s1 + $0x2d0] ss:$8 sps:$4 sm:$0xff]   ;;  %v2987_v43 = vld [vmem:[%s3957_s1 + $0x300] ss:$8 sps:$4 sm:$0xff]  }
  0x2c   : > { %v366_v19 = vor.u32 %v365_v14, %v362_v13  ;;  %v2979_v14 = vld [vmem:[%s3957_s1 + $0x74] ss:$8 sps:$4 sm:$0xff]   ;;  %v3109_v52 = vld [vmem:[%s3957_s1 + $0x470] ss:$8 sps:$4 sm:$0xff]  }
  0x2d   : > { %680 = vmatpush1.bf16.msra.mxu1 %v2941_v18  ;;  %v2959_v18 = vld [vmem:[%s3957_s1 + $0x40] ss:$8 sps:$4 sm:$0xff]   ;;  %v358_v26 = vsel %vm3311_vm2, %v353_v16, %v357_v9  ;;  %v376_v40 = vrot.slane %v374_v29, 4  ;;  %v771_v16 = vrot.slane %v3304_v50, 5  ;;  %v2986_v29 = vld [vmem:[%s3957_s1 + $0x104] ss:$8 sps:$4 sm:$0xff]  }
  0x2e   : > { %681 = vmatprep.subr.bf16.mxu1 %v2949_v36  ;;  %1514 = vmatpush1.bf16.msra.mxu0 %v2944_v35  ;;  %v3457_v34 = vcombine.low %v344_v62, %v358_v26  ;;  %v367_v35 = vrot.slane %v366_v19, 4  ;;  %v2962_v36 = vld [vmem:[%s3957_s1 + $0x2c0] ss:$8 sps:$4 sm:$0xff]   ;;  %v2973_v62 = vld [vmem:[%s3957_s1 + $0x64] ss:$8 sps:$4 sm:$0xff]  }
  0x2f   : > { %1515 = vmatprep.subr.bf16.mxu0 %v2952_v42  ;;  %v3469_v42 = vld [vmem:[%s3253_s17 + $0x44] sm:$0x1] }
  0x30   : > { %543 = vmatmul.mubr.bf16.gmra.mrb[4].mxu1 %v3404_v54  ;;  %1354 = vmatmul.mubr.bf16.gmra.mrb[4].mxu0 %v2542_v5  ;;  %v372_v44 = vsel %vm3311_vm2, %v367_v35, %v371_v20  ;;  %v1201_v51 = vshll.u32 %v3469_v42, 16  ;;  %v2971_v5 = vld [vmem:[%s3957_s1 + $0x60] ss:$8 sps:$4 sm:$0xff]  }
  0x31   : > { %682 = vmatpush1.bf16.msra.mxu1 %v2947_v41  ;;  %552 = vmatprep.mubr.bf16.mxu1 %v3136_v2  ;;  %v379_v41 = vrot.slane %v377_v32, 5  ;;  %v2543_v55 = vcombine.low %v358_v26, %v372_v44  ;;  %v2974_v20 = vld [vmem:[%s3957_s1 + $0x2e0] ss:$8 sps:$4 sm:$0xff]   ;;  %v2977_v26 = vld [vmem:[%s3957_s1 + $0x70] ss:$8 sps:$4 sm:$0xff]  }
  0x32   : > { %683 = vmatprep.subr.bf16.mxu1 %v2955_v57  ;;  %1516 = vmatpush1.bf16.msra.mxu0 %v2950_v56  ;;  %v2970_v56 = vld [vmem:[%s3957_s1 + $0x2d4] ss:$8 sps:$4 sm:$0xff]   ;;  %v1203_v7 = vrot.slane %v1201_v51, 5  ;;  %v2980_v32 = vld [vmem:[%s3957_s1 + $0x2f0] ss:$8 sps:$4 sm:$0xff]   ;;  %v2449_v51 = vrot.slane %v3360_v21, 9 }
  0x33   : > { %1363 = vmatprep.mubr.bf16.mxu0 %v3136_v2  ;;  %1517 = vmatprep.subr.bf16.mxu0 %v2958_v6  ;;  %v380_v57 = vor.u32 %v379_v41, %v376_v40  ;;  %v2984_v35 = vld [vmem:[%s3957_s1 + $0x100] ss:$8 sps:$4 sm:$0xff]   ;;  %v2989_v40 = vld [vmem:[%s3957_s1 + $0x304] ss:$8 sps:$4 sm:$0xff]  }
  0x35   : > { %684 = vmatpush1.bf16.msra.mxu1 %v2953_v63  ;;  %v1197_v63 = vrot.slane %v1195_v48, 5  ;;  %v381_v1 = vrot.slane %v380_v57, 4  ;;  %v775_v48 = vrot.slane %v3339_v10, 5  ;;  %v2999_v57 = vld [vmem:[%s3957_s1 + $0x124] ss:$8 sps:$4 sm:$0xff]  }
  0x36   : > { %685 = vmatprep.subr.bf16.mxu1 %v2961_v12  ;;  %1518 = vmatpush1.bf16.msra.mxu0 %v2956_v15  ;;  %v767_v15 = vrot.slane %v3280_v31, 5  ;;  %v2447_v31 = vrot.slane %v3301_v49, 9  ;;  %v2993_v10 = vld [vmem:[%s3957_s1 + $0x310] ss:$8 sps:$4 sm:$0xff]  }
  0x37   : > { %1519 = vmatprep.subr.bf16.mxu0 %v2964_v28  ;;  %v1198_v6 = vor.u32 %v1197_v63, %v1194_v60  ;;  %v386_v9 = vsel %vm3311_vm2, %v381_v1, %v385_v58  ;;  %v2982_v28 = vld [vmem:[%s3957_s1 + $0x2f4] ss:$8 sps:$4 sm:$0xff]   ;;  %v2997_v58 = vld [vmem:[%s3957_s1 + $0x120] ss:$8 sps:$4 sm:$0xff]   ;;  %v3002_v63 = vld [vmem:[%s3957_s1 + $0x324] ss:$8 sps:$4 sm:$0xff]  }
  0x38   : > { %553 = vmatmul.mubr.bf16.gmra.mrb[8].mxu1 %v3457_v34  ;;  %1364 = vmatmul.mubr.bf16.gmra.mrb[8].mxu0 %v2543_v55  ;;  %v3501_v12 = vcombine.low %v372_v44, %v386_v9  ;;  %v2448_v44 = vrot.slane %v3336_v8, 9  ;;  %v779_v55 = vrot.slane %v3363_v22, 5  ;;  %v3577_v22 = vcombine.low %v3301_v49, %v3336_v8  ;;  %v3005_v1 = vld [vmem:[%s3957_s1 + $0x134] ss:$8 sps:$4 sm:$0xff]   ;;  %v3092_v49 = vld [vmem:[%s3957_s1 + $0x420] ss:$8 sps:$4 sm:$0xff]  }
  0x39   : > { %686 = vmatpush1.bf16.msra.mxu1 %v2959_v18  ;;  %562 = vmatprep.mubr.bf16.mxu1 %v3136_v2  ;;  %v1199_v13 = vrot.slane %v1198_v6, 4  ;;  %v2446_v18 = vrot.slane %v3277_v30, 9  ;;  %v783_v6 = vrot.slane %v3397_v46, 5  ;;  %v3008_v46 = vld [vmem:[%s3957_s1 + $0x334] ss:$8 sps:$4 sm:$0xff]  }
  0x3a   : > { %687 = vmatprep.subr.bf16.mxu1 %v2967_v37  ;;  %1520 = vmatpush1.bf16.msra.mxu0 %v2962_v36  ;;  %v3544_v37 = vsel %vm3352_vm5, %v2447_v31, %v771_v16  ;;  %v3584_v60 = vsel %vm3352_vm5, %v2448_v44, %v775_v48  ;;  %v3010_v16 = vld [vmem:[%s3957_s1 + $0x140] ss:$8 sps:$4 sm:$0xff]   ;;  %v3018_v31 = vld [vmem:[%s3957_s1 + $0x154] ss:$8 sps:$4 sm:$0xff]   ;;  %v3028_v48 = vld [vmem:[%s3957_s1 + $0x364] ss:$8 sps:$4 sm:$0xff]  }
  0x3b   : > { %1373 = vmatprep.mubr.bf16.mxu0 %v3136_v2  ;;  %1521 = vmatprep.subr.bf16.mxu0 %v2970_v56  ;;  %v3512_v19 = vsel %vm3311_vm2, %v1199_v13, %v1203_v7  ;;  %v3540_v36 = vsel %vm3352_vm5, %v2446_v18, %v767_v15  ;;  %v2995_v56 = vld [vmem:[%s3957_s1 + $0x314] ss:$8 sps:$4 sm:$0xff]   ;;  %v2451_v7 = vrot.slane %v3413_v61, 9  ;;  %v787_v13 = vrot.slane %v3422_v0, 5  ;;  %v3006_v15 = vld [vmem:[%s3957_s1 + $0x330] ss:$8 sps:$4 sm:$0xff]  }
  0x3c   : > { %v2544_v50 = vcombine.low %v386_v9, %v3512_v19  ;;  %v2578_v41 = vcombine.low %v3540_v36, %v3544_v37  ;;  %v3000_v9 = vld [vmem:[%s3957_s1 + $0x320] ss:$8 sps:$4 sm:$0xff]   ;;  %v3622_v0 = vcombine.low %v3360_v21, %v3394_v45 }
  0x3d   : > { %688 = vmatpush1.bf16.msra.mxu1 %v2965_v47  ;;  %v2990_v47 = vld [vmem:[%s3957_s1 + $0x110] ss:$8 sps:$4 sm:$0xff]  }
  0x3e   : > { %689 = vmatprep.subr.bf16.mxu1 %v2973_v62  ;;  %1522 = vmatpush1.bf16.msra.mxu0 %v2968_v3  ;;  %v3588_v62 = vsel %vm3352_vm5, %v2449_v51, %v779_v55  ;;  %v3031_v51 = vld [vmem:[%s3957_s1 + $0x174] ss:$8 sps:$4 sm:$0xff]  }
  0x3f   : > { %1523 = vmatprep.subr.bf16.mxu0 %v2976_v11  ;;  %v2579_v3 = vcombine.low %v3584_v60, %v3588_v62  ;;  %v3003_v11 = vld [vmem:[%s3957_s1 + $0x130] ss:$8 sps:$4 sm:$0xff]  }
  0x40   : > { %563 = vmatmul.mubr.bf16.gmra.mrb[12].mxu1 %v3501_v12  ;;  %1374 = vmatmul.mubr.bf16.gmra.mrb[12].mxu0 %v2544_v50 }
  0x41   : > { %690 = vmatpush1.bf16.msra.mxu1 %v2971_v5  ;;  %709 = vmatprep.mubr.bf16.mxu1 %v3136_v2  ;;  %v2450_v5 = vrot.slane %v3394_v45, 9 }
  0x42   : > { %691 = vmatprep.subr.bf16.mxu1 %v2979_v14  ;;  %1524 = vmatpush1.bf16.msra.mxu0 %v2974_v20  ;;  %v3012_v14 = vld [vmem:[%s3957_s1 + $0x144] ss:$8 sps:$4 sm:$0xff]   ;;  %v3633_v20 = vsel %vm3352_vm5, %v2451_v7, %v787_v13  ;;  %v3038_v7 = vld [vmem:[%s3957_s1 + $0x380] ss:$8 sps:$4 sm:$0xff]   ;;  %v3737_v13 = vcombine.low %v3544_v37, %v3584_v60  ;;  %v3053_v60 = vld [vmem:[%s3957_s1 + $0x1b0] ss:$8 sps:$4 sm:$0xff]  }
  0x43   : > { %1543 = vmatprep.mubr.bf16.mxu0 %v3136_v2  ;;  %1525 = vmatprep.subr.bf16.mxu0 %v2982_v28  ;;  %v3629_v18 = vsel %vm3352_vm5, %v2450_v5, %v783_v6  ;;  %v2452_v28 = vrot.slane %v3444_v24, 9  ;;  %v3040_v5 = vld [vmem:[%s3957_s1 + $0x384] ss:$8 sps:$4 sm:$0xff]   ;;  %v3043_v6 = vld [vmem:[%s3957_s1 + $0x194] ss:$8 sps:$4 sm:$0xff]  }
  0x44   : > { %v2580_v50 = vcombine.low %v3629_v18, %v3633_v20  ;;  %v3050_v37 = vld [vmem:[%s3957_s1 + $0x3a0] ss:$8 sps:$4 sm:$0xff]  }
  0x45   : > { %692 = vmatpush1.bf16.msra.mxu1 %v2977_v26  ;;  %v3015_v26 = vld [vmem:[%s3957_s1 + $0x344] ss:$8 sps:$4 sm:$0xff]  }
  0x46   : > { %906 = vmatprep.subr.bf16.mxu1 %v2986_v29  ;;  %1526 = vmatpush1.bf16.msra.mxu0 %v2980_v32  ;;  %v791_v29 = vrot.slane %v3447_v25, 5  ;;  %v2561_v32 = vrot.slane %v3466_v38, 9  ;;  %v3021_v25 = vld [vmem:[%s3957_s1 + $0x354] ss:$8 sps:$4 sm:$0xff]  }
  0x47   : > { %1701 = vmatprep.subr.bf16.mxu0 %v2989_v40  ;;  %v1403_v40 = vrot.slane %v3469_v42, 5  ;;  %v3667_v42 = vcombine.low %v3413_v61, %v3444_v24  ;;  %v3106_v61 = vld [vmem:[%s3957_s1 + $0x460] ss:$8 sps:$4 sm:$0xff]  }
  0x48   : > { %710 = vmatmul.mubr.bf16.vlgmr.msra.gmra.mrb[0].mxu1 %v2425_v33  ;;  %v3013_v33 = vld [vmem:[%s3957_s1 + $0x340] ss:$8 sps:$4 sm:$0xff]   ;;  %v3674_v44 = vsel %vm3352_vm5, %v2452_v28, %v791_v29  ;;  %v3067_v28 = vld [vmem:[%s3957_s1 + $0x1d4] ss:$8 sps:$4 sm:$0xff]  }
  0x49   : > { %907 = vmatpush1.bf16.msra.mxu1 %v2984_v35  ;;  %719 = vmatprep.mubr.bf16.mxu1 %v3136_v2  ;;  %v3016_v35 = vld [vmem:[%s3957_s1 + $0x150] ss:$8 sps:$4 sm:$0xff]   ;;  %v3070_v29 = vld [vmem:[%s3957_s1 + $0x3d4] ss:$8 sps:$4 sm:$0xff]  }
  0x4a   : > { %908 = vmatprep.subr.bf16.mxu1 %v2992_v27  ;;  %1544 = vmatmul.mubr.bf16.vlgmr.msra.gmra.mrb[0].mxu0 %v2578_v41  ;;  %v3025_v27 = vld [vmem:[%s3957_s1 + $0x164] ss:$8 sps:$4 sm:$0xff]   ;;  %v3019_v41 = vld [vmem:[%s3957_s1 + $0x350] ss:$8 sps:$4 sm:$0xff]  }
  0x4b   : > { %1702 = vmatpush1.bf16.msra.mxu0 %v2987_v43  ;;  %1553 = vmatprep.mubr.bf16.mxu0 %v3136_v2  ;;  %v3023_v43 = vld [vmem:[%s3957_s1 + $0x160] ss:$8 sps:$4 sm:$0xff]  }
  0x4c   : > { %1703 = vmatprep.subr.bf16.mxu0 %v2995_v56  ;;  %v3026_v56 = vld [vmem:[%s3957_s1 + $0x360] ss:$8 sps:$4 sm:$0xff]  }
  0x4d   : > { %909 = vmatpush1.bf16.msra.mxu1 %v2990_v47  ;;  %v3678_v47 = vsel %vm3352_vm5, %v2561_v32, %v1403_v40  ;;  %v3073_v32 = vld [vmem:[%s3957_s1 + $0x1e4] ss:$8 sps:$4 sm:$0xff]   ;;  %v3804_v40 = vld [vmem:[%s3253_s17 + $0x48] sm:$0xf] }
  0x4e   : > { %910 = vmatprep.subr.bf16.mxu1 %v2999_v57  ;;  %v2581_v55 = vcombine.low %v3674_v44, %v3678_v47  ;;  %v3029_v57 = vld [vmem:[%s3957_s1 + $0x170] ss:$8 sps:$4 sm:$0xff]   ;;  %v1794_v30 = vshll.u32 %v3804_v40, 16 }
  0x4f   : > { %1704 = vmatpush1.bf16.msra.mxu0 %v2993_v10  ;;  %v3034_v10 = vld [vmem:[%s3957_s1 + $0x374] ss:$8 sps:$4 sm:$0xff]  }
  0x50   : > { %720 = vmatmul.mubr.bf16.gmra.mrb[4].mxu1 %v3577_v22  ;;  %1705 = vmatprep.subr.bf16.mxu0 %v3002_v63  ;;  %v3032_v63 = vld [vmem:[%s3957_s1 + $0x370] ss:$8 sps:$4 sm:$0xff]  }
  0x51   : > { %911 = vmatpush1.bf16.msra.mxu1 %v2997_v58  ;;  %729 = vmatprep.mubr.bf16.mxu1 %v3136_v2  ;;  %v3037_v58 = vld [vmem:[%s3957_s1 + $0x184] ss:$8 sps:$4 sm:$0xff]  }
  0x52   : > { %912 = vmatprep.subr.bf16.mxu1 %v3005_v1  ;;  %1554 = vmatmul.mubr.bf16.gmra.mrb[4].mxu0 %v2579_v3  ;;  %v2469_v1 = vcombine.low %v3367_v23, %v3540_v36  ;;  %v3035_v3 = vld [vmem:[%s3957_s1 + $0x180] ss:$8 sps:$4 sm:$0xff]   ;;  %v3041_v23 = vld [vmem:[%s3957_s1 + $0x190] ss:$8 sps:$4 sm:$0xff]   ;;  %v3046_v36 = vld [vmem:[%s3957_s1 + $0x394] ss:$8 sps:$4 sm:$0xff]  }
  0x53   : > { %1706 = vmatpush1.bf16.msra.mxu0 %v3000_v9  ;;  %1563 = vmatprep.mubr.bf16.mxu0 %v3136_v2  ;;  %v3049_v9 = vld [vmem:[%s3957_s1 + $0x1a4] ss:$8 sps:$4 sm:$0xff]  }
  0x54   : > { %1707 = vmatprep.subr.bf16.mxu0 %v3008_v46  ;;  %v3047_v46 = vld [vmem:[%s3957_s1 + $0x1a0] ss:$8 sps:$4 sm:$0xff]  }
  0x55   : > { %913 = vmatpush1.bf16.msra.mxu1 %v3003_v11  ;;  %v3044_v11 = vld [vmem:[%s3957_s1 + $0x390] ss:$8 sps:$4 sm:$0xff]  }
  0x56   : > { %914 = vmatprep.subr.bf16.mxu1 %v3012_v14  ;;  %v3055_v14 = vld [vmem:[%s3957_s1 + $0x1b4] ss:$8 sps:$4 sm:$0xff]  }
  0x57   : > { %1708 = vmatpush1.bf16.msra.mxu0 %v3006_v15  ;;  %v3058_v15 = vld [vmem:[%s3957_s1 + $0x3b4] ss:$8 sps:$4 sm:$0xff]  }
  0x58   : > { %730 = vmatmul.mubr.bf16.gmra.mrb[8].mxu1 %v3622_v0  ;;  %1709 = vmatprep.subr.bf16.mxu0 %v3015_v26  ;;  %v3056_v26 = vld [vmem:[%s3957_s1 + $0x3b0] ss:$8 sps:$4 sm:$0xff]  }
  0x59   : > { %915 = vmatpush1.bf16.msra.mxu1 %v3010_v16  ;;  %739 = vmatprep.mubr.bf16.mxu1 %v3136_v2  ;;  %v3061_v16 = vld [vmem:[%s3957_s1 + $0x1c4] ss:$8 sps:$4 sm:$0xff]  }
  0x5a   : > { %916 = vmatprep.subr.bf16.mxu1 %v3018_v31  ;;  %1564 = vmatmul.mubr.bf16.gmra.mrb[8].mxu0 %v2580_v50  ;;  %v3769_v31 = vcombine.low %v3588_v62, %v3629_v18  ;;  %v3059_v50 = vld [vmem:[%s3957_s1 + $0x1c0] ss:$8 sps:$4 sm:$0xff]   ;;  %v3065_v18 = vld [vmem:[%s3957_s1 + $0x1d0] ss:$8 sps:$4 sm:$0xff]  }
  0x5b   : > { %1710 = vmatpush1.bf16.msra.mxu0 %v3013_v33  ;;  %1573 = vmatprep.mubr.bf16.mxu0 %v3136_v2  ;;  %v3062_v62 = vld [vmem:[%s3957_s1 + $0x3c0] ss:$8 sps:$4 sm:$0xff]   ;;  %v3068_v33 = vld [vmem:[%s3957_s1 + $0x3d0] ss:$8 sps:$4 sm:$0xff]  }
  0x5c   : > { %1711 = vmatprep.subr.bf16.mxu0 %v3021_v25  ;;  %v3071_v25 = vld [vmem:[%s3957_s1 + $0x1e0] ss:$8 sps:$4 sm:$0xff]  }
  0x5d   : > { %917 = vmatpush1.bf16.msra.mxu1 %v3016_v35  ;;  %v3801_v35 = vcombine.low %v3633_v20, %v3674_v44  ;;  %v2614_v20 = vcombine.low %v3466_v38, %v3804_v40  ;;  %v3083_v44 = vld [vmem:[%s3957_s1 + $0x3f4] ss:$8 sps:$4 sm:$0xff]  }
  0x5e   : > { %918 = vmatprep.subr.bf16.mxu1 %v3025_v27  ;;  %v3077_v27 = vld [vmem:[%s3957_s1 + $0x3e4] ss:$8 sps:$4 sm:$0xff]  }
  0x5f   : > { %1712 = vmatpush1.bf16.msra.mxu0 %v3019_v41  ;;  %v3080_v41 = vld [vmem:[%s3957_s1 + $0x1f4] ss:$8 sps:$4 sm:$0xff]  }
  0x60   : > { %740 = vmatmul.mubr.bf16.gmra.mrb[12].mxu1 %v3667_v42  ;;  %1713 = vmatprep.subr.bf16.mxu0 %v3028_v48  ;;  %v3087_v48 = vld [vmem:[%s3957_s1 + $0x404] ss:$8 sps:$4 sm:$0xff]  }
  0x61   : > { %919 = vmatpush1.bf16.msra.mxu1 %v3023_v43  ;;  %938 = vmatprep.mubr.bf16.mxu1 %v3136_v2  ;;  %v3078_v43 = vld [vmem:[%s3957_s1 + $0x1f0] ss:$8 sps:$4 sm:$0xff]  }
  0x62   : > { %920 = vmatprep.subr.bf16.mxu1 %v3031_v51  ;;  %1574 = vmatmul.mubr.bf16.gmra.mrb[12].mxu0 %v2581_v55  ;;  %v3081_v51 = vld [vmem:[%s3957_s1 + $0x3f0] ss:$8 sps:$4 sm:$0xff]   ;;  %v3085_v55 = vld [vmem:[%s3957_s1 + $0x400] ss:$8 sps:$4 sm:$0xff]  }
  0x63   : > { %1714 = vmatpush1.bf16.msra.mxu0 %v3026_v56  ;;  %1733 = vmatprep.mubr.bf16.mxu0 %v3136_v2  ;;  %v3090_v56 = vld [vmem:[%s3957_s1 + $0x414] ss:$8 sps:$4 sm:$0xff]  }
  0x64   : > { %1715 = vmatprep.subr.bf16.mxu0 %v3034_v10  ;;  %v3094_v10 = vld [vmem:[%s3957_s1 + $0x424] ss:$8 sps:$4 sm:$0xff]  }
  0x65   : > { %921 = vmatpush1.bf16.msra.mxu1 %v3029_v57  ;;  %v3088_v57 = vld [vmem:[%s3957_s1 + $0x410] ss:$8 sps:$4 sm:$0xff]  }
  0x66   : > { %1102 = vmatprep.subr.bf16.mxu1 %v3037_v58  ;;  %v1791_v58 = vshrl.u32 %v3804_v40, 16 }
  0x67   : > { %1716 = vmatpush1.bf16.msra.mxu0 %v3032_v63  ;;  %v1796_v63 = vrot.slane %v1794_v30, 5 }
  0x68   : > { %939 = vmatmul.mubr.bf16.vlgmr.msra.gmra.mrb[0].mxu1 %v2469_v1  ;;  %1904 = vmatprep.subr.bf16.mxu0 %v3040_v5  ;;  %v3095_v1 = vld [vmem:[%s3957_s1 + $0x430] ss:$8 sps:$4 sm:$0xff]   ;;  %v3101_v5 = vld [vmem:[%s3957_s1 + $0x444] ss:$8 sps:$4 sm:$0xff]  }
  0x69   : > { %1103 = vmatpush1.bf16.msra.mxu1 %v3035_v3  ;;  %948 = vmatprep.mubr.bf16.mxu1 %v3136_v2  ;;  %v255_v3 = vld [vmem:[%s3253_s17 + $0x4c] sm:$0x1] }
  0x6a   : > { %1104 = vmatprep.subr.bf16.mxu1 %v3043_v6  ;;  %1734 = vmatmul.mubr.bf16.vlgmr.msra.gmra.mrb[0].mxu0 %v3577_v22  ;;  %v3052_v22 = vld [vmem:[%s3957_s1 + $0x3a4] ss:$8 sps:$4 sm:$0xff]   ;;  %v1800_v21 = vshll.u32 %v255_v3, 16  ;;  %v3104_v6 = vld [vmem:[%s3957_s1 + $0x454] ss:$8 sps:$4 sm:$0xff]  }
  0x6b   : > { %1905 = vmatpush1.bf16.msra.mxu0 %v3038_v7  ;;  %1743 = vmatprep.mubr.bf16.mxu0 %v3136_v2 }
  0x6c   : > { %1906 = vmatprep.subr.bf16.mxu0 %v3046_v36  ;;  %v1802_v7 = vrot.slane %v1800_v21, 5  ;;  %v3108_v36 = vld [vmem:[%s3957_s1 + $0x464] ss:$8 sps:$4 sm:$0xff]  }
  0x6d   : > { %1105 = vmatpush1.bf16.msra.mxu1 %v3041_v23  ;;  %v3102_v23 = vld [vmem:[%s3957_s1 + $0x450] ss:$8 sps:$4 sm:$0xff]  }
  0x6e   : > { %1106 = vmatprep.subr.bf16.mxu1 %v3049_v9 }
  0x6f   : > { %1907 = vmatpush1.bf16.msra.mxu0 %v3044_v11 }
  0x70   : > { %949 = vmatmul.mubr.bf16.gmra.mrb[4].mxu1 %v3737_v13  ;;  %1908 = vmatprep.subr.bf16.mxu0 %v3052_v22 }
  0x71   : > { %1107 = vmatpush1.bf16.msra.mxu1 %v3047_v46  ;;  %958 = vmatprep.mubr.bf16.mxu1 %v3136_v2 }
  0x72   : > { %1108 = vmatprep.subr.bf16.mxu1 %v3055_v14  ;;  %1744 = vmatmul.mubr.bf16.gmra.mrb[4].mxu0 %v3622_v0  ;;  %v3064_v0 = vld [vmem:[%s3957_s1 + $0x3c4] ss:$8 sps:$4 sm:$0xff]  }
  0x73   : > { %1909 = vmatpush1.bf16.msra.mxu0 %v3050_v37  ;;  %1753 = vmatprep.mubr.bf16.mxu0 %v3136_v2 }
  0x74   : > { %1910 = vmatprep.subr.bf16.mxu0 %v3058_v15 }
  0x75   : > { %1109 = vmatpush1.bf16.msra.mxu1 %v3053_v60 }
  0x76   : > { %1110 = vmatprep.subr.bf16.mxu1 %v3061_v16 }
  0x77   : > { %1911 = vmatpush1.bf16.msra.mxu0 %v3056_v26  ;;  %v2189_v26 = vlaneseq }
  0x78   : > { %959 = vmatmul.mubr.bf16.gmra.mrb[8].mxu1 %v3769_v31  ;;  %1912 = vmatprep.subr.bf16.mxu0 %v3064_v0 }
  0x79   : > { %1111 = vmatpush1.bf16.msra.mxu1 %v3059_v50  ;;  %968 = vmatprep.mubr.bf16.mxu1 %v3136_v2 }
  0x7a   : > { %1112 = vmatprep.subr.bf16.mxu1 %v3067_v28  ;;  %1754 = vmatmul.mubr.bf16.gmra.mrb[8].mxu0 %v3667_v42  ;;  %v3075_v42 = vld [vmem:[%s3957_s1 + $0x3e0] ss:$8 sps:$4 sm:$0xff]  }
  0x7b   : > { %1913 = vmatpush1.bf16.msra.mxu0 %v3062_v62  ;;  %1763 = vmatprep.mubr.bf16.mxu0 %v3136_v2 }
  0x7c   : > { %1914 = vmatprep.subr.bf16.mxu0 %v3070_v29 }
  0x7d   : > { %1113 = vmatpush1.bf16.msra.mxu1 %v3065_v18 }
  0x7e   : > { %1114 = vmatprep.subr.bf16.mxu1 %v3073_v32  ;;  %v2190_v32 = vshrl.u32 %v2189_v26, 7 }
  0x7f   : > { %1915 = vmatpush1.bf16.msra.mxu0 %v3068_v33 }
  0x80   : > { %969 = vmatmul.mubr.bf16.gmra.mrb[12].mxu1 %v3801_v35  ;;  %1916 = vmatprep.subr.bf16.mxu0 %v3077_v27 }
  0x81   : > { %1115 = vmatpush1.bf16.msra.mxu1 %v3071_v25  ;;  %1134 = vmatprep.mubr.bf16.mxu1 %v3136_v2 }
  0x82   : > { %1116 = vmatprep.subr.bf16.mxu1 %v3080_v41  ;;  %1764 = vmatmul.mubr.bf16.gmra.mrb[12].mxu0 %v2614_v20  ;;  %v2191_v41 = vsub.s32 0, %v2190_v32 }
  0x83   : > { %1917 = vmatpush1.bf16.msra.mxu0 %v3075_v42  ;;  %1936 = vmatprep.mubr.bf16.mxu0 %v3136_v2 }
  0x84   : > { %1918 = vmatprep.subr.bf16.mxu0 %v3083_v44  ;;  %v2195_v44 = vsub.s32 1, %v2190_v32 }
  0x85   : > { %1117 = vmatpush1.bf16.msra.mxu1 %v3078_v43  ;;  %v2187_v43 = vld [vmem:[%s3958_s2] sm:$0x3] }
  0x86   : > { %2717 = vmatprep.subr.bf16.mxu1 %v3087_v48  ;;  %v2196_v30 = vrot.slane %v2187_v43, %v2195_v44 }
  0x87   : > { %1919 = vmatpush1.bf16.msra.mxu0 %v3081_v51 }
  0x88   : > { %1135 = vmatmul.mubr.bf16.vlgmr.msra.gmra.mrb[0].mxu1 %v2505_v59  ;;  %2098 = vmatprep.subr.bf16.mxu0 %v3087_v48  ;;  %v3097_v59 = vld [vmem:[%s3957_s1 + $0x434] ss:$8 sps:$4 sm:$0xff]  }
  0x89   : > { %2725 = vmatpush1.bf16.msra.mxu1 %v3085_v55  ;;  %1144 = vmatprep.mubr.bf16.mxu1 %v3136_v2 }
  0x8a   : > { %2718 = vmatprep.subr.bf16.mxu1 %v3090_v56  ;;  %1937 = vmatmul.mubr.bf16.vlgmr.msra.gmra.mrb[0].mxu0 %v3404_v54  ;;  %v1793_v54 = vrot.slane %v1791_v58, 4 }
  0x8b   : > { %2099 = vmatpush1.bf16.msra.mxu0 %v3085_v55  ;;  %1946 = vmatprep.mubr.bf16.mxu0 %v3136_v2 }
  0x8c   : > { %2100 = vmatprep.subr.bf16.mxu0 %v3090_v56  ;;  %v1797_v8 = vor.u32 %v1796_v63, %v1793_v54 }
  0x8d   : > { %2726 = vmatpush1.bf16.msra.mxu1 %v3088_v57 }
  0x8e   : > { %2719 = vmatprep.subr.bf16.mxu1 %v3094_v10 }
  0x8f   : > { %2101 = vmatpush1.bf16.msra.mxu0 %v3088_v57 }
  0x90   : > { %1145 = vmatmul.mubr.bf16.gmra.mrb[4].mxu1 %v2506_v39  ;;  %2102 = vmatprep.subr.bf16.mxu0 %v3094_v10  ;;  %v3099_v39 = vld [vmem:[%s3957_s1 + $0x440] ss:$8 sps:$4 sm:$0xff]   ;;  %v2192_v10 = vrot.slane %v2187_v43, %v2191_v41 }
  0x91   : > { %2727 = vmatpush1.bf16.msra.mxu1 %v3092_v49  ;;  %1154 = vmatprep.mubr.bf16.mxu1 %v3136_v2 }
  0x92   : > { %2720 = vmatprep.subr.bf16.mxu1 %v3097_v59  ;;  %1947 = vmatmul.mubr.bf16.gmra.mrb[4].mxu0 %v3457_v34  ;;  %v1798_v34 = vrot.slane %v1797_v8, 4 }
  0x93   : > { %2103 = vmatpush1.bf16.msra.mxu0 %v3092_v49  ;;  %1956 = vmatprep.mubr.bf16.mxu0 %v3136_v2 }
  0x94   : > { %2104 = vmatprep.subr.bf16.mxu0 %v3097_v59  ;;  %v1803_v45 = vsel %vm3311_vm2, %v1798_v34, %v1802_v7 }
  0x95   : > { %2728 = vmatpush1.bf16.msra.mxu1 %v3095_v1  ;;  %v2647_v9 = vcombine.low %v3512_v19, %v1803_v45  ;;  %v1996_v19 = vrot.slane %v255_v3, 5 }
  0x96   : > { %2721 = vmatprep.subr.bf16.mxu1 %v3101_v5 }
  0x97   : > { %2105 = vmatpush1.bf16.msra.mxu0 %v3095_v1 }
  0x98   : > { %1155 = vmatmul.mubr.bf16.gmra.mrb[8].mxu1 %v2507_v4  ;;  %2106 = vmatprep.subr.bf16.mxu0 %v3101_v5  ;;  %v3111_v4 = vld [vmem:[%s3957_s1 + $0x474] ss:$8 sps:$4 sm:$0xff]  }
  0x99   : > { %2729 = vmatpush1.bf16.msra.mxu1 %v3099_v39  ;;  %1164 = vmatprep.mubr.bf16.mxu1 %v3136_v2 }
  0x9a   : > { %2722 = vmatprep.subr.bf16.mxu1 %v3104_v6  ;;  %1957 = vmatmul.mubr.bf16.gmra.mrb[8].mxu0 %v3501_v12  ;;  %v2664_v12 = vrot.slane %v3804_v40, 9 }
  0x9b   : > { %2107 = vmatpush1.bf16.msra.mxu0 %v3099_v39  ;;  %1966 = vmatprep.mubr.bf16.mxu0 %v3136_v2 }
  0x9c   : > { %2108 = vmatprep.subr.bf16.mxu0 %v3104_v6  ;;  %v1997_v24 = vsel %vm3352_vm5, %v2664_v12, %v1996_v19 }
  0x9d   : > { %2730 = vmatpush1.bf16.msra.mxu1 %v3102_v23  ;;  %v2681_v38 = vcombine.low %v3678_v47, %v1997_v24 }
  0x9e   : > { %2723 = vmatprep.subr.bf16.mxu1 %v3108_v36 }
  0x9f   : > { %2109 = vmatpush1.bf16.msra.mxu0 %v3102_v23 }
  0xa0   : > { %1165 = vmatmul.mubr.bf16.gmra.mrb[12].mxu1 %v2508_v53  ;;  %2110 = vmatprep.subr.bf16.mxu0 %v3108_v36 }
  0xa1   : > { %2731 = vmatpush1.bf16.msra.mxu1 %v3106_v61  ;;  %2150 = vmatprep.mubr.bf16.mxu1 %v3136_v2 }
  0xa2   : > { %2724 = vmatprep.subr.bf16.mxu1 %v3111_v4  ;;  %1967 = vmatmul.mubr.bf16.gmra.mrb[12].mxu0 %v2647_v9 }
  0xa3   : > { %2111 = vmatpush1.bf16.msra.mxu0 %v3106_v61  ;;  %2130 = vmatprep.mubr.bf16.mxu0 %v3136_v2 }
  0xa4   : > { %2112 = vmatprep.subr.bf16.mxu0 %v3111_v4 }
  0xa5   : > { %2732 = vmatpush1.bf16.msra.mxu1 %v3109_v52 }
  0xa7   : > { %2113 = vmatpush1.bf16.msra.mxu0 %v3109_v52 }
  0xa8   : > { %2151 = vmatmul.mubr.bf16.vlgmr.msra.gmra.mrb[16].mxu1 %v3801_v35 }
  0xa9   : > { %2160 = vmatprep.mubr.bf16.mxu1 %v3136_v2 }
  0xaa   : > { %2131 = vmatmul.mubr.bf16.vlgmr.msra.gmra.mrb[0].mxu0 %v3737_v13 }
  0xab   : > { %2140 = vmatprep.mubr.bf16.mxu0 %v3136_v2 }
  0xb0   : > { %2161 = vmatmul.mubr.bf16.gmra.mrb[20].mxu1 %v2681_v38 }
  0xb2   : > { %2141 = vmatmul.mubr.bf16.gmra.mrb[4].mxu0 %v3769_v31 }
 0x15b   : > { %v1136_v53 = vpop.f32.mrb[0].mxu1 }
 0x15c   : > { %v1138_v11 = vpop.f32.mrb[1].mxu1 }
 0x15d   : > { %v1140_v46 = vpop.f32.mrb[2].mxu1 }
 0x15e   : > { %v1142_v22 = vpop.f32.mrb[3].mxu1 }
 0x163   : > { %v3918_v14 = vpop.f32.mrb[4].mxu1 }
 0x164   : > { %v3920_v37 = vpop.f32.mrb[5].mxu1 }
 0x165   : > { %v3922_v60 = vpop.f32.mrb[6].mxu1 }
 0x166   : > { %v3924_v17 = vpop.f32.mrb[7].mxu1 }
 0x16b   : > { %v1156_v13 = vpop.f32.mrb[8].mxu1 }
 0x16c   : > { %v1158_v15 = vpop.f32.mrb[9].mxu1 }
 0x16d   : > { %v1160_v2 = vpop.f32.mrb[10].mxu1  ;;  %v1958_v16 = vpop.f32.mrb[8].mxu0 }
 0x16e   : > { %v1162_v47 = vpop.f32.mrb[11].mxu1  ;;  %v2741_v50 = vadd.f32 %v1958_v16, %v1156_v13  ;;  %v1960_v31 = vpop.f32.mrb[9].mxu0 }
 0x16f   : > { %v2743_v0 = vadd.f32 %v1960_v31, %v1158_v15  ;;  %v1962_v28 = vpop.f32.mrb[10].mxu0 }
 0x170   : > { %v2745_v62 = vadd.f32 %v1962_v28, %v1160_v2  ;;  %v1964_v18 = vpop.f32.mrb[11].mxu0 }
 0x171   : > { %v2747_v29 = vadd.f32 %v1964_v18, %v1162_v47 }
 0x173   : > { %v1166_v33 = vpop.f32.mrb[12].mxu1 }
 0x174   : > { %v1168_v35 = vpop.f32.mrb[13].mxu1 }
 0x175   : > { %v1170_v40 = vpop.f32.mrb[14].mxu1  ;;  %v1968_v25 = vpop.f32.mrb[12].mxu0 }
 0x176   : > { %v1172_v27 = vpop.f32.mrb[15].mxu1  ;;  %v2749_v20 = vadd.f32 %v1968_v25, %v1166_v33  ;;  %v1970_v42 = vpop.f32.mrb[13].mxu0 }
 0x177   : > { %v2751_v48 = vadd.f32 %v1970_v42, %v1168_v35  ;;  %v1972_v51 = vpop.f32.mrb[14].mxu0 }
 0x178   : > { %v2753_v55 = vadd.f32 %v1972_v51, %v1170_v40  ;;  %v1974_v56 = vpop.f32.mrb[15].mxu0 }
 0x179   : > { %v2755_v57 = vadd.f32 %v1974_v56, %v1172_v27 }
 0x17b   : > { %v2152_v58 = vpop.f32.mrb[16].mxu1 }
 0x17c   : > { %v2742_v49 = vadd.f32 %v2741_v50, %v2152_v58  ;;  %v2154_v59 = vpop.f32.mrb[17].mxu1 }
 0x17d   : > { %v2744_v54 = vadd.f32 %v2743_v0, %v2154_v59  ;;  %v2156_v63 = vpop.f32.mrb[18].mxu1  ;;  %v2132_v1 = vpop.f32.mrb[0].mxu0 }
 0x17e   : > { %v2207_v3 = vadd.f32 %v2742_v49, %v2192_v10  ;;  %v2746_v5 = vadd.f32 %v2745_v62, %v2156_v63  ;;  %v2158_v8 = vpop.f32.mrb[19].mxu1  ;;  %v2733_v21 = vadd.f32 %v2132_v1, %v1136_v53  ;;  %v2134_v39 = vpop.f32.mrb[1].mxu0 }
 0x17f   : > { %v2208_v6 = vadd.f32 %v2744_v54, %v2196_v30  ;;  %v2748_v34 = vadd.f32 %v2747_v29, %v2158_v8  ;;  %v2734_v7 = vadd.f32 %v2134_v39, %v1138_v11  ;;  %v2136_v23 = vpop.f32.mrb[2].mxu0 }
 0x180   : > { %v2209_v36 = vadd.f32 %v2746_v5, %v2192_v10  ;;  %v2199_v45 = vadd.f32 %v2733_v21, %v2192_v10  ;;  %v2735_v4 = vadd.f32 %v2136_v23, %v1140_v46  ;;  %v2138_v9 = vpop.f32.mrb[3].mxu0 }
 0x181   : > { %v2713_v61 = vpack.c.bf16 %v2208_v6, %v2207_v3  ;;  %v2210_v52 = vadd.f32 %v2748_v34, %v2196_v30  ;;  %v2200_v12 = vadd.f32 %v2734_v7, %v2196_v30  ;;  %v2736_v19 = vadd.f32 %v2138_v9, %v1142_v22 }
 0x182   : > { %v2201_v24 = vadd.f32 %v2735_v4, %v2192_v10 }
 0x183   : > { %2267 = vst [vmem:[%s3933_s24 + $0x20] sm:$0xff] %v2713_v61  ;;  %v2714_v38 = vpack.c.bf16 %v2210_v52, %v2209_v36  ;;  %v2162_v53 = vpop.f32.mrb[20].mxu1  ;;  %v2709_v13 = vpack.c.bf16 %v2200_v12, %v2199_v45  ;;  %v2202_v15 = vadd.f32 %v2736_v19, %v2196_v30 }
 0x184   : > { %v2750_v2 = vadd.f32 %v2749_v20, %v2162_v53  ;;  %v2164_v11 = vpop.f32.mrb[21].mxu1 }
 0x185   : > { %2268 = vst [vmem:[%s3933_s24 + $0x28] sm:$0xff] %v2714_v38  ;;  %v2752_v16 = vadd.f32 %v2751_v48, %v2164_v11  ;;  %v2166_v47 = vpop.f32.mrb[22].mxu1  ;;  %2263 = vst [vmem:[%s3933_s24] sm:$0xff] %v2709_v13  ;;  %v2710_v26 = vpack.c.bf16 %v2202_v15, %v2201_v24  ;;  %v2142_v46 = vpop.f32.mrb[4].mxu0 }
 0x186   : > { %v2211_v50 = vadd.f32 %v2750_v2, %v2192_v10  ;;  %v2754_v31 = vadd.f32 %v2753_v55, %v2166_v47  ;;  %v2168_v0 = vpop.f32.mrb[23].mxu1  ;;  %v2737_v22 = vadd.f32 %v2142_v46, %v3918_v14  ;;  %v2144_v28 = vpop.f32.mrb[5].mxu0 }
 0x187   : > { %v2212_v62 = vadd.f32 %v2752_v16, %v2196_v30  ;;  %v2756_v18 = vadd.f32 %v2755_v57, %v2168_v0  ;;  %2264 = vst [vmem:[%s3933_s24 + $0x8] sm:$0xff] %v2710_v26  ;;  %v2738_v29 = vadd.f32 %v2144_v28, %v3920_v37  ;;  %v2146_v32 = vpop.f32.mrb[6].mxu0 }
 0x188   : > { %v2213_v33 = vadd.f32 %v2754_v31, %v2192_v10  ;;  %v2203_v35 = vadd.f32 %v2737_v22, %v2192_v10  ;;  %v2739_v25 = vadd.f32 %v2146_v32, %v3922_v60  ;;  %v2148_v27 = vpop.f32.mrb[7].mxu0 }
 0x189   : > { %v2715_v40 = vpack.c.bf16 %v2212_v62, %v2211_v50  ;;  %v2214_v41 = vadd.f32 %v2756_v18, %v2196_v30  ;;  %v2204_v20 = vadd.f32 %v2738_v29, %v2196_v30  ;;  %v2740_v14 = vadd.f32 %v2148_v27, %v3924_v17 }
 0x18a   : > { %v2205_v42 = vadd.f32 %v2739_v25, %v2192_v10 }
 0x18b   : > { %2269 = vst [vmem:[%s3933_s24 + $0x30] sm:$0xff] %v2715_v40  ;;  %v2716_v43 = vpack.c.bf16 %v2214_v41, %v2213_v33  ;;  %v2711_v44 = vpack.c.bf16 %v2204_v20, %v2203_v35  ;;  %v2206_v48 = vadd.f32 %v2740_v14, %v2196_v30 }
 0x18d   : > { %2270 = vst [vmem:[%s3933_s24 + $0x38] sm:$0xff] %v2716_v43  ;;  %2265 = vst [vmem:[%s3933_s24 + $0x10] sm:$0xff] %v2711_v44  ;;  %v2712_v37 = vpack.c.bf16 %v2206_v48, %v2205_v42 }
 0x18f   : > { %2266 = vst [vmem:[%s3933_s24 + $0x18] sm:$0xff] %v2712_v37 }
 0x190 PF: > { %s13_s14 = sadd.s32 1, %s3134_s14   ;;  %s3964_s12 = smov %s3130_s13 }
 0x191   : > { %p10_p5 = scmp.ge.s32.totalorder %s13_s14, 4   ;;  %s3965_s13 = smov %s3967_s15 }
 0x193   :  { %12 = sbr.rel (!%p10_p5) target bundleno = 2 (0x2), region = 76 }

// kernel: _lambda_.12
= control target key start
LH: loop header
LB: loop body
LE: loop exit
PB: predicated region body
PF: predicated region fallthrough
CT: control target
= control target key end

     0   :  { %s2770_s12 = smov 0   ;;  %s2772_s13 = smov 0   ;;  %s3299_s0 = inlined_call_operand.vmem [shape: bf16[8,10,10,128], index: 0, kind: input, shape index: {}]   ;;  %s3300_s1 = inlined_call_operand.vmem [shape: bf16[9,128,128], index: 1, kind: input, shape index: {}]   ;;  %s3301_s2 = inlined_call_operand.vmem [shape: f32[1,128], index: 2, kind: input, shape index: {}]   ;;  %s3302_s3 = inlined_call_operand.vmem [shape: bf16[8,64,128], index: 3, kind: output, shape index: {}]  }
   0x1   :  { %s2774_s14 = smov 0  }
   0x2 LB: > { %s25_s15 = sadd.s32 1, %s2744_s13  ;;  %p1932_p0 = scmp.ge.s32.totalorder %s2748_s14, 1  ;;  %s2748_s14 = sphi %s2774_s14, %s13_s14   ;;  %s2744_s13 = sphi %s2772_s13, %s3308_s13   ;;  %s2740_s12 = sphi %s2770_s12, %s3307_s12  }
   0x3   : > { %p27_p1 = scmp.ge.s32.totalorder %s25_s15, 8  ;;  %p168_p2 = scmp.lt.s32.totalorder %s2748_s14, 9 }
   0x5   : > { %s3310_s15 = smov (%p27_p1, %s25_s15), 0  ;;  %p169_p3 = pnand %p1932_p0, %p168_p2 }
   0x6   : > { %v2645_v0 = vld [vmem:[%s3300_s1 + $0x40] sm:$0xff] (!%p169_p3)   ;;  %p202_p4 = scmp.lt.s32.totalorder (!%p169_p3), %s2740_s12, 7  ;;  %v2647_v2 = vld [vmem:[%s3300_s1 + $0x48] sm:$0xff] (!%p169_p3)   ;;  %v2649_v4 = vld [vmem:[%s3300_s1 + $0x50] sm:$0xff] (!%p169_p3)   ;;  %vm259_vm0 = vsmask.f32 (!%p169_p3), 3328 }
   0x7   : > { %172 = sbr.rel (%p169_p3) target bundleno = 393 (0x189), region = 32  ;;  %v2646_v1 = vld [vmem:[%s3300_s1 + $0x100] sm:$0xff] (!%p169_p3)   ;;  %2324 = vmatprep.subr.bf16.mxu1 (!%p169_p3), %v2645_v0  ;;  %v2648_v3 = vld [vmem:[%s3300_s1 + $0x108] sm:$0xff] (!%p169_p3)   ;;  %v2650_v5 = vld [vmem:[%s3300_s1 + $0x110] sm:$0xff] (!%p169_p3)   ;;  %vm260_vm1 = vsmask.f32 (!%p169_p3), 7440 }
   0x8   : > { %2420 = vmatprep.subr.bf16.mxu0 (!%p169_p3), %v2646_v1  ;;  %2325 = vmatpush3.bf16.msra.mxu1 (!%p169_p3), %v2645_v0  ;;  %v2651_v6 = vld [vmem:[%s3300_s1 + $0x58] sm:$0xff] (!%p169_p3)   ;;  %v2653_v8 = vld [vmem:[%s3300_s1 + $0x60] sm:$0xff] (!%p169_p3)   ;;  %v2655_v10 = vld [vmem:[%s3300_s1 + $0x68] sm:$0xff] (!%p169_p3)   ;;  %vm665_vm3 = vcmask (!%p169_p3), 1042432   ;;  %vm666_vm4 = vcmask (!%p169_p3), 1046532  }
   0x9   : > { %2421 = vmatpush3.bf16.msra.mxu0 (!%p169_p3), %v2646_v1  ;;  %2326 = vmatprep.subr.bf16.mxu1 (!%p169_p3), %v2647_v2  ;;  %v2652_v7 = vld [vmem:[%s3300_s1 + $0x118] sm:$0xff] (!%p169_p3)   ;;  %v2654_v9 = vld [vmem:[%s3300_s1 + $0x120] sm:$0xff] (!%p169_p3)   ;;  %v2656_v14 = vld [vmem:[%s3300_s1 + $0x128] sm:$0xff] (!%p169_p3)  }
   0xa   : > { %2422 = vmatprep.subr.bf16.mxu0 (!%p169_p3), %v2648_v3  ;;  %v2657_v22 = vld [vmem:[%s3300_s1 + $0x70] sm:$0xff] (!%p169_p3)   ;;  %v2659_v38 = vld [vmem:[%s3300_s1 + $0x78] sm:$0xff] (!%p169_p3)   ;;  %vm2877_vm2 = vmor (!%p169_p3), %vm259_vm0, %vm260_vm1 }
   0xb   : > { %v2658_v23 = vld [vmem:[%s3300_s1 + $0x130] sm:$0xff] (!%p169_p3)   ;;  %v2660_v48 = vld [vmem:[%s3300_s1 + $0x138] sm:$0xff] (!%p169_p3)   ;;  %v2661_v62 = vld [vmem:[%s3300_s1] sm:$0xff] (!%p169_p3)  }
   0xc   : > { %2327 = vmatpush3.bf16.msra.mxu1 (!%p169_p3), %v2647_v2  ;;  %vm2990_vm5 = vmor (!%p169_p3), %vm665_vm3, %vm666_vm4  ;;  %v2689_v39 = vld [vmem:[%s3300_s1 + $0xa8] sm:$0xff] (!%p169_p3)  }
   0xd   : > { %2423 = vmatpush3.bf16.msra.mxu0 (!%p169_p3), %v2648_v3  ;;  %2328 = vmatprep.subr.bf16.mxu1 (!%p169_p3), %v2649_v4  ;;  %v2662_v3 = vld [vmem:[%s3300_s1 + $0x140] sm:$0xff] (!%p169_p3)  }
   0xe   : > { %s3312_s12 = smov (!%p202_p4, %s2740_s12), 7  ;;  %2424 = vmatprep.subr.bf16.mxu0 %v2650_v5 }
   0xf   : > { %s2620_s5 = smul.u32 80, %s3312_s12  ;;  %s2184_s29 = sshll.u32 %s3312_s12, 5 }
  0x10   : > { %2329 = vmatpush3.bf16.msra.mxu1 %v2649_v4 }
  0x11   : > { %2425 = vmatpush3.bf16.msra.mxu0 %v2650_v5  ;;  %2330 = vmatprep.subr.bf16.mxu1 %v2651_v6  ;;  %s2824_s16 = scalar_lea.vmem %s3299_s0, %s2620_s5  ;;  %s221_s5 = scalar_lea.vmem %s3302_s3, %s2184_s29 }
  0x12   : > { %2426 = vmatprep.subr.bf16.mxu0 %v2652_v7  ;;  %v2830_v11 = vld [vmem:[%s2824_s16] sm:$0xf]  ;;  %v2833_v12 = vld [vmem:[%s2824_s16 + $0x4] sm:$0x1]  ;;  %v2836_v13 = vld [vmem:[%s2824_s16 + $0x8] sm:$0xf] }
  0x13   : > { %v2842_v15 = vld [vmem:[%s2824_s16 + $0xc] sm:$0x1]  ;;  %v263_v16 = vshrl.u32 %v2830_v11, 16  ;;  %v266_v17 = vshll.u32 %v2830_v11, 16  ;;  %v272_v18 = vshll.u32 %v2833_v12, 16  ;;  %v277_v19 = vshrl.u32 %v2836_v13, 16 }
  0x14   : > { %2331 = vmatpush3.bf16.msra.mxu1 %v2651_v6  ;;  %v280_v20 = vshll.u32 %v2836_v13, 16  ;;  %v286_v21 = vshll.u32 %v2842_v15, 16  ;;  %v2857_v30 = vld [vmem:[%s2824_s16 + $0x10] sm:$0xf]  ;;  %v2860_v31 = vld [vmem:[%s2824_s16 + $0x14] sm:$0x1] }
  0x15   : > { %2427 = vmatpush3.bf16.msra.mxu0 %v2652_v7  ;;  %2332 = vmatprep.subr.bf16.mxu1 %v2653_v8  ;;  %v265_v24 = vrot.slane %v263_v16, 4  ;;  %v268_v25 = vrot.slane %v266_v17, 5  ;;  %v274_v26 = vrot.slane %v272_v18, 5  ;;  %v279_v27 = vrot.slane %v277_v19, 4  ;;  %v2863_v33 = vld [vmem:[%s2824_s16 + $0x18] sm:$0xf] }
  0x16   : > { %2428 = vmatprep.subr.bf16.mxu0 %v2654_v9  ;;  %v282_v28 = vrot.slane %v280_v20, 5  ;;  %v288_v29 = vrot.slane %v286_v21, 5  ;;  %v2866_v34 = vld [vmem:[%s2824_s16 + $0x1c] sm:$0x1]  ;;  %v291_v35 = vshrl.u32 %v2857_v30, 16  ;;  %v294_v36 = vshll.u32 %v2857_v30, 16 }
  0x17   : > { %v269_v32 = vor.u32 %v268_v25, %v265_v24  ;;  %v2028_v37 = vcombine.low %v2836_v13, %v2857_v30  ;;  %v300_v41 = vshll.u32 %v2860_v31, 16  ;;  %v305_v42 = vshrl.u32 %v2863_v33, 16  ;;  %v2889_v52 = vld [vmem:[%s2824_s16 + $0x20] sm:$0xf]  ;;  %v2894_v56 = vld [vmem:[%s2824_s16 + $0x24] sm:$0x1] }
  0x18   : > { %2333 = vmatpush3.bf16.msra.mxu1 %v2653_v8  ;;  %v283_v40 = vor.u32 %v282_v28, %v279_v27  ;;  %v308_v43 = vshll.u32 %v2863_v33, 16  ;;  %v293_v45 = vrot.slane %v291_v35, 4  ;;  %v296_v46 = vrot.slane %v294_v36, 5  ;;  %v2663_v17 = vld [vmem:[%s3300_s1 + $0x8] sm:$0xff]   ;;  %v2667_v35 = vld [vmem:[%s3300_s1 + $0x18] sm:$0xff]  }
  0x19   : > { %2429 = vmatpush3.bf16.msra.mxu0 %v2654_v9  ;;  %2334 = vmatprep.subr.bf16.mxu1 %v2655_v10  ;;  %v270_v44 = vrot.slane %v269_v32, 4  ;;  %v314_v47 = vshll.u32 %v2866_v34, 16  ;;  %v307_v50 = vrot.slane %v305_v42, 4  ;;  %v302_v55 = vrot.slane %v300_v41, 5  ;;  %v2664_v24 = vld [vmem:[%s3300_s1 + $0x148] sm:$0xff]   ;;  %v2666_v32 = vld [vmem:[%s3300_s1 + $0x150] sm:$0xff]  }
  0x1a   : > { %2430 = vmatprep.subr.bf16.mxu0 %v2656_v14  ;;  %v284_v49 = vrot.slane %v283_v40, 4  ;;  %v310_v51 = vrot.slane %v308_v43, 5  ;;  %v297_v54 = vor.u32 %v296_v46, %v293_v45  ;;  %v319_v60 = vshrl.u32 %v2889_v52, 16  ;;  %v2930_v25 = vld [vmem:[%s2824_s16 + $0x28] sm:$0xf] }
  0x1b   : > { %v275_v53 = vsel %vm2877_vm2, %v270_v44, %v274_v26  ;;  %v316_v59 = vrot.slane %v314_v47, 5  ;;  %v322_v0 = vshll.u32 %v2889_v52, 16  ;;  %v328_v1 = vshll.u32 %v2894_v56, 16  ;;  %v2934_v27 = vld [vmem:[%s2824_s16 + $0x2c] sm:$0x1] }
  0x1c   : > { %2335 = vmatpush3.bf16.msra.mxu1 %v2655_v10  ;;  %v289_v57 = vsel %vm2877_vm2, %v284_v49, %v288_v29  ;;  %v311_v58 = vor.u32 %v310_v51, %v307_v50  ;;  %v298_v63 = vrot.slane %v297_v54, 4  ;;  %v321_v4 = vrot.slane %v319_v60, 4  ;;  %v2949_v42 = vld [vmem:[%s2824_s16 + $0x34] sm:$0x1]  ;;  %v2668_v54 = vld [vmem:[%s3300_s1 + $0x158] sm:$0xff]  }
  0x1d   : > { %2431 = vmatpush3.bf16.msra.mxu0 %v2656_v14  ;;  %2336 = vmatprep.subr.bf16.mxu1 %v2657_v22  ;;  %v1952_v61 = vcombine.low %v275_v53, %v289_v57  ;;  %v324_v6 = vrot.slane %v322_v0, 5  ;;  %v2029_v7 = vcombine.low %v2863_v33, %v2889_v52  ;;  %v330_v16 = vrot.slane %v328_v1, 5  ;;  %v2958_v53 = vld [vmem:[%s2824_s16 + $0x38] sm:$0xf]  ;;  %v2973_v0 = vld [vmem:[%s2824_s16 + $0x40] sm:$0xf] }
  0x1e   : > { %2432 = vmatprep.subr.bf16.mxu0 %v2658_v23  ;;  %v312_v2 = vrot.slane %v311_v58, 4  ;;  %v303_v5 = vsel %vm2877_vm2, %v298_v63, %v302_v55  ;;  %v674_v19 = vrot.slane %v2842_v15, 5  ;;  %v678_v20 = vrot.slane %v2860_v31, 5  ;;  %v2669_v55 = vld [vmem:[%s3300_s1 + $0x20] sm:$0xff]   ;;  %v2967_v58 = vld [vmem:[%s2824_s16 + $0x3c] sm:$0x1] }
  0x1f   : > { %2340 = vmatprep.mubr.bf16.mxu1 %v1952_v61  ;;  %v2056_v9 = vcombine.low %v289_v57, %v303_v5  ;;  %v325_v14 = vor.u32 %v324_v6, %v321_v4  ;;  %v1977_v26 = vrot.slane %v2836_v13, 9  ;;  %v333_v28 = vshrl.u32 %v2930_v25, 16  ;;  %v2976_v1 = vld [vmem:[%s2824_s16 + $0x44] sm:$0x1]  ;;  %v2672_v15 = vld [vmem:[%s3300_s1 + $0x168] sm:$0xff]  }
  0x20   : > { %2337 = vmatpush3.bf16.msra.mxu1 %v2657_v22  ;;  %v317_v8 = vsel %vm2877_vm2, %v312_v2, %v316_v59  ;;  %v2665_v22 = vld [vmem:[%s3300_s1 + $0x10] sm:$0xff]   ;;  %v336_v29 = vshll.u32 %v2930_v25, 16  ;;  %v342_v36 = vshll.u32 %v2934_v27, 16  ;;  %v356_v45 = vshll.u32 %v2949_v42, 16 }
  0x21   : > { %2433 = vmatpush3.bf16.msra.mxu0 %v2658_v23  ;;  %2338 = vmatprep.subr.bf16.mxu1 %v2659_v38  ;;  %v2913_v10 = vcombine.low %v303_v5, %v317_v8  ;;  %v326_v18 = vrot.slane %v325_v14, 4  ;;  %v335_v40 = vrot.slane %v333_v28, 4  ;;  %v1978_v46 = vrot.slane %v2857_v30, 9  ;;  %v2671_v28 = vld [vmem:[%s3300_s1 + $0x28] sm:$0xff]  }
  0x22   : > { %2434 = vmatprep.subr.bf16.mxu0 %v2660_v48  ;;  %2436 = vmatprep.mubr.bf16.mxu0 %v2056_v9  ;;  %v338_v41 = vrot.slane %v336_v29, 5  ;;  %v344_v49 = vrot.slane %v342_v36, 5  ;;  %v358_v57 = vrot.slane %v356_v45, 5  ;;  %v361_v59 = vshrl.u32 %v2958_v53, 16 }
  0x23   : > { %v331_v21 = vsel %vm2877_vm2, %v326_v18, %v330_v16  ;;  %v364_v60 = vshll.u32 %v2958_v53, 16  ;;  %v370_v63 = vshll.u32 %v2967_v58, 16  ;;  %v1003_v4 = vshrl.u32 %v2973_v0, 16  ;;  %v2670_v16 = vld [vmem:[%s3300_s1 + $0x160] sm:$0xff]  }
  0x24   : > { %2339 = vmatpush3.bf16.msra.mxu1 %v2659_v38  ;;  %v2057_v23 = vcombine.low %v317_v8, %v331_v21  ;;  %v2946_v38 = vld [vmem:[%s2824_s16 + $0x30] sm:$0xf]  ;;  %v363_v2 = vrot.slane %v361_v59, 4  ;;  %v1006_v5 = vshll.u32 %v2973_v0, 16  ;;  %v1012_v14 = vshll.u32 %v2976_v1, 16  ;;  %v2678_v59 = vld [vmem:[%s3300_s1 + $0x80] sm:$0xff]  }
  0x25   : > { %2435 = vmatpush3.bf16.msra.mxu0 %v2660_v48  ;;  %2348 = vmatprep.subr.bf16.mxu1 %v2661_v62  ;;  %v347_v43 = vshrl.u32 %v2946_v38, 16  ;;  %v350_v44 = vshll.u32 %v2946_v38, 16  ;;  %v2030_v47 = vcombine.low %v2930_v25, %v2946_v38  ;;  %v339_v48 = vor.u32 %v338_v41, %v335_v40 }
  0x26   : > { %2444 = vmatprep.subr.bf16.mxu0 %v2662_v3  ;;  %v372_v9 = vrot.slane %v370_v63, 5  ;;  %v1014_v41 = vrot.slane %v1012_v14, 5  ;;  %v3012_v45 = vsel %vm2990_vm5, %v1977_v26, %v674_v19  ;;  %v670_v26 = vrot.slane %v2833_v12, 5  ;;  %v3058_v63 = vld [vmem:[%s2824_s16 + $0x48] sm:$0xf]  ;;  %v2679_v14 = vld [vmem:[%s3300_s1 + $0x180] sm:$0xff]  }
  0x27   : > { %2341 = vmatmul.mubr.bf16.vlgmr.msra.gmra.mrb[0].mxu1 %v2913_v10  ;;  %v349_v50 = vrot.slane %v347_v43, 4  ;;  %v352_v51 = vrot.slane %v350_v44, 5  ;;  %v340_v61 = vrot.slane %v339_v48, 4  ;;  %v3018_v48 = vsel %vm2990_vm5, %v1978_v46, %v678_v20 }
  0x28   : > { %2349 = vmatpush3.bf16.msra.mxu1 %v2661_v62  ;;  %2437 = vmatmul.mubr.bf16.vlgmr.msra.gmra.mrb[0].mxu0 %v2057_v23  ;;  %v1008_v23 = vrot.slane %v1006_v5, 5  ;;  %v2085_v20 = vcombine.low %v3012_v45, %v3018_v48  ;;  %v682_v46 = vrot.slane %v2866_v34, 5  ;;  %v1979_v12 = vrot.slane %v2863_v33, 9  ;;  %v242_v5 = vld [vmem:[%s2824_s16 + $0x4c] sm:$0x1] }
  0x29   : > { %2350 = vmatprep.subr.bf16.mxu1 %v2663_v17  ;;  %2445 = vmatpush3.bf16.msra.mxu0 %v2662_v3  ;;  %v353_v62 = vor.u32 %v352_v51, %v349_v50  ;;  %v366_v3 = vrot.slane %v364_v60, 5  ;;  %v345_v6 = vsel %vm2877_vm2, %v340_v61, %v344_v49  ;;  %v2673_v49 = vld [vmem:[%s3300_s1 + $0x30] sm:$0xff]   ;;  %v686_v51 = vrot.slane %v2894_v56, 5 }
  0x2a   : > { %2446 = vmatprep.subr.bf16.mxu0 %v2664_v24  ;;  %v1980_v34 = vrot.slane %v2889_v52, 9  ;;  %v1976_v56 = vrot.slane %v2830_v11, 9  ;;  %v1981_v60 = vrot.slane %v2930_v25, 9  ;;  %v690_v61 = vrot.slane %v2934_v27, 5  ;;  %v2681_v27 = vld [vmem:[%s3300_s1 + $0x88] sm:$0xff]  }
  0x2b   : > { %v354_v8 = vrot.slane %v353_v62, 4  ;;  %v367_v18 = vor.u32 %v366_v3, %v363_v2  ;;  %v1982_v62 = vrot.slane %v2946_v38, 9  ;;  %v1166_v2 = vrot.slane %v2976_v1, 5 }
  0x2c   : > { %2351 = vmatpush3.bf16.msra.mxu1 %v2663_v17  ;;  %v2986_v17 = vcombine.low %v331_v21, %v345_v6  ;;  %v2031_v21 = vcombine.low %v2958_v53, %v2973_v0  ;;  %v3064_v3 = vcombine.low %v2857_v30, %v2863_v33  ;;  %v3078_v1 = vsel %vm2990_vm5, %v1979_v12, %v682_v46  ;;  %v2706_v30 = vld [vmem:[%s3300_s1 + $0x1e0] sm:$0xff]   ;;  %v2721_v33 = vld [vmem:[%s3300_s1 + $0x218] sm:$0xff]  }
  0x2d   : > { %2352 = vmatprep.subr.bf16.mxu1 %v2665_v22  ;;  %2447 = vmatpush3.bf16.msra.mxu0 %v2664_v24  ;;  %v359_v29 = vsel %vm2877_vm2, %v354_v8, %v358_v57  ;;  %v368_v36 = vrot.slane %v367_v18, 4  ;;  %v2676_v57 = vld [vmem:[%s3300_s1 + $0x178] sm:$0xff]   ;;  %v3074_v8 = vcombine.low %v2889_v52, %v2930_v25  ;;  %v3125_v46 = vcombine.low %v2946_v38, %v2958_v53  ;;  %v2687_v24 = vld [vmem:[%s3300_s1 + $0xa0] sm:$0xff]   ;;  %v2724_v25 = vld [vmem:[%s3300_s1 + $0x230] sm:$0xff]  }
  0x2e   : > { %2448 = vmatprep.subr.bf16.mxu0 %v2666_v32  ;;  %2344 = vmatprep.mubr.bf16.mxu1 %v2986_v17  ;;  %v2722_v52 = vld [vmem:[%s3300_s1 + $0x220] sm:$0xff]   ;;  %v2725_v38 = vld [vmem:[%s3300_s1 + $0x238] sm:$0xff]  }
  0x2f   : > { %v373_v43 = vsel %vm2877_vm2, %v368_v36, %v372_v9  ;;  %v1615_v9 = vrot.slane %v242_v5, 5  ;;  %v1461_v36 = vshll.u32 %v3058_v63, 16 }
  0x30   : > { %2353 = vmatpush3.bf16.msra.mxu1 %v2665_v22  ;;  %v1005_v22 = vrot.slane %v1003_v4, 4  ;;  %v3023_v50 = vcombine.low %v359_v29, %v373_v43  ;;  %v694_v4 = vrot.slane %v2949_v42, 5  ;;  %v3082_v42 = vsel %vm2990_vm5, %v1980_v34, %v686_v51  ;;  %v2684_v34 = vld [vmem:[%s3300_s1 + $0x190] sm:$0xff]  }
  0x31   : > { %2354 = vmatprep.subr.bf16.mxu1 %v2667_v35  ;;  %2449 = vmatpush3.bf16.msra.mxu0 %v2666_v32  ;;  %v1964_v32 = vcombine.low %v2830_v11, %v2836_v13  ;;  %v2068_v11 = vrot.slane %v2973_v0, 9  ;;  %v2707_v13 = vld [vmem:[%s3300_s1 + $0xe8] sm:$0xff]  }
  0x32   : > { %2450 = vmatprep.subr.bf16.mxu0 %v2668_v54  ;;  %v1009_v40 = vor.u32 %v1008_v23, %v1005_v22  ;;  %2345 = vmatmul.mubr.bf16.gmra.mrb[4].mxu1 %v3023_v50  ;;  %v1458_v22 = vshrl.u32 %v3058_v63, 16  ;;  %v2683_v23 = vld [vmem:[%s3300_s1 + $0x90] sm:$0xff]  }
  0x33   : > { %2364 = vmatprep.mubr.bf16.mxu1 %v1964_v32 }
  0x34   : > { %2355 = vmatpush3.bf16.msra.mxu1 %v2667_v35  ;;  %v2058_v35 = vcombine.low %v345_v6, %v359_v29  ;;  %v1010_v44 = vrot.slane %v1009_v40, 4  ;;  %v2147_v6 = vrot.slane %v3058_v63, 9  ;;  %v3106_v29 = vsel %vm2990_vm5, %v1982_v62, %v694_v4  ;;  %v2695_v62 = vld [vmem:[%s3300_s1 + $0xb8] sm:$0xff]  }
  0x35   : > { %2356 = vmatprep.subr.bf16.mxu1 %v2669_v55  ;;  %2451 = vmatpush3.bf16.msra.mxu0 %v2668_v54  ;;  %v2675_v54 = vld [vmem:[%s3300_s1 + $0x38] sm:$0xff]   ;;  %v2086_v40 = vcombine.low %v3078_v1, %v3082_v42  ;;  %v1460_v32 = vrot.slane %v1458_v22, 4  ;;  %v3176_v4 = vcombine.low %v3018_v48, %v3078_v1  ;;  %v2701_v48 = vld [vmem:[%s3300_s1 + $0xd0] sm:$0xff]   ;;  %v2705_v22 = vld [vmem:[%s3300_s1 + $0xe0] sm:$0xff]  }
  0x36   : > { %2440 = vmatprep.mubr.bf16.mxu0 %v2058_v35  ;;  %2452 = vmatprep.subr.bf16.mxu0 %v2670_v16  ;;  %v3030_v31 = vsel %vm2877_vm2, %v1010_v44, %v1014_v41  ;;  %v3093_v18 = vsel %vm2990_vm5, %v2147_v6, %v1615_v9  ;;  %v1983_v41 = vrot.slane %v2958_v53, 9  ;;  %v671_v44 = vsel %vm2990_vm5, %v1976_v56, %v670_v26  ;;  %v2699_v6 = vld [vmem:[%s3300_s1 + $0xc8] sm:$0xff]  }
  0x37   : > { %v2059_v19 = vcombine.low %v373_v43, %v3030_v31  ;;  %v698_v43 = vrot.slane %v2967_v58, 5  ;;  %v2000_v58 = vcombine.low %v671_v44, %v3012_v45  ;;  %v2700_v9 = vld [vmem:[%s3300_s1 + $0x1c8] sm:$0xff]  }
  0x38   : > { %2357 = vmatpush3.bf16.msra.mxu1 %v2669_v55  ;;  %v2674_v55 = vld [vmem:[%s3300_s1 + $0x170] sm:$0xff]  }
  0x39   : > { %2358 = vmatprep.subr.bf16.mxu1 %v2671_v28  ;;  %2453 = vmatpush3.bf16.msra.mxu0 %v2670_v16  ;;  %v3089_v16 = vsel %vm2990_vm5, %v2068_v11, %v1166_v2  ;;  %v2693_v11 = vld [vmem:[%s3300_s1 + $0x1b0] sm:$0xff]   ;;  %v2697_v2 = vld [vmem:[%s3300_s1 + $0xc0] sm:$0xff]  }
  0x3a   : > { %2454 = vmatprep.subr.bf16.mxu0 %v2672_v15  ;;  %2441 = vmatmul.mubr.bf16.gmra.mrb[4].mxu0 %v2059_v19  ;;  %v2164_v35 = vcombine.low %v3089_v16, %v3093_v18 }
  0x3b   : > { %2460 = vmatprep.mubr.bf16.mxu0 %v2085_v20  ;;  %v1467_v20 = vshll.u32 %v242_v5, 16 }
  0x3c   : > { %2359 = vmatpush3.bf16.msra.mxu1 %v2671_v28  ;;  %v3102_v28 = vsel %vm2990_vm5, %v1981_v60, %v690_v61  ;;  %v2692_v60 = vld [vmem:[%s3300_s1 + $0xb0] sm:$0xff]   ;;  %v2690_v61 = vld [vmem:[%s3300_s1 + $0x1a8] sm:$0xff]  }
  0x3d   : > { %2360 = vmatprep.subr.bf16.mxu1 %v2673_v49  ;;  %2455 = vmatpush3.bf16.msra.mxu0 %v2672_v15  ;;  %v2682_v15 = vld [vmem:[%s3300_s1 + $0x188] sm:$0xff]   ;;  %v2087_v19 = vcombine.low %v3102_v28, %v3106_v29  ;;  %v1469_v26 = vrot.slane %v1467_v20, 5  ;;  %v3180_v5 = vcombine.low %v3082_v42, %v3102_v28  ;;  %v2703_v42 = vld [vmem:[%s3300_s1 + $0xd8] sm:$0xff]  }
  0x3e   : > { %2456 = vmatprep.subr.bf16.mxu0 %v2674_v55  ;;  %v2712_v28 = vld [vmem:[%s3300_s1 + $0xf8] sm:$0xff]  }
  0x40   : > { %2361 = vmatpush3.bf16.msra.mxu1 %v2673_v49  ;;  %v1463_v49 = vrot.slane %v1461_v36, 5  ;;  %v2713_v36 = vld [vmem:[%s3300_s1 + $0x1f8] sm:$0xff]  }
  0x41   : > { %2362 = vmatprep.subr.bf16.mxu1 %v2675_v54  ;;  %2457 = vmatpush3.bf16.msra.mxu0 %v2674_v55  ;;  %v699_v55 = vsel %vm2990_vm5, %v1983_v41, %v698_v43  ;;  %v2720_v41 = vld [vmem:[%s3300_s1 + $0x210] sm:$0xff]  }
  0x42   : > { %2458 = vmatprep.subr.bf16.mxu0 %v2676_v57  ;;  %v1464_v51 = vor.u32 %v1463_v49, %v1460_v32  ;;  %v2088_v56 = vcombine.low %v699_v55, %v3089_v16  ;;  %v3197_v1 = vcombine.low %v3106_v29, %v699_v55  ;;  %v2716_v29 = vld [vmem:[%s3300_s1 + $0x200] sm:$0xff]  }
  0x44   : > { %2363 = vmatpush3.bf16.msra.mxu1 %v2675_v54  ;;  %v2685_v54 = vld [vmem:[%s3300_s1 + $0x98] sm:$0xff]   ;;  %v1465_v12 = vrot.slane %v1464_v51, 4 }
  0x45   : > { %2372 = vmatprep.subr.bf16.mxu1 %v2678_v59  ;;  %2459 = vmatpush3.bf16.msra.mxu0 %v2676_v57 }
  0x46   : > { %2468 = vmatprep.subr.bf16.mxu0 %v2679_v14  ;;  %v1470_v45 = vsel %vm2877_vm2, %v1465_v12, %v1469_v26 }
  0x47   : > { %2365 = vmatmul.mubr.bf16.vlgmr.msra.gmra.mrb[0].mxu1 %v3064_v3  ;;  %v3141_v57 = vcombine.low %v3030_v31, %v1470_v45  ;;  %v2688_v31 = vld [vmem:[%s3300_s1 + $0x1a0] sm:$0xff]  }
  0x48   : > { %2373 = vmatpush3.bf16.msra.mxu1 %v2678_v59  ;;  %2368 = vmatprep.mubr.bf16.mxu1 %v3074_v8  ;;  %v2686_v59 = vld [vmem:[%s3300_s1 + $0x198] sm:$0xff]  }
  0x49   : > { %2374 = vmatprep.subr.bf16.mxu1 %v2681_v27  ;;  %2461 = vmatmul.mubr.bf16.vlgmr.msra.gmra.mrb[0].mxu0 %v2086_v40  ;;  %v2717_v40 = vld [vmem:[%s3300_s1 + $0x208] sm:$0xff]  }
  0x4a   : > { %2469 = vmatpush3.bf16.msra.mxu0 %v2679_v14  ;;  %2464 = vmatprep.mubr.bf16.mxu0 %v2087_v19  ;;  %v2702_v14 = vld [vmem:[%s3300_s1 + $0x1d0] sm:$0xff]  }
  0x4b   : > { %2470 = vmatprep.subr.bf16.mxu0 %v2682_v15 }
  0x4c   : > { %2375 = vmatpush3.bf16.msra.mxu1 %v2681_v27  ;;  %v2698_v27 = vld [vmem:[%s3300_s1 + $0x1c0] sm:$0xff]  }
  0x4d   : > { %2376 = vmatprep.subr.bf16.mxu1 %v2683_v23 }
  0x4e   : > { %2471 = vmatpush3.bf16.msra.mxu0 %v2682_v15 }
  0x4f   : > { %2369 = vmatmul.mubr.bf16.gmra.mrb[4].mxu1 %v3125_v46  ;;  %2472 = vmatprep.subr.bf16.mxu0 %v2684_v34 }
  0x50   : > { %2377 = vmatpush3.bf16.msra.mxu1 %v2683_v23  ;;  %2388 = vmatprep.mubr.bf16.mxu1 %v2000_v58  ;;  %v2704_v23 = vld [vmem:[%s3300_s1 + $0x1d8] sm:$0xff]  }
  0x51   : > { %2378 = vmatprep.subr.bf16.mxu1 %v2685_v54  ;;  %2465 = vmatmul.mubr.bf16.gmra.mrb[4].mxu0 %v2088_v56 }
  0x52   : > { %2473 = vmatpush3.bf16.msra.mxu0 %v2684_v34  ;;  %2484 = vmatprep.mubr.bf16.mxu0 %v3064_v3  ;;  %v2696_v3 = vld [vmem:[%s3300_s1 + $0x1b8] sm:$0xff]  }
  0x53   : > { %2474 = vmatprep.subr.bf16.mxu0 %v2686_v59 }
  0x54   : > { %2379 = vmatpush3.bf16.msra.mxu1 %v2685_v54 }
  0x55   : > { %2380 = vmatprep.subr.bf16.mxu1 %v2687_v24 }
  0x56   : > { %2475 = vmatpush3.bf16.msra.mxu0 %v2686_v59 }
  0x57   : > { %2476 = vmatprep.subr.bf16.mxu0 %v2688_v31 }
  0x58   : > { %2381 = vmatpush3.bf16.msra.mxu1 %v2687_v24 }
  0x59   : > { %2382 = vmatprep.subr.bf16.mxu1 %v2689_v39 }
  0x5a   : > { %2477 = vmatpush3.bf16.msra.mxu0 %v2688_v31 }
  0x5b   : > { %2478 = vmatprep.subr.bf16.mxu0 %v2690_v61 }
  0x5c   : > { %2383 = vmatpush3.bf16.msra.mxu1 %v2689_v39 }
  0x5d   : > { %2384 = vmatprep.subr.bf16.mxu1 %v2692_v60 }
  0x5e   : > { %2479 = vmatpush3.bf16.msra.mxu0 %v2690_v61 }
  0x5f   : > { %2480 = vmatprep.subr.bf16.mxu0 %v2693_v11 }
  0x60   : > { %2385 = vmatpush3.bf16.msra.mxu1 %v2692_v60 }
  0x61   : > { %2386 = vmatprep.subr.bf16.mxu1 %v2695_v62 }
  0x62   : > { %2481 = vmatpush3.bf16.msra.mxu0 %v2693_v11 }
  0x63   : > { %2482 = vmatprep.subr.bf16.mxu0 %v2696_v3 }
  0x64   : > { %2387 = vmatpush3.bf16.msra.mxu1 %v2695_v62 }
  0x65   : > { %2396 = vmatprep.subr.bf16.mxu1 %v2697_v2 }
  0x66   : > { %2483 = vmatpush3.bf16.msra.mxu0 %v2696_v3 }
  0x67   : > { %2389 = vmatmul.mubr.bf16.vlgmr.msra.gmra.mrb[0].mxu1 %v3176_v4  ;;  %2492 = vmatprep.subr.bf16.mxu0 %v2698_v27 }
  0x68   : > { %2397 = vmatpush3.bf16.msra.mxu1 %v2697_v2  ;;  %2392 = vmatprep.mubr.bf16.mxu1 %v3180_v5 }
  0x69   : > { %2398 = vmatprep.subr.bf16.mxu1 %v2699_v6  ;;  %2485 = vmatmul.mubr.bf16.vlgmr.msra.gmra.mrb[0].mxu0 %v3074_v8  ;;  %v2113_v8 = vcombine.low %v2973_v0, %v3058_v63  ;;  %v2708_v63 = vld [vmem:[%s3300_s1 + $0x1e8] sm:$0xff]  }
  0x6a   : > { %2493 = vmatpush3.bf16.msra.mxu0 %v2698_v27  ;;  %2488 = vmatprep.mubr.bf16.mxu0 %v3125_v46 }
  0x6b   : > { %2494 = vmatprep.subr.bf16.mxu0 %v2700_v9 }
  0x6c   : > { %2399 = vmatpush3.bf16.msra.mxu1 %v2699_v6 }
  0x6d   : > { %2400 = vmatprep.subr.bf16.mxu1 %v2701_v48 }
  0x6e   : > { %2495 = vmatpush3.bf16.msra.mxu0 %v2700_v9 }
  0x6f   : > { %2393 = vmatmul.mubr.bf16.gmra.mrb[4].mxu1 %v3197_v1  ;;  %2496 = vmatprep.subr.bf16.mxu0 %v2702_v14 }
  0x70   : > { %2401 = vmatpush3.bf16.msra.mxu1 %v2701_v48  ;;  %2412 = vmatprep.mubr.bf16.mxu1 %v2028_v37  ;;  %v2709_v37 = vld [vmem:[%s3300_s1 + $0xf0] sm:$0xff]  }
  0x71   : > { %2402 = vmatprep.subr.bf16.mxu1 %v2703_v42  ;;  %2489 = vmatmul.mubr.bf16.gmra.mrb[4].mxu0 %v2113_v8 }
  0x72   : > { %2497 = vmatpush3.bf16.msra.mxu0 %v2702_v14  ;;  %2508 = vmatprep.mubr.bf16.mxu0 %v2913_v10  ;;  %v2711_v10 = vld [vmem:[%s3300_s1 + $0x1f0] sm:$0xff]  }
  0x73   : > { %2498 = vmatprep.subr.bf16.mxu0 %v2704_v23 }
  0x74   : > { %2403 = vmatpush3.bf16.msra.mxu1 %v2703_v42 }
  0x75   : > { %2404 = vmatprep.subr.bf16.mxu1 %v2705_v22 }
  0x76   : > { %2499 = vmatpush3.bf16.msra.mxu0 %v2704_v23 }
  0x77   : > { %2500 = vmatprep.subr.bf16.mxu0 %v2706_v30 }
  0x78   : > { %2405 = vmatpush3.bf16.msra.mxu1 %v2705_v22 }
  0x79   : > { %2406 = vmatprep.subr.bf16.mxu1 %v2707_v13 }
  0x7a   : > { %2501 = vmatpush3.bf16.msra.mxu0 %v2706_v30 }
  0x7b   : > { %2502 = vmatprep.subr.bf16.mxu0 %v2708_v63 }
  0x7c   : > { %2407 = vmatpush3.bf16.msra.mxu1 %v2707_v13 }
  0x7d   : > { %2408 = vmatprep.subr.bf16.mxu1 %v2709_v37 }
  0x7e   : > { %2503 = vmatpush3.bf16.msra.mxu0 %v2708_v63 }
  0x7f   : > { %2504 = vmatprep.subr.bf16.mxu0 %v2711_v10 }
  0x80   : > { %2409 = vmatpush3.bf16.msra.mxu1 %v2709_v37 }
  0x81   : > { %2410 = vmatprep.subr.bf16.mxu1 %v2712_v28 }
  0x82   : > { %2505 = vmatpush3.bf16.msra.mxu0 %v2711_v10 }
  0x83   : > { %2506 = vmatprep.subr.bf16.mxu0 %v2713_v36 }
  0x84   : > { %2411 = vmatpush3.bf16.msra.mxu1 %v2712_v28 }
  0x85   : > { %2540 = vmatprep.subr.bf16.mxu1 %v2716_v29 }
  0x86   : > { %2507 = vmatpush3.bf16.msra.mxu0 %v2713_v36 }
  0x87   : > { %2413 = vmatmul.mubr.bf16.vlgmr.msra.gmra.mrb[0].mxu1 %v2029_v7  ;;  %2516 = vmatprep.subr.bf16.mxu0 %v2716_v29  ;;  %v2723_v7 = vld [vmem:[%s3300_s1 + $0x228] sm:$0xff]  }
  0x88   : > { %2548 = vmatpush3.bf16.msra.mxu1 %v2716_v29  ;;  %2416 = vmatprep.mubr.bf16.mxu1 %v2030_v47 }
  0x89   : > { %2541 = vmatprep.subr.bf16.mxu1 %v2717_v40  ;;  %2509 = vmatmul.mubr.bf16.vlgmr.msra.gmra.mrb[0].mxu0 %v2986_v17 }
  0x8a   : > { %2517 = vmatpush3.bf16.msra.mxu0 %v2716_v29  ;;  %2512 = vmatprep.mubr.bf16.mxu0 %v3023_v50 }
  0x8b   : > { %2518 = vmatprep.subr.bf16.mxu0 %v2717_v40 }
  0x8c   : > { %2549 = vmatpush3.bf16.msra.mxu1 %v2717_v40 }
  0x8d   : > { %2542 = vmatprep.subr.bf16.mxu1 %v2720_v41 }
  0x8e   : > { %2519 = vmatpush3.bf16.msra.mxu0 %v2717_v40 }
  0x8f   : > { %2417 = vmatmul.mubr.bf16.gmra.mrb[4].mxu1 %v2031_v21  ;;  %2520 = vmatprep.subr.bf16.mxu0 %v2720_v41 }
  0x90   : > { %2550 = vmatpush3.bf16.msra.mxu1 %v2720_v41  ;;  %2536 = vmatprep.mubr.bf16.mxu1 %v3197_v1 }
  0x91   : > { %2543 = vmatprep.subr.bf16.mxu1 %v2721_v33  ;;  %2513 = vmatmul.mubr.bf16.gmra.mrb[4].mxu0 %v3141_v57 }
  0x92   : > { %2521 = vmatpush3.bf16.msra.mxu0 %v2720_v41  ;;  %2532 = vmatprep.mubr.bf16.mxu0 %v3176_v4 }
  0x93   : > { %2522 = vmatprep.subr.bf16.mxu0 %v2721_v33 }
  0x94   : > { %2551 = vmatpush3.bf16.msra.mxu1 %v2721_v33 }
  0x95   : > { %2544 = vmatprep.subr.bf16.mxu1 %v2722_v52 }
  0x96   : > { %2523 = vmatpush3.bf16.msra.mxu0 %v2721_v33 }
  0x97   : > { %2524 = vmatprep.subr.bf16.mxu0 %v2722_v52 }
  0x98   : > { %2552 = vmatpush3.bf16.msra.mxu1 %v2722_v52 }
  0x99   : > { %2545 = vmatprep.subr.bf16.mxu1 %v2723_v7 }
  0x9a   : > { %2525 = vmatpush3.bf16.msra.mxu0 %v2722_v52 }
  0x9b   : > { %2526 = vmatprep.subr.bf16.mxu0 %v2723_v7 }
  0x9c   : > { %2553 = vmatpush3.bf16.msra.mxu1 %v2723_v7 }
  0x9d   : > { %2546 = vmatprep.subr.bf16.mxu1 %v2724_v25 }
  0x9e   : > { %2527 = vmatpush3.bf16.msra.mxu0 %v2723_v7 }
  0x9f   : > { %2528 = vmatprep.subr.bf16.mxu0 %v2724_v25 }
  0xa0   : > { %2554 = vmatpush3.bf16.msra.mxu1 %v2724_v25 }
  0xa1   : > { %2547 = vmatprep.subr.bf16.mxu1 %v2725_v38 }
  0xa2   : > { %2529 = vmatpush3.bf16.msra.mxu0 %v2724_v25 }
  0xa3   : > { %2530 = vmatprep.subr.bf16.mxu0 %v2725_v38 }
  0xa4   : > { %2555 = vmatpush3.bf16.msra.mxu1 %v2725_v38 }
  0xa6   : > { %2531 = vmatpush3.bf16.msra.mxu0 %v2725_v38 }
  0xa7   : > { %2537 = vmatmul.mubr.bf16.vlgmr.msra.gmra.mrb[8].mxu1 %v2164_v35  ;;  %v2173_v35 = vld [vmem:[%s3301_s2] ss:$0 sm:$0xff] }
  0xa9   : > { %2533 = vmatmul.mubr.bf16.vlgmr.msra.gmra.mrb[0].mxu0 %v3180_v5 }
 0x15a   : > { %v2414_v47 = vpop.f32.mrb[0].mxu1 }
 0x15b   : > { %v963_v53 = vpop.f32.mrb[1].mxu1 }
 0x15c   : > { %v2415_v0 = vpop.f32.mrb[2].mxu1 }
 0x15d   : > { %v966_v17 = vpop.f32.mrb[3].mxu1 }
 0x162   : > { %v2418_v21 = vpop.f32.mrb[4].mxu1 }
 0x163   : > { %v979_v50 = vpop.f32.mrb[5].mxu1 }
 0x164   : > { %v2419_v32 = vpop.f32.mrb[6].mxu1  ;;  %v2514_v44 = vpop.f32.mrb[4].mxu0 }
 0x165   : > { %v982_v43 = vpop.f32.mrb[7].mxu1  ;;  %v2560_v49 = vadd.f32 %v2514_v44, %v2418_v21  ;;  %v1589_v15 = vpop.f32.mrb[5].mxu0 }
 0x166   : > { %v2562_v19 = vadd.f32 %v1589_v15, %v979_v50  ;;  %v2515_v20 = vpop.f32.mrb[6].mxu0 }
 0x167   : > { %v2564_v46 = vadd.f32 %v2515_v20, %v2419_v32  ;;  %v1592_v16 = vpop.f32.mrb[7].mxu0 }
 0x168   : > { %v2566_v18 = vadd.f32 %v1592_v16, %v982_v43 }
 0x17a   : > { %v2538_v51 = vpop.f32.mrb[8].mxu1 }
 0x17b   : > { %v2561_v58 = vadd.f32 %v2560_v49, %v2538_v51  ;;  %v1735_v26 = vpop.f32.mrb[9].mxu1 }
 0x17c   : > { %v2563_v54 = vadd.f32 %v2562_v19, %v1735_v26  ;;  %v2539_v55 = vpop.f32.mrb[10].mxu1  ;;  %v2534_v24 = vpop.f32.mrb[0].mxu0 }
 0x17d   : > { %v1771_v12 = vadd.f32 %v2561_v58, %v2173_v35  ;;  %v2565_v34 = vadd.f32 %v2564_v46, %v2539_v55  ;;  %v1738_v45 = vpop.f32.mrb[11].mxu1  ;;  %v2556_v39 = vadd.f32 %v2534_v24, %v2414_v47  ;;  %v1719_v31 = vpop.f32.mrb[1].mxu0 }
 0x17e   : > { %v1769_v56 = vadd.f32 %v2563_v54, %v2173_v35  ;;  %v2567_v57 = vadd.f32 %v2566_v18, %v1738_v45  ;;  %v2557_v62 = vadd.f32 %v1719_v31, %v963_v53  ;;  %v2535_v11 = vpop.f32.mrb[2].mxu0 }
 0x17f   : > { %v1772_v59 = vadd.f32 %v2565_v34, %v2173_v35  ;;  %v1779_v61 = vmax.f32 %v1771_v12, 0.0  ;;  %v1767_v3 = vadd.f32 %v2556_v39, %v2173_v35  ;;  %v2558_v5 = vadd.f32 %v2535_v11, %v2415_v0  ;;  %v1722_v6 = vpop.f32.mrb[3].mxu0 }
 0x180   : > { %v1770_v60 = vadd.f32 %v2567_v57, %v2173_v35  ;;  %v1777_v4 = vmax.f32 %v1769_v56, 0.0  ;;  %v1765_v48 = vadd.f32 %v2557_v62, %v2173_v35  ;;  %v2559_v1 = vadd.f32 %v1722_v6, %v966_v17 }
 0x181   : > { %v1780_v2 = vmax.f32 %v1772_v59, 0.0  ;;  %v1768_v42 = vadd.f32 %v2558_v5, %v2173_v35  ;;  %v1775_v22 = vmax.f32 %v1767_v3, 0.0 }
 0x182   : > { %v1778_v27 = vmax.f32 %v1770_v60, 0.0  ;;  %v1766_v8 = vadd.f32 %v2559_v1, %v2173_v35  ;;  %v1773_v13 = vmax.f32 %v1765_v48, 0.0 }
 0x183   : > { %v2211_v9 = vpack.c.bf16 %v1780_v2, %v1779_v61  ;;  %v1776_v23 = vmax.f32 %v1768_v42, 0.0 }
 0x184   : > { %v2206_v14 = vpack.c.bf16 %v1778_v27, %v1777_v4  ;;  %v1774_v30 = vmax.f32 %v1766_v8, 0.0 }
 0x185   : > { %2215 = vst [vmem:[%s221_s5 + $0x18] sm:$0xff] %v2211_v9   ;;  %v2201_v37 = vpack.c.bf16 %v1776_v23, %v1775_v22 }
 0x186   : > { %2214 = vst [vmem:[%s221_s5 + $0x10] sm:$0xff] %v2206_v14   ;;  %v2196_v63 = vpack.c.bf16 %v1774_v30, %v1773_v13 }
 0x187   : > { %2213 = vst [vmem:[%s221_s5 + $0x8] sm:$0xff] %v2201_v37  }
 0x188   : > { %2197 = vst [vmem:[%s221_s5] sm:$0xff] %v2196_v63  }
 0x189 PF: > { %s13_s14 = sadd.s32 1, %s2748_s14   ;;  %s3307_s12 = smov %s2744_s13 }
 0x18a   : > { %p10_p5 = scmp.ge.s32.totalorder %s13_s14, 10   ;;  %s3308_s13 = smov %s3310_s15 }
 0x18c   :  { %12 = sbr.rel (!%p10_p5) target bundleno = 2 (0x2), region = 76 }

// kernel: _lambda_.13
= control target key start
LH: loop header
LB: loop body
LE: loop exit
PB: predicated region body
PF: predicated region fallthrough
CT: control target
= control target key end

     0   :  { %s2001_s15 = smov 0   ;;  %s2003_s16 = smov 0   ;;  %s2498_s0 = inlined_call_operand.vmem [shape: bf16[512,128], index: 0, kind: input, shape index: {}]   ;;  %s2499_s1 = inlined_call_operand.vmem [shape: bf16[128,256], index: 1, kind: input, shape index: {}]   ;;  %s2500_s2 = inlined_call_operand.vmem [shape: f32[1,256], index: 2, kind: input, shape index: {}]   ;;  %s2501_s3 = inlined_call_operand.vmem [shape: bf16[512,256], index: 3, kind: input, shape index: {}]   ;;  %s2502_s4 = inlined_call_operand.vmem [shape: bf16[512,256], index: 4, kind: output, shape index: {}]  }
   0x1   :  { %s2005_s17 = smov 0  }
   0x2 LB: > { %s33_s18 = sadd.s32 1, %s1969_s16  ;;  %p1761_p0 = scmp.ge.s32.totalorder %s1973_s17, 1  ;;  %s1973_s17 = sphi %s2005_s17, %s14_s17   ;;  %s1969_s16 = sphi %s2003_s16, %s2513_s16   ;;  %s1965_s15 = sphi %s2001_s15, %s2512_s15  }
   0x3   : > { %p35_p1 = scmp.ge.s32.totalorder %s33_s18, 2  ;;  %p237_p2 = scmp.lt.s32.totalorder %s1973_s17, 3 }
   0x5   : > { %s2515_s18 = smov (%p35_p1, %s33_s18), 0  ;;  %p238_p3 = pnand %p1761_p0, %p237_p2 }
   0x6   : > { %v1911_v0 = vld [vmem:[%s2499_s1 + $0x4] ss:$8 sps:$4 sm:$0xff] (!%p238_p3)   ;;  %s1762_s21 = sshll.u32 (!%p238_p3), %s1965_s15, 5  ;;  %v1913_v1 = vld [vmem:[%s2499_s1] ss:$8 sps:$4 sm:$0xff] (!%p238_p3)   ;;  %v1975_v2 = vmov (!%p238_p3), 0   ;;  %v1092_v33 = vlaneseq (!%p238_p3) }
   0x7   : > { %241 = sbr.rel (%p238_p3) target bundleno = 323 (0x143), region = 36  ;;  %734 = vmatprep.mubr.bf16.mxu0 (!%p238_p3), %v1975_v2  ;;  %814 = vmatprep.mubr.bf16.mxu1 (!%p238_p3), %v1975_v2  ;;  %p296_p4 = scmp.lt.s32.totalorder (!%p238_p3), %s1762_s21, 63  ;;  %v1914_v3 = vld [vmem:[%s2499_s1 + $0x14] ss:$8 sps:$4 sm:$0xff] (!%p238_p3)   ;;  %v1916_v4 = vld [vmem:[%s2499_s1 + $0x10] ss:$8 sps:$4 sm:$0xff] (!%p238_p3)  }
   0x8   : > { %702 = vmatprep.subr.bf16.mxu0 (!%p238_p3), %v1911_v0  ;;  %1870 = vmatprep.subr.bf16.mxu1 (!%p238_p3), %v1911_v0  ;;  %v1917_v5 = vld [vmem:[%s2499_s1 + $0x24] ss:$8 sps:$4 sm:$0xff] (!%p238_p3)   ;;  %v1919_v6 = vld [vmem:[%s2499_s1 + $0x20] ss:$8 sps:$4 sm:$0xff] (!%p238_p3)   ;;  %v1920_v7 = vld [vmem:[%s2499_s1 + $0x34] ss:$8 sps:$4 sm:$0xff] (!%p238_p3)  }
   0x9   : > { %703 = vmatpush1.bf16.msra.mxu0 (!%p238_p3), %v1913_v1  ;;  %1878 = vmatpush1.bf16.msra.mxu1 (!%p238_p3), %v1913_v1  ;;  %v1922_v8 = vld [vmem:[%s2499_s1 + $0x30] ss:$8 sps:$4 sm:$0xff] (!%p238_p3)   ;;  %v1923_v9 = vld [vmem:[%s2499_s1 + $0x44] ss:$8 sps:$4 sm:$0xff] (!%p238_p3)   ;;  %v1925_v10 = vld [vmem:[%s2499_s1 + $0x40] ss:$8 sps:$4 sm:$0xff] (!%p238_p3)  }
   0xa   : > { %704 = vmatprep.subr.bf16.mxu0 (!%p238_p3), %v1914_v3  ;;  %1871 = vmatprep.subr.bf16.mxu1 (!%p238_p3), %v1914_v3  ;;  %v1926_v11 = vld [vmem:[%s2499_s1 + $0x54] ss:$8 sps:$4 sm:$0xff] (!%p238_p3)   ;;  %v1928_v12 = vld [vmem:[%s2499_s1 + $0x50] ss:$8 sps:$4 sm:$0xff] (!%p238_p3)   ;;  %v1929_v13 = vld [vmem:[%s2499_s1 + $0x64] ss:$8 sps:$4 sm:$0xff] (!%p238_p3)  }
   0xb   : > { %v1931_v14 = vld [vmem:[%s2499_s1 + $0x60] ss:$8 sps:$4 sm:$0xff] (!%p238_p3)   ;;  %v1932_v15 = vld [vmem:[%s2499_s1 + $0x74] ss:$8 sps:$4 sm:$0xff] (!%p238_p3)   ;;  %v1934_v16 = vld [vmem:[%s2499_s1 + $0x70] ss:$8 sps:$4 sm:$0xff] (!%p238_p3)  }
   0xc   : > { %v1093_v34 = vshrl.u32 (!%p238_p3), %v1092_v33, 7  ;;  %v1090_v37 = vld [vmem:[%s2500_s2] sm:$0x3] (!%p238_p3) }
   0xd   : > { %705 = vmatpush1.bf16.msra.mxu0 (!%p238_p3), %v1916_v4  ;;  %1879 = vmatpush1.bf16.msra.mxu1 (!%p238_p3), %v1916_v4 }
   0xe   : > { %s2517_s21 = smov (!%p296_p4, %s1762_s21), 63  ;;  %706 = vmatprep.subr.bf16.mxu0 %v1917_v5  ;;  %1872 = vmatprep.subr.bf16.mxu1 %v1917_v5  ;;  %v1094_v35 = vsub.s32 0, %v1093_v34  ;;  %v1098_v36 = vsub.s32 1, %v1093_v34 }
   0xf   : > { %s1763_s30 = sshll.u32 %s2517_s21, 2  ;;  %s1836_s8 = sshll.u32 %s2517_s21, 3 }
  0x10   : > { %s2048_s11 = scalar_lea.vmem %s2498_s0, %s1763_s30  ;;  %s2113_s12 = scalar_lea.vmem %s2501_s3, %s1836_s8  ;;  %v2130_v42 = vrot.slane %v1090_v37, %v1094_v35  ;;  %v2132_v43 = vrot.slane %v1090_v37, %v1098_v36 }
  0x11   : > { %707 = vmatpush1.bf16.msra.mxu0 %v1919_v6  ;;  %1880 = vmatpush1.bf16.msra.mxu1 %v1919_v6  ;;  %v1935_v17 = vld [vmem:[%s2048_s11] sm:$0xff]   ;;  %v1937_v19 = vld [vmem:[%s2048_s11 + $0x8] sm:$0xff]   ;;  %v1939_v21 = vld [vmem:[%s2048_s11 + $0x10] sm:$0xff]   ;;  %s2239_s19 = scalar_lea.vmem %s2502_s4, %s1836_s8 }
  0x12   : > { %708 = vmatprep.subr.bf16.mxu0 %v1920_v7  ;;  %1873 = vmatprep.subr.bf16.mxu1 %v1920_v7  ;;  %v1936_v18 = vld [vmem:[%s2048_s11 + $0x40] sm:$0xff]   ;;  %v1938_v20 = vld [vmem:[%s2048_s11 + $0x48] sm:$0xff]   ;;  %v1940_v22 = vld [vmem:[%s2048_s11 + $0x50] sm:$0xff]  }
  0x13   : > { %v1941_v23 = vld [vmem:[%s2048_s11 + $0x18] sm:$0xff]   ;;  %v1943_v25 = vld [vmem:[%s2048_s11 + $0x20] sm:$0xff]   ;;  %v1945_v27 = vld [vmem:[%s2048_s11 + $0x28] sm:$0xff]  }
  0x14   : > { %v1942_v24 = vld [vmem:[%s2048_s11 + $0x58] sm:$0xff]   ;;  %v1944_v26 = vld [vmem:[%s2048_s11 + $0x60] sm:$0xff]   ;;  %v1946_v28 = vld [vmem:[%s2048_s11 + $0x68] sm:$0xff]  }
  0x15   : > { %709 = vmatpush1.bf16.msra.mxu0 %v1922_v8  ;;  %1881 = vmatpush1.bf16.msra.mxu1 %v1922_v8  ;;  %v1947_v29 = vld [vmem:[%s2048_s11 + $0x30] sm:$0xff]   ;;  %v1949_v31 = vld [vmem:[%s2048_s11 + $0x38] sm:$0xff]   ;;  %v2119_v38 = vld [vmem:[%s2113_s12] sm:$0xff] }
  0x16   : > { %710 = vmatprep.subr.bf16.mxu0 %v1923_v9  ;;  %1874 = vmatprep.subr.bf16.mxu1 %v1923_v9  ;;  %v1948_v30 = vld [vmem:[%s2048_s11 + $0x70] sm:$0xff]   ;;  %v1950_v32 = vld [vmem:[%s2048_s11 + $0x78] sm:$0xff]   ;;  %v2122_v39 = vld [vmem:[%s2113_s12 + $0x80] sm:$0xff]  ;;  %v1198_v46 = vunpack.c.l.bf16 %v2119_v38  ;;  %v1199_v48 = vunpack.c.h.bf16 %v2119_v38 }
  0x17   : > { %v2125_v40 = vld [vmem:[%s2113_s12 + $0x8] sm:$0xff]  ;;  %v2135_v44 = vld [vmem:[%s2113_s12 + $0x10] sm:$0xff]  ;;  %v1230_v47 = vunpack.c.l.bf16 %v2122_v39  ;;  %v1231_v49 = vunpack.c.h.bf16 %v2122_v39  ;;  %v2145_v50 = vld [vmem:[%s2113_s12 + $0x18] sm:$0xff] }
  0x18   : > { %v2128_v41 = vld [vmem:[%s2113_s12 + $0x88] sm:$0xff]  ;;  %v2138_v45 = vld [vmem:[%s2113_s12 + $0x90] sm:$0xff]  ;;  %v2148_v51 = vld [vmem:[%s2113_s12 + $0x98] sm:$0xff]  ;;  %v1200_v52 = vunpack.c.l.bf16 %v2125_v40  ;;  %v1201_v54 = vunpack.c.h.bf16 %v2125_v40  ;;  %v1202_v58 = vunpack.c.l.bf16 %v2135_v44  ;;  %v1203_v60 = vunpack.c.h.bf16 %v2135_v44 }
  0x19   : > { %711 = vmatpush1.bf16.msra.mxu0 %v1925_v10  ;;  %1882 = vmatpush1.bf16.msra.mxu1 %v1925_v10  ;;  %v1232_v53 = vunpack.c.l.bf16 %v2128_v41  ;;  %v1233_v55 = vunpack.c.h.bf16 %v2128_v41  ;;  %v2155_v56 = vld [vmem:[%s2113_s12 + $0x20] sm:$0xff]  ;;  %v1234_v59 = vunpack.c.l.bf16 %v2138_v45  ;;  %v1235_v61 = vunpack.c.h.bf16 %v2138_v45  ;;  %v2165_v62 = vld [vmem:[%s2113_s12 + $0x28] sm:$0xff]  ;;  %v2175_v4 = vld [vmem:[%s2113_s12 + $0x30] sm:$0xff] }
  0x1a   : > { %712 = vmatprep.subr.bf16.mxu0 %v1926_v11  ;;  %1875 = vmatprep.subr.bf16.mxu1 %v1926_v11  ;;  %v2158_v57 = vld [vmem:[%s2113_s12 + $0xa0] sm:$0xff]  ;;  %v2168_v63 = vld [vmem:[%s2113_s12 + $0xa8] sm:$0xff]  ;;  %v1204_v0 = vunpack.c.l.bf16 %v2145_v50  ;;  %v1236_v1 = vunpack.c.l.bf16 %v2148_v51  ;;  %v1237_v3 = vunpack.c.h.bf16 %v2148_v51  ;;  %v2178_v5 = vld [vmem:[%s2113_s12 + $0xb0] sm:$0xff]  ;;  %v1206_v6 = vunpack.c.l.bf16 %v2155_v56 }
  0x1b   : > { %v1238_v7 = vunpack.c.l.bf16 %v2158_v57  ;;  %v1207_v8 = vunpack.c.h.bf16 %v2155_v56  ;;  %v1239_v9 = vunpack.c.h.bf16 %v2158_v57  ;;  %v2185_v10 = vld [vmem:[%s2113_s12 + $0x38] sm:$0xff]  ;;  %v2224_v38 = vld [vmem:[%s2113_s12 + $0xc8] sm:$0xff] }
  0x1c   : > { %v2188_v11 = vld [vmem:[%s2113_s12 + $0xb8] sm:$0xff] }
  0x1d   : > { %713 = vmatpush1.bf16.msra.mxu0 %v1928_v12  ;;  %1883 = vmatpush1.bf16.msra.mxu1 %v1928_v12  ;;  %v1208_v12 = vunpack.c.l.bf16 %v2165_v62 }
  0x1e   : > { %714 = vmatprep.subr.bf16.mxu0 %v1929_v13  ;;  %1876 = vmatprep.subr.bf16.mxu1 %v1929_v13  ;;  %v1240_v13 = vunpack.c.l.bf16 %v2168_v63 }
  0x21   : > { %715 = vmatpush1.bf16.msra.mxu0 %v1931_v14  ;;  %1884 = vmatpush1.bf16.msra.mxu1 %v1931_v14  ;;  %v1209_v14 = vunpack.c.h.bf16 %v2165_v62 }
  0x22   : > { %716 = vmatprep.subr.bf16.mxu0 %v1932_v15  ;;  %1877 = vmatprep.subr.bf16.mxu1 %v1932_v15  ;;  %v1241_v15 = vunpack.c.h.bf16 %v2168_v63 }
  0x25   : > { %717 = vmatpush1.bf16.msra.mxu0 %v1934_v16  ;;  %1885 = vmatpush1.bf16.msra.mxu1 %v1934_v16  ;;  %v2195_v16 = vld [vmem:[%s2113_s12 + $0x40] sm:$0xff] }
  0x28   : > { %735 = vmatmul.mubr.bf16.vlgmr.msra.gmra.mrb[0].mxu0 %v1935_v17  ;;  %815 = vmatmul.mubr.bf16.vlgmr.msra.gmra.mrb[0].mxu1 %v1936_v18  ;;  %v2198_v17 = vld [vmem:[%s2113_s12 + $0xc0] sm:$0xff]  ;;  %v1210_v18 = vunpack.c.l.bf16 %v2175_v4 }
  0x29   : > { %744 = vmatprep.mubr.bf16.mxu0 %v1975_v2  ;;  %824 = vmatprep.mubr.bf16.mxu1 %v1975_v2 }
  0x30   : > { %745 = vmatmul.mubr.bf16.gmra.mrb[4].mxu0 %v1937_v19  ;;  %825 = vmatmul.mubr.bf16.gmra.mrb[4].mxu1 %v1938_v20  ;;  %v1242_v19 = vunpack.c.l.bf16 %v2178_v5  ;;  %v1211_v20 = vunpack.c.h.bf16 %v2175_v4 }
  0x31   : > { %754 = vmatprep.mubr.bf16.mxu0 %v1975_v2  ;;  %834 = vmatprep.mubr.bf16.mxu1 %v1975_v2 }
  0x38   : > { %755 = vmatmul.mubr.bf16.gmra.mrb[8].mxu0 %v1939_v21  ;;  %835 = vmatmul.mubr.bf16.gmra.mrb[8].mxu1 %v1940_v22  ;;  %v2221_v21 = vld [vmem:[%s2113_s12 + $0x48] sm:$0xff] }
  0x39   : > { %764 = vmatprep.mubr.bf16.mxu0 %v1975_v2  ;;  %844 = vmatprep.mubr.bf16.mxu1 %v1975_v2 }
  0x40   : > { %765 = vmatmul.mubr.bf16.gmra.mrb[12].mxu0 %v1941_v23  ;;  %845 = vmatmul.mubr.bf16.gmra.mrb[12].mxu1 %v1942_v24 }
  0x41   : > { %774 = vmatprep.mubr.bf16.mxu0 %v1975_v2  ;;  %854 = vmatprep.mubr.bf16.mxu1 %v1975_v2 }
  0x48   : > { %775 = vmatmul.mubr.bf16.gmra.mrb[16].mxu0 %v1943_v25  ;;  %855 = vmatmul.mubr.bf16.gmra.mrb[16].mxu1 %v1944_v26 }
  0x49   : > { %784 = vmatprep.mubr.bf16.mxu0 %v1975_v2  ;;  %864 = vmatprep.mubr.bf16.mxu1 %v1975_v2 }
  0x50   : > { %785 = vmatmul.mubr.bf16.gmra.mrb[20].mxu0 %v1945_v27  ;;  %865 = vmatmul.mubr.bf16.gmra.mrb[20].mxu1 %v1946_v28 }
  0x51   : > { %794 = vmatprep.mubr.bf16.mxu0 %v1975_v2  ;;  %874 = vmatprep.mubr.bf16.mxu1 %v1975_v2 }
  0x58   : > { %795 = vmatmul.mubr.bf16.gmra.mrb[24].mxu0 %v1947_v29  ;;  %875 = vmatmul.mubr.bf16.gmra.mrb[24].mxu1 %v1948_v30 }
  0x59   : > { %804 = vmatprep.mubr.bf16.mxu0 %v1975_v2  ;;  %884 = vmatprep.mubr.bf16.mxu1 %v1975_v2  ;;  %v1205_v2 = vunpack.c.h.bf16 %v2145_v50 }
  0x60   : > { %805 = vmatmul.mubr.bf16.gmra.mrb[28].mxu0 %v1949_v31  ;;  %885 = vmatmul.mubr.bf16.gmra.mrb[28].mxu1 %v1950_v32 }
  0xfb   : > { %v736_v22 = vpop.f32.mrb[0].mxu0  ;;  %v816_v23 = vpop.f32.mrb[0].mxu1 }
  0xfc   : > { %v1102_v28 = vadd.f32 %v2130_v42, %v736_v22  ;;  %v1134_v29 = vadd.f32 %v2130_v42, %v816_v23  ;;  %v738_v30 = vpop.f32.mrb[1].mxu0  ;;  %v818_v31 = vpop.f32.mrb[1].mxu1 }
  0xfd   : > { %v1103_v34 = vadd.f32 %v2132_v43, %v738_v30  ;;  %v1135_v35 = vadd.f32 %v2132_v43, %v818_v31  ;;  %v740_v36 = vpop.f32.mrb[2].mxu0  ;;  %v820_v37 = vpop.f32.mrb[2].mxu1 }
  0xfe   : > { %v1262_v22 = vadd.f32 %v1198_v46, %v1102_v28  ;;  %v1294_v23 = vadd.f32 %v1230_v47, %v1134_v29  ;;  %v1104_v27 = vadd.f32 %v2130_v42, %v740_v36  ;;  %v1136_v32 = vadd.f32 %v2130_v42, %v820_v37  ;;  %v742_v26 = vpop.f32.mrb[3].mxu0  ;;  %v822_v33 = vpop.f32.mrb[3].mxu1 }
  0xff   : > { %v1263_v30 = vadd.f32 %v1199_v48, %v1103_v34  ;;  %v1295_v25 = vadd.f32 %v1231_v49, %v1135_v35  ;;  %v1105_v31 = vadd.f32 %v2132_v43, %v742_v26  ;;  %v1137_v24 = vadd.f32 %v2132_v43, %v822_v33 }
 0x100   : > { %v1326_v39 = vmax.f32 %v1262_v22, 0.0  ;;  %v1358_v46 = vmax.f32 %v1294_v23, 0.0  ;;  %v1264_v47 = vadd.f32 %v1200_v52, %v1104_v27  ;;  %v1296_v28 = vadd.f32 %v1232_v53, %v1136_v32 }
 0x101   : > { %v1327_v29 = vmax.f32 %v1263_v30, 0.0  ;;  %v1359_v36 = vmax.f32 %v1295_v25, 0.0  ;;  %v1265_v48 = vadd.f32 %v1201_v54, %v1105_v31  ;;  %v1297_v49 = vadd.f32 %v1233_v55, %v1137_v24 }
 0x102   : > { %v1328_v26 = vmax.f32 %v1264_v47, 0.0  ;;  %v1360_v52 = vmax.f32 %v1296_v28, 0.0  ;;  %v1216_v53 = vunpack.c.l.bf16 %v2221_v21  ;;  %v1248_v25 = vunpack.c.l.bf16 %v2224_v38 }
 0x103   : > { %v1838_v27 = vpack.c.bf16 %v1327_v29, %v1326_v39  ;;  %v1854_v40 = vpack.c.bf16 %v1359_v36, %v1358_v46  ;;  %v1329_v54 = vmax.f32 %v1265_v48, 0.0  ;;  %v1361_v32 = vmax.f32 %v1297_v49, 0.0  ;;  %v746_v41 = vpop.f32.mrb[4].mxu0  ;;  %v826_v55 = vpop.f32.mrb[4].mxu1 }
 0x104   : > { %v1106_v24 = vadd.f32 %v2130_v42, %v746_v41  ;;  %v1138_v33 = vadd.f32 %v2130_v42, %v826_v55  ;;  %v748_v34 = vpop.f32.mrb[5].mxu0  ;;  %v828_v35 = vpop.f32.mrb[5].mxu1  ;;  %v1217_v37 = vunpack.c.h.bf16 %v2221_v21  ;;  %v1249_v22 = vunpack.c.h.bf16 %v2224_v38 }
 0x105   : > { %1582 = vst [vmem:[%s2239_s19] sm:$0xff] %v1838_v27  ;;  %1598 = vst [vmem:[%s2239_s19 + $0x80] sm:$0xff] %v1854_v40  ;;  %v1839_v39 = vpack.c.bf16 %v1329_v54, %v1328_v26  ;;  %v1855_v23 = vpack.c.bf16 %v1361_v32, %v1360_v52  ;;  %v1107_v30 = vadd.f32 %v2132_v43, %v748_v34  ;;  %v750_v46 = vpop.f32.mrb[6].mxu0  ;;  %v830_v47 = vpop.f32.mrb[6].mxu1  ;;  %v2266_v54 = vld [vmem:[%s2113_s12 + $0x50] sm:$0xff] }
 0x106   : > { %v1139_v31 = vadd.f32 %v2132_v43, %v828_v35  ;;  %v1266_v28 = vadd.f32 %v1202_v58, %v1106_v24  ;;  %v1298_v29 = vadd.f32 %v1234_v59, %v1138_v33  ;;  %v1108_v36 = vadd.f32 %v2130_v42, %v750_v46  ;;  %v752_v49 = vpop.f32.mrb[7].mxu0  ;;  %v832_v26 = vpop.f32.mrb[7].mxu1  ;;  %v2269_v59 = vld [vmem:[%s2113_s12 + $0xd0] sm:$0xff] }
 0x107   : > { %v1140_v48 = vadd.f32 %v2130_v42, %v830_v47  ;;  %1583 = vst [vmem:[%s2239_s19 + $0x8] sm:$0xff] %v1839_v39  ;;  %1599 = vst [vmem:[%s2239_s19 + $0x88] sm:$0xff] %v1855_v23  ;;  %v1267_v52 = vadd.f32 %v1203_v60, %v1107_v30  ;;  %v1109_v40 = vadd.f32 %v2132_v43, %v752_v49  ;;  %v1218_v35 = vunpack.c.l.bf16 %v2266_v54 }
 0x108   : > { %v1299_v27 = vadd.f32 %v1235_v61, %v1139_v31  ;;  %v1141_v58 = vadd.f32 %v2132_v43, %v832_v26  ;;  %v1330_v32 = vmax.f32 %v1266_v28, 0.0  ;;  %v1362_v41 = vmax.f32 %v1298_v29, 0.0 }
 0x109   : > { %v1268_v55 = vadd.f32 %v1204_v0, %v1108_v36  ;;  %v1300_v44 = vadd.f32 %v1236_v1, %v1140_v48  ;;  %v1331_v60 = vmax.f32 %v1267_v52, 0.0  ;;  %v1269_v45 = vadd.f32 %v1205_v2, %v1109_v40 }
 0x10a   : > { %v1363_v24 = vmax.f32 %v1299_v27, 0.0  ;;  %v1301_v61 = vadd.f32 %v1237_v3, %v1141_v58  ;;  %v1250_v39 = vunpack.c.l.bf16 %v2269_v59  ;;  %v1219_v47 = vunpack.c.h.bf16 %v2266_v54 }
 0x10b   : > { %v1332_v33 = vmax.f32 %v1268_v55, 0.0  ;;  %v1364_v34 = vmax.f32 %v1300_v44, 0.0  ;;  %v1840_v0 = vpack.c.bf16 %v1331_v60, %v1330_v32  ;;  %v1333_v30 = vmax.f32 %v1269_v45, 0.0  ;;  %v756_v31 = vpop.f32.mrb[8].mxu0  ;;  %v836_v46 = vpop.f32.mrb[8].mxu1  ;;  %v2304_v45 = vld [vmem:[%s2113_s12 + $0x58] sm:$0xff] }
 0x10c   : > { %v1856_v23 = vpack.c.bf16 %v1363_v24, %v1362_v41  ;;  %v1365_v1 = vmax.f32 %v1301_v61, 0.0  ;;  %v1110_v50 = vadd.f32 %v2130_v42, %v756_v31  ;;  %v1142_v2 = vadd.f32 %v2130_v42, %v836_v46  ;;  %v758_v51 = vpop.f32.mrb[9].mxu0  ;;  %v838_v3 = vpop.f32.mrb[9].mxu1 }
 0x10d   : > { %v1251_v28 = vunpack.c.h.bf16 %v2269_v59  ;;  %1584 = vst [vmem:[%s2239_s19 + $0x10] sm:$0xff] %v1840_v0  ;;  %v1841_v29 = vpack.c.bf16 %v1333_v30, %v1332_v33  ;;  %v1111_v48 = vadd.f32 %v2132_v43, %v758_v51  ;;  %v1143_v49 = vadd.f32 %v2132_v43, %v838_v3  ;;  %v760_v26 = vpop.f32.mrb[10].mxu0  ;;  %v840_v52 = vpop.f32.mrb[10].mxu1 }
 0x10e   : > { %1600 = vst [vmem:[%s2239_s19 + $0x90] sm:$0xff] %v1856_v23  ;;  %v1857_v36 = vpack.c.bf16 %v1365_v1, %v1364_v34  ;;  %v1270_v27 = vadd.f32 %v1206_v6, %v1110_v50  ;;  %v1302_v40 = vadd.f32 %v1238_v7, %v1142_v2  ;;  %v1112_v58 = vadd.f32 %v2130_v42, %v760_v26  ;;  %v762_v41 = vpop.f32.mrb[11].mxu0  ;;  %v842_v55 = vpop.f32.mrb[11].mxu1  ;;  %v2307_v7 = vld [vmem:[%s2113_s12 + $0xd8] sm:$0xff] }
 0x10f   : > { %v1144_v32 = vadd.f32 %v2130_v42, %v840_v52  ;;  %1585 = vst [vmem:[%s2239_s19 + $0x18] sm:$0xff] %v1841_v29  ;;  %v1271_v44 = vadd.f32 %v1207_v8, %v1111_v48  ;;  %v1303_v60 = vadd.f32 %v1239_v9, %v1143_v49  ;;  %v1113_v24 = vadd.f32 %v2132_v43, %v762_v41 }
 0x110   : > { %1601 = vst [vmem:[%s2239_s19 + $0x98] sm:$0xff] %v1857_v36  ;;  %v1145_v6 = vadd.f32 %v2132_v43, %v842_v55  ;;  %v1334_v61 = vmax.f32 %v1270_v27, 0.0  ;;  %v1366_v33 = vmax.f32 %v1302_v40, 0.0  ;;  %v1272_v34 = vadd.f32 %v1208_v12, %v1112_v58 }
 0x111   : > { %v1304_v56 = vadd.f32 %v1240_v13, %v1144_v32  ;;  %v1335_v8 = vmax.f32 %v1271_v44, 0.0  ;;  %v1367_v0 = vmax.f32 %v1303_v60, 0.0  ;;  %v1273_v57 = vadd.f32 %v1209_v14, %v1113_v24 }
 0x112   : > { %v1305_v9 = vadd.f32 %v1241_v15, %v1145_v6  ;;  %v1336_v23 = vmax.f32 %v1272_v34, 0.0  ;;  %v1220_v1 = vunpack.c.l.bf16 %v2304_v45  ;;  %v1252_v31 = vunpack.c.l.bf16 %v2307_v7 }
 0x113   : > { %v1368_v30 = vmax.f32 %v1304_v56, 0.0  ;;  %v1842_v12 = vpack.c.bf16 %v1335_v8, %v1334_v61  ;;  %v1858_v46 = vpack.c.bf16 %v1367_v0, %v1366_v33  ;;  %v1337_v50 = vmax.f32 %v1273_v57, 0.0  ;;  %v766_v2 = vpop.f32.mrb[12].mxu0  ;;  %v846_v51 = vpop.f32.mrb[12].mxu1  ;;  %v2342_v33 = vld [vmem:[%s2113_s12 + $0x60] sm:$0xff] }
 0x114   : > { %v1369_v13 = vmax.f32 %v1305_v9, 0.0  ;;  %v1114_v62 = vadd.f32 %v2130_v42, %v766_v2  ;;  %v1146_v14 = vadd.f32 %v2130_v42, %v846_v51  ;;  %v768_v63 = vpop.f32.mrb[13].mxu0  ;;  %v848_v15 = vpop.f32.mrb[13].mxu1  ;;  %v1221_v3 = vunpack.c.h.bf16 %v2304_v45 }
 0x115   : > { %v1253_v29 = vunpack.c.h.bf16 %v2307_v7  ;;  %1586 = vst [vmem:[%s2239_s19 + $0x20] sm:$0xff] %v1842_v12  ;;  %1602 = vst [vmem:[%s2239_s19 + $0xa0] sm:$0xff] %v1858_v46  ;;  %v1843_v36 = vpack.c.bf16 %v1337_v50, %v1336_v23  ;;  %v1115_v49 = vadd.f32 %v2132_v43, %v768_v63  ;;  %v1147_v26 = vadd.f32 %v2132_v43, %v848_v15  ;;  %v770_v52 = vpop.f32.mrb[14].mxu0  ;;  %v850_v27 = vpop.f32.mrb[14].mxu1 }
 0x116   : > { %v1859_v48 = vpack.c.bf16 %v1369_v13, %v1368_v30  ;;  %v1274_v40 = vadd.f32 %v1210_v18, %v1114_v62  ;;  %v1306_v58 = vadd.f32 %v1242_v19, %v1146_v14  ;;  %v1116_v32 = vadd.f32 %v2130_v42, %v770_v52  ;;  %v772_v55 = vpop.f32.mrb[15].mxu0  ;;  %v852_v44 = vpop.f32.mrb[15].mxu1  ;;  %v2345_v19 = vld [vmem:[%s2113_s12 + $0xe0] sm:$0xff] }
 0x117   : > { %v1148_v41 = vadd.f32 %v2130_v42, %v850_v27  ;;  %1587 = vst [vmem:[%s2239_s19 + $0x28] sm:$0xff] %v1843_v36  ;;  %v1275_v60 = vadd.f32 %v1211_v20, %v1115_v49  ;;  %v2503_v24 = vunpack.c.h.bf16 %v2178_v5  ;;  %v1117_v61 = vadd.f32 %v2132_v43, %v772_v55 }
 0x118   : > { %1603 = vst [vmem:[%s2239_s19 + $0xa8] sm:$0xff] %v1859_v48  ;;  %v1149_v18 = vadd.f32 %v2132_v43, %v852_v44  ;;  %v1338_v34 = vmax.f32 %v1274_v40, 0.0  ;;  %v1370_v56 = vmax.f32 %v1306_v58, 0.0  ;;  %v2504_v8 = vunpack.c.l.bf16 %v2185_v10 }
 0x119   : > { %v1307_v6 = vadd.f32 %v2503_v24, %v1147_v26  ;;  %v2505_v57 = vunpack.c.l.bf16 %v2188_v11  ;;  %v1339_v20 = vmax.f32 %v1275_v60, 0.0  ;;  %v2506_v5 = vunpack.c.h.bf16 %v2185_v10 }
 0x11a   : > { %v1276_v0 = vadd.f32 %v2504_v8, %v1116_v32  ;;  %v2507_v30 = vunpack.c.h.bf16 %v2188_v11  ;;  %v1222_v13 = vunpack.c.l.bf16 %v2342_v33  ;;  %v1254_v2 = vunpack.c.l.bf16 %v2345_v19 }
 0x11b   : > { %v1308_v4 = vadd.f32 %v2505_v57, %v1148_v41  ;;  %v1371_v9 = vmax.f32 %v1307_v6, 0.0  ;;  %v1277_v23 = vadd.f32 %v2506_v5, %v1117_v61  ;;  %v1844_v51 = vpack.c.bf16 %v1339_v20, %v1338_v34  ;;  %v776_v15 = vpop.f32.mrb[16].mxu0  ;;  %v856_v36 = vpop.f32.mrb[16].mxu1  ;;  %v2380_v5 = vld [vmem:[%s2113_s12 + $0x68] sm:$0xff] }
 0x11c   : > { %v1309_v12 = vadd.f32 %v2507_v30, %v1149_v18  ;;  %v1340_v46 = vmax.f32 %v1276_v0, 0.0  ;;  %v1118_v10 = vadd.f32 %v2130_v42, %v776_v15  ;;  %v1150_v48 = vadd.f32 %v2130_v42, %v856_v36  ;;  %v778_v11 = vpop.f32.mrb[17].mxu0  ;;  %v858_v49 = vpop.f32.mrb[17].mxu1 }
 0x11d   : > { %v1372_v50 = vmax.f32 %v1308_v4, 0.0  ;;  %v1860_v62 = vpack.c.bf16 %v1371_v9, %v1370_v56  ;;  %v1341_v14 = vmax.f32 %v1277_v23, 0.0  ;;  %v1223_v26 = vunpack.c.h.bf16 %v2342_v33  ;;  %1588 = vst [vmem:[%s2239_s19 + $0x30] sm:$0xff] %v1844_v51  ;;  %v780_v41 = vpop.f32.mrb[18].mxu0  ;;  %v860_v55 = vpop.f32.mrb[18].mxu1  ;;  %v2383_v23 = vld [vmem:[%s2113_s12 + $0xe8] sm:$0xff] }
 0x11e   : > { %v1373_v63 = vmax.f32 %v1309_v12, 0.0  ;;  %v1255_v52 = vunpack.c.h.bf16 %v2345_v19  ;;  %v1119_v58 = vadd.f32 %v2132_v43, %v778_v11  ;;  %v1151_v32 = vadd.f32 %v2132_v43, %v858_v49  ;;  %v782_v34 = vpop.f32.mrb[19].mxu0  ;;  %v862_v56 = vpop.f32.mrb[19].mxu1 }
 0x11f   : > { %1604 = vst [vmem:[%s2239_s19 + $0xb0] sm:$0xff] %v1860_v62  ;;  %v1845_v27 = vpack.c.bf16 %v1341_v14, %v1340_v46  ;;  %v2508_v44 = vunpack.c.l.bf16 %v2195_v16  ;;  %v2509_v24 = vunpack.c.l.bf16 %v2198_v17  ;;  %v1120_v61 = vadd.f32 %v2130_v42, %v780_v41 }
 0x120   : > { %v1861_v40 = vpack.c.bf16 %v1373_v63, %v1372_v50  ;;  %v1152_v18 = vadd.f32 %v2130_v42, %v860_v55  ;;  %v2510_v8 = vunpack.c.h.bf16 %v2195_v16  ;;  %v2511_v57 = vunpack.c.h.bf16 %v2198_v17 }
 0x121   : > { %v1278_v60 = vadd.f32 %v2508_v44, %v1118_v10  ;;  %v1310_v6 = vadd.f32 %v2509_v24, %v1150_v48  ;;  %1589 = vst [vmem:[%s2239_s19 + $0x38] sm:$0xff] %v1845_v27  ;;  %v1121_v20 = vadd.f32 %v2132_v43, %v782_v34  ;;  %v1153_v9 = vadd.f32 %v2132_v43, %v862_v56 }
 0x122   : > { %1605 = vst [vmem:[%s2239_s19 + $0xb8] sm:$0xff] %v1861_v40  ;;  %v1279_v0 = vadd.f32 %v2510_v8, %v1119_v58  ;;  %v1311_v4 = vadd.f32 %v2511_v57, %v1151_v32  ;;  %v1280_v46 = vadd.f32 %v1216_v53, %v1120_v61  ;;  %v1312_v16 = vadd.f32 %v1248_v25, %v1152_v18 }
 0x123   : > { %v1342_v30 = vmax.f32 %v1278_v60, 0.0  ;;  %v1374_v12 = vmax.f32 %v1310_v6, 0.0  ;;  %v1281_v17 = vadd.f32 %v1217_v37, %v1121_v20  ;;  %v1313_v62 = vadd.f32 %v1249_v22, %v1153_v9  ;;  %v786_v11 = vpop.f32.mrb[20].mxu0  ;;  %v866_v49 = vpop.f32.mrb[20].mxu1 }
 0x124   : > { %v1343_v50 = vmax.f32 %v1279_v0, 0.0  ;;  %v1375_v51 = vmax.f32 %v1311_v4, 0.0  ;;  %v1344_v14 = vmax.f32 %v1280_v46, 0.0  ;;  %v1376_v63 = vmax.f32 %v1312_v16, 0.0  ;;  %v788_v38 = vpop.f32.mrb[21].mxu0  ;;  %v868_v22 = vpop.f32.mrb[21].mxu1 }
 0x125   : > { %v1224_v15 = vunpack.c.l.bf16 %v2380_v5  ;;  %v1256_v36 = vunpack.c.l.bf16 %v2383_v23  ;;  %v1345_v48 = vmax.f32 %v1281_v17, 0.0  ;;  %v1377_v25 = vmax.f32 %v1313_v62, 0.0  ;;  %v790_v44 = vpop.f32.mrb[22].mxu0  ;;  %v870_v60 = vpop.f32.mrb[22].mxu1  ;;  %v2418_v4 = vld [vmem:[%s2113_s12 + $0x70] sm:$0xff] }
 0x126   : > { %v1846_v53 = vpack.c.bf16 %v1343_v50, %v1342_v30  ;;  %v1862_v10 = vpack.c.bf16 %v1375_v51, %v1374_v12  ;;  %v1122_v21 = vadd.f32 %v2130_v42, %v786_v11  ;;  %v1154_v37 = vadd.f32 %v2130_v42, %v866_v49  ;;  %v792_v34 = vpop.f32.mrb[23].mxu0  ;;  %v872_v56 = vpop.f32.mrb[23].mxu1 }
 0x127   : > { %v1225_v27 = vunpack.c.h.bf16 %v2380_v5  ;;  %v1257_v40 = vunpack.c.h.bf16 %v2383_v23  ;;  %v1847_v58 = vpack.c.bf16 %v1345_v48, %v1344_v14  ;;  %v1863_v32 = vpack.c.bf16 %v1377_v25, %v1376_v63 }
 0x128   : > { %1590 = vst [vmem:[%s2239_s19 + $0x40] sm:$0xff] %v1846_v53  ;;  %1606 = vst [vmem:[%s2239_s19 + $0xc0] sm:$0xff] %v1862_v10  ;;  %v1123_v41 = vadd.f32 %v2132_v43, %v788_v38  ;;  %v1155_v55 = vadd.f32 %v2132_v43, %v868_v22  ;;  %v1282_v24 = vadd.f32 %v1218_v35, %v1122_v21  ;;  %v1226_v50 = vunpack.c.l.bf16 %v2418_v4 }
 0x129   : > { %v1314_v6 = vadd.f32 %v1250_v39, %v1154_v37  ;;  %v1124_v61 = vadd.f32 %v2130_v42, %v790_v44  ;;  %v1156_v18 = vadd.f32 %v2130_v42, %v870_v60  ;;  %1591 = vst [vmem:[%s2239_s19 + $0x48] sm:$0xff] %v1847_v58  ;;  %1607 = vst [vmem:[%s2239_s19 + $0xc8] sm:$0xff] %v1863_v32  ;;  %v2421_v39 = vld [vmem:[%s2113_s12 + $0xf0] sm:$0xff]  ;;  %v1227_v53 = vunpack.c.h.bf16 %v2418_v4 }
 0x12a   : > { %v1283_v8 = vadd.f32 %v1219_v47, %v1123_v41  ;;  %v1315_v0 = vadd.f32 %v1251_v28, %v1155_v55  ;;  %v1125_v57 = vadd.f32 %v2132_v43, %v792_v34  ;;  %v1157_v35 = vadd.f32 %v2132_v43, %v872_v56 }
 0x12b   : > { %v1346_v20 = vmax.f32 %v1282_v24, 0.0  ;;  %v1378_v9 = vmax.f32 %v1314_v6, 0.0  ;;  %v1284_v30 = vadd.f32 %v1220_v1, %v1124_v61  ;;  %v1316_v54 = vadd.f32 %v1252_v31, %v1156_v18  ;;  %v796_v14 = vpop.f32.mrb[24].mxu0  ;;  %v876_v63 = vpop.f32.mrb[24].mxu1  ;;  %v1181_v6 = vld [vmem:[%s2113_s12 + $0x78] sm:$0xff] }
 0x12c   : > { %v1347_v47 = vmax.f32 %v1283_v8, 0.0  ;;  %v1379_v12 = vmax.f32 %v1315_v0, 0.0  ;;  %v1285_v59 = vadd.f32 %v1221_v3, %v1125_v57  ;;  %v1317_v28 = vadd.f32 %v1253_v29, %v1157_v35  ;;  %v798_v7 = vpop.f32.mrb[25].mxu0  ;;  %v878_v29 = vpop.f32.mrb[25].mxu1 }
 0x12d   : > { %v1348_v46 = vmax.f32 %v1284_v30, 0.0  ;;  %v1380_v16 = vmax.f32 %v1316_v54, 0.0  ;;  %v1258_v51 = vunpack.c.l.bf16 %v2421_v39  ;;  %v1126_v45 = vadd.f32 %v2130_v42, %v796_v14  ;;  %v800_v21 = vpop.f32.mrb[26].mxu0  ;;  %v880_v37 = vpop.f32.mrb[26].mxu1 }
 0x12e   : > { %v1848_v1 = vpack.c.bf16 %v1347_v47, %v1346_v20  ;;  %v1864_v17 = vpack.c.bf16 %v1379_v12, %v1378_v9  ;;  %v1349_v62 = vmax.f32 %v1285_v59, 0.0  ;;  %v1381_v31 = vmax.f32 %v1317_v28, 0.0  ;;  %v802_v41 = vpop.f32.mrb[27].mxu0  ;;  %v882_v55 = vpop.f32.mrb[27].mxu1 }
 0x12f   : > { %v1158_v3 = vadd.f32 %v2130_v42, %v876_v63  ;;  %v1259_v10 = vunpack.c.h.bf16 %v2421_v39  ;;  %v1127_v11 = vadd.f32 %v2132_v43, %v798_v7  ;;  %v1159_v49 = vadd.f32 %v2132_v43, %v878_v29 }
 0x130   : > { %1592 = vst [vmem:[%s2239_s19 + $0x50] sm:$0xff] %v1848_v1  ;;  %1608 = vst [vmem:[%s2239_s19 + $0xd0] sm:$0xff] %v1864_v17  ;;  %v1849_v48 = vpack.c.bf16 %v1349_v62, %v1348_v46  ;;  %v1865_v25 = vpack.c.bf16 %v1381_v31, %v1380_v16  ;;  %v1286_v38 = vadd.f32 %v1222_v13, %v1126_v45  ;;  %v1228_v57 = vunpack.c.l.bf16 %v1181_v6 }
 0x131   : > { %v1318_v22 = vadd.f32 %v1254_v2, %v1158_v3  ;;  %v1128_v58 = vadd.f32 %v2130_v42, %v800_v21  ;;  %v1160_v32 = vadd.f32 %v2130_v42, %v880_v37  ;;  %v1287_v44 = vadd.f32 %v1223_v26, %v1127_v11  ;;  %v1197_v2 = vld [vmem:[%s2113_s12 + $0xf8] sm:$0xff] }
 0x132   : > { %1593 = vst [vmem:[%s2239_s19 + $0x58] sm:$0xff] %v1849_v48  ;;  %1609 = vst [vmem:[%s2239_s19 + $0xd8] sm:$0xff] %v1865_v25  ;;  %v1319_v60 = vadd.f32 %v1255_v52, %v1159_v49  ;;  %v1129_v24 = vadd.f32 %v2132_v43, %v802_v41  ;;  %v1161_v13 = vadd.f32 %v2132_v43, %v882_v55  ;;  %v1350_v61 = vmax.f32 %v1286_v38, 0.0 }
 0x133   : > { %v1382_v18 = vmax.f32 %v1318_v22, 0.0  ;;  %v1288_v34 = vadd.f32 %v1224_v15, %v1128_v58  ;;  %v1320_v56 = vadd.f32 %v1256_v36, %v1160_v32  ;;  %v1351_v8 = vmax.f32 %v1287_v44, 0.0  ;;  %v806_v54 = vpop.f32.mrb[28].mxu0  ;;  %v886_v36 = vpop.f32.mrb[28].mxu1 }
 0x134   : > { %v1383_v33 = vmax.f32 %v1319_v60, 0.0  ;;  %v1289_v19 = vadd.f32 %v1225_v27, %v1129_v24  ;;  %v1321_v26 = vadd.f32 %v1257_v40, %v1161_v13  ;;  %v1260_v35 = vunpack.c.l.bf16 %v1197_v2  ;;  %v808_v27 = vpop.f32.mrb[29].mxu0  ;;  %v888_v12 = vpop.f32.mrb[29].mxu1 }
 0x135   : > { %v1352_v52 = vmax.f32 %v1288_v34, 0.0  ;;  %v1384_v0 = vmax.f32 %v1320_v56, 0.0  ;;  %v1850_v20 = vpack.c.bf16 %v1351_v8, %v1350_v61  ;;  %v1130_v47 = vadd.f32 %v2130_v42, %v806_v54  ;;  %v810_v1 = vpop.f32.mrb[30].mxu0  ;;  %v890_v17 = vpop.f32.mrb[30].mxu1 }
 0x136   : > { %v1866_v9 = vpack.c.bf16 %v1383_v33, %v1382_v18  ;;  %v1353_v15 = vmax.f32 %v1289_v19, 0.0  ;;  %v1385_v30 = vmax.f32 %v1321_v26, 0.0  ;;  %v1162_v5 = vadd.f32 %v2130_v42, %v886_v36  ;;  %v812_v45 = vpop.f32.mrb[31].mxu0  ;;  %v892_v3 = vpop.f32.mrb[31].mxu1 }
 0x137   : > { %v1229_v23 = vunpack.c.h.bf16 %v1181_v6  ;;  %v1261_v40 = vunpack.c.h.bf16 %v1197_v2  ;;  %1594 = vst [vmem:[%s2239_s19 + $0x60] sm:$0xff] %v1850_v20  ;;  %v1131_v46 = vadd.f32 %v2132_v43, %v808_v27  ;;  %v1163_v16 = vadd.f32 %v2132_v43, %v888_v12 }
 0x138   : > { %1610 = vst [vmem:[%s2239_s19 + $0xe0] sm:$0xff] %v1866_v9  ;;  %v1851_v59 = vpack.c.bf16 %v1353_v15, %v1352_v52  ;;  %v1867_v28 = vpack.c.bf16 %v1385_v30, %v1384_v0  ;;  %v1290_v62 = vadd.f32 %v1226_v50, %v1130_v47  ;;  %v1322_v31 = vadd.f32 %v1258_v51, %v1162_v5 }
 0x139   : > { %v1132_v14 = vadd.f32 %v2130_v42, %v810_v1  ;;  %v1164_v63 = vadd.f32 %v2130_v42, %v890_v17  ;;  %v1291_v7 = vadd.f32 %v1227_v53, %v1131_v46  ;;  %v1323_v29 = vadd.f32 %v1259_v10, %v1163_v16 }
 0x13a   : > { %1595 = vst [vmem:[%s2239_s19 + $0x68] sm:$0xff] %v1851_v59  ;;  %1611 = vst [vmem:[%s2239_s19 + $0xe8] sm:$0xff] %v1867_v28  ;;  %v1133_v48 = vadd.f32 %v2132_v43, %v812_v45  ;;  %v1165_v50 = vadd.f32 %v2132_v43, %v892_v3  ;;  %v1354_v51 = vmax.f32 %v1290_v62, 0.0  ;;  %v1386_v25 = vmax.f32 %v1322_v31, 0.0 }
 0x13b   : > { %v1292_v11 = vadd.f32 %v1228_v57, %v1132_v14  ;;  %v1324_v42 = vadd.f32 %v1260_v35, %v1164_v63  ;;  %v1355_v49 = vmax.f32 %v1291_v7, 0.0  ;;  %v1387_v21 = vmax.f32 %v1323_v29, 0.0 }
 0x13c   : > { %v1293_v37 = vadd.f32 %v1229_v23, %v1133_v48  ;;  %v1325_v4 = vadd.f32 %v1261_v40, %v1165_v50 }
 0x13d   : > { %v1356_v53 = vmax.f32 %v1292_v11, 0.0  ;;  %v1388_v38 = vmax.f32 %v1324_v42, 0.0  ;;  %v1852_v39 = vpack.c.bf16 %v1355_v49, %v1354_v51  ;;  %v1868_v10 = vpack.c.bf16 %v1387_v21, %v1386_v25 }
 0x13e   : > { %v1357_v22 = vmax.f32 %v1293_v37, 0.0  ;;  %v1389_v58 = vmax.f32 %v1325_v4, 0.0 }
 0x13f   : > { %1596 = vst [vmem:[%s2239_s19 + $0x70] sm:$0xff] %v1852_v39  ;;  %1612 = vst [vmem:[%s2239_s19 + $0xf0] sm:$0xff] %v1868_v10 }
 0x140   : > { %v1853_v43 = vpack.c.bf16 %v1357_v22, %v1356_v53  ;;  %v1869_v32 = vpack.c.bf16 %v1389_v58, %v1388_v38 }
 0x142   : > { %1597 = vst [vmem:[%s2239_s19 + $0x78] sm:$0xff] %v1853_v43  ;;  %1613 = vst [vmem:[%s2239_s19 + $0xf8] sm:$0xff] %v1869_v32 }
 0x143 PF: > { %s14_s17 = sadd.s32 1, %s1973_s17   ;;  %s2512_s15 = smov %s1969_s16 }
 0x144   : > { %p11_p5 = scmp.ge.s32.totalorder %s14_s17, 4   ;;  %s2513_s16 = smov %s2515_s18 }
 0x146   :  { %13 = sbr.rel (!%p11_p5) target bundleno = 2 (0x2), region = 83 }

</bundles_post_ra>
